<compile_context>
chip_gen: v7x
topology: tpu7x:2x2x1
jax: 0.10.0
libtpu: 0.0.40
codegen_flags: <defaults>
</compile_context>

<pallas_src>
import functools

import jax
import jax.numpy as jnp
from jax.experimental import pallas as pl
from jax.experimental.pallas import tpu as pltpu


def _mlp_kernel(x_ref, wfc_ref, wproj_ref, o_ref, h_ref):
    """One (TILE_M, E) row-tile of the MLP.

    x_ref:     (TILE_M, E)  input dtype, streamed / double-buffered per step
    wfc_ref:   (E, H)       bf16, VMEM-resident (constant index_map, 1 buffer)
    wproj_ref: (H, E)       bf16, VMEM-resident (constant index_map, 1 buffer)
    o_ref:     (TILE_M, E)  output dtype
    h_ref:     (TILE_M, H)  bf16 VMEM scratch for the relu^2 intermediate
    """
    # c_fc: cast the streamed activation tile to bf16 in-VMEM (no wrapper-side
    # HBM cast pass); MXU matmul with f32 accumulation.
    h = jnp.dot(x_ref[...].astype(wfc_ref.dtype), wfc_ref[...],
                preferred_element_type=jnp.float32)
    # relu(h)^2 in f32 on the VPU, staged as bf16 (it feeds a bf16 matmul
    # anyway) -> half the scratch VMEM and half the h store/load traffic.
    r = jnp.maximum(h, 0.0)
    h_ref[...] = (r * r).astype(jnp.bfloat16)
    # c_proj: second MXU matmul, f32 accumulation.
    y = jnp.dot(h_ref[...], wproj_ref[...], preferred_element_type=jnp.float32)
    o_ref[...] = y.astype(o_ref.dtype)


@functools.partial(jax.jit, static_argnames=("tile_m", "single_buffer_weights"))
def mlp_forward(x, wfc_t, wproj_t, *, tile_m=256, single_buffer_weights=True):
    """MLP forward.

    x:       (B, T, E) activations (any float dtype; cast to bf16 in-kernel)
    wfc_t:   (E, H)  = c_fc.weight.T   -- stored pre-transposed, bf16
    wproj_t: (H, E)  = c_proj.weight.T -- stored pre-transposed, bf16
    """
    B, T, E = x.shape
    H = wfc_t.shape[1]
    M = B * T

    # No dtype cast here: avoids an extra full-tensor HBM read+write pass.
    x2d = x.reshape(M, E)

    tm = min(tile_m, M)
    tm = max(8, (tm // 8) * 8)          # keep the sublane axis 8-aligned
    n_tiles = pl.cdiv(M, tm)
    m_pad = n_tiles * tm
    if m_pad != M:
        # Fallback only when tile_m doesn't divide M (prefer a divisor so the
        # pad + [:M] slice HBM round trips never happen).
        x2d = jnp.pad(x2d, ((0, m_pad - M), (0, 0)))

    w_dtype = wfc_t.dtype
    out_dtype = x.dtype
    itemsize = lambda dt: jnp.dtype(dt).itemsize

    # Resident weights: constant index_map -> fetched once.  Buffered(1) drops
    # the useless second buffer, halving resident-weight VMEM.
    wbuf = 1 if single_buffer_weights else 2
    if single_buffer_weights:
        wfc_spec = pl.BlockSpec((E, H), lambda i: (0, 0),
                                pipeline_mode=pl.Buffered(1))
        wproj_spec = pl.BlockSpec((H, E), lambda i: (0, 0),
                                  pipeline_mode=pl.Buffered(1))
    else:
        wfc_spec = pl.BlockSpec((E, H), lambda i: (0, 0))
        wproj_spec = pl.BlockSpec((H, E), lambda i: (0, 0))

    # Explicit VMEM budget: weights + double-buffered x/out tiles + bf16 h
    # scratch, with headroom; floor at 16 MiB, cap at 128 MiB physical.
    vmem_needed = (
        wbuf * (E * H + H * E) * itemsize(w_dtype)
        + 2 * tm * E * itemsize(x2d.dtype)       # input tiles (2 buffers)
        + 2 * tm * E * itemsize(out_dtype)       # output tiles (2 buffers)
        + tm * H * itemsize(jnp.bfloat16)        # h scratch
    )
    vmem_limit = min(128 * 1024 * 1024,
                     max(16 * 1024 * 1024, (vmem_needed * 5) // 4 + (4 << 20)))

    flops = 4 * m_pad * E * H  # two matmuls, 2*M*E*H flops each
    bytes_accessed = (
        x2d.size * itemsize(x2d.dtype)
        + (E * H + H * E) * itemsize(w_dtype)
        + m_pad * E * itemsize(out_dtype)
    )

    out2d = pl.pallas_call(
        _mlp_kernel,
        out_shape=jax.ShapeDtypeStruct((m_pad, E), out_dtype),
        grid=(n_tiles,),
        in_specs=[
            # Activation row-tiles: pipelined across the grid.
            pl.BlockSpec((tm, E), lambda i: (i, 0)),
            wfc_spec,
            wproj_spec,
        ],
        out_specs=pl.BlockSpec((tm, E), lambda i: (i, 0)),
        scratch_shapes=[pltpu.VMEM((tm, H), jnp.bfloat16)],
        compiler_params=pltpu.CompilerParams(
            # Independent row-tiles -> megacore-shardable (v7x has 2 TCs).
            dimension_semantics=("parallel",),
            vmem_limit_bytes=int(vmem_limit),
        ),
        cost_estimate=pl.CostEstimate(
            flops=flops, transcendentals=0, bytes_accessed=bytes_accessed),
    )(x2d, wfc_t, wproj_t)

    if m_pad != M:
        out2d = out2d[:M]
    return out2d.reshape(B, T, E)


def _run(x, wfc_t, wproj_t, *, tile_m):
    # Graceful degrade for JAX versions whose grid pipeline rejects
    # pl.Buffered(1): fall back to default (double-buffered) weights.
    try:
        return jax.block_until_ready(
            mlp_forward(x, wfc_t, wproj_t, tile_m=tile_m,
                        single_buffer_weights=True))
    except Exception:
        return jax.block_until_ready(
            mlp_forward(x, wfc_t, wproj_t, tile_m=tile_m,
                        single_buffer_weights=False))


if __name__ == "__main__":
    # Small demo config.  E is a multiple of 256 so the first matmul's K dim
    # fills the v6e/v7x 256-wide MXU; M=512 with tile_m=256 -> 2 row-tiles
    # (even count -> both v7x TensorCores busy) and no padding.
    B, T, E = 4, 128, 256
    H = 4 * E

    key = jax.random.PRNGKey(0)
    kx, kfc, kproj = jax.random.split(key, 3)
    x = jax.random.normal(kx, (B, T, E), dtype=jnp.float32)

    # Torch-layout params: nn.Linear weight is (out_features, in_features).
    w_fc = jax.random.normal(kfc, (H, E), dtype=jnp.float32) / (E ** 0.5)
    w_proj = jnp.zeros((E, H), dtype=jnp.float32)      # c_proj.weight.zero_()

    # One-time parameter prep: transpose ONCE and store bf16 (no per-call .T).
    wfc_t = jnp.asarray(w_fc.T, dtype=jnp.bfloat16)      # (E, H)
    wproj_t = jnp.asarray(w_proj.T, dtype=jnp.bfloat16)  # (H, E)

    y = _run(x, wfc_t, wproj_t, tile_m=256)

    # Reference mirroring the kernel's precision path (bf16 in, f32 accumulate,
    # intermediate quantized to bf16 before the second matmul).
    def ref_mlp(x, wfc_t, wproj_t):
        x2 = x.reshape(-1, x.shape[-1]).astype(jnp.bfloat16).astype(jnp.float32)
        h = jnp.maximum(x2 @ wfc_t.astype(jnp.float32), 0.0) ** 2
        h = h.astype(jnp.bfloat16).astype(jnp.float32)
        return (h @ wproj_t.astype(jnp.float32)).reshape(x.shape)

    y_ref = ref_mlp(x, wfc_t, wproj_t)
    assert jnp.allclose(y, y_ref, atol=2e-2, rtol=2e-2), "zero-init mismatch"

    # Zero-init c_proj makes the forward all zeros; also run with a non-zero
    # projection so the full matmul/activation path is exercised numerically.
    w_proj_nz = jax.random.normal(kproj, (E, H), dtype=jnp.float32) / (H ** 0.5)
    wproj_nz_t = jnp.asarray(w_proj_nz.T, dtype=jnp.bfloat16)
    y2 = _run(x, wfc_t, wproj_nz_t, tile_m=256)
    y2_ref = ref_mlp(x, wfc_t, wproj_nz_t)
    max_err = float(jnp.max(jnp.abs(y2 - y2_ref)))
    assert jnp.allclose(y2, y2_ref, atol=5e-2, rtol=5e-2), (
        f"mismatch vs reference, max abs err {max_err}")

    print("KERNEL_OK")
</pallas_src>

<mosaic_0001>
module attributes {stable_mosaic.version = 11 : i64} {
  func.func @_mlp_kernel(%arg0: i32, %arg1: memref<256x256xf32, #tpu.memory_space<vmem>>, %arg2: memref<256x1024xbf16, #tpu.memory_space<vmem>>, %arg3: memref<1024x256xbf16, #tpu.memory_space<vmem>>, %arg4: memref<256x256xf32, #tpu.memory_space<vmem>>, %arg5: memref<256x1024xbf16, #tpu.memory_space<vmem>>) attributes {dimension_semantics = [#tpu.dimension_semantics<parallel>], iteration_bounds = array<i64: 2>, scalar_prefetch = 0 : i64, scratch_operands = 1 : i64, tpu.core_type = #tpu.core_type<tc>, window_params = [{transform_indices = @transform_0, window_bounds = array<i64: 256, 256>}, {pipeline_mode = #tpu.pipeline_mode<synchronous>, transform_indices = @transform_1, window_bounds = array<i64: 256, 1024>}, {pipeline_mode = #tpu.pipeline_mode<synchronous>, transform_indices = @transform_2, window_bounds = array<i64: 1024, 256>}, {transform_indices = @transform_3, window_bounds = array<i64: 256, 256>}]} {
    %c0 = arith.constant 0 : index
    %c0_0 = arith.constant 0 : index
    %0 = vector.load %arg1[%c0, %c0_0] : memref<256x256xf32, #tpu.memory_space<vmem>>, vector<256x256xf32>
    %1 = arith.truncf %0 : vector<256x256xf32> to vector<256x256xbf16>
    %c0_1 = arith.constant 0 : index
    %c0_2 = arith.constant 0 : index
    %2 = vector.load %arg2[%c0_1, %c0_2] : memref<256x1024xbf16, #tpu.memory_space<vmem>>, vector<256x1024xbf16>
    %cst = arith.constant dense<0.000000e+00> : vector<256x1024xf32>
    %3 = tpu.matmul %1, %2, %cst {dimension_numbers = #tpu.dot_dimension_numbers<[1], [0], [0], [1], [0, 0, 1, 1], [], []>} : vector<256x256xbf16>, vector<256x1024xbf16>, vector<256x1024xf32> -> vector<256x1024xf32>
    %cst_3 = arith.constant 0.000000e+00 : f32
    %4 = vector.broadcast %cst_3 : f32 to vector<256x1024xf32>
    %5 = arith.maximumf %3, %4 : vector<256x1024xf32>
    %6 = arith.mulf %5, %5 : vector<256x1024xf32>
    %7 = arith.truncf %6 : vector<256x1024xf32> to vector<256x1024xbf16>
    %c0_4 = arith.constant 0 : index
    %c0_5 = arith.constant 0 : index
    %8 = vector.load %arg5[%c0_4, %c0_5] : memref<256x1024xbf16, #tpu.memory_space<vmem>>, vector<256x1024xbf16>
    tpu.vector_store %arg5[%c0_4, %c0_5], %7 {strides = array<i32>} : memref<256x1024xbf16, #tpu.memory_space<vmem>>, vector<256x1024xbf16>,
    %c0_6 = arith.constant 0 : index
    %c0_7 = arith.constant 0 : index
    %9 = vector.load %arg5[%c0_6, %c0_7] : memref<256x1024xbf16, #tpu.memory_space<vmem>>, vector<256x1024xbf16>
    %c0_8 = arith.constant 0 : index
    %c0_9 = arith.constant 0 : index
    %10 = vector.load %arg3[%c0_8, %c0_9] : memref<1024x256xbf16, #tpu.memory_space<vmem>>, vector<1024x256xbf16>
    %cst_10 = arith.constant dense<0.000000e+00> : vector<256x256xf32>
    %11 = tpu.matmul %9, %10, %cst_10 {dimension_numbers = #tpu.dot_dimension_numbers<[1], [0], [0], [1], [0, 0, 1, 1], [], []>} : vector<256x1024xbf16>, vector<1024x256xbf16>, vector<256x256xf32> -> vector<256x256xf32>
    %c0_11 = arith.constant 0 : index
    %c0_12 = arith.constant 0 : index
    %12 = vector.load %arg4[%c0_11, %c0_12] : memref<256x256xf32, #tpu.memory_space<vmem>>, vector<256x256xf32>
    tpu.vector_store %arg4[%c0_11, %c0_12], %11 {strides = array<i32>} : memref<256x256xf32, #tpu.memory_space<vmem>>, vector<256x256xf32>,
    return
  }
  func.func @transform_0(%arg0: i32) -> (i32, i32) {
    %c0_i32 = arith.constant 0 : i32
    %c0_i32_0 = arith.constant 0 : i32
    return %arg0, %c0_i32 : i32, i32
  }
  func.func @transform_1(%arg0: i32) -> (i32, i32) {
    %c0_i32 = arith.constant 0 : i32
    %c0_i32_0 = arith.constant 0 : i32
    %c0_i32_1 = arith.constant 0 : i32
    return %c0_i32, %c0_i32_0 : i32, i32
  }
  func.func @transform_2(%arg0: i32) -> (i32, i32) {
    %c0_i32 = arith.constant 0 : i32
    %c0_i32_0 = arith.constant 0 : i32
    %c0_i32_1 = arith.constant 0 : i32
    return %c0_i32, %c0_i32_0 : i32, i32
  }
  func.func @transform_3(%arg0: i32) -> (i32, i32) {
    %c0_i32 = arith.constant 0 : i32
    %c0_i32_0 = arith.constant 0 : i32
    return %arg0, %c0_i32 : i32, i32
  }
}

module attributes {stable_mosaic.version = 11 : i64} {
  func.func @_mlp_kernel(%arg0: i32, %arg1: memref<256x256xf32, #tpu.memory_space<vmem>>, %arg2: memref<256x1024xbf16, #tpu.memory_space<vmem>>, %arg3: memref<1024x256xbf16, #tpu.memory_space<vmem>>, %arg4: memref<256x256xf32, #tpu.memory_space<vmem>>, %arg5: memref<256x1024xbf16, #tpu.memory_space<vmem>>) attributes {dimension_semantics = [#tpu.dimension_semantics<parallel>], iteration_bounds = array<i64: 2>, scalar_prefetch = 0 : i64, scratch_operands = 1 : i64, tpu.core_type = #tpu.core_type<tc>, window_params = [{transform_indices = @transform_0, window_bounds = array<i64: 256, 256>}, {pipeline_mode = #tpu.pipeline_mode<synchronous>, transform_indices = @transform_1, window_bounds = array<i64: 256, 1024>}, {pipeline_mode = #tpu.pipeline_mode<synchronous>, transform_indices = @transform_2, window_bounds = array<i64: 1024, 256>}, {transform_indices = @transform_3, window_bounds = array<i64: 256, 256>}]} {
    %c0 = arith.constant 0 : index
    %c0_0 = arith.constant 0 : index
    %0 = vector.load %arg1[%c0, %c0_0] : memref<256x256xf32, #tpu.memory_space<vmem>>, vector<256x256xf32>
    %1 = arith.truncf %0 : vector<256x256xf32> to vector<256x256xbf16>
    %c0_1 = arith.constant 0 : index
    %c0_2 = arith.constant 0 : index
    %2 = vector.load %arg2[%c0_1, %c0_2] : memref<256x1024xbf16, #tpu.memory_space<vmem>>, vector<256x1024xbf16>
    %cst = arith.constant dense<0.000000e+00> : vector<256x1024xf32>
    %3 = tpu.matmul %1, %2, %cst {dimension_numbers = #tpu.dot_dimension_numbers<[1], [0], [0], [1], [0, 0, 1, 1], [], []>} : vector<256x256xbf16>, vector<256x1024xbf16>, vector<256x1024xf32> -> vector<256x1024xf32>
    %cst_3 = arith.constant 0.000000e+00 : f32
    %4 = vector.broadcast %cst_3 : f32 to vector<256x1024xf32>
    %5 = arith.maximumf %3, %4 : vector<256x1024xf32>
    %6 = arith.mulf %5, %5 : vector<256x1024xf32>
    %7 = arith.truncf %6 : vector<256x1024xf32> to vector<256x1024xbf16>
    %c0_4 = arith.constant 0 : index
    %c0_5 = arith.constant 0 : index
    %8 = vector.load %arg5[%c0_4, %c0_5] : memref<256x1024xbf16, #tpu.memory_space<vmem>>, vector<256x1024xbf16>
    tpu.vector_store %arg5[%c0_4, %c0_5], %7 {strides = array<i32>} : memref<256x1024xbf16, #tpu.memory_space<vmem>>, vector<256x1024xbf16>,
    %c0_6 = arith.constant 0 : index
    %c0_7 = arith.constant 0 : index
    %9 = vector.load %arg5[%c0_6, %c0_7] : memref<256x1024xbf16, #tpu.memory_space<vmem>>, vector<256x1024xbf16>
    %c0_8 = arith.constant 0 : index
    %c0_9 = arith.constant 0 : index
    %10 = vector.load %arg3[%c0_8, %c0_9] : memref<1024x256xbf16, #tpu.memory_space<vmem>>, vector<1024x256xbf16>
    %cst_10 = arith.constant dense<0.000000e+00> : vector<256x256xf32>
    %11 = tpu.matmul %9, %10, %cst_10 {dimension_numbers = #tpu.dot_dimension_numbers<[1], [0], [0], [1], [0, 0, 1, 1], [], []>} : vector<256x1024xbf16>, vector<1024x256xbf16>, vector<256x256xf32> -> vector<256x256xf32>
    %c0_11 = arith.constant 0 : index
    %c0_12 = arith.constant 0 : index
    %12 = vector.load %arg4[%c0_11, %c0_12] : memref<256x256xf32, #tpu.memory_space<vmem>>, vector<256x256xf32>
    tpu.vector_store %arg4[%c0_11, %c0_12], %11 {strides = array<i32>} : memref<256x256xf32, #tpu.memory_space<vmem>>, vector<256x256xf32>,
    return
  }
  func.func @transform_0(%arg0: i32) -> (i32, i32) {
    %c0_i32 = arith.constant 0 : i32
    %c0_i32_0 = arith.constant 0 : i32
    return %arg0, %c0_i32 : i32, i32
  }
  func.func @transform_1(%arg0: i32) -> (i32, i32) {
    %c0_i32 = arith.constant 0 : i32
    %c0_i32_0 = arith.constant 0 : i32
    %c0_i32_1 = arith.constant 0 : i32
    return %c0_i32, %c0_i32_0 : i32, i32
  }
  func.func @transform_2(%arg0: i32) -> (i32, i32) {
    %c0_i32 = arith.constant 0 : i32
    %c0_i32_0 = arith.constant 0 : i32
    %c0_i32_1 = arith.constant 0 : i32
    return %c0_i32, %c0_i32_0 : i32, i32
  }
  func.func @transform_3(%arg0: i32) -> (i32, i32) {
    %c0_i32 = arith.constant 0 : i32
    %c0_i32_0 = arith.constant 0 : i32
    return %arg0, %c0_i32 : i32, i32
  }
}

</mosaic_0001>

<bundles_post_ra>
// kernel: mlp_forward.1
= control target key start
LH: loop header
LB: loop body
LE: loop exit
PB: predicated region body
PF: predicated region fallthrough
CT: control target
= control target key end

     0   :  { %8 = vsyncpa [#allocation4], 0  ;;  %s5978_s0 = inlined_call_operand.hbm [shape: f32[512,256], index: 0, kind: input, shape index: {}]   ;;  %s5979_s1 = inlined_call_operand.hbm [shape: bf16[256,1024], index: 1, kind: input, shape index: {}]   ;;  %s5980_s2 = inlined_call_operand.hbm [shape: bf16[1024,256], index: 2, kind: input, shape index: {}]   ;;  %s5981_s3 = inlined_call_operand.hbm [shape: f32[512,256], index: 3, kind: output, shape index: {}]  }
   0x1   :  { %10 = vsyncpa [#allocation4 + $0x1], 0 }
   0x2   :  { %11 = vsyncpa [#allocation7], 0 }
   0x3   :  { %12 = vsyncpa [#allocation5], 0 }
   0x4   :  { %14 = vsyncpa [#allocation5 + $0x1], 0  ;;  %s5393_s12 = smov 0   ;;  %s5395_s13 = smov 0  }
   0x5   :  { %s5397_s14 = smov 0   ;;  %s5399_s15 = smov 0  }
   0x6 LB: > { %s5414_s16 = sadd.s32 4294967295, %s5359_s15   ;;  %s4464_s17 = sadd.s32 4294967294, %s5359_s15   ;;  %s5359_s15 = sphi %s5399_s15, %s6001_s15   ;;  %s5355_s14 = sphi %s5397_s14, %s6000_s14   ;;  %s5351_s13 = sphi %s5395_s13, %s5999_s13   ;;  %s5347_s12 = sphi %s5393_s12, %s5998_s12  }
   0x7   : > { %p40_p0 = scmp.ne.s32.totalorder %s5351_s13, %s5347_s12  ;;  %p5982_p1 = scmp.eq.s32.totalorder %s5414_s16, 0 }
   0x8   : > { %p112_p3 = scmp.eq.s32.totalorder %s4464_s17, 1  ;;  %p4465_p5 = scmp.ge.s32.totalorder %s5359_s15, 1 }
   0x9   : > { %p5423_p4 = por %p5982_p1, %p40_p0  ;;  %p119_p7 = scmp.lt.s32.totalorder %s5359_s15, 3 }
   0xa   : > { %p5428_p6 = por %p112_p3, %p40_p0  ;;  %s5361_s21 = smov [#allocation6]  }
   0xb   : > { %s5985_s18 = scalar_select %p5423_p4, 1, 0 }
   0xc   : > { %s5986_s19 = scalar_select %p5428_p6, 1, 0 }
   0xd   : > { %p5433_p8 = pnand %p4465_p5, %p119_p7  ;;  %s131_s22 = sshll.u32 %s5361_s21, 4  ;;  %s5437_s22 = int_to_ptr.vmem [resolvable:$true] %s131_s22 }
   0xe   : > { %s5362_s24 = smov [#allocation8]   ;;  %s5203_s28 = scalar_lea.hbm %s5979_s1, 16384 }
   0xf   : > { %p4948_p9 = pneg %p5433_p8  ;;  %s144_s25 = sshll.u32 %s5362_s24, 4  ;;  %s5448_s25 = int_to_ptr.vmem [resolvable:$true] %s144_s25 }
  0x10   : > { %p5204_p12 = scmp.ne.s32.totalorder %s5979_s1, %s5203_s28  ;;  %p5210_p5 = scmp.lt.u32.totalorder %s5203_s28, %s5979_s1 }
  0x11   : > { %p5444_p11 = pnand %p4948_p9, %p5982_p1 }
  0x13   : > { %p5205_p13 = pneg %p5444_p11 }
  0x15   : > { %p5206_p0 = pnand %p5205_p13, %p5204_p12 }
  0x17   : > { %p5207_p3 = pneg %p5206_p0 }
  0x19   : > { %p5212_p7 = pnand %p5210_p5, %p5207_p3 }
  0x1b   : > { %5215 = shalt.err (!%p5212_p7)
}
  0x1c   : > { %s5216_s6 = scalar_lea.vmem %s5437_s22, 16384  ;;  %p5224_p2 = scmp.lt.s32.totalorder %s5437_s22, %s5437_s22 }
  0x1d   : > { %p5217_p9 = scmp.ne.s32.totalorder %s5437_s22, %s5216_s6  ;;  %p5225_p12 = scmp.lt.s32.totalorder %s5216_s6, %s5216_s6 }
  0x1f   : > { %p5219_p10 = pnand %p5217_p9, %p5205_p13  ;;  %p5226_p0 = por %p5225_p12, %p5224_p2 }
  0x21   : > { %p5220_p1 = pneg %p5219_p10 }
  0x23   : > { %p5227_p6 = pnand %p5226_p0, %p5220_p1 }
  0x25   : > { %5230 = shalt.err (!%p5227_p6)
}
  0x26   : > { %s5363_s7 = smov 512   ;;  %s5364_s8 = smov 32  }
  0x27   : > { %4951 = dma.hbm_to_vmem [thread:$0]  (!%p5444_p11), %s5979_s1, 16384, %s5437_s22, [#allocation7], %s5363_s7, %s5363_s7, %s5364_s8  }
  0x28   : > { %s5231_s21 = scalar_lea.hbm %s5980_s2, 16384 }
  0x29   : > { %p5232_p2 = scmp.ne.s32.totalorder %s5980_s2, %s5231_s21  ;;  %p5238_p10 = scmp.lt.u32.totalorder %s5231_s21, %s5980_s2 }
  0x2b   : > { %p5234_p1 = pnand %p5232_p2, %p5205_p13 }
  0x2d   : > { %p5235_p6 = pneg %p5234_p1 }
  0x2f   : > { %p5240_p3 = pnand %p5238_p10, %p5235_p6 }
  0x31   : > { %5243 = shalt.err (!%p5240_p3)
}
  0x32   : > { %s5244_s22 = scalar_lea.vmem %s5448_s25, 16384  ;;  %p5252_p12 = scmp.lt.s32.totalorder %s5448_s25, %s5448_s25 }
  0x33   : > { %p5245_p5 = scmp.ne.s32.totalorder %s5448_s25, %s5244_s22  ;;  %p5253_p0 = scmp.lt.s32.totalorder %s5244_s22, %s5244_s22 }
  0x35   : > { %p5247_p7 = pnand %p5245_p5, %p5205_p13  ;;  %p5254_p2 = por %p5253_p0, %p5252_p12 }
  0x37   : > { %p5248_p9 = pneg %p5247_p7 }
  0x39   : > { %p5255_p1 = pnand %p5254_p2, %p5248_p9 }
  0x3b   : > { %5258 = shalt.err (!%p5255_p1)
}
  0x3c   : > { %s5365_s29 = smov 128   ;;  %s5366_s30 = smov 8  }
  0x3d   : > { %4954 = dma.hbm_to_vmem [thread:$0]  (!%p5444_p11), %s5980_s2, 16384, %s5448_s25, [#allocation7], %s5365_s29, %s5365_s29, %s5366_s30  }
  0x3e   : > { %s5503_s6 = sadd.s32 1, %s5359_s15   ;;  %s27_s8 = sadd.s32 1, %s5355_s14 }
  0x3f   : > { %s24_s7 = ssub.s32 %s5359_s15, %s5503_s6  ;;  %p34_p6 = scmp.ne.s32.totalorder %s5355_s14, %s5351_s13 }
  0x40   : > { %p25_p13 = scmp.eq.s32.totalorder %s24_s7, 0  ;;  %p35_p10 = scmp.eq.s32.totalorder %s5359_s15, 0 }
  0x41   : > { %p5989_p5 = scmp.eq.s32.totalorder %s5414_s16, 1  ;;  %p4965_p9 = scmp.lt.s32.totalorder %s5359_s15, 2 }
  0x42   : > { %s5512_s9 = scalar_select %p25_p13, %s5355_s14, %s27_s8  }
  0x43   : > { %p36_p3 = por %p35_p10, %p34_p6  ;;  %p5516_p7 = por %p5989_p5, %p34_p6 }
  0x44   : > { %s158_s23 = sand.u32 1, %s5355_s14   ;;  %s4741_s25 = sshll.u32 %s5359_s15, 13 }
  0x45   : > { %s5990_s10 = scalar_select %p5516_p7, 1, 0 }
  0x46   : > { %s4469_s11 = sshll.u32 %s158_s23, 9  ;;  %s5526_s24 = scalar_lea.hbm %s5978_s0, %s4741_s25 }
  0x47   : > { %s162_s26 = scalar_lea.vmem [#allocation3], %s4469_s11  ;;  %p5530_p11 = pnand %p4965_p9, %p36_p3 }
  0x48   : > { %s170_s27 = sshll.u32 %s162_s26, 4  ;;  %s5534_s22 = scalar_lea.sflag [#allocation4], %s158_s23  ;;  %s5528_s27 = int_to_ptr.vmem [resolvable:$true] %s170_s27 }
  0x49   : > { %s5259_s29 = scalar_lea.hbm %s5526_s24, 8192  ;;  %p5261_p0 = pneg %p5530_p11 }
  0x4a   : > { %p5260_p12 = scmp.ne.s32.totalorder %s5526_s24, %s5259_s29  ;;  %s5264_s5 = scalar_lea.hbm %s5978_s0, 16384 }
  0x4b   : > { %p5265_p13 = scmp.lt.u32.totalorder %s5526_s24, %s5978_s0  ;;  %p5266_p6 = scmp.lt.u32.totalorder %s5264_s5, %s5259_s29 }
  0x4c   : > { %p5262_p2 = pnand %p5261_p0, %p5260_p12  ;;  %p5268_p3 = scmp.lt.u32.totalorder %s5259_s29, %s5526_s24 }
  0x4d   : > { %p5267_p10 = por %p5266_p6, %p5265_p13 }
  0x4e   : > { %p5263_p1 = pneg %p5262_p2 }
  0x4f   : > { %p5269_p5 = por %p5268_p3, %p5267_p10 }
  0x51   : > { %p5270_p9 = pnand %p5269_p5, %p5263_p1 }
  0x53   : > { %5273 = shalt.err (!%p5270_p9)
}
  0x54   : > { %s5274_s23 = scalar_lea.vmem %s5528_s27, 8192  ;;  %s5367_s11 = smov [#allocation3]  }
  0x55   : > { %p5275_p12 = scmp.ne.s32.totalorder %s5528_s27, %s5274_s23  ;;  %s5279_s25 = sshll.u32 %s5367_s11, 4  ;;  %s5280_s25 = int_to_ptr.vmem [resolvable:$false] %s5279_s25 }
  0x56   : > { %s5281_s17 = scalar_lea.vmem %s5280_s25, 16384  ;;  %p5282_p4 = scmp.lt.s32.totalorder %s5528_s27, %s5280_s25 }
  0x57   : > { %p5277_p2 = pnand %p5275_p12, %p5261_p0  ;;  %p5283_p13 = scmp.lt.s32.totalorder %s5281_s17, %s5274_s23 }
  0x59   : > { %p5278_p7 = pneg %p5277_p2  ;;  %p5284_p6 = por %p5283_p13, %p5282_p4 }
  0x5b   : > { %p5285_p10 = pnand %p5284_p6, %p5278_p7 }
  0x5d   : > { %5288 = shalt.err (!%p5285_p10)
}
  0x5e   : > { %s5368_s21 = smov 256   ;;  %s5369_s26 = smov 16  }
  0x5f   : > { %4958 = dma.hbm_to_vmem [thread:$0]  (!%p5530_p11), %s5526_s24, 8192, %s5528_s27, %s5534_s22, %s5368_s21, %s5368_s21, %s5369_s26  }
  0x60   : > { %182 = sbr.rel (%p5433_p8) target bundleno = 1131 (0x46b), region = 32  ;;  %s5565_s29 = sand.u32 (!%p5433_p8), 1, %s5351_s13  }
  0x61   : > { %s4474_s30 = sshll.u32 (!%p5433_p8), %s5565_s29, 9  ;;  %s185_s4 = scalar_lea.sflag (!%p5433_p8), [#allocation4], %s5565_s29 }
  0x62   : > { %s5571_s5 = scalar_lea.vmem (!%p5433_p8), [#allocation3], %s4474_s30  ;;  %p5992_p4 = scmp.ne.s32.totalorder (!%p5433_p8), %s5985_s18, 0 }
  0x67   : > { %5334 = dma.done.wait (%p5992_p4), %s185_s4, 8192  }
  0x68   : > { %5336 = vsyncadd (%p5992_p4), %s185_s4, 4294959104  ;;  %p5993_p7 = scmp.eq.s32.totalorder %s5414_s16, 0 }
  0x6a   : > { %5338 = dma.done.wait (%p5993_p7), [#allocation7], 32768   ;;  %p5994_p8 = pmov %p5993_p7 }
  0x6b   : > { %v317_v0 = vld [vmem:[#allocation6] sm:$0xff]  ;;  %v222_v17 = vld [vmem:[%s5571_s5 + $0x8] sm:$0xff]  ;;  %v224_v18 = vld [vmem:[%s5571_s5 + $0x18] sm:$0xff]  ;;  %s5861_s18 = scalar_lea.vmem [#allocation9], %s4474_s30  ;;  %s4743_s20 = sshll.u32 %s5414_s16, 13 }
  0x6c   : > { %5340 = vsyncadd (%p5994_p8), [#allocation7], 4294934528  ;;  %v321_v1 = vld [vmem:[#allocation6 + $0x20] sm:$0xff]  ;;  %v5583_v20 = vpack.c.bf16 %v224_v18, %v222_v17  ;;  %s4372_s24 = sshll.u32 %s5861_s18, 4  ;;  %s5929_s22 = scalar_lea.hbm %s5981_s3, %s4743_s20  ;;  %s5931_s24 = int_to_ptr.vmem [resolvable:$true] %s4372_s24 }
  0x6d   : > { %v325_v2 = vld [vmem:[#allocation6 + $0x40] sm:$0xff]  ;;  %v4479_v3 = vcombine.high %v317_v0, %v321_v1  ;;  %v4478_v4 = vcombine.low %v317_v0, %v321_v1  ;;  %v318_v1 = vld [vmem:[#allocation6 + $0x8] sm:$0xff]  ;;  %s4358_s16 = scalar_lea.sflag [#allocation5], %s5565_s29  ;;  %s5289_s7 = scalar_lea.vmem %s5931_s24, 8192 }
  0x6e   : > { %v329_v5 = vld [vmem:[#allocation6 + $0x60] sm:$0xff]  ;;  %1117 = vmatprep.mubr.bf16.mxu1 %v5583_v20  ;;  %p5290_p11 = scmp.ne.s32.totalorder %s5931_s24, %s5289_s7  ;;  %p5995_p0 = scmp.ne.s32.totalorder %s5990_s10, 0 }
  0x6f   : > { %v4487_v6 = vcombine.high %v325_v2, %v329_v5  ;;  %v333_v7 = vld [vmem:[#allocation6 + $0x80] sm:$0xff]  ;;  %1085 = vmatprep.subr.bf16.mxu1 %v4479_v3  ;;  %v4486_v9 = vcombine.low %v325_v2, %v329_v5  ;;  %v322_v2 = vld [vmem:[#allocation6 + $0x28] sm:$0xff]  ;;  %v223_v5 = vld [vmem:[%s5571_s5 + $0x10] sm:$0xff]  ;;  %s5370_s8 = smov [#allocation9]  }
  0x70   : > { %v337_v8 = vld [vmem:[#allocation6 + $0xa0] sm:$0xff]  ;;  %1086 = vmatpush1.bf16.msra.mxu1 %v4478_v4  ;;  %p5291_p1 = pnand %p5290_p11, %p5995_p0  ;;  %s5293_s23 = sshll.u32 %s5370_s8, 4  ;;  %s5294_s23 = int_to_ptr.vmem [resolvable:$false] %s5293_s23 }
  0x71   : > { %1087 = vmatprep.subr.bf16.mxu1 %v4487_v6  ;;  %v4495_v10 = vcombine.high %v333_v7, %v337_v8  ;;  %v341_v11 = vld [vmem:[#allocation6 + $0xc0] sm:$0xff]  ;;  %v4494_v13 = vcombine.low %v333_v7, %v337_v8  ;;  %v226_v6 = vld [vmem:[%s5571_s5 + $0x28] sm:$0xff]  ;;  %v228_v7 = vld [vmem:[%s5571_s5 + $0x38] sm:$0xff]  ;;  %s5295_s11 = scalar_lea.vmem %s5294_s23, 16384  ;;  %p5296_p5 = scmp.lt.s32.totalorder %s5931_s24, %s5294_s23 }
  0x72   : > { %v345_v12 = vld [vmem:[#allocation6 + $0xe0] sm:$0xff]  ;;  %p5292_p3 = pneg %p5291_p1  ;;  %p5297_p9 = scmp.lt.s32.totalorder %s5295_s11, %s5289_s7 }
  0x73   : > { %v4503_v14 = vcombine.high %v341_v11, %v345_v12  ;;  %v349_v15 = vld [vmem:[#allocation6 + $0x100] sm:$0xff]  ;;  %v4502_v19 = vcombine.low %v341_v11, %v345_v12  ;;  %v4481_v11 = vcombine.high %v318_v1, %v322_v2 }
  0x74   : > { %1088 = vmatpush1.bf16.msra.mxu1 %v4486_v9  ;;  %v353_v16 = vld [vmem:[#allocation6 + $0x120] sm:$0xff]  ;;  %v326_v9 = vld [vmem:[#allocation6 + $0x48] sm:$0xff]  ;;  %p5298_p12 = por %p5297_p9, %p5296_p5 }
  0x75   : > { %1089 = vmatprep.subr.bf16.mxu1 %v4495_v10  ;;  %v4511_v21 = vcombine.high %v349_v15, %v353_v16  ;;  %v357_v22 = vld [vmem:[#allocation6 + $0x140] sm:$0xff]  ;;  %v4510_v24 = vcombine.low %v349_v15, %v353_v16  ;;  %v330_v10 = vld [vmem:[#allocation6 + $0x68] sm:$0xff] }
  0x76   : > { %v361_v23 = vld [vmem:[#allocation6 + $0x160] sm:$0xff]  ;;  %v334_v15 = vld [vmem:[#allocation6 + $0x88] sm:$0xff]  ;;  %v4489_v17 = vcombine.high %v326_v9, %v330_v10  ;;  %p5299_p2 = pnand %p5298_p12, %p5292_p3 }
  0x77   : > { %v4519_v25 = vcombine.high %v357_v22, %v361_v23  ;;  %v365_v26 = vld [vmem:[#allocation6 + $0x180] sm:$0xff]  ;;  %v4518_v28 = vcombine.low %v357_v22, %v361_v23  ;;  %v338_v16 = vld [vmem:[#allocation6 + $0xa8] sm:$0xff]  ;;  %v232_v22 = vld [vmem:[%s5571_s5 + $0x58] sm:$0xff] }
  0x78   : > { %1090 = vmatpush1.bf16.msra.mxu1 %v4494_v13  ;;  %v369_v27 = vld [vmem:[#allocation6 + $0x1a0] sm:$0xff]  ;;  %v4480_v13 = vcombine.low %v318_v1, %v322_v2  ;;  %v5599_v23 = vld [vmem:[#allocation6 + $0x10] sm:$0xff] }
  0x79   : > { %1091 = vmatprep.subr.bf16.mxu1 %v4503_v14  ;;  %v4527_v29 = vcombine.high %v365_v26, %v369_v27  ;;  %v373_v30 = vld [vmem:[#allocation6 + $0x1c0] sm:$0xff]  ;;  %v4526_v32 = vcombine.low %v365_v26, %v369_v27  ;;  %v5592_v14 = vpack.c.bf16 %v228_v7, %v226_v6  ;;  %v342_v26 = vld [vmem:[#allocation6 + $0xc8] sm:$0xff]  ;;  %v239_v2 = vld [vmem:[%s5571_s5 + $0x90] sm:$0xff] }
  0x7a   : > { %v377_v31 = vld [vmem:[#allocation6 + $0x1e0] sm:$0xff]  ;;  %v346_v27 = vld [vmem:[#allocation6 + $0xe8] sm:$0xff]  ;;  %v244_v6 = vld [vmem:[%s5571_s5 + $0xb8] sm:$0xff] }
  0x7b   : > { %v4535_v33 = vcombine.high %v373_v30, %v377_v31  ;;  %v381_v34 = vld [vmem:[#allocation6 + $0x200] sm:$0xff]  ;;  %v4534_v36 = vcombine.low %v373_v30, %v377_v31 }
  0x7c   : > { %1092 = vmatpush1.bf16.msra.mxu1 %v4502_v19  ;;  %v385_v35 = vld [vmem:[#allocation6 + $0x220] sm:$0xff]  ;;  %v227_v19 = vld [vmem:[%s5571_s5 + $0x30] sm:$0xff] }
  0x7d   : > { %1093 = vmatprep.subr.bf16.mxu1 %v4511_v21  ;;  %v4543_v37 = vcombine.high %v381_v34, %v385_v35  ;;  %v389_v38 = vld [vmem:[#allocation6 + $0x240] sm:$0xff]  ;;  %v4542_v40 = vcombine.low %v381_v34, %v385_v35  ;;  %v230_v21 = vld [vmem:[%s5571_s5 + $0x48] sm:$0xff]  ;;  %v4505_v35 = vcombine.high %v342_v26, %v346_v27 }
  0x7e   : > { %v393_v39 = vld [vmem:[#allocation6 + $0x260] sm:$0xff]  ;;  %v5608_v31 = vpack.c.bf16 %v232_v22, %v230_v21  ;;  %v354_v34 = vld [vmem:[#allocation6 + $0x128] sm:$0xff]  ;;  %v243_v21 = vld [vmem:[%s5571_s5 + $0xb0] sm:$0xff] }
  0x7f   : > { %v4551_v41 = vcombine.high %v389_v38, %v393_v39  ;;  %v397_v42 = vld [vmem:[#allocation6 + $0x280] sm:$0xff]  ;;  %v4550_v44 = vcombine.low %v389_v38, %v393_v39  ;;  %v234_v38 = vld [vmem:[%s5571_s5 + $0x68] sm:$0xff]  ;;  %v236_v39 = vld [vmem:[%s5571_s5 + $0x78] sm:$0xff] }
  0x80   : > { %1094 = vmatpush1.bf16.msra.mxu1 %v4510_v24  ;;  %v401_v43 = vld [vmem:[#allocation6 + $0x2a0] sm:$0xff]  ;;  %v5601_v24 = vld [vmem:[#allocation6 + $0x30] sm:$0xff] }
  0x81   : > { %1095 = vmatprep.subr.bf16.mxu1 %v4519_v25  ;;  %v4559_v45 = vcombine.high %v397_v42, %v401_v43  ;;  %v405_v46 = vld [vmem:[#allocation6 + $0x2c0] sm:$0xff]  ;;  %v4558_v48 = vcombine.low %v397_v42, %v401_v43  ;;  %v4488_v25 = vcombine.low %v326_v9, %v330_v10  ;;  %v362_v42 = vld [vmem:[#allocation6 + $0x168] sm:$0xff] }
  0x82   : > { %v409_v47 = vld [vmem:[#allocation6 + $0x2e0] sm:$0xff]  ;;  %v394_v9 = vld [vmem:[#allocation6 + $0x268] sm:$0xff] }
  0x83   : > { %v413_v49 = vld [vmem:[#allocation6 + $0x300] sm:$0xff]  ;;  %v4567_v51 = vcombine.high %v405_v46, %v409_v47  ;;  %v4566_v52 = vcombine.low %v405_v46, %v409_v47  ;;  %v366_v47 = vld [vmem:[#allocation6 + $0x188] sm:$0xff] }
  0x84   : > { %1096 = vmatpush1.bf16.msra.mxu1 %v4518_v28  ;;  %v417_v50 = vld [vmem:[#allocation6 + $0x320] sm:$0xff]  ;;  %v4482_v28 = vcombine.low %v5599_v23, %v5601_v24 }
  0x85   : > { %1097 = vmatprep.subr.bf16.mxu1 %v4527_v29  ;;  %v421_v53 = vld [vmem:[#allocation6 + $0x340] sm:$0xff]  ;;  %v4575_v55 = vcombine.high %v413_v49, %v417_v50  ;;  %v4574_v56 = vcombine.low %v413_v49, %v417_v50  ;;  %v4497_v29 = vcombine.high %v334_v15, %v338_v16 }
  0x86   : > { %v425_v54 = vld [vmem:[#allocation6 + $0x360] sm:$0xff] }
  0x87   : > { %v429_v57 = vld [vmem:[#allocation6 + $0x380] sm:$0xff]  ;;  %v4583_v59 = vcombine.high %v421_v53, %v425_v54  ;;  %v4582_v60 = vcombine.low %v421_v53, %v425_v54  ;;  %v240_v53 = vld [vmem:[%s5571_s5 + $0x98] sm:$0xff] }
  0x88   : > { %1098 = vmatpush1.bf16.msra.mxu1 %v4526_v32  ;;  %v433_v58 = vld [vmem:[#allocation6 + $0x3a0] sm:$0xff]  ;;  %v4496_v32 = vcombine.low %v334_v15, %v338_v16  ;;  %v398_v16 = vld [vmem:[#allocation6 + $0x288] sm:$0xff] }
  0x89   : > { %1099 = vmatprep.subr.bf16.mxu1 %v4535_v33  ;;  %v437_v61 = vld [vmem:[#allocation6 + $0x3c0] sm:$0xff]  ;;  %v4591_v63 = vcombine.high %v429_v57, %v433_v58  ;;  %v4590_v0 = vcombine.low %v429_v57, %v433_v58  ;;  %v350_v33 = vld [vmem:[#allocation6 + $0x108] sm:$0xff] }
  0x8a   : > { %v441_v62 = vld [vmem:[#allocation6 + $0x3e0] sm:$0xff]  ;;  %v4513_v43 = vcombine.high %v350_v33, %v354_v34  ;;  %v4512_v46 = vcombine.low %v350_v33, %v354_v34  ;;  %v406_v33 = vld [vmem:[#allocation6 + $0x2c8] sm:$0xff] }
  0x8b   : > { %v4599_v3 = vcombine.high %v437_v61, %v441_v62  ;;  %v221_v4 = vld [vmem:[%s5571_s5] sm:$0xff]  ;;  %v4598_v8 = vcombine.low %v437_v61, %v441_v62  ;;  %v382_v62 = vld [vmem:[#allocation6 + $0x208] sm:$0xff] }
  0x8c   : > { %1100 = vmatpush1.bf16.msra.mxu1 %v4534_v36  ;;  %v5590_v12 = vpack.c.bf16 %v223_v5, %v221_v4  ;;  %v225_v18 = vld [vmem:[%s5571_s5 + $0x20] sm:$0xff]  ;;  %v242_v5 = vld [vmem:[%s5571_s5 + $0xa8] sm:$0xff] }
  0x8d   : > { %1101 = vmatprep.subr.bf16.mxu1 %v4543_v37  ;;  %v5606_v30 = vpack.c.bf16 %v227_v19, %v225_v18  ;;  %v229_v36 = vld [vmem:[%s5571_s5 + $0x40] sm:$0xff]  ;;  %v231_v37 = vld [vmem:[%s5571_s5 + $0x50] sm:$0xff]  ;;  %v410_v34 = vld [vmem:[#allocation6 + $0x2e8] sm:$0xff] }
  0x8e   : > { %v233_v50 = vld [vmem:[%s5571_s5 + $0x60] sm:$0xff]  ;;  %v5014_v19 = vld [vmem:[#allocation8 + $0x14] ss:$8 sps:$4 sm:$0xff]  }
  0x8f   : > { %v237_v1 = vld [vmem:[%s5571_s5 + $0x80] sm:$0xff] }
  0x90   : > { %1102 = vmatpush1.bf16.msra.mxu1 %v4542_v40  ;;  %v4504_v40 = vcombine.low %v342_v26, %v346_v27  ;;  %v5013_v4 = vld [vmem:[#allocation8] ss:$8 sps:$4 sm:$0xff]   ;;  %v5636_v10 = vpack.c.bf16 %v239_v2, %v237_v1  ;;  %v5017_v26 = vld [vmem:[#allocation8 + $0x24] ss:$8 sps:$4 sm:$0xff]   ;;  %v5026_v1 = vld [vmem:[#allocation8 + $0x54] ss:$8 sps:$4 sm:$0xff]  }
  0x91   : > { %1103 = vmatprep.subr.bf16.mxu1 %v4551_v41  ;;  %v358_v41 = vld [vmem:[#allocation6 + $0x148] sm:$0xff]  ;;  %v241_v18 = vld [vmem:[%s5571_s5 + $0xa0] sm:$0xff]  ;;  %v251_v2 = vld [vmem:[%s5571_s5 + $0xf0] sm:$0xff] }
  0x92   : > { %v4521_v49 = vcombine.high %v358_v41, %v362_v42  ;;  %v4520_v54 = vcombine.low %v358_v41, %v362_v42  ;;  %v246_v27 = vld [vmem:[%s5571_s5 + $0xc8] sm:$0xff]  ;;  %v245_v42 = vld [vmem:[%s5571_s5 + $0xc0] sm:$0xff] }
  0x93   : > { %v418_v41 = vld [vmem:[#allocation6 + $0x328] sm:$0xff] }
  0x94   : > { %1104 = vmatpush1.bf16.msra.mxu1 %v4550_v44  ;;  %v5616_v44 = vpack.c.bf16 %v231_v37, %v229_v36  ;;  %v5646_v36 = vpack.c.bf16 %v243_v21, %v241_v18  ;;  %v253_v21 = vld [vmem:[%s5571_s5 + $0x100] sm:$0xff] }
  0x95   : > { %1105 = vmatprep.subr.bf16.mxu1 %v4559_v45  ;;  %v5618_v45 = vpack.c.bf16 %v236_v39, %v234_v38  ;;  %v4569_v39 = vcombine.high %v406_v33, %v410_v34 }
  0x98   : > { %1106 = vmatpush1.bf16.msra.mxu1 %v4558_v48  ;;  %v370_v48 = vld [vmem:[#allocation6 + $0x1a8] sm:$0xff] }
  0x99   : > { %1107 = vmatprep.subr.bf16.mxu1 %v4567_v51  ;;  %v235_v51 = vld [vmem:[%s5571_s5 + $0x70] sm:$0xff]  ;;  %v4529_v57 = vcombine.high %v366_v47, %v370_v48 }
  0x9a   : > { %v5626_v58 = vpack.c.bf16 %v235_v51, %v233_v50  ;;  %v250_v50 = vld [vmem:[%s5571_s5 + $0xe8] sm:$0xff]  ;;  %v252_v51 = vld [vmem:[%s5571_s5 + $0xf8] sm:$0xff] }
  0x9c   : > { %1108 = vmatpush1.bf16.msra.mxu1 %v4566_v52  ;;  %v238_v52 = vld [vmem:[%s5571_s5 + $0x88] sm:$0xff] }
  0x9d   : > { %1109 = vmatprep.subr.bf16.mxu1 %v4575_v55  ;;  %v374_v55 = vld [vmem:[#allocation6 + $0x1c8] sm:$0xff] }
  0xa0   : > { %1110 = vmatpush1.bf16.msra.mxu1 %v4574_v56  ;;  %v378_v56 = vld [vmem:[#allocation6 + $0x1e8] sm:$0xff] }
  0xa1   : > { %1111 = vmatprep.subr.bf16.mxu1 %v4583_v59  ;;  %v5628_v59 = vpack.c.bf16 %v240_v53, %v238_v52  ;;  %v4537_v61 = vcombine.high %v374_v55, %v378_v56  ;;  %v422_v53 = vld [vmem:[#allocation6 + $0x348] sm:$0xff] }
  0xa4   : > { %1112 = vmatpush1.bf16.msra.mxu1 %v4582_v60  ;;  %v4528_v60 = vcombine.low %v366_v47, %v370_v48  ;;  %v4568_v47 = vcombine.low %v406_v33, %v410_v34  ;;  %v5022_v48 = vld [vmem:[#allocation8 + $0x30] ss:$8 sps:$4 sm:$0xff]   ;;  %v4483_v34 = vcombine.high %v5599_v23, %v5601_v24 }
  0xa5   : > { %1113 = vmatprep.subr.bf16.mxu1 %v4591_v63  ;;  %v386_v63 = vld [vmem:[#allocation6 + $0x228] sm:$0xff]  ;;  %v260_v33 = vld [vmem:[%s5571_s5 + $0x138] sm:$0xff]  ;;  %v351_v23 = vld [vmem:[#allocation6 + $0x110] sm:$0xff] }
  0xa6   : > { %v4545_v7 = vcombine.high %v382_v62, %v386_v63  ;;  %v355_v24 = vld [vmem:[#allocation6 + $0x130] sm:$0xff] }
  0xa8   : > { %1114 = vmatpush1.bf16.msra.mxu1 %v4590_v0  ;;  %v5011_v0 = vld [vmem:[#allocation8 + $0x4] ss:$8 sps:$4 sm:$0xff]  }
  0xa9   : > { %1115 = vmatprep.subr.bf16.mxu1 %v4599_v3  ;;  %v4536_v3 = vcombine.low %v374_v55, %v378_v56  ;;  %3521 = vmatprep.subr.bf16.mxu0 %v5011_v0  ;;  %v5025_v55 = vld [vmem:[#allocation8 + $0x40] ss:$8 sps:$4 sm:$0xff]  }
  0xaa   : > { %3522 = vmatpush1.bf16.msra.mxu0 %v5013_v4  ;;  %v249_v0 = vld [vmem:[%s5571_s5 + $0xe0] sm:$0xff]  ;;  %v5028_v4 = vld [vmem:[#allocation8 + $0x50] ss:$8 sps:$4 sm:$0xff]  }
  0xab   : > { %3523 = vmatprep.subr.bf16.mxu0 %v5014_v19 }
  0xac   : > { %1116 = vmatpush1.bf16.msra.mxu1 %v4598_v8  ;;  %v390_v8 = vld [vmem:[#allocation6 + $0x248] sm:$0xff] }
  0xad   : > { %1278 = vmatprep.subr.bf16.mxu1 %v4481_v11  ;;  %v5638_v11 = vpack.c.bf16 %v244_v6, %v242_v5  ;;  %v4553_v15 = vcombine.high %v390_v8, %v394_v9  ;;  %v4552_v22 = vcombine.low %v390_v8, %v394_v9  ;;  %v5029_v5 = vld [vmem:[#allocation8 + $0x64] ss:$8 sps:$4 sm:$0xff]  }
  0xae   : > { %v254_v6 = vld [vmem:[%s5571_s5 + $0x108] sm:$0xff] }
  0xaf   : > { %1118 = vmatmul.mubr.bf16.vlgmr.msra.gmra.mrb[0].mxu1 %v5590_v12  ;;  %v438_v9 = vld [vmem:[#allocation6 + $0x3c8] sm:$0xff] }
  0xb0   : > { %1279 = vmatpush1.bf16.msra.mxu1 %v4480_v13  ;;  %1127 = vmatprep.mubr.bf16.mxu1 %v5592_v14  ;;  %v4544_v13 = vcombine.low %v382_v62, %v386_v63  ;;  %v430_v62 = vld [vmem:[#allocation6 + $0x388] sm:$0xff] }
  0xb1   : > { %1280 = vmatprep.subr.bf16.mxu1 %v4489_v17  ;;  %v402_v17 = vld [vmem:[#allocation6 + $0x2a8] sm:$0xff] }
  0xb2   : > { %v4560_v38 = vcombine.low %v398_v16, %v402_v17  ;;  %v434_v63 = vld [vmem:[#allocation6 + $0x3a8] sm:$0xff] }
  0xb3   : > { %v4593_v8 = vcombine.high %v430_v62, %v434_v63  ;;  %v4592_v18 = vcombine.low %v430_v62, %v434_v63  ;;  %v268_v62 = vld [vmem:[%s5571_s5 + $0x178] sm:$0xff]  ;;  %v5049_v63 = vld [vmem:[#allocation8 + $0xc0] ss:$8 sps:$4 sm:$0xff]  }
  0xb4   : > { %1281 = vmatpush1.bf16.msra.mxu1 %v4488_v25  ;;  %v5016_v25 = vld [vmem:[#allocation8 + $0x10] ss:$8 sps:$4 sm:$0xff]  }
  0xb5   : > { %1282 = vmatprep.subr.bf16.mxu1 %v4497_v29  ;;  %v248_v29 = vld [vmem:[%s5571_s5 + $0xd8] sm:$0xff]  ;;  %3524 = vmatpush1.bf16.msra.mxu0 %v5016_v25  ;;  %v255_v25 = vld [vmem:[%s5571_s5 + $0x110] sm:$0xff] }
  0xb6   : > { %3525 = vmatprep.subr.bf16.mxu0 %v5017_v26  ;;  %v5648_v37 = vpack.c.bf16 %v248_v29, %v246_v27  ;;  %v5034_v27 = vld [vmem:[#allocation8 + $0x70] ss:$8 sps:$4 sm:$0xff]   ;;  %v5035_v29 = vld [vmem:[#allocation8 + $0x84] ss:$8 sps:$4 sm:$0xff]  }
  0xb7   : > { %1128 = vmatmul.mubr.bf16.gmra.mrb[4].mxu1 %v5606_v30 }
  0xb8   : > { %1137 = vmatprep.mubr.bf16.mxu1 %v5608_v31  ;;  %1283 = vmatpush1.bf16.msra.mxu1 %v4496_v32  ;;  %v4561_v32 = vcombine.high %v398_v16, %v402_v17  ;;  %v5666_v16 = vpack.c.bf16 %v251_v2, %v249_v0  ;;  %v5050_v2 = vld [vmem:[#allocation8 + $0xd4] ss:$8 sps:$4 sm:$0xff]  }
  0xb9   : > { %1284 = vmatprep.subr.bf16.mxu1 %v4505_v35  ;;  %v5019_v35 = vld [vmem:[#allocation8 + $0x20] ss:$8 sps:$4 sm:$0xff]  }
  0xba   : > { %3526 = vmatpush1.bf16.msra.mxu0 %v5019_v35  ;;  %v5037_v35 = vld [vmem:[#allocation8 + $0x80] ss:$8 sps:$4 sm:$0xff]  }
  0xbc   : > { %1285 = vmatpush1.bf16.msra.mxu1 %v4504_v40  ;;  %v414_v40 = vld [vmem:[#allocation6 + $0x308] sm:$0xff] }
  0xbd   : > { %1286 = vmatprep.subr.bf16.mxu1 %v4513_v43  ;;  %v5020_v43 = vld [vmem:[#allocation8 + $0x34] ss:$8 sps:$4 sm:$0xff]   ;;  %v4577_v52 = vcombine.high %v414_v40, %v418_v41 }
  0xbe   : > { %3527 = vmatprep.subr.bf16.mxu0 %v5020_v43  ;;  %v5040_v43 = vld [vmem:[#allocation8 + $0x90] ss:$8 sps:$4 sm:$0xff]  }
  0xbf   : > { %1138 = vmatmul.mubr.bf16.gmra.mrb[8].mxu1 %v5616_v44  ;;  %3528 = vmatpush1.bf16.msra.mxu0 %v5022_v48  ;;  %v264_v48 = vld [vmem:[%s5571_s5 + $0x158] sm:$0xff] }
  0xc0   : > { %1147 = vmatprep.mubr.bf16.mxu1 %v5618_v45  ;;  %1287 = vmatpush1.bf16.msra.mxu1 %v4512_v46  ;;  %v247_v46 = vld [vmem:[%s5571_s5 + $0xd0] sm:$0xff] }
  0xc1   : > { %1288 = vmatprep.subr.bf16.mxu1 %v4521_v49  ;;  %v5023_v49 = vld [vmem:[#allocation8 + $0x44] ss:$8 sps:$4 sm:$0xff]   ;;  %v5656_v56 = vpack.c.bf16 %v247_v46, %v245_v42  ;;  %v259_v42 = vld [vmem:[%s5571_s5 + $0x130] sm:$0xff] }
  0xc2   : > { %3529 = vmatprep.subr.bf16.mxu0 %v5023_v49  ;;  %v5041_v46 = vld [vmem:[#allocation8 + $0xa4] ss:$8 sps:$4 sm:$0xff]   ;;  %v5043_v49 = vld [vmem:[#allocation8 + $0xa0] ss:$8 sps:$4 sm:$0xff]  }
  0xc3   : > { %3530 = vmatpush1.bf16.msra.mxu0 %v5025_v55  ;;  %v5046_v55 = vld [vmem:[#allocation8 + $0xb0] ss:$8 sps:$4 sm:$0xff]  }
  0xc4   : > { %1289 = vmatpush1.bf16.msra.mxu1 %v4520_v54  ;;  %v426_v54 = vld [vmem:[#allocation6 + $0x368] sm:$0xff]  ;;  %3531 = vmatprep.subr.bf16.mxu0 %v5026_v1 }
  0xc5   : > { %1290 = vmatprep.subr.bf16.mxu1 %v4529_v57  ;;  %v5658_v57 = vpack.c.bf16 %v252_v51, %v250_v50 }
  0xc7   : > { %1148 = vmatmul.mubr.bf16.gmra.mrb[12].mxu1 %v5626_v58  ;;  %3532 = vmatpush1.bf16.msra.mxu0 %v5028_v4  ;;  %v267_v4 = vld [vmem:[%s5571_s5 + $0x170] sm:$0xff] }
  0xc8   : > { %1157 = vmatprep.mubr.bf16.mxu1 %v5628_v59  ;;  %1291 = vmatpush1.bf16.msra.mxu1 %v4528_v60  ;;  %v4576_v60 = vcombine.low %v414_v40, %v418_v41  ;;  %v257_v40 = vld [vmem:[%s5571_s5 + $0x120] sm:$0xff]  ;;  %v5038_v41 = vld [vmem:[#allocation8 + $0x94] ss:$8 sps:$4 sm:$0xff]  }
  0xc9   : > { %1292 = vmatprep.subr.bf16.mxu1 %v4537_v61  ;;  %v4585_v61 = vcombine.high %v422_v53, %v426_v54  ;;  %3533 = vmatprep.subr.bf16.mxu0 %v5029_v5  ;;  %v5688_v50 = vpack.c.bf16 %v259_v42, %v257_v40  ;;  %v5052_v5 = vld [vmem:[#allocation8 + $0xd0] ss:$8 sps:$4 sm:$0xff]   ;;  %v5061_v40 = vld [vmem:[#allocation8 + $0x104] ss:$8 sps:$4 sm:$0xff]  }
  0xcc   : > { %1293 = vmatpush1.bf16.msra.mxu1 %v4536_v3  ;;  %v4584_v3 = vcombine.low %v422_v53, %v426_v54  ;;  %v5044_v53 = vld [vmem:[#allocation8 + $0xb4] ss:$8 sps:$4 sm:$0xff]  }
  0xcd   : > { %1294 = vmatprep.subr.bf16.mxu1 %v4545_v7  ;;  %v256_v7 = vld [vmem:[%s5571_s5 + $0x118] sm:$0xff]  ;;  %v263_v54 = vld [vmem:[%s5571_s5 + $0x150] sm:$0xff] }
  0xce   : > { %v5668_v17 = vpack.c.bf16 %v256_v7, %v254_v6  ;;  %v270_v6 = vld [vmem:[%s5571_s5 + $0x188] sm:$0xff]  ;;  %v272_v7 = vld [vmem:[%s5571_s5 + $0x198] sm:$0xff] }
  0xcf   : > { %1158 = vmatmul.mubr.bf16.gmra.mrb[16].mxu1 %v5636_v10 }
  0xd0   : > { %1167 = vmatprep.mubr.bf16.mxu1 %v5638_v11  ;;  %1295 = vmatpush1.bf16.msra.mxu1 %v4544_v13  ;;  %v442_v13 = vld [vmem:[#allocation6 + $0x3e8] sm:$0xff] }
  0xd1   : > { %1296 = vmatprep.subr.bf16.mxu1 %v4553_v15  ;;  %v5031_v15 = vld [vmem:[#allocation8 + $0x60] ss:$8 sps:$4 sm:$0xff]   ;;  %v4601_v19 = vcombine.high %v438_v9, %v442_v13  ;;  %v4600_v26 = vcombine.low %v438_v9, %v442_v13  ;;  %v5053_v9 = vld [vmem:[#allocation8 + $0xe4] ss:$8 sps:$4 sm:$0xff]   ;;  %v5710_v13 = vpack.c.bf16 %v272_v7, %v270_v6  ;;  %v347_v6 = vld [vmem:[#allocation6 + $0xf0] sm:$0xff] }
  0xd2   : > { %3534 = vmatpush1.bf16.msra.mxu0 %v5031_v15  ;;  %v5055_v15 = vld [vmem:[#allocation8 + $0xe0] ss:$8 sps:$4 sm:$0xff]   ;;  %v5755_v7 = vld [vmem:[#allocation6 + $0x18] sm:$0xff] }
  0xd4   : > { %1297 = vmatpush1.bf16.msra.mxu1 %v4552_v22  ;;  %v5032_v22 = vld [vmem:[#allocation8 + $0x74] ss:$8 sps:$4 sm:$0xff]  }
  0xd5   : > { %1298 = vmatprep.subr.bf16.mxu1 %v4561_v32  ;;  %v258_v32 = vld [vmem:[%s5571_s5 + $0x128] sm:$0xff]  ;;  %3535 = vmatprep.subr.bf16.mxu0 %v5032_v22  ;;  %v5058_v22 = vld [vmem:[#allocation8 + $0xf0] ss:$8 sps:$4 sm:$0xff]  }
  0xd6   : > { %3536 = vmatpush1.bf16.msra.mxu0 %v5034_v27 }
  0xd7   : > { %1168 = vmatmul.mubr.bf16.gmra.mrb[20].mxu1 %v5646_v36  ;;  %3537 = vmatprep.subr.bf16.mxu0 %v5035_v29 }
  0xd8   : > { %1177 = vmatprep.mubr.bf16.mxu1 %v5648_v37  ;;  %1299 = vmatpush1.bf16.msra.mxu1 %v4560_v38  ;;  %v5678_v38 = vpack.c.bf16 %v255_v25, %v253_v21  ;;  %v271_v21 = vld [vmem:[%s5571_s5 + $0x190] sm:$0xff]  ;;  %v274_v25 = vld [vmem:[%s5571_s5 + $0x1a8] sm:$0xff] }
  0xd9   : > { %1300 = vmatprep.subr.bf16.mxu1 %v4569_v39  ;;  %v5680_v39 = vpack.c.bf16 %v260_v33, %v258_v32  ;;  %v273_v32 = vld [vmem:[%s5571_s5 + $0x1a0] sm:$0xff]  ;;  %v275_v33 = vld [vmem:[%s5571_s5 + $0x1b0] sm:$0xff] }
  0xda   : > { %3538 = vmatpush1.bf16.msra.mxu0 %v5037_v35  ;;  %v280_v35 = vld [vmem:[%s5571_s5 + $0x1d8] sm:$0xff] }
  0xdb   : > { %3539 = vmatprep.subr.bf16.mxu0 %v5038_v41  ;;  %v5728_v41 = vpack.c.bf16 %v275_v33, %v273_v32  ;;  %v367_v33 = vld [vmem:[#allocation6 + $0x190] sm:$0xff] }
  0xdc   : > { %1301 = vmatpush1.bf16.msra.mxu1 %v4568_v47  ;;  %v262_v47 = vld [vmem:[%s5571_s5 + $0x148] sm:$0xff] }
  0xdd   : > { %1302 = vmatprep.subr.bf16.mxu1 %v4577_v52  ;;  %v5690_v51 = vpack.c.bf16 %v264_v48, %v262_v47  ;;  %v261_v52 = vld [vmem:[%s5571_s5 + $0x140] sm:$0xff]  ;;  %v282_v47 = vld [vmem:[%s5571_s5 + $0x1e8] sm:$0xff]  ;;  %v284_v48 = vld [vmem:[%s5571_s5 + $0x1f8] sm:$0xff] }
  0xde   : > { %3540 = vmatpush1.bf16.msra.mxu0 %v5040_v43  ;;  %v5698_v0 = vpack.c.bf16 %v263_v54, %v261_v52  ;;  %v277_v43 = vld [vmem:[%s5571_s5 + $0x1c0] sm:$0xff]  ;;  %v5740_v52 = vpack.c.bf16 %v284_v48, %v282_v47  ;;  %v283_v54 = vld [vmem:[%s5571_s5 + $0x1f0] sm:$0xff] }
  0xdf   : > { %1178 = vmatmul.mubr.bf16.gmra.mrb[24].mxu1 %v5656_v56  ;;  %3541 = vmatprep.subr.bf16.mxu0 %v5041_v46  ;;  %v279_v46 = vld [vmem:[%s5571_s5 + $0x1d0] sm:$0xff] }
  0xe0   : > { %1187 = vmatprep.mubr.bf16.mxu1 %v5658_v57  ;;  %1303 = vmatpush1.bf16.msra.mxu1 %v4576_v60  ;;  %v5047_v60 = vld [vmem:[#allocation8 + $0xc4] ss:$8 sps:$4 sm:$0xff]  }
  0xe1   : > { %1304 = vmatprep.subr.bf16.mxu1 %v4585_v61  ;;  %v266_v61 = vld [vmem:[%s5571_s5 + $0x168] sm:$0xff] }
  0xe2   : > { %3542 = vmatpush1.bf16.msra.mxu0 %v5043_v49  ;;  %v5700_v1 = vpack.c.bf16 %v268_v62, %v266_v61  ;;  %v5738_v49 = vpack.c.bf16 %v279_v46, %v277_v43  ;;  %v331_v61 = vld [vmem:[#allocation6 + $0x70] sm:$0xff] }
  0xe3   : > { %3543 = vmatprep.subr.bf16.mxu0 %v5044_v53  ;;  %v281_v53 = vld [vmem:[%s5571_s5 + $0x1e0] sm:$0xff]  ;;  %v375_v43 = vld [vmem:[#allocation6 + $0x1d0] sm:$0xff] }
  0xe4   : > { %1305 = vmatpush1.bf16.msra.mxu1 %v4584_v3  ;;  %v265_v3 = vld [vmem:[%s5571_s5 + $0x160] sm:$0xff]  ;;  %v379_v46 = vld [vmem:[#allocation6 + $0x1f0] sm:$0xff] }
  0xe5   : > { %1306 = vmatprep.subr.bf16.mxu1 %v4593_v8  ;;  %v5708_v8 = vpack.c.bf16 %v267_v4, %v265_v3  ;;  %v4539_v48 = vcombine.high %v375_v43, %v379_v46 }
  0xe6   : > { %3544 = vmatpush1.bf16.msra.mxu0 %v5046_v55  ;;  %v5746_v55 = vpack.c.bf16 %v283_v54, %v281_v53  ;;  %v383_v53 = vld [vmem:[#allocation6 + $0x210] sm:$0xff] }
  0xe7   : > { %1188 = vmatmul.mubr.bf16.gmra.mrb[28].mxu1 %v5666_v16  ;;  %3545 = vmatprep.subr.bf16.mxu0 %v5047_v60  ;;  %v327_v60 = vld [vmem:[#allocation6 + $0x50] sm:$0xff] }
  0xe8   : > { %1197 = vmatprep.mubr.bf16.mxu1 %v5668_v17  ;;  %1307 = vmatpush1.bf16.msra.mxu1 %v4592_v18  ;;  %v5056_v18 = vld [vmem:[#allocation8 + $0xf4] ss:$8 sps:$4 sm:$0xff]   ;;  %v4491_v62 = vcombine.high %v327_v60, %v331_v61  ;;  %v4490_v3 = vcombine.low %v327_v60, %v331_v61  ;;  %v4538_v60 = vcombine.low %v375_v43, %v379_v46 }
  0xe9   : > { %1308 = vmatprep.subr.bf16.mxu1 %v4601_v19  ;;  %v269_v19 = vld [vmem:[%s5571_s5 + $0x180] sm:$0xff]  ;;  %v387_v54 = vld [vmem:[#allocation6 + $0x230] sm:$0xff] }
  0xea   : > { %3546 = vmatpush1.bf16.msra.mxu0 %v5049_v63  ;;  %v5718_v27 = vpack.c.bf16 %v271_v21, %v269_v19  ;;  %v335_v63 = vld [vmem:[#allocation6 + $0x90] sm:$0xff]  ;;  %v4515_v21 = vcombine.high %v351_v23, %v355_v24  ;;  %v4547_v61 = vcombine.high %v383_v53, %v387_v54 }
  0xeb   : > { %3547 = vmatprep.subr.bf16.mxu0 %v5050_v2  ;;  %v339_v2 = vld [vmem:[#allocation6 + $0xb0] sm:$0xff] }
  0xec   : > { %1309 = vmatpush1.bf16.msra.mxu1 %v4600_v26  ;;  %v276_v26 = vld [vmem:[%s5571_s5 + $0x1b8] sm:$0xff]  ;;  %v4499_v4 = vcombine.high %v335_v63, %v339_v2  ;;  %v435_v43 = vld [vmem:[#allocation6 + $0x3b0] sm:$0xff] }
  0xed   : > { %1471 = vmatprep.subr.bf16.mxu1 %v4483_v34  ;;  %v5720_v29 = vpack.c.bf16 %v276_v26, %v274_v25  ;;  %v278_v34 = vld [vmem:[%s5571_s5 + $0x1c8] sm:$0xff]  ;;  %v363_v25 = vld [vmem:[#allocation6 + $0x170] sm:$0xff]  ;;  %v4514_v26 = vcombine.low %v351_v23, %v355_v24 }
  0xee   : > { %3548 = vmatpush1.bf16.msra.mxu0 %v5052_v5  ;;  %v5730_v42 = vpack.c.bf16 %v280_v35, %v278_v34  ;;  %v343_v5 = vld [vmem:[#allocation6 + $0xd0] sm:$0xff] }
  0xef   : > { %1198 = vmatmul.mubr.bf16.gmra.mrb[32].mxu1 %v5678_v38  ;;  %3549 = vmatprep.subr.bf16.mxu0 %v5053_v9  ;;  %v5757_v9 = vld [vmem:[#allocation6 + $0x38] sm:$0xff]  ;;  %v4507_v19 = vcombine.high %v343_v5, %v347_v6  ;;  %v371_v34 = vld [vmem:[#allocation6 + $0x1b0] sm:$0xff] }
  0xf0   : > { %1207 = vmatprep.mubr.bf16.mxu1 %v5680_v39  ;;  %v4530_v47 = vcombine.low %v367_v33, %v371_v34  ;;  %v411_v23 = vld [vmem:[#allocation6 + $0x2f0] sm:$0xff] }
  0xf2   : > { %3550 = vmatpush1.bf16.msra.mxu0 %v5055_v15  ;;  %v4498_v15 = vcombine.low %v335_v63, %v339_v2  ;;  %v395_v63 = vld [vmem:[#allocation6 + $0x270] sm:$0xff]  ;;  %v4546_v2 = vcombine.low %v383_v53, %v387_v54 }
  0xf3   : > { %3551 = vmatprep.subr.bf16.mxu0 %v5056_v18  ;;  %v4484_v18 = vcombine.low %v5755_v7, %v5757_v9  ;;  %v443_v53 = vld [vmem:[#allocation6 + $0x3f0] sm:$0xff] }
  0xf6   : > { %3552 = vmatpush1.bf16.msra.mxu0 %v5058_v22  ;;  %v359_v22 = vld [vmem:[#allocation6 + $0x150] sm:$0xff] }
  0xf7   : > { %1208 = vmatmul.mubr.bf16.gmra.mrb[36].mxu1 %v5688_v50  ;;  %3714 = vmatprep.subr.bf16.mxu0 %v5061_v40  ;;  %v4523_v32 = vcombine.high %v359_v22, %v363_v25  ;;  %v4522_v35 = vcombine.low %v359_v22, %v363_v25  ;;  %v4531_v40 = vcombine.high %v367_v33, %v371_v34  ;;  %v419_v22 = vld [vmem:[#allocation6 + $0x330] sm:$0xff] }
  0xf8   : > { %1217 = vmatprep.mubr.bf16.mxu1 %v5690_v51  ;;  %v427_v33 = vld [vmem:[#allocation6 + $0x370] sm:$0xff] }
  0xff   : > { %1218 = vmatmul.mubr.bf16.gmra.mrb[40].mxu1 %v5698_v0 }
 0x100   : > { %1227 = vmatprep.mubr.bf16.mxu1 %v5700_v1 }
 0x107   : > { %1228 = vmatmul.mubr.bf16.gmra.mrb[44].mxu1 %v5708_v8 }
 0x108   : > { %1237 = vmatprep.mubr.bf16.mxu1 %v5710_v13 }
 0x10f   : > { %1238 = vmatmul.mubr.bf16.gmra.mrb[48].mxu1 %v5718_v27 }
 0x110   : > { %1247 = vmatprep.mubr.bf16.mxu1 %v5720_v29 }
 0x117   : > { %1248 = vmatmul.mubr.bf16.gmra.mrb[52].mxu1 %v5728_v41 }
 0x118   : > { %1257 = vmatprep.mubr.bf16.mxu1 %v5730_v42 }
 0x11f   : > { %1258 = vmatmul.mubr.bf16.gmra.mrb[56].mxu1 %v5738_v49 }
 0x120   : > { %1267 = vmatprep.mubr.bf16.mxu1 %v5740_v52 }
 0x127   : > { %1268 = vmatmul.mubr.bf16.gmra.mrb[60].mxu1 %v5746_v55 }
 0x128   : > { %1310 = vmatprep.mubr.bf16.mxu1 %v5583_v20 }
 0x12f   : > { %1311 = vmatmul.mubr.bf16.vlgmr.msra.gmra.mrb[64].mxu1 %v5590_v12 }
 0x130   : > { %1472 = vmatpush1.bf16.msra.mxu1 %v4482_v28  ;;  %1320 = vmatprep.mubr.bf16.mxu1 %v5592_v14  ;;  %v4506_v28 = vcombine.low %v343_v5, %v347_v6  ;;  %v403_v5 = vld [vmem:[#allocation6 + $0x2b0] sm:$0xff] }
 0x131   : > { %1473 = vmatprep.subr.bf16.mxu1 %v4491_v62  ;;  %v391_v62 = vld [vmem:[#allocation6 + $0x250] sm:$0xff] }
 0x132   : > { %v4554_v6 = vcombine.low %v391_v62, %v395_v63 }
 0x134   : > { %1474 = vmatpush1.bf16.msra.mxu1 %v4490_v3  ;;  %v4555_v3 = vcombine.high %v391_v62, %v395_v63  ;;  %v4485_v62 = vcombine.high %v5755_v7, %v5757_v9 }
 0x135   : > { %1475 = vmatprep.subr.bf16.mxu1 %v4499_v4  ;;  %v399_v4 = vld [vmem:[#allocation6 + $0x290] sm:$0xff] }
 0x136   : > { %v4562_v24 = vcombine.low %v399_v4, %v403_v5 }
 0x137   : > { %1321 = vmatmul.mubr.bf16.gmra.mrb[68].mxu1 %v5606_v30 }
 0x138   : > { %1330 = vmatprep.mubr.bf16.mxu1 %v5608_v31  ;;  %1476 = vmatpush1.bf16.msra.mxu1 %v4498_v15  ;;  %v4563_v15 = vcombine.high %v399_v4, %v403_v5 }
 0x139   : > { %1477 = vmatprep.subr.bf16.mxu1 %v4507_v19  ;;  %v407_v19 = vld [vmem:[#allocation6 + $0x2d0] sm:$0xff] }
 0x13a   : > { %v4570_v25 = vcombine.low %v407_v19, %v411_v23 }
 0x13c   : > { %1478 = vmatpush1.bf16.msra.mxu1 %v4506_v28  ;;  %v4571_v28 = vcombine.high %v407_v19, %v411_v23 }
 0x13d   : > { %1479 = vmatprep.subr.bf16.mxu1 %v4515_v21  ;;  %v415_v21 = vld [vmem:[#allocation6 + $0x310] sm:$0xff] }
 0x13e   : > { %v4578_v34 = vcombine.low %v415_v21, %v419_v22 }
 0x13f   : > { %1331 = vmatmul.mubr.bf16.gmra.mrb[72].mxu1 %v5616_v44 }
 0x140   : > { %1340 = vmatprep.mubr.bf16.mxu1 %v5618_v45  ;;  %1480 = vmatpush1.bf16.msra.mxu1 %v4514_v26  ;;  %v4579_v26 = vcombine.high %v415_v21, %v419_v22 }
 0x141   : > { %1481 = vmatprep.subr.bf16.mxu1 %v4523_v32  ;;  %v423_v32 = vld [vmem:[#allocation6 + $0x350] sm:$0xff] }
 0x142   : > { %v4586_v46 = vcombine.low %v423_v32, %v427_v33 }
 0x144   : > { %1482 = vmatpush1.bf16.msra.mxu1 %v4522_v35  ;;  %v4587_v35 = vcombine.high %v423_v32, %v427_v33  ;;  %v5059_v32 = vld [vmem:[#allocation8 + $0x100] ss:$8 sps:$4 sm:$0xff]  }
 0x145   : > { %1483 = vmatprep.subr.bf16.mxu1 %v4531_v40  ;;  %v431_v40 = vld [vmem:[#allocation6 + $0x390] sm:$0xff] }
 0x146   : > { %v4594_v54 = vcombine.low %v431_v40, %v435_v43 }
 0x147   : > { %1341 = vmatmul.mubr.bf16.gmra.mrb[76].mxu1 %v5626_v58 }
 0x148   : > { %1350 = vmatprep.mubr.bf16.mxu1 %v5628_v59  ;;  %1484 = vmatpush1.bf16.msra.mxu1 %v4530_v47  ;;  %v4595_v47 = vcombine.high %v431_v40, %v435_v43 }
 0x149   : > { %1485 = vmatprep.subr.bf16.mxu1 %v4539_v48  ;;  %v439_v48 = vld [vmem:[#allocation6 + $0x3d0] sm:$0xff] }
 0x14c   : > { %1486 = vmatpush1.bf16.msra.mxu1 %v4538_v60  ;;  %v4603_v60 = vcombine.high %v439_v48, %v443_v53 }
 0x14d   : > { %1487 = vmatprep.subr.bf16.mxu1 %v4547_v61  ;;  %v4602_v61 = vcombine.low %v439_v48, %v443_v53  ;;  %v5062_v53 = vld [vmem:[#allocation8 + $0x110] ss:$8 sps:$4 sm:$0xff]  }
 0x14f   : > { %1351 = vmatmul.mubr.bf16.gmra.mrb[80].mxu1 %v5636_v10 }
 0x150   : > { %1360 = vmatprep.mubr.bf16.mxu1 %v5638_v11  ;;  %1488 = vmatpush1.bf16.msra.mxu1 %v4546_v2 }
 0x151   : > { %1489 = vmatprep.subr.bf16.mxu1 %v4555_v3 }
 0x154   : > { %1490 = vmatpush1.bf16.msra.mxu1 %v4554_v6 }
 0x155   : > { %1491 = vmatprep.subr.bf16.mxu1 %v4563_v15 }
 0x157   : > { %1361 = vmatmul.mubr.bf16.gmra.mrb[84].mxu1 %v5646_v36 }
 0x158   : > { %1370 = vmatprep.mubr.bf16.mxu1 %v5648_v37  ;;  %1492 = vmatpush1.bf16.msra.mxu1 %v4562_v24 }
 0x159   : > { %1493 = vmatprep.subr.bf16.mxu1 %v4571_v28 }
 0x15c   : > { %1494 = vmatpush1.bf16.msra.mxu1 %v4570_v25 }
 0x15d   : > { %1495 = vmatprep.subr.bf16.mxu1 %v4579_v26 }
 0x15f   : > { %1371 = vmatmul.mubr.bf16.gmra.mrb[88].mxu1 %v5656_v56 }
 0x160   : > { %1380 = vmatprep.mubr.bf16.mxu1 %v5658_v57  ;;  %1496 = vmatpush1.bf16.msra.mxu1 %v4578_v34 }
 0x161   : > { %1497 = vmatprep.subr.bf16.mxu1 %v4587_v35  ;;  %v5064_v35 = vld [vmem:[#allocation8 + $0x114] ss:$8 sps:$4 sm:$0xff]  }
 0x164   : > { %1498 = vmatpush1.bf16.msra.mxu1 %v4586_v46 }
 0x165   : > { %1499 = vmatprep.subr.bf16.mxu1 %v4595_v47 }
 0x167   : > { %1381 = vmatmul.mubr.bf16.gmra.mrb[92].mxu1 %v5666_v16 }
 0x168   : > { %1390 = vmatprep.mubr.bf16.mxu1 %v5668_v17  ;;  %1500 = vmatpush1.bf16.msra.mxu1 %v4594_v54 }
 0x169   : > { %1501 = vmatprep.subr.bf16.mxu1 %v4603_v60 }
 0x16c   : > { %1502 = vmatpush1.bf16.msra.mxu1 %v4602_v61  ;;  %v5067_v61 = vld [vmem:[#allocation8 + $0x124] ss:$8 sps:$4 sm:$0xff]  }
 0x16d   : > { %1664 = vmatprep.subr.bf16.mxu1 %v4485_v62 }
 0x16f   : > { %1391 = vmatmul.mubr.bf16.gmra.mrb[96].mxu1 %v5678_v38 }
 0x170   : > { %1400 = vmatprep.mubr.bf16.mxu1 %v5680_v39 }
 0x177   : > { %1401 = vmatmul.mubr.bf16.gmra.mrb[100].mxu1 %v5688_v50 }
 0x178   : > { %1410 = vmatprep.mubr.bf16.mxu1 %v5690_v51 }
 0x17f   : > { %1411 = vmatmul.mubr.bf16.gmra.mrb[104].mxu1 %v5698_v0 }
 0x180   : > { %1420 = vmatprep.mubr.bf16.mxu1 %v5700_v1 }
 0x182   : > { %v1119_v63 = vpop.f32.mrb[0].mxu1 }
 0x183   : > { %v1857_v2 = vmax.f32 %v1119_v63, 0.0  ;;  %v1121_v3 = vpop.f32.mrb[1].mxu1 }
 0x184   : > { %v1858_v4 = vmax.f32 %v1121_v3, 0.0  ;;  %v1123_v5 = vpop.f32.mrb[2].mxu1 }
 0x185   : > { %v1865_v6 = vmax.f32 %v1123_v5, 0.0  ;;  %v1125_v15 = vpop.f32.mrb[3].mxu1  ;;  %v2113_v23 = vmul.f32 %v1857_v2, %v1857_v2  ;;  %v5065_v5 = vld [vmem:[#allocation8 + $0x120] ss:$8 sps:$4 sm:$0xff]  }
 0x186   : > { %v1866_v19 = vmax.f32 %v1125_v15, 0.0  ;;  %v2114_v28 = vmul.f32 %v1858_v4, %v1858_v4 }
 0x187   : > { %v2121_v24 = vmul.f32 %v1865_v6, %v1865_v6  ;;  %1421 = vmatmul.mubr.bf16.gmra.mrb[108].mxu1 %v5708_v8 }
 0x188   : > { %v2122_v21 = vmul.f32 %v1866_v19, %v1866_v19  ;;  %1430 = vmatprep.mubr.bf16.mxu1 %v5710_v13  ;;  %v5070_v19 = vld [vmem:[#allocation8 + $0x134] ss:$8 sps:$4 sm:$0xff]  }
 0x189   : > { %v2369_v22 = vpack.c.bf16 %v2121_v24, %v2113_v23 }
 0x18a   : > { %v1129_v25 = vpop.f32.mrb[4].mxu1  ;;  %v2370_v26 = vpack.c.bf16 %v2122_v21, %v2114_v28 }
 0x18b   : > { %v1873_v33 = vmax.f32 %v1129_v25, 0.0  ;;  %v1131_v34 = vpop.f32.mrb[5].mxu1  ;;  %v5068_v25 = vld [vmem:[#allocation8 + $0x130] ss:$8 sps:$4 sm:$0xff]  }
 0x18c   : > { %v1874_v40 = vmax.f32 %v1131_v34, 0.0  ;;  %v1133_v43 = vpop.f32.mrb[6].mxu1  ;;  %3553 = vmatprep.mubr.bf16.mxu0 %v2370_v26 }
 0x18d   : > { %v1881_v46 = vmax.f32 %v1133_v43, 0.0  ;;  %v1135_v47 = vpop.f32.mrb[7].mxu1  ;;  %3554 = vmatmul.mubr.bf16.vlgmr.msra.gmra.mrb[0].mxu0 %v2369_v22  ;;  %v2129_v54 = vmul.f32 %v1873_v33, %v1873_v33  ;;  %v5073_v33 = vld [vmem:[#allocation8 + $0x144] ss:$8 sps:$4 sm:$0xff]  }
 0x18e   : > { %v1882_v48 = vmax.f32 %v1135_v47, 0.0  ;;  %3715 = vmatpush1.bf16.msra.mxu0 %v5059_v32  ;;  %v2130_v62 = vmul.f32 %v1874_v40, %v1874_v40  ;;  %v5071_v47 = vld [vmem:[#allocation8 + $0x140] ss:$8 sps:$4 sm:$0xff]  }
 0x18f   : > { %v2137_v60 = vmul.f32 %v1881_v46, %v1881_v46  ;;  %1431 = vmatmul.mubr.bf16.gmra.mrb[112].mxu1 %v5718_v27  ;;  %3716 = vmatprep.subr.bf16.mxu0 %v5064_v35 }
 0x190   : > { %v2138_v63 = vmul.f32 %v1882_v48, %v1882_v48  ;;  %1440 = vmatprep.mubr.bf16.mxu1 %v5720_v29 }
 0x191   : > { %v2377_v2 = vpack.c.bf16 %v2137_v60, %v2129_v54  ;;  %v5076_v54 = vld [vmem:[#allocation8 + $0x154] ss:$8 sps:$4 sm:$0xff]  }
 0x192   : > { %v2378_v3 = vpack.c.bf16 %v2138_v63, %v2130_v62  ;;  %v1139_v4 = vpop.f32.mrb[8].mxu1  ;;  %3717 = vmatpush1.bf16.msra.mxu0 %v5062_v53 }
 0x193   : > { %v1889_v6 = vmax.f32 %v1139_v4, 0.0  ;;  %v1141_v15 = vpop.f32.mrb[9].mxu1  ;;  %3718 = vmatprep.subr.bf16.mxu0 %v5067_v61 }
 0x194   : > { %v1890_v23 = vmax.f32 %v1141_v15, 0.0  ;;  %v1143_v24 = vpop.f32.mrb[10].mxu1  ;;  %3563 = vmatprep.mubr.bf16.mxu0 %v2378_v3  ;;  %v5074_v3 = vld [vmem:[#allocation8 + $0x150] ss:$8 sps:$4 sm:$0xff]  }
 0x195   : > { %v1897_v28 = vmax.f32 %v1143_v24, 0.0  ;;  %v1145_v21 = vpop.f32.mrb[11].mxu1  ;;  %3564 = vmatmul.mubr.bf16.gmra.mrb[4].mxu0 %v2377_v2  ;;  %v2145_v26 = vmul.f32 %v1889_v6, %v1889_v6  ;;  %v5079_v6 = vld [vmem:[#allocation8 + $0x164] ss:$8 sps:$4 sm:$0xff]  }
 0x196   : > { %v1898_v22 = vmax.f32 %v1145_v21, 0.0  ;;  %3719 = vmatpush1.bf16.msra.mxu0 %v5065_v5  ;;  %v2146_v34 = vmul.f32 %v1890_v23, %v1890_v23  ;;  %v5077_v21 = vld [vmem:[#allocation8 + $0x160] ss:$8 sps:$4 sm:$0xff]  }
 0x197   : > { %v2153_v32 = vmul.f32 %v1897_v28, %v1897_v28  ;;  %1441 = vmatmul.mubr.bf16.gmra.mrb[116].mxu1 %v5728_v41  ;;  %3720 = vmatprep.subr.bf16.mxu0 %v5070_v19 }
 0x198   : > { %v2154_v35 = vmul.f32 %v1898_v22, %v1898_v22  ;;  %1450 = vmatprep.mubr.bf16.mxu1 %v5730_v42 }
 0x199   : > { %v2385_v40 = vpack.c.bf16 %v2153_v32, %v2145_v26  ;;  %v5082_v26 = vld [vmem:[#allocation8 + $0x174] ss:$8 sps:$4 sm:$0xff]  }
 0x19a   : > { %v2386_v43 = vpack.c.bf16 %v2154_v35, %v2146_v34  ;;  %v1149_v46 = vpop.f32.mrb[12].mxu1  ;;  %3721 = vmatpush1.bf16.msra.mxu0 %v5068_v25 }
 0x19b   : > { %v1905_v48 = vmax.f32 %v1149_v46, 0.0  ;;  %v1151_v53 = vpop.f32.mrb[13].mxu1  ;;  %3722 = vmatprep.subr.bf16.mxu0 %v5073_v33 }
 0x19c   : > { %v1906_v60 = vmax.f32 %v1151_v53, 0.0  ;;  %v1153_v61 = vpop.f32.mrb[14].mxu1  ;;  %3573 = vmatprep.mubr.bf16.mxu0 %v2386_v43  ;;  %v5080_v43 = vld [vmem:[#allocation8 + $0x170] ss:$8 sps:$4 sm:$0xff]  }
 0x19d   : > { %v1913_v62 = vmax.f32 %v1153_v61, 0.0  ;;  %v1155_v63 = vpop.f32.mrb[15].mxu1  ;;  %3574 = vmatmul.mubr.bf16.gmra.mrb[8].mxu0 %v2385_v40  ;;  %v2161_v4 = vmul.f32 %v1905_v48, %v1905_v48  ;;  %v5085_v48 = vld [vmem:[#allocation8 + $0x184] ss:$8 sps:$4 sm:$0xff]  }
 0x19e   : > { %v1914_v2 = vmax.f32 %v1155_v63, 0.0  ;;  %3723 = vmatpush1.bf16.msra.mxu0 %v5071_v47  ;;  %v2162_v15 = vmul.f32 %v1906_v60, %v1906_v60  ;;  %v328_v63 = vld [vmem:[#allocation6 + $0x58] sm:$0xff] }
 0x19f   : > { %v2169_v5 = vmul.f32 %v1913_v62, %v1913_v62  ;;  %1451 = vmatmul.mubr.bf16.gmra.mrb[120].mxu1 %v5738_v49  ;;  %3724 = vmatprep.subr.bf16.mxu0 %v5076_v54 }
 0x1a0   : > { %v2170_v19 = vmul.f32 %v1914_v2, %v1914_v2  ;;  %1460 = vmatprep.mubr.bf16.mxu1 %v5740_v52  ;;  %v332_v2 = vld [vmem:[#allocation6 + $0x78] sm:$0xff] }
 0x1a1   : > { %v2393_v23 = vpack.c.bf16 %v2169_v5, %v2161_v4 }
 0x1a2   : > { %v2394_v24 = vpack.c.bf16 %v2170_v19, %v2162_v15  ;;  %v1159_v28 = vpop.f32.mrb[16].mxu1  ;;  %3725 = vmatpush1.bf16.msra.mxu0 %v5074_v3  ;;  %v5083_v3 = vld [vmem:[#allocation8 + $0x180] ss:$8 sps:$4 sm:$0xff]  }
 0x1a3   : > { %v1921_v22 = vmax.f32 %v1159_v28, 0.0  ;;  %v1161_v25 = vpop.f32.mrb[17].mxu1  ;;  %3726 = vmatprep.subr.bf16.mxu0 %v5079_v6  ;;  %v5088_v6 = vld [vmem:[#allocation8 + $0x194] ss:$8 sps:$4 sm:$0xff]   ;;  %v4493_v28 = vcombine.high %v328_v63, %v332_v2 }
 0x1a4   : > { %v1922_v32 = vmax.f32 %v1161_v25, 0.0  ;;  %v1163_v33 = vpop.f32.mrb[18].mxu1  ;;  %3583 = vmatprep.mubr.bf16.mxu0 %v2394_v24  ;;  %v340_v25 = vld [vmem:[#allocation6 + $0xb8] sm:$0xff] }
 0x1a5   : > { %v1929_v34 = vmax.f32 %v1163_v33, 0.0  ;;  %v1165_v35 = vpop.f32.mrb[19].mxu1  ;;  %3584 = vmatmul.mubr.bf16.gmra.mrb[12].mxu0 %v2393_v23  ;;  %v2177_v46 = vmul.f32 %v1921_v22, %v1921_v22  ;;  %v336_v22 = vld [vmem:[#allocation6 + $0x98] sm:$0xff] }
 0x1a6   : > { %v1930_v40 = vmax.f32 %v1165_v35, 0.0  ;;  %3727 = vmatpush1.bf16.msra.mxu0 %v5077_v21  ;;  %v2178_v53 = vmul.f32 %v1922_v32, %v1922_v32  ;;  %v4500_v7 = vcombine.low %v336_v22, %v340_v25 }
 0x1a7   : > { %v2185_v47 = vmul.f32 %v1929_v34, %v1929_v34  ;;  %1461 = vmatmul.mubr.bf16.gmra.mrb[124].mxu1 %v5746_v55  ;;  %3728 = vmatprep.subr.bf16.mxu0 %v5082_v26  ;;  %v5086_v26 = vld [vmem:[#allocation8 + $0x190] ss:$8 sps:$4 sm:$0xff]   ;;  %v5091_v34 = vld [vmem:[#allocation8 + $0x1a4] ss:$8 sps:$4 sm:$0xff]  }
 0x1a8   : > { %v2186_v54 = vmul.f32 %v1930_v40, %v1930_v40  ;;  %1503 = vmatprep.mubr.bf16.mxu1 %v5583_v20 }
 0x1a9   : > { %v2401_v60 = vpack.c.bf16 %v2185_v47, %v2177_v46  ;;  %v4501_v47 = vcombine.high %v336_v22, %v340_v25 }
 0x1aa   : > { %v2402_v61 = vpack.c.bf16 %v2186_v54, %v2178_v53  ;;  %v1169_v62 = vpop.f32.mrb[20].mxu1  ;;  %3729 = vmatpush1.bf16.msra.mxu0 %v5080_v43  ;;  %v4492_v43 = vcombine.low %v328_v63, %v332_v2  ;;  %v344_v54 = vld [vmem:[#allocation6 + $0xd8] sm:$0xff] }
 0x1ab   : > { %v1937_v4 = vmax.f32 %v1169_v62, 0.0  ;;  %v1171_v5 = vpop.f32.mrb[21].mxu1  ;;  %3730 = vmatprep.subr.bf16.mxu0 %v5085_v48 }
 0x1ac   : > { %v1938_v15 = vmax.f32 %v1171_v5, 0.0  ;;  %v1173_v19 = vpop.f32.mrb[22].mxu1  ;;  %3593 = vmatprep.mubr.bf16.mxu0 %v2402_v61  ;;  %v5089_v61 = vld [vmem:[#allocation8 + $0x1a0] ss:$8 sps:$4 sm:$0xff]  }
 0x1ad   : > { %v1945_v23 = vmax.f32 %v1173_v19, 0.0  ;;  %v1175_v24 = vpop.f32.mrb[23].mxu1  ;;  %3594 = vmatmul.mubr.bf16.gmra.mrb[16].mxu0 %v2401_v60  ;;  %v2193_v32 = vmul.f32 %v1937_v4, %v1937_v4  ;;  %v348_v60 = vld [vmem:[#allocation6 + $0xf8] sm:$0xff] }
 0x1ae   : > { %v1946_v21 = vmax.f32 %v1175_v24, 0.0  ;;  %3731 = vmatpush1.bf16.msra.mxu0 %v5083_v3  ;;  %v2194_v35 = vmul.f32 %v1938_v15, %v1938_v15  ;;  %v5094_v4 = vld [vmem:[#allocation8 + $0x1b4] ss:$8 sps:$4 sm:$0xff]   ;;  %v4509_v63 = vcombine.high %v344_v54, %v348_v60  ;;  %v4508_v22 = vcombine.low %v344_v54, %v348_v60 }
 0x1af   : > { %v2201_v33 = vmul.f32 %v1945_v23, %v1945_v23  ;;  %1504 = vmatmul.mubr.bf16.vlgmr.msra.gmra.mrb[128].mxu1 %v5590_v12  ;;  %3732 = vmatprep.subr.bf16.mxu0 %v5088_v6  ;;  %v352_v15 = vld [vmem:[#allocation6 + $0x118] sm:$0xff] }
 0x1b0   : > { %v2202_v40 = vmul.f32 %v1946_v21, %v1946_v21  ;;  %1665 = vmatpush1.bf16.msra.mxu1 %v4484_v18  ;;  %1513 = vmatprep.mubr.bf16.mxu1 %v5592_v14  ;;  %v356_v19 = vld [vmem:[#allocation6 + $0x138] sm:$0xff]  ;;  %v5097_v21 = vld [vmem:[#allocation8 + $0x1c4] ss:$8 sps:$4 sm:$0xff]  }
 0x1b1   : > { %v2409_v46 = vpack.c.bf16 %v2201_v33, %v2193_v32  ;;  %1666 = vmatprep.subr.bf16.mxu1 %v4493_v28  ;;  %v5092_v23 = vld [vmem:[#allocation8 + $0x1b0] ss:$8 sps:$4 sm:$0xff]   ;;  %v4517_v33 = vcombine.high %v352_v15, %v356_v19 }
 0x1b2   : > { %v2410_v48 = vpack.c.bf16 %v2202_v40, %v2194_v35  ;;  %v1179_v53 = vpop.f32.mrb[24].mxu1  ;;  %3733 = vmatpush1.bf16.msra.mxu0 %v5086_v26  ;;  %v360_v40 = vld [vmem:[#allocation6 + $0x158] sm:$0xff] }
 0x1b3   : > { %v1953_v62 = vmax.f32 %v1179_v53, 0.0  ;;  %v1181_v3 = vpop.f32.mrb[25].mxu1  ;;  %3734 = vmatprep.subr.bf16.mxu0 %v5091_v34  ;;  %v5100_v53 = vld [vmem:[#allocation8 + $0x1d4] ss:$8 sps:$4 sm:$0xff]  }
 0x1b4   : > { %v1954_v5 = vmax.f32 %v1181_v3, 0.0  ;;  %v1183_v6 = vpop.f32.mrb[26].mxu1  ;;  %3603 = vmatprep.mubr.bf16.mxu0 %v2410_v48  ;;  %1667 = vmatpush1.bf16.msra.mxu1 %v4492_v43  ;;  %v364_v43 = vld [vmem:[#allocation6 + $0x178] sm:$0xff]  ;;  %v4516_v3 = vcombine.low %v352_v15, %v356_v19 }
 0x1b5   : > { %v1961_v9 = vmax.f32 %v1183_v6, 0.0  ;;  %v1185_v18 = vpop.f32.mrb[27].mxu1  ;;  %3604 = vmatmul.mubr.bf16.gmra.mrb[20].mxu0 %v2409_v46  ;;  %1668 = vmatprep.subr.bf16.mxu1 %v4501_v47  ;;  %v2209_v24 = vmul.f32 %v1953_v62, %v1953_v62  ;;  %v5095_v46 = vld [vmem:[#allocation8 + $0x1c0] ss:$8 sps:$4 sm:$0xff]   ;;  %v4525_v60 = vcombine.high %v360_v40, %v364_v43  ;;  %v368_v6 = vld [vmem:[#allocation6 + $0x198] sm:$0xff]  ;;  %v4524_v15 = vcombine.low %v360_v40, %v364_v43 }
 0x1b6   : > { %v1962_v2 = vmax.f32 %v1185_v18, 0.0  ;;  %3735 = vmatpush1.bf16.msra.mxu0 %v5089_v61  ;;  %v2210_v26 = vmul.f32 %v1954_v5, %v1954_v5 }
 0x1b7   : > { %v2217_v28 = vmul.f32 %v1961_v9, %v1961_v9  ;;  %1514 = vmatmul.mubr.bf16.gmra.mrb[132].mxu1 %v5606_v30  ;;  %3736 = vmatprep.subr.bf16.mxu0 %v5094_v4  ;;  %v5098_v9 = vld [vmem:[#allocation8 + $0x1d0] ss:$8 sps:$4 sm:$0xff]  }
 0x1b8   : > { %v2218_v32 = vmul.f32 %v1962_v2, %v1962_v2  ;;  %1523 = vmatprep.mubr.bf16.mxu1 %v5608_v31  ;;  %1669 = vmatpush1.bf16.msra.mxu1 %v4500_v7  ;;  %v372_v7 = vld [vmem:[#allocation6 + $0x1b8] sm:$0xff]  ;;  %v5103_v2 = vld [vmem:[#allocation8 + $0x1e4] ss:$8 sps:$4 sm:$0xff]  }
 0x1b9   : > { %v2417_v25 = vpack.c.bf16 %v2217_v28, %v2209_v24  ;;  %1670 = vmatprep.subr.bf16.mxu1 %v4509_v63  ;;  %v4533_v28 = vcombine.high %v368_v6, %v372_v7 }
 0x1ba   : > { %v2418_v34 = vpack.c.bf16 %v2218_v32, %v2210_v26  ;;  %v1189_v35 = vpop.f32.mrb[28].mxu1  ;;  %3737 = vmatpush1.bf16.msra.mxu0 %v5092_v23  ;;  %v376_v32 = vld [vmem:[#allocation6 + $0x1d8] sm:$0xff] }
 0x1bb   : > { %v1969_v47 = vmax.f32 %v1189_v35, 0.0  ;;  %v1191_v48 = vpop.f32.mrb[29].mxu1  ;;  %3738 = vmatprep.subr.bf16.mxu0 %v5097_v21  ;;  %v5106_v35 = vld [vmem:[#allocation8 + $0x1f4] ss:$8 sps:$4 sm:$0xff]  }
 0x1bc   : > { %v1970_v61 = vmax.f32 %v1191_v48, 0.0  ;;  %v1193_v62 = vpop.f32.mrb[30].mxu1  ;;  %3613 = vmatprep.mubr.bf16.mxu0 %v2418_v34  ;;  %1671 = vmatpush1.bf16.msra.mxu1 %v4508_v22  ;;  %v380_v22 = vld [vmem:[#allocation6 + $0x1f8] sm:$0xff]  ;;  %v4532_v48 = vcombine.low %v368_v6, %v372_v7 }
 0x1bd   : > { %v1977_v4 = vmax.f32 %v1193_v62, 0.0  ;;  %v1195_v54 = vpop.f32.mrb[31].mxu1  ;;  %3614 = vmatmul.mubr.bf16.gmra.mrb[24].mxu0 %v2417_v25  ;;  %1672 = vmatprep.subr.bf16.mxu1 %v4517_v33  ;;  %v2225_v18 = vmul.f32 %v1969_v47, %v1969_v47  ;;  %v5101_v25 = vld [vmem:[#allocation8 + $0x1e0] ss:$8 sps:$4 sm:$0xff]   ;;  %v4541_v43 = vcombine.high %v376_v32, %v380_v22  ;;  %v384_v62 = vld [vmem:[#allocation6 + $0x218] sm:$0xff]  ;;  %v4540_v6 = vcombine.low %v376_v32, %v380_v22 }
 0x1be   : > { %v1978_v5 = vmax.f32 %v1195_v54, 0.0  ;;  %3739 = vmatpush1.bf16.msra.mxu0 %v5095_v46  ;;  %v2226_v23 = vmul.f32 %v1970_v61, %v1970_v61 }
 0x1bf   : > { %v2233_v63 = vmul.f32 %v1977_v4, %v1977_v4  ;;  %1524 = vmatmul.mubr.bf16.gmra.mrb[136].mxu1 %v5616_v44  ;;  %3740 = vmatprep.subr.bf16.mxu0 %v5100_v53  ;;  %v5104_v4 = vld [vmem:[#allocation8 + $0x1f0] ss:$8 sps:$4 sm:$0xff]  }
 0x1c0   : > { %v2234_v24 = vmul.f32 %v1978_v5, %v1978_v5  ;;  %1533 = vmatprep.mubr.bf16.mxu1 %v5618_v45  ;;  %1673 = vmatpush1.bf16.msra.mxu1 %v4516_v3  ;;  %v388_v3 = vld [vmem:[#allocation6 + $0x238] sm:$0xff]  ;;  %v5109_v5 = vld [vmem:[#allocation8 + $0x204] ss:$8 sps:$4 sm:$0xff]  }
 0x1c1   : > { %v2425_v19 = vpack.c.bf16 %v2233_v63, %v2225_v18  ;;  %1674 = vmatprep.subr.bf16.mxu1 %v4525_v60  ;;  %v4549_v63 = vcombine.high %v384_v62, %v388_v3 }
 0x1c2   : > { %v2426_v21 = vpack.c.bf16 %v2234_v24, %v2226_v23  ;;  %v1199_v26 = vpop.f32.mrb[32].mxu1  ;;  %3741 = vmatpush1.bf16.msra.mxu0 %v5098_v9  ;;  %v392_v24 = vld [vmem:[#allocation6 + $0x258] sm:$0xff] }
 0x1c3   : > { %v1985_v33 = vmax.f32 %v1199_v26, 0.0  ;;  %v1201_v34 = vpop.f32.mrb[33].mxu1  ;;  %3742 = vmatprep.subr.bf16.mxu0 %v5103_v2 }
 0x1c4   : > { %v1986_v46 = vmax.f32 %v1201_v34, 0.0  ;;  %v1203_v47 = vpop.f32.mrb[34].mxu1  ;;  %3623 = vmatprep.mubr.bf16.mxu0 %v2426_v21  ;;  %1675 = vmatpush1.bf16.msra.mxu1 %v4524_v15  ;;  %v396_v15 = vld [vmem:[#allocation6 + $0x278] sm:$0xff] }
 0x1c5   : > { %v1993_v53 = vmax.f32 %v1203_v47, 0.0  ;;  %v1205_v40 = vpop.f32.mrb[35].mxu1  ;;  %3624 = vmatmul.mubr.bf16.gmra.mrb[28].mxu0 %v2425_v19  ;;  %1676 = vmatprep.subr.bf16.mxu1 %v4533_v28  ;;  %v2241_v54 = vmul.f32 %v1985_v33, %v1985_v33  ;;  %v4557_v32 = vcombine.high %v392_v24, %v396_v15 }
 0x1c6   : > { %v1994_v61 = vmax.f32 %v1205_v40, 0.0  ;;  %3743 = vmatpush1.bf16.msra.mxu0 %v5101_v25  ;;  %v2242_v9 = vmul.f32 %v1986_v46, %v1986_v46  ;;  %v4548_v25 = vcombine.low %v384_v62, %v388_v3  ;;  %v404_v46 = vld [vmem:[#allocation6 + $0x2b8] sm:$0xff] }
 0x1c7   : > { %v2249_v60 = vmul.f32 %v1993_v53, %v1993_v53  ;;  %1534 = vmatmul.mubr.bf16.gmra.mrb[140].mxu1 %v5626_v58  ;;  %3744 = vmatprep.subr.bf16.mxu0 %v5106_v35  ;;  %v400_v35 = vld [vmem:[#allocation6 + $0x298] sm:$0xff] }
 0x1c8   : > { %v2250_v18 = vmul.f32 %v1994_v61, %v1994_v61  ;;  %1543 = vmatprep.mubr.bf16.mxu1 %v5628_v59  ;;  %1677 = vmatpush1.bf16.msra.mxu1 %v4532_v48  ;;  %v4565_v62 = vcombine.high %v400_v35, %v404_v46 }
 0x1c9   : > { %v2433_v7 = vpack.c.bf16 %v2249_v60, %v2241_v54  ;;  %1678 = vmatprep.subr.bf16.mxu1 %v4541_v43  ;;  %v4556_v43 = vcombine.low %v392_v24, %v396_v15  ;;  %v408_v54 = vld [vmem:[#allocation6 + $0x2d8] sm:$0xff] }
 0x1ca   : > { %v2434_v2 = vpack.c.bf16 %v2250_v18, %v2242_v9  ;;  %v1209_v23 = vpop.f32.mrb[36].mxu1  ;;  %3745 = vmatpush1.bf16.msra.mxu0 %v5104_v4  ;;  %v412_v60 = vld [vmem:[#allocation6 + $0x2f8] sm:$0xff] }
 0x1cb   : > { %v2001_v19 = vmax.f32 %v1209_v23, 0.0  ;;  %v1211_v28 = vpop.f32.mrb[37].mxu1  ;;  %3907 = vmatprep.subr.bf16.mxu0 %v5109_v5  ;;  %v4573_v23 = vcombine.high %v408_v54, %v412_v60  ;;  %v416_v15 = vld [vmem:[#allocation6 + $0x318] sm:$0xff] }
 0x1cc   : > { %v2002_v21 = vmax.f32 %v1211_v28, 0.0  ;;  %v1213_v26 = vpop.f32.mrb[38].mxu1  ;;  %3633 = vmatprep.mubr.bf16.mxu0 %v2434_v2  ;;  %1679 = vmatpush1.bf16.msra.mxu1 %v4540_v6 }
 0x1cd   : > { %v2009_v33 = vmax.f32 %v1213_v26, 0.0  ;;  %v1215_v34 = vpop.f32.mrb[39].mxu1  ;;  %3634 = vmatmul.mubr.bf16.gmra.mrb[32].mxu0 %v2433_v7  ;;  %1680 = vmatprep.subr.bf16.mxu1 %v4549_v63  ;;  %v2257_v47 = vmul.f32 %v2001_v19, %v2001_v19  ;;  %v4564_v7 = vcombine.low %v400_v35, %v404_v46  ;;  %v420_v19 = vld [vmem:[#allocation6 + $0x338] sm:$0xff] }
 0x1ce   : > { %v2010_v22 = vmax.f32 %v1215_v34, 0.0  ;;  %v2258_v53 = vmul.f32 %v2002_v21, %v2002_v21  ;;  %v424_v46 = vld [vmem:[#allocation6 + $0x358] sm:$0xff] }
 0x1cf   : > { %v2265_v48 = vmul.f32 %v2009_v33, %v2009_v33  ;;  %1544 = vmatmul.mubr.bf16.gmra.mrb[144].mxu1 %v5636_v10  ;;  %v4572_v33 = vcombine.low %v408_v54, %v412_v60  ;;  %v432_v60 = vld [vmem:[#allocation6 + $0x398] sm:$0xff] }
 0x1d0   : > { %v2266_v40 = vmul.f32 %v2010_v22, %v2010_v22  ;;  %1553 = vmatprep.mubr.bf16.mxu1 %v5638_v11  ;;  %1681 = vmatpush1.bf16.msra.mxu1 %v4548_v25 }
 0x1d1   : > { %v2441_v61 = vpack.c.bf16 %v2265_v48, %v2257_v47  ;;  %1682 = vmatprep.subr.bf16.mxu1 %v4557_v32  ;;  %v4581_v32 = vcombine.high %v416_v15, %v420_v19  ;;  %v428_v47 = vld [vmem:[#allocation6 + $0x378] sm:$0xff] }
 0x1d2   : > { %v2442_v3 = vpack.c.bf16 %v2266_v40, %v2258_v53  ;;  %v1219_v4 = vpop.f32.mrb[40].mxu1 }
 0x1d3   : > { %v2017_v5 = vmax.f32 %v1219_v4, 0.0  ;;  %v1221_v9 = vpop.f32.mrb[41].mxu1  ;;  %v4589_v4 = vcombine.high %v424_v46, %v428_v47 }
 0x1d4   : > { %v2018_v18 = vmax.f32 %v1221_v9, 0.0  ;;  %v1223_v6 = vpop.f32.mrb[42].mxu1  ;;  %3643 = vmatprep.mubr.bf16.mxu0 %v2442_v3  ;;  %1683 = vmatpush1.bf16.msra.mxu1 %v4556_v43 }
 0x1d5   : > { %v2025_v63 = vmax.f32 %v1223_v6, 0.0  ;;  %v1225_v2 = vpop.f32.mrb[43].mxu1  ;;  %3644 = vmatmul.mubr.bf16.gmra.mrb[36].mxu0 %v2441_v61  ;;  %1684 = vmatprep.subr.bf16.mxu1 %v4565_v62  ;;  %v2273_v28 = vmul.f32 %v2017_v5, %v2017_v5  ;;  %v4580_v61 = vcombine.low %v416_v15, %v420_v19  ;;  %v436_v5 = vld [vmem:[#allocation6 + $0x3b8] sm:$0xff] }
 0x1d6   : > { %v2026_v24 = vmax.f32 %v1225_v2, 0.0  ;;  %v2274_v26 = vmul.f32 %v2018_v18, %v2018_v18  ;;  %v440_v19 = vld [vmem:[#allocation6 + $0x3d8] sm:$0xff] }
 0x1d7   : > { %v2281_v21 = vmul.f32 %v2025_v63, %v2025_v63  ;;  %1554 = vmatmul.mubr.bf16.gmra.mrb[148].mxu1 %v5646_v36  ;;  %v4588_v63 = vcombine.low %v424_v46, %v428_v47 }
 0x1d8   : > { %v2282_v25 = vmul.f32 %v2026_v24, %v2026_v24  ;;  %1563 = vmatprep.mubr.bf16.mxu1 %v5648_v37  ;;  %1685 = vmatpush1.bf16.msra.mxu1 %v4564_v7 }
 0x1d9   : > { %v2449_v34 = vpack.c.bf16 %v2281_v21, %v2273_v28  ;;  %1686 = vmatprep.subr.bf16.mxu1 %v4573_v23  ;;  %v4597_v23 = vcombine.high %v432_v60, %v436_v5  ;;  %v444_v28 = vld [vmem:[#allocation6 + $0x3f8] sm:$0xff] }
 0x1da   : > { %v2450_v22 = vpack.c.bf16 %v2282_v25, %v2274_v26  ;;  %v1229_v35 = vpop.f32.mrb[44].mxu1 }
 0x1db   : > { %v2033_v48 = vmax.f32 %v1229_v35, 0.0  ;;  %v1231_v53 = vpop.f32.mrb[45].mxu1  ;;  %v4605_v35 = vcombine.high %v440_v19, %v444_v28 }
 0x1dc   : > { %v2034_v40 = vmax.f32 %v1231_v53, 0.0  ;;  %v1233_v43 = vpop.f32.mrb[46].mxu1  ;;  %3653 = vmatprep.mubr.bf16.mxu0 %v2450_v22  ;;  %1687 = vmatpush1.bf16.msra.mxu1 %v4572_v33 }
 0x1dd   : > { %v2041_v62 = vmax.f32 %v1233_v43, 0.0  ;;  %v1235_v3 = vpop.f32.mrb[47].mxu1  ;;  %3654 = vmatmul.mubr.bf16.gmra.mrb[40].mxu0 %v2449_v34  ;;  %1688 = vmatprep.subr.bf16.mxu1 %v4581_v32  ;;  %v2289_v9 = vmul.f32 %v2033_v48, %v2033_v48  ;;  %v4596_v34 = vcombine.low %v432_v60, %v436_v5  ;;  %v4604_v43 = vcombine.low %v440_v19, %v444_v28 }
 0x1de   : > { %v2042_v54 = vmax.f32 %v1235_v3, 0.0  ;;  %v2290_v6 = vmul.f32 %v2034_v40, %v2034_v40 }
 0x1df   : > { %v2297_v18 = vmul.f32 %v2041_v62, %v2041_v62  ;;  %1564 = vmatmul.mubr.bf16.gmra.mrb[152].mxu1 %v5656_v56 }
 0x1e0   : > { %v2298_v7 = vmul.f32 %v2042_v54, %v2042_v54  ;;  %1573 = vmatprep.mubr.bf16.mxu1 %v5658_v57  ;;  %1689 = vmatpush1.bf16.msra.mxu1 %v4580_v61 }
 0x1e1   : > { %v2457_v2 = vpack.c.bf16 %v2297_v18, %v2289_v9  ;;  %1690 = vmatprep.subr.bf16.mxu1 %v4589_v4 }
 0x1e2   : > { %v2458_v24 = vpack.c.bf16 %v2298_v7, %v2290_v6  ;;  %v1239_v15 = vpop.f32.mrb[48].mxu1 }
 0x1e3   : > { %v2049_v21 = vmax.f32 %v1239_v15, 0.0  ;;  %v1241_v26 = vpop.f32.mrb[49].mxu1 }
 0x1e4   : > { %v2050_v25 = vmax.f32 %v1241_v26, 0.0  ;;  %v1243_v33 = vpop.f32.mrb[50].mxu1  ;;  %3663 = vmatprep.mubr.bf16.mxu0 %v2458_v24  ;;  %1691 = vmatpush1.bf16.msra.mxu1 %v4588_v63 }
 0x1e5   : > { %v2057_v32 = vmax.f32 %v1243_v33, 0.0  ;;  %v1245_v22 = vpop.f32.mrb[51].mxu1  ;;  %3664 = vmatmul.mubr.bf16.gmra.mrb[44].mxu0 %v2457_v2  ;;  %1692 = vmatprep.subr.bf16.mxu1 %v4597_v23  ;;  %v2305_v47 = vmul.f32 %v2049_v21, %v2049_v21 }
 0x1e6   : > { %v2058_v46 = vmax.f32 %v1245_v22, 0.0  ;;  %v2306_v53 = vmul.f32 %v2050_v25, %v2050_v25 }
 0x1e7   : > { %v2313_v48 = vmul.f32 %v2057_v32, %v2057_v32  ;;  %1574 = vmatmul.mubr.bf16.gmra.mrb[156].mxu1 %v5666_v16 }
 0x1e8   : > { %v2314_v40 = vmul.f32 %v2058_v46, %v2058_v46  ;;  %1583 = vmatprep.mubr.bf16.mxu1 %v5668_v17  ;;  %1693 = vmatpush1.bf16.msra.mxu1 %v4596_v34 }
 0x1e9   : > { %v2465_v61 = vpack.c.bf16 %v2313_v48, %v2305_v47  ;;  %1694 = vmatprep.subr.bf16.mxu1 %v4605_v35 }
 0x1ea   : > { %v2466_v62 = vpack.c.bf16 %v2314_v40, %v2306_v53  ;;  %v1249_v3 = vpop.f32.mrb[52].mxu1 }
 0x1eb   : > { %v2065_v4 = vmax.f32 %v1249_v3, 0.0  ;;  %v1251_v54 = vpop.f32.mrb[53].mxu1 }
 0x1ec   : > { %v2066_v60 = vmax.f32 %v1251_v54, 0.0  ;;  %v1253_v5 = vpop.f32.mrb[54].mxu1  ;;  %3673 = vmatprep.mubr.bf16.mxu0 %v2466_v62  ;;  %1695 = vmatpush1.bf16.msra.mxu1 %v4604_v43 }
 0x1ed   : > { %v2073_v9 = vmax.f32 %v1253_v5, 0.0  ;;  %v1255_v18 = vpop.f32.mrb[55].mxu1  ;;  %3674 = vmatmul.mubr.bf16.gmra.mrb[48].mxu0 %v2465_v61  ;;  %v2321_v7 = vmul.f32 %v2065_v4, %v2065_v4 }
 0x1ee   : > { %v2074_v6 = vmax.f32 %v1255_v18, 0.0  ;;  %v2322_v2 = vmul.f32 %v2066_v60, %v2066_v60 }
 0x1ef   : > { %v2329_v63 = vmul.f32 %v2073_v9, %v2073_v9  ;;  %1584 = vmatmul.mubr.bf16.gmra.mrb[160].mxu1 %v5678_v38 }
 0x1f0   : > { %v2330_v23 = vmul.f32 %v2074_v6, %v2074_v6  ;;  %1593 = vmatprep.mubr.bf16.mxu1 %v5680_v39 }
 0x1f1   : > { %v2473_v24 = vpack.c.bf16 %v2329_v63, %v2321_v7 }
 0x1f2   : > { %v2474_v15 = vpack.c.bf16 %v2330_v23, %v2322_v2  ;;  %v1259_v19 = vpop.f32.mrb[56].mxu1 }
 0x1f3   : > { %v2081_v28 = vmax.f32 %v1259_v19, 0.0  ;;  %v1261_v21 = vpop.f32.mrb[57].mxu1 }
 0x1f4   : > { %v2082_v26 = vmax.f32 %v1261_v21, 0.0  ;;  %v1263_v25 = vpop.f32.mrb[58].mxu1  ;;  %3683 = vmatprep.mubr.bf16.mxu0 %v2474_v15 }
 0x1f5   : > { %v2089_v33 = vmax.f32 %v1263_v25, 0.0  ;;  %v1265_v34 = vpop.f32.mrb[59].mxu1  ;;  %3684 = vmatmul.mubr.bf16.gmra.mrb[52].mxu0 %v2473_v24  ;;  %v2337_v22 = vmul.f32 %v2081_v28, %v2081_v28 }
 0x1f6   : > { %v2090_v32 = vmax.f32 %v1265_v34, 0.0  ;;  %v2338_v46 = vmul.f32 %v2082_v26, %v2082_v26 }
 0x1f7   : > { %v2345_v35 = vmul.f32 %v2089_v33, %v2089_v33  ;;  %1594 = vmatmul.mubr.bf16.gmra.mrb[164].mxu1 %v5688_v50 }
 0x1f8   : > { %v2346_v47 = vmul.f32 %v2090_v32, %v2090_v32  ;;  %1603 = vmatprep.mubr.bf16.mxu1 %v5690_v51 }
 0x1f9   : > { %v2481_v48 = vpack.c.bf16 %v2345_v35, %v2337_v22 }
 0x1fa   : > { %v2482_v53 = vpack.c.bf16 %v2346_v47, %v2338_v46  ;;  %v1269_v40 = vpop.f32.mrb[60].mxu1  ;;  %v5107_v47 = vld [vmem:[#allocation8 + $0x200] ss:$8 sps:$4 sm:$0xff]  }
 0x1fb   : > { %v2097_v43 = vmax.f32 %v1269_v40, 0.0  ;;  %v1271_v61 = vpop.f32.mrb[61].mxu1  ;;  %v5112_v40 = vld [vmem:[#allocation8 + $0x214] ss:$8 sps:$4 sm:$0xff]  }
 0x1fc   : > { %v2098_v62 = vmax.f32 %v1271_v61, 0.0  ;;  %v1273_v3 = vpop.f32.mrb[62].mxu1  ;;  %3693 = vmatprep.mubr.bf16.mxu0 %v2482_v53 }
 0x1fd   : > { %v2105_v4 = vmax.f32 %v1273_v3, 0.0  ;;  %v1275_v54 = vpop.f32.mrb[63].mxu1  ;;  %3694 = vmatmul.mubr.bf16.gmra.mrb[56].mxu0 %v2481_v48  ;;  %v2353_v5 = vmul.f32 %v2097_v43, %v2097_v43 }
 0x1fe   : > { %v2106_v60 = vmax.f32 %v1275_v54, 0.0  ;;  %v2354_v18 = vmul.f32 %v2098_v62, %v2098_v62  ;;  %v5110_v54 = vld [vmem:[#allocation8 + $0x210] ss:$8 sps:$4 sm:$0xff]  }
 0x1ff   : > { %v2361_v9 = vmul.f32 %v2105_v4, %v2105_v4  ;;  %1604 = vmatmul.mubr.bf16.gmra.mrb[168].mxu1 %v5698_v0 }
 0x200   : > { %v2362_v6 = vmul.f32 %v2106_v60, %v2106_v60  ;;  %1613 = vmatprep.mubr.bf16.mxu1 %v5700_v1 }
 0x201   : > { %v2489_v7 = vpack.c.bf16 %v2361_v9, %v2353_v5  ;;  %v5115_v9 = vld [vmem:[#allocation8 + $0x224] ss:$8 sps:$4 sm:$0xff]  }
 0x202   : > { %v2490_v63 = vpack.c.bf16 %v2362_v6, %v2354_v18  ;;  %v1312_v2 = vpop.f32.mrb[64].mxu1 }
 0x203   : > { %v1859_v23 = vmax.f32 %v1312_v2, 0.0  ;;  %v1314_v24 = vpop.f32.mrb[65].mxu1 }
 0x204   : > { %v1860_v15 = vmax.f32 %v1314_v24, 0.0  ;;  %v1316_v19 = vpop.f32.mrb[66].mxu1  ;;  %3703 = vmatprep.mubr.bf16.mxu0 %v2490_v63 }
 0x205   : > { %v1867_v28 = vmax.f32 %v1316_v19, 0.0  ;;  %v1318_v21 = vpop.f32.mrb[67].mxu1  ;;  %3704 = vmatmul.mubr.bf16.gmra.mrb[60].mxu0 %v2489_v7  ;;  %v2115_v25 = vmul.f32 %v1859_v23, %v1859_v23  ;;  %v5113_v23 = vld [vmem:[#allocation8 + $0x220] ss:$8 sps:$4 sm:$0xff]   ;;  %v5118_v19 = vld [vmem:[#allocation8 + $0x234] ss:$8 sps:$4 sm:$0xff]  }
 0x206   : > { %v1868_v26 = vmax.f32 %v1318_v21, 0.0  ;;  %v2116_v34 = vmul.f32 %v1860_v15, %v1860_v15 }
 0x207   : > { %v2123_v33 = vmul.f32 %v1867_v28, %v1867_v28  ;;  %1614 = vmatmul.mubr.bf16.gmra.mrb[172].mxu1 %v5708_v8 }
 0x208   : > { %v2124_v32 = vmul.f32 %v1868_v26, %v1868_v26  ;;  %1623 = vmatprep.mubr.bf16.mxu1 %v5710_v13 }
 0x209   : > { %v2371_v22 = vpack.c.bf16 %v2123_v33, %v2115_v25 }
 0x20a   : > { %v2372_v35 = vpack.c.bf16 %v2124_v32, %v2116_v34  ;;  %v1322_v46 = vpop.f32.mrb[68].mxu1  ;;  %v5116_v34 = vld [vmem:[#allocation8 + $0x230] ss:$8 sps:$4 sm:$0xff]  }
 0x20b   : > { %v1875_v48 = vmax.f32 %v1322_v46, 0.0  ;;  %v1324_v53 = vpop.f32.mrb[69].mxu1 }
 0x20c   : > { %v1876_v43 = vmax.f32 %v1324_v53, 0.0  ;;  %v1326_v61 = vpop.f32.mrb[70].mxu1  ;;  %3746 = vmatprep.mubr.bf16.mxu0 %v2372_v35  ;;  %v5121_v35 = vld [vmem:[#allocation8 + $0x244] ss:$8 sps:$4 sm:$0xff]  }
 0x20d   : > { %v1883_v62 = vmax.f32 %v1326_v61, 0.0  ;;  %v1328_v3 = vpop.f32.mrb[71].mxu1  ;;  %3747 = vmatmul.mubr.bf16.vlgmr.msra.gmra.mrb[0].mxu0 %v2371_v22  ;;  %v2131_v60 = vmul.f32 %v1875_v48, %v1875_v48 }
 0x20e   : > { %v1884_v4 = vmax.f32 %v1328_v3, 0.0  ;;  %3908 = vmatpush1.bf16.msra.mxu0 %v5107_v47  ;;  %v2132_v18 = vmul.f32 %v1876_v43, %v1876_v43  ;;  %v5119_v43 = vld [vmem:[#allocation8 + $0x240] ss:$8 sps:$4 sm:$0xff]   ;;  %v5124_v3 = vld [vmem:[#allocation8 + $0x254] ss:$8 sps:$4 sm:$0xff]  }
 0x20f   : > { %v2139_v5 = vmul.f32 %v1883_v62, %v1883_v62  ;;  %1624 = vmatmul.mubr.bf16.gmra.mrb[176].mxu1 %v5718_v27  ;;  %3909 = vmatprep.subr.bf16.mxu0 %v5112_v40 }
 0x210   : > { %v2140_v6 = vmul.f32 %v1884_v4, %v1884_v4  ;;  %1633 = vmatprep.mubr.bf16.mxu1 %v5720_v29 }
 0x211   : > { %v2379_v7 = vpack.c.bf16 %v2139_v5, %v2131_v60 }
 0x212   : > { %v2380_v63 = vpack.c.bf16 %v2140_v6, %v2132_v18  ;;  %v1332_v2 = vpop.f32.mrb[72].mxu1  ;;  %3910 = vmatpush1.bf16.msra.mxu0 %v5110_v54  ;;  %v5122_v18 = vld [vmem:[#allocation8 + $0x250] ss:$8 sps:$4 sm:$0xff]  }
 0x213   : > { %v1891_v24 = vmax.f32 %v1332_v2, 0.0  ;;  %v1334_v15 = vpop.f32.mrb[73].mxu1  ;;  %3911 = vmatprep.subr.bf16.mxu0 %v5115_v9 }
 0x214   : > { %v1892_v28 = vmax.f32 %v1334_v15, 0.0  ;;  %v1336_v21 = vpop.f32.mrb[74].mxu1  ;;  %3756 = vmatprep.mubr.bf16.mxu0 %v2380_v63  ;;  %v5127_v63 = vld [vmem:[#allocation8 + $0x264] ss:$8 sps:$4 sm:$0xff]  }
 0x215   : > { %v1899_v26 = vmax.f32 %v1336_v21, 0.0  ;;  %v1338_v25 = vpop.f32.mrb[75].mxu1  ;;  %3757 = vmatmul.mubr.bf16.gmra.mrb[4].mxu0 %v2379_v7  ;;  %v2147_v32 = vmul.f32 %v1891_v24, %v1891_v24 }
 0x216   : > { %v1900_v33 = vmax.f32 %v1338_v25, 0.0  ;;  %3912 = vmatpush1.bf16.msra.mxu0 %v5113_v23  ;;  %v2148_v46 = vmul.f32 %v1892_v28, %v1892_v28  ;;  %v5125_v28 = vld [vmem:[#allocation8 + $0x260] ss:$8 sps:$4 sm:$0xff]   ;;  %v5130_v25 = vld [vmem:[#allocation8 + $0x274] ss:$8 sps:$4 sm:$0xff]  }
 0x217   : > { %v2155_v22 = vmul.f32 %v1899_v26, %v1899_v26  ;;  %1634 = vmatmul.mubr.bf16.gmra.mrb[180].mxu1 %v5728_v41  ;;  %3913 = vmatprep.subr.bf16.mxu0 %v5118_v19 }
 0x218   : > { %v2156_v47 = vmul.f32 %v1900_v33, %v1900_v33  ;;  %1643 = vmatprep.mubr.bf16.mxu1 %v5730_v42 }
 0x219   : > { %v2387_v48 = vpack.c.bf16 %v2155_v22, %v2147_v32 }
 0x21a   : > { %v2388_v53 = vpack.c.bf16 %v2156_v47, %v2148_v46  ;;  %v1342_v40 = vpop.f32.mrb[76].mxu1  ;;  %3914 = vmatpush1.bf16.msra.mxu0 %v5116_v34  ;;  %v5128_v46 = vld [vmem:[#allocation8 + $0x270] ss:$8 sps:$4 sm:$0xff]  }
 0x21b   : > { %v1907_v61 = vmax.f32 %v1342_v40, 0.0  ;;  %v1344_v62 = vpop.f32.mrb[77].mxu1  ;;  %3915 = vmatprep.subr.bf16.mxu0 %v5121_v35 }
 0x21c   : > { %v1908_v4 = vmax.f32 %v1344_v62, 0.0  ;;  %v1346_v54 = vpop.f32.mrb[78].mxu1  ;;  %3766 = vmatprep.mubr.bf16.mxu0 %v2388_v53  ;;  %v5133_v53 = vld [vmem:[#allocation8 + $0x284] ss:$8 sps:$4 sm:$0xff]  }
 0x21d   : > { %v1915_v60 = vmax.f32 %v1346_v54, 0.0  ;;  %v1348_v5 = vpop.f32.mrb[79].mxu1  ;;  %3767 = vmatmul.mubr.bf16.gmra.mrb[8].mxu0 %v2387_v48  ;;  %v2163_v6 = vmul.f32 %v1907_v61, %v1907_v61 }
 0x21e   : > { %v1916_v9 = vmax.f32 %v1348_v5, 0.0  ;;  %3916 = vmatpush1.bf16.msra.mxu0 %v5119_v43  ;;  %v2164_v2 = vmul.f32 %v1908_v4, %v1908_v4  ;;  %v5131_v4 = vld [vmem:[#allocation8 + $0x280] ss:$8 sps:$4 sm:$0xff]   ;;  %v5136_v5 = vld [vmem:[#allocation8 + $0x294] ss:$8 sps:$4 sm:$0xff]  }
 0x21f   : > { %v2171_v7 = vmul.f32 %v1915_v60, %v1915_v60  ;;  %1644 = vmatmul.mubr.bf16.gmra.mrb[184].mxu1 %v5738_v49  ;;  %3917 = vmatprep.subr.bf16.mxu0 %v5124_v3 }
 0x220   : > { %v2172_v23 = vmul.f32 %v1916_v9, %v1916_v9  ;;  %1653 = vmatprep.mubr.bf16.mxu1 %v5740_v52 }
 0x221   : > { %v2395_v24 = vpack.c.bf16 %v2171_v7, %v2163_v6 }
 0x222   : > { %v2396_v15 = vpack.c.bf16 %v2172_v23, %v2164_v2  ;;  %v1352_v19 = vpop.f32.mrb[80].mxu1  ;;  %3918 = vmatpush1.bf16.msra.mxu0 %v5122_v18  ;;  %v5134_v2 = vld [vmem:[#allocation8 + $0x290] ss:$8 sps:$4 sm:$0xff]  }
 0x223   : > { %v1923_v21 = vmax.f32 %v1352_v19, 0.0  ;;  %v1354_v26 = vpop.f32.mrb[81].mxu1  ;;  %3919 = vmatprep.subr.bf16.mxu0 %v5127_v63 }
 0x224   : > { %v1924_v33 = vmax.f32 %v1354_v26, 0.0  ;;  %v1356_v34 = vpop.f32.mrb[82].mxu1  ;;  %3776 = vmatprep.mubr.bf16.mxu0 %v2396_v15 }
 0x225   : > { %v1931_v32 = vmax.f32 %v1356_v34, 0.0  ;;  %v1358_v22 = vpop.f32.mrb[83].mxu1  ;;  %3777 = vmatmul.mubr.bf16.gmra.mrb[12].mxu0 %v2395_v24  ;;  %v2179_v47 = vmul.f32 %v1923_v21, %v1923_v21  ;;  %v5139_v24 = vld [vmem:[#allocation8 + $0x2a4] ss:$8 sps:$4 sm:$0xff]  }
 0x226   : > { %v1932_v35 = vmax.f32 %v1358_v22, 0.0  ;;  %3920 = vmatpush1.bf16.msra.mxu0 %v5125_v28  ;;  %v2180_v40 = vmul.f32 %v1924_v33, %v1924_v33 }
 0x227   : > { %v2187_v48 = vmul.f32 %v1931_v32, %v1931_v32  ;;  %1654 = vmatmul.mubr.bf16.gmra.mrb[188].mxu1 %v5746_v55  ;;  %3921 = vmatprep.subr.bf16.mxu0 %v5130_v25  ;;  %v5137_v25 = vld [vmem:[#allocation8 + $0x2a0] ss:$8 sps:$4 sm:$0xff]   ;;  %v5142_v32 = vld [vmem:[#allocation8 + $0x2b4] ss:$8 sps:$4 sm:$0xff]  }
 0x228   : > { %v2188_v43 = vmul.f32 %v1932_v35, %v1932_v35  ;;  %1696 = vmatprep.mubr.bf16.mxu1 %v5583_v20 }
 0x229   : > { %v2403_v61 = vpack.c.bf16 %v2187_v48, %v2179_v47  ;;  %v5140_v48 = vld [vmem:[#allocation8 + $0x2b0] ss:$8 sps:$4 sm:$0xff]  }
 0x22a   : > { %v2404_v62 = vpack.c.bf16 %v2188_v43, %v2180_v40  ;;  %v1362_v3 = vpop.f32.mrb[84].mxu1  ;;  %3922 = vmatpush1.bf16.msra.mxu0 %v5128_v46  ;;  %v5145_v40 = vld [vmem:[#allocation8 + $0x2c4] ss:$8 sps:$4 sm:$0xff]  }
 0x22b   : > { %v1939_v54 = vmax.f32 %v1362_v3, 0.0  ;;  %v1364_v60 = vpop.f32.mrb[85].mxu1  ;;  %3923 = vmatprep.subr.bf16.mxu0 %v5133_v53 }
 0x22c   : > { %v1940_v9 = vmax.f32 %v1364_v60, 0.0  ;;  %v1366_v18 = vpop.f32.mrb[86].mxu1  ;;  %3786 = vmatprep.mubr.bf16.mxu0 %v2404_v62 }
 0x22d   : > { %v1947_v6 = vmax.f32 %v1366_v18, 0.0  ;;  %v1368_v7 = vpop.f32.mrb[87].mxu1  ;;  %3787 = vmatmul.mubr.bf16.gmra.mrb[16].mxu0 %v2403_v61  ;;  %v2195_v23 = vmul.f32 %v1939_v54, %v1939_v54  ;;  %v5143_v54 = vld [vmem:[#allocation8 + $0x2c0] ss:$8 sps:$4 sm:$0xff]  }
 0x22e   : > { %v1948_v63 = vmax.f32 %v1368_v7, 0.0  ;;  %3924 = vmatpush1.bf16.msra.mxu0 %v5131_v4  ;;  %v2196_v15 = vmul.f32 %v1940_v9, %v1940_v9  ;;  %v5148_v9 = vld [vmem:[#allocation8 + $0x2d4] ss:$8 sps:$4 sm:$0xff]  }
 0x22f   : > { %v2203_v20 = vmul.f32 %v1947_v6, %v1947_v6  ;;  %1697 = vmatmul.mubr.bf16.vlgmr.msra.gmra.mrb[192].mxu1 %v5590_v12  ;;  %3925 = vmatprep.subr.bf16.mxu0 %v5136_v5 }
 0x230   : > { %v2204_v19 = vmul.f32 %v1948_v63, %v1948_v63  ;;  %1706 = vmatprep.mubr.bf16.mxu1 %v5592_v14 }
 0x231   : > { %v2411_v28 = vpack.c.bf16 %v2203_v20, %v2195_v23  ;;  %v5151_v20 = vld [vmem:[#allocation8 + $0x2e4] ss:$8 sps:$4 sm:$0xff]  }
 0x232   : > { %v2412_v21 = vpack.c.bf16 %v2204_v19, %v2196_v15  ;;  %v1372_v26 = vpop.f32.mrb[88].mxu1  ;;  %3926 = vmatpush1.bf16.msra.mxu0 %v5134_v2  ;;  %v5146_v2 = vld [vmem:[#allocation8 + $0x2d0] ss:$8 sps:$4 sm:$0xff]  }
 0x233   : > { %v1955_v33 = vmax.f32 %v1372_v26, 0.0  ;;  %v1374_v34 = vpop.f32.mrb[89].mxu1  ;;  %3927 = vmatprep.subr.bf16.mxu0 %v5139_v24  ;;  %v5149_v26 = vld [vmem:[#allocation8 + $0x2e0] ss:$8 sps:$4 sm:$0xff]  }
 0x234   : > { %v1956_v22 = vmax.f32 %v1374_v34, 0.0  ;;  %v1376_v35 = vpop.f32.mrb[90].mxu1  ;;  %3796 = vmatprep.mubr.bf16.mxu0 %v2412_v21  ;;  %v5154_v34 = vld [vmem:[#allocation8 + $0x2f4] ss:$8 sps:$4 sm:$0xff]  }
 0x235   : > { %v1963_v46 = vmax.f32 %v1376_v35, 0.0  ;;  %v1378_v12 = vpop.f32.mrb[91].mxu1  ;;  %3797 = vmatmul.mubr.bf16.gmra.mrb[20].mxu0 %v2411_v28  ;;  %v2211_v53 = vmul.f32 %v1955_v33, %v1955_v33 }
 0x236   : > { %v1964_v47 = vmax.f32 %v1378_v12, 0.0  ;;  %3928 = vmatpush1.bf16.msra.mxu0 %v5137_v25  ;;  %v2212_v43 = vmul.f32 %v1956_v22, %v1956_v22  ;;  %v5152_v12 = vld [vmem:[#allocation8 + $0x2f0] ss:$8 sps:$4 sm:$0xff]  }
 0x237   : > { %v2219_v14 = vmul.f32 %v1963_v46, %v1963_v46  ;;  %1707 = vmatmul.mubr.bf16.gmra.mrb[196].mxu1 %v5606_v30  ;;  %3929 = vmatprep.subr.bf16.mxu0 %v5142_v32 }
 0x238   : > { %v2220_v61 = vmul.f32 %v1964_v47, %v1964_v47  ;;  %1716 = vmatprep.mubr.bf16.mxu1 %v5608_v31 }
 0x239   : > { %v2419_v62 = vpack.c.bf16 %v2219_v14, %v2211_v53 }
 0x23a   : > { %v2420_v3 = vpack.c.bf16 %v2220_v61, %v2212_v43  ;;  %v1382_v4 = vpop.f32.mrb[92].mxu1  ;;  %3930 = vmatpush1.bf16.msra.mxu0 %v5140_v48  ;;  %v5157_v48 = vld [vmem:[#allocation8 + $0x304] ss:$8 sps:$4 sm:$0xff]  }
 0x23b   : > { %v1971_v60 = vmax.f32 %v1382_v4, 0.0  ;;  %v1384_v5 = vpop.f32.mrb[93].mxu1  ;;  %3931 = vmatprep.subr.bf16.mxu0 %v5145_v40 }
 0x23c   : > { %v1972_v18 = vmax.f32 %v1384_v5, 0.0  ;;  %v1386_v6 = vpop.f32.mrb[94].mxu1  ;;  %3806 = vmatprep.mubr.bf16.mxu0 %v2420_v3 }
 0x23d   : > { %v1979_v7 = vmax.f32 %v1386_v6, 0.0  ;;  %v1388_v30 = vpop.f32.mrb[95].mxu1  ;;  %3807 = vmatmul.mubr.bf16.gmra.mrb[24].mxu0 %v2419_v62  ;;  %v2227_v23 = vmul.f32 %v1971_v60, %v1971_v60 }
 0x23e   : > { %v1980_v63 = vmax.f32 %v1388_v30, 0.0  ;;  %3932 = vmatpush1.bf16.msra.mxu0 %v5143_v54  ;;  %v2228_v24 = vmul.f32 %v1972_v18, %v1972_v18 }
 0x23f   : > { %v2235_v31 = vmul.f32 %v1979_v7, %v1979_v7  ;;  %1717 = vmatmul.mubr.bf16.gmra.mrb[200].mxu1 %v5616_v44  ;;  %3933 = vmatprep.subr.bf16.mxu0 %v5148_v9 }
 0x240   : > { %v2236_v15 = vmul.f32 %v1980_v63, %v1980_v63  ;;  %1726 = vmatprep.mubr.bf16.mxu1 %v5618_v45 }
 0x241   : > { %v2427_v19 = vpack.c.bf16 %v2235_v31, %v2227_v23 }
 0x242   : > { %v2428_v28 = vpack.c.bf16 %v2236_v15, %v2228_v24  ;;  %v1392_v21 = vpop.f32.mrb[96].mxu1  ;;  %3934 = vmatpush1.bf16.msra.mxu0 %v5146_v2 }
 0x243   : > { %v1987_v25 = vmax.f32 %v1392_v21, 0.0  ;;  %v1394_v33 = vpop.f32.mrb[97].mxu1  ;;  %3935 = vmatprep.subr.bf16.mxu0 %v5151_v20 }
 0x244   : > { %v1988_v32 = vmax.f32 %v1394_v33, 0.0  ;;  %v1396_v22 = vpop.f32.mrb[98].mxu1  ;;  %3816 = vmatprep.mubr.bf16.mxu0 %v2428_v28 }
 0x245   : > { %v1995_v35 = vmax.f32 %v1396_v22, 0.0  ;;  %v1398_v44 = vpop.f32.mrb[99].mxu1  ;;  %3817 = vmatmul.mubr.bf16.gmra.mrb[28].mxu0 %v2427_v19  ;;  %v2243_v47 = vmul.f32 %v1987_v25, %v1987_v25 }
 0x246   : > { %v1996_v46 = vmax.f32 %v1398_v44, 0.0  ;;  %3936 = vmatpush1.bf16.msra.mxu0 %v5149_v26  ;;  %v2244_v53 = vmul.f32 %v1988_v32, %v1988_v32 }
 0x247   : > { %v2251_v45 = vmul.f32 %v1995_v35, %v1995_v35  ;;  %1727 = vmatmul.mubr.bf16.gmra.mrb[204].mxu1 %v5626_v58  ;;  %3937 = vmatprep.subr.bf16.mxu0 %v5154_v34 }
 0x248   : > { %v2252_v14 = vmul.f32 %v1996_v46, %v1996_v46  ;;  %1736 = vmatprep.mubr.bf16.mxu1 %v5628_v59 }
 0x249   : > { %v2435_v40 = vpack.c.bf16 %v2251_v45, %v2243_v47 }
 0x24a   : > { %v2436_v43 = vpack.c.bf16 %v2252_v14, %v2244_v53  ;;  %v1402_v61 = vpop.f32.mrb[100].mxu1  ;;  %3938 = vmatpush1.bf16.msra.mxu0 %v5152_v12 }
 0x24b   : > { %v2003_v62 = vmax.f32 %v1402_v61, 0.0  ;;  %v1404_v3 = vpop.f32.mrb[101].mxu1  ;;  %4100 = vmatprep.subr.bf16.mxu0 %v5157_v48 }
 0x24c   : > { %v2004_v4 = vmax.f32 %v1404_v3, 0.0  ;;  %v1406_v54 = vpop.f32.mrb[102].mxu1  ;;  %3826 = vmatprep.mubr.bf16.mxu0 %v2436_v43 }
 0x24d   : > { %v2011_v60 = vmax.f32 %v1406_v54, 0.0  ;;  %v1408_v5 = vpop.f32.mrb[103].mxu1  ;;  %3827 = vmatmul.mubr.bf16.gmra.mrb[32].mxu0 %v2435_v40  ;;  %v2259_v9 = vmul.f32 %v2003_v62, %v2003_v62 }
 0x24e   : > { %v2012_v58 = vmax.f32 %v1408_v5, 0.0  ;;  %v2260_v6 = vmul.f32 %v2004_v4, %v2004_v4 }
 0x24f   : > { %v2267_v18 = vmul.f32 %v2011_v60, %v2011_v60  ;;  %1737 = vmatmul.mubr.bf16.gmra.mrb[208].mxu1 %v5636_v10 }
 0x250   : > { %v2268_v59 = vmul.f32 %v2012_v58, %v2012_v58  ;;  %1746 = vmatprep.mubr.bf16.mxu1 %v5638_v11 }
 0x251   : > { %v2443_v7 = vpack.c.bf16 %v2267_v18, %v2259_v9 }
 0x252   : > { %v2444_v30 = vpack.c.bf16 %v2268_v59, %v2260_v6  ;;  %v1412_v63 = vpop.f32.mrb[104].mxu1 }
 0x253   : > { %v2019_v2 = vmax.f32 %v1412_v63, 0.0  ;;  %v1414_v23 = vpop.f32.mrb[105].mxu1 }
 0x254   : > { %v2020_v31 = vmax.f32 %v1414_v23, 0.0  ;;  %v1416_v20 = vpop.f32.mrb[106].mxu1  ;;  %3836 = vmatprep.mubr.bf16.mxu0 %v2444_v30 }
 0x255   : > { %v2027_v24 = vmax.f32 %v1416_v20, 0.0  ;;  %v1418_v15 = vpop.f32.mrb[107].mxu1  ;;  %3837 = vmatmul.mubr.bf16.gmra.mrb[36].mxu0 %v2443_v7  ;;  %v2275_v28 = vmul.f32 %v2019_v2, %v2019_v2 }
 0x256   : > { %v2028_v19 = vmax.f32 %v1418_v15, 0.0  ;;  %v2276_v10 = vmul.f32 %v2020_v31, %v2020_v31 }
 0x257   : > { %v2283_v21 = vmul.f32 %v2027_v24, %v2027_v24  ;;  %1747 = vmatmul.mubr.bf16.gmra.mrb[212].mxu1 %v5646_v36 }
 0x258   : > { %v2284_v26 = vmul.f32 %v2028_v19, %v2028_v19  ;;  %1756 = vmatprep.mubr.bf16.mxu1 %v5648_v37 }
 0x259   : > { %v2451_v11 = vpack.c.bf16 %v2283_v21, %v2275_v28 }
 0x25a   : > { %v2452_v25 = vpack.c.bf16 %v2284_v26, %v2276_v10  ;;  %v1422_v33 = vpop.f32.mrb[108].mxu1 }
 0x25b   : > { %v2035_v34 = vmax.f32 %v1422_v33, 0.0  ;;  %v1424_v32 = vpop.f32.mrb[109].mxu1 }
 0x25c   : > { %v2036_v22 = vmax.f32 %v1424_v32, 0.0  ;;  %v1426_v35 = vpop.f32.mrb[110].mxu1  ;;  %3846 = vmatprep.mubr.bf16.mxu0 %v2452_v25 }
 0x25d   : > { %v2043_v44 = vmax.f32 %v1426_v35, 0.0  ;;  %v1428_v46 = vpop.f32.mrb[111].mxu1  ;;  %3847 = vmatmul.mubr.bf16.gmra.mrb[40].mxu0 %v2451_v11  ;;  %v2291_v47 = vmul.f32 %v2035_v34, %v2035_v34 }
 0x25e   : > { %v2044_v12 = vmax.f32 %v1428_v46, 0.0  ;;  %v2292_v36 = vmul.f32 %v2036_v22, %v2036_v22 }
 0x25f   : > { %v2299_v45 = vmul.f32 %v2043_v44, %v2043_v44  ;;  %1757 = vmatmul.mubr.bf16.gmra.mrb[216].mxu1 %v5656_v56 }
 0x260   : > { %v2300_v48 = vmul.f32 %v2044_v12, %v2044_v12  ;;  %1766 = vmatprep.mubr.bf16.mxu1 %v5658_v57 }
 0x261   : > { %v2459_v37 = vpack.c.bf16 %v2299_v45, %v2291_v47 }
 0x262   : > { %v2460_v53 = vpack.c.bf16 %v2300_v48, %v2292_v36  ;;  %v1432_v14 = vpop.f32.mrb[112].mxu1 }
 0x263   : > { %v2051_v40 = vmax.f32 %v1432_v14, 0.0  ;;  %v1434_v43 = vpop.f32.mrb[113].mxu1 }
 0x264   : > { %v2052_v61 = vmax.f32 %v1434_v43, 0.0  ;;  %v1436_v62 = vpop.f32.mrb[114].mxu1  ;;  %3856 = vmatprep.mubr.bf16.mxu0 %v2460_v53 }
 0x265   : > { %v2059_v3 = vmax.f32 %v1436_v62, 0.0  ;;  %v1438_v4 = vpop.f32.mrb[115].mxu1  ;;  %3857 = vmatmul.mubr.bf16.gmra.mrb[44].mxu0 %v2459_v37  ;;  %v2307_v60 = vmul.f32 %v2051_v40, %v2051_v40 }
 0x266   : > { %v2060_v54 = vmax.f32 %v1438_v4, 0.0  ;;  %v2308_v56 = vmul.f32 %v2052_v61, %v2052_v61 }
 0x267   : > { %v2315_v5 = vmul.f32 %v2059_v3, %v2059_v3  ;;  %1767 = vmatmul.mubr.bf16.gmra.mrb[220].mxu1 %v5666_v16 }
 0x268   : > { %v2316_v58 = vmul.f32 %v2060_v54, %v2060_v54  ;;  %1776 = vmatprep.mubr.bf16.mxu1 %v5668_v17 }
 0x269   : > { %v2467_v57 = vpack.c.bf16 %v2315_v5, %v2307_v60 }
 0x26a   : > { %v2468_v9 = vpack.c.bf16 %v2316_v58, %v2308_v56  ;;  %v1442_v18 = vpop.f32.mrb[116].mxu1 }
 0x26b   : > { %v2067_v6 = vmax.f32 %v1442_v18, 0.0  ;;  %v1444_v59 = vpop.f32.mrb[117].mxu1 }
 0x26c   : > { %v2068_v7 = vmax.f32 %v1444_v59, 0.0  ;;  %v1446_v30 = vpop.f32.mrb[118].mxu1  ;;  %3866 = vmatprep.mubr.bf16.mxu0 %v2468_v9  ;;  %v5155_v59 = vld [vmem:[#allocation8 + $0x300] ss:$8 sps:$4 sm:$0xff]  }
 0x26d   : > { %v2075_v63 = vmax.f32 %v1446_v30, 0.0  ;;  %v1448_v2 = vpop.f32.mrb[119].mxu1  ;;  %3867 = vmatmul.mubr.bf16.gmra.mrb[48].mxu0 %v2467_v57  ;;  %v2323_v31 = vmul.f32 %v2067_v6, %v2067_v6 }
 0x26e   : > { %v2076_v23 = vmax.f32 %v1448_v2, 0.0  ;;  %v2324_v16 = vmul.f32 %v2068_v7, %v2068_v7 }
 0x26f   : > { %v2331_v20 = vmul.f32 %v2075_v63, %v2075_v63  ;;  %1777 = vmatmul.mubr.bf16.gmra.mrb[224].mxu1 %v5678_v38  ;;  %v5160_v63 = vld [vmem:[#allocation8 + $0x314] ss:$8 sps:$4 sm:$0xff]  }
 0x270   : > { %v2332_v24 = vmul.f32 %v2076_v23, %v2076_v23  ;;  %1786 = vmatprep.mubr.bf16.mxu1 %v5680_v39 }
 0x271   : > { %v2475_v17 = vpack.c.bf16 %v2331_v20, %v2323_v31 }
 0x272   : > { %v2476_v15 = vpack.c.bf16 %v2332_v24, %v2324_v16  ;;  %v1452_v19 = vpop.f32.mrb[120].mxu1 }
 0x273   : > { %v2083_v28 = vmax.f32 %v1452_v19, 0.0  ;;  %v1454_v21 = vpop.f32.mrb[121].mxu1 }
 0x274   : > { %v2084_v10 = vmax.f32 %v1454_v21, 0.0  ;;  %v1456_v26 = vpop.f32.mrb[122].mxu1  ;;  %3876 = vmatprep.mubr.bf16.mxu0 %v2476_v15 }
 0x275   : > { %v2091_v11 = vmax.f32 %v1456_v26, 0.0  ;;  %v1458_v25 = vpop.f32.mrb[123].mxu1  ;;  %3877 = vmatmul.mubr.bf16.gmra.mrb[52].mxu0 %v2475_v17  ;;  %v2339_v34 = vmul.f32 %v2083_v28, %v2083_v28  ;;  %v5161_v26 = vld [vmem:[#allocation8 + $0x320] ss:$8 sps:$4 sm:$0xff]  }
 0x276   : > { %v2092_v33 = vmax.f32 %v1458_v25, 0.0  ;;  %v2340_v38 = vmul.f32 %v2084_v10, %v2084_v10 }
 0x277   : > { %v2347_v32 = vmul.f32 %v2091_v11, %v2091_v11  ;;  %1787 = vmatmul.mubr.bf16.gmra.mrb[228].mxu1 %v5688_v50 }
 0x278   : > { %v2348_v22 = vmul.f32 %v2092_v33, %v2092_v33  ;;  %1796 = vmatprep.mubr.bf16.mxu1 %v5690_v51  ;;  %v5166_v33 = vld [vmem:[#allocation8 + $0x334] ss:$8 sps:$4 sm:$0xff]  }
 0x279   : > { %v2483_v39 = vpack.c.bf16 %v2347_v32, %v2339_v34 }
 0x27a   : > { %v2484_v35 = vpack.c.bf16 %v2348_v22, %v2340_v38  ;;  %v1462_v44 = vpop.f32.mrb[124].mxu1 }
 0x27b   : > { %v2099_v46 = vmax.f32 %v1462_v44, 0.0  ;;  %v1464_v12 = vpop.f32.mrb[125].mxu1  ;;  %v5169_v44 = vld [vmem:[#allocation8 + $0x344] ss:$8 sps:$4 sm:$0xff]  }
 0x27c   : > { %v2100_v47 = vmax.f32 %v1464_v12, 0.0  ;;  %v1466_v45 = vpop.f32.mrb[126].mxu1  ;;  %3886 = vmatprep.mubr.bf16.mxu0 %v2484_v35 }
 0x27d   : > { %v2107_v36 = vmax.f32 %v1466_v45, 0.0  ;;  %v1468_v48 = vpop.f32.mrb[127].mxu1  ;;  %3887 = vmatmul.mubr.bf16.gmra.mrb[56].mxu0 %v2483_v39  ;;  %v2355_v53 = vmul.f32 %v2099_v46, %v2099_v46  ;;  %v5164_v39 = vld [vmem:[#allocation8 + $0x330] ss:$8 sps:$4 sm:$0xff]  }
 0x27e   : > { %v2108_v37 = vmax.f32 %v1468_v48, 0.0  ;;  %v2356_v50 = vmul.f32 %v2100_v47, %v2100_v47  ;;  %v5167_v48 = vld [vmem:[#allocation8 + $0x340] ss:$8 sps:$4 sm:$0xff]  }
 0x27f   : > { %v2363_v14 = vmul.f32 %v2107_v36, %v2107_v36  ;;  %1797 = vmatmul.mubr.bf16.gmra.mrb[232].mxu1 %v5698_v0 }
 0x280   : > { %v2364_v40 = vmul.f32 %v2108_v37, %v2108_v37  ;;  %1806 = vmatprep.mubr.bf16.mxu1 %v5700_v1 }
 0x281   : > { %v2491_v51 = vpack.c.bf16 %v2363_v14, %v2355_v53  ;;  %v5172_v14 = vld [vmem:[#allocation8 + $0x354] ss:$8 sps:$4 sm:$0xff]  }
 0x282   : > { %v2492_v43 = vpack.c.bf16 %v2364_v40, %v2356_v50  ;;  %v1505_v61 = vpop.f32.mrb[128].mxu1 }
 0x283   : > { %v1861_v62 = vmax.f32 %v1505_v61, 0.0  ;;  %v1507_v3 = vpop.f32.mrb[129].mxu1  ;;  %v5170_v61 = vld [vmem:[#allocation8 + $0x350] ss:$8 sps:$4 sm:$0xff]  }
 0x284   : > { %v1862_v4 = vmax.f32 %v1507_v3, 0.0  ;;  %v1509_v54 = vpop.f32.mrb[130].mxu1  ;;  %3896 = vmatprep.mubr.bf16.mxu0 %v2492_v43  ;;  %v5175_v3 = vld [vmem:[#allocation8 + $0x364] ss:$8 sps:$4 sm:$0xff]  }
 0x285   : > { %v1869_v60 = vmax.f32 %v1509_v54, 0.0  ;;  %v1511_v5 = vpop.f32.mrb[131].mxu1  ;;  %3897 = vmatmul.mubr.bf16.gmra.mrb[60].mxu0 %v2491_v51  ;;  %v2117_v58 = vmul.f32 %v1861_v62, %v1861_v62 }
 0x286   : > { %v1870_v56 = vmax.f32 %v1511_v5, 0.0  ;;  %v2118_v0 = vmul.f32 %v1862_v4, %v1862_v4 }
 0x287   : > { %v2125_v57 = vmul.f32 %v1869_v60, %v1869_v60  ;;  %1807 = vmatmul.mubr.bf16.gmra.mrb[236].mxu1 %v5708_v8  ;;  %v5158_v8 = vld [vmem:[#allocation8 + $0x310] ss:$8 sps:$4 sm:$0xff]  }
 0x288   : > { %v2126_v9 = vmul.f32 %v1870_v56, %v1870_v56  ;;  %1816 = vmatprep.mubr.bf16.mxu1 %v5710_v13  ;;  %v5163_v13 = vld [vmem:[#allocation8 + $0x324] ss:$8 sps:$4 sm:$0xff]  }
 0x289   : > { %v2373_v1 = vpack.c.bf16 %v2125_v57, %v2117_v58  ;;  %v5173_v58 = vld [vmem:[#allocation8 + $0x360] ss:$8 sps:$4 sm:$0xff]  }
 0x28a   : > { %v2374_v18 = vpack.c.bf16 %v2126_v9, %v2118_v0  ;;  %v1515_v6 = vpop.f32.mrb[132].mxu1  ;;  %v5178_v9 = vld [vmem:[#allocation8 + $0x374] ss:$8 sps:$4 sm:$0xff]  }
 0x28b   : > { %v1877_v7 = vmax.f32 %v1515_v6, 0.0  ;;  %v1517_v30 = vpop.f32.mrb[133].mxu1 }
 0x28c   : > { %v1878_v2 = vmax.f32 %v1517_v30, 0.0  ;;  %v1519_v23 = vpop.f32.mrb[134].mxu1  ;;  %3939 = vmatprep.mubr.bf16.mxu0 %v2374_v18 }
 0x28d   : > { %v1885_v31 = vmax.f32 %v1519_v23, 0.0  ;;  %v1521_v20 = vpop.f32.mrb[135].mxu1  ;;  %3940 = vmatmul.mubr.bf16.vlgmr.msra.gmra.mrb[0].mxu0 %v2373_v1  ;;  %v2133_v24 = vmul.f32 %v1877_v7, %v1877_v7  ;;  %v5176_v7 = vld [vmem:[#allocation8 + $0x370] ss:$8 sps:$4 sm:$0xff]  }
 0x28e   : > { %v1886_v16 = vmax.f32 %v1521_v20, 0.0  ;;  %4101 = vmatpush1.bf16.msra.mxu0 %v5155_v59  ;;  %v2134_v15 = vmul.f32 %v1878_v2, %v1878_v2 }
 0x28f   : > { %v2141_v17 = vmul.f32 %v1885_v31, %v1885_v31  ;;  %1817 = vmatmul.mubr.bf16.gmra.mrb[240].mxu1 %v5718_v27  ;;  %4102 = vmatprep.subr.bf16.mxu0 %v5160_v63  ;;  %v5181_v63 = vld [vmem:[#allocation8 + $0x384] ss:$8 sps:$4 sm:$0xff]  }
 0x290   : > { %v2142_v19 = vmul.f32 %v1886_v16, %v1886_v16  ;;  %1826 = vmatprep.mubr.bf16.mxu1 %v5720_v29 }
 0x291   : > { %v2381_v28 = vpack.c.bf16 %v2141_v17, %v2133_v24 }
 0x292   : > { %v2382_v21 = vpack.c.bf16 %v2142_v19, %v2134_v15  ;;  %v1525_v10 = vpop.f32.mrb[136].mxu1  ;;  %4103 = vmatpush1.bf16.msra.mxu0 %v5158_v8  ;;  %v5179_v8 = vld [vmem:[#allocation8 + $0x380] ss:$8 sps:$4 sm:$0xff]  }
 0x293   : > { %v1893_v11 = vmax.f32 %v1525_v10, 0.0  ;;  %v1527_v25 = vpop.f32.mrb[137].mxu1  ;;  %4104 = vmatprep.subr.bf16.mxu0 %v5163_v13  ;;  %v5184_v13 = vld [vmem:[#allocation8 + $0x394] ss:$8 sps:$4 sm:$0xff]   ;;  %v5182_v10 = vld [vmem:[#allocation8 + $0x390] ss:$8 sps:$4 sm:$0xff]  }
 0x294   : > { %v1894_v34 = vmax.f32 %v1527_v25, 0.0  ;;  %v1529_v32 = vpop.f32.mrb[138].mxu1  ;;  %3949 = vmatprep.mubr.bf16.mxu0 %v2382_v21  ;;  %v5187_v25 = vld [vmem:[#allocation8 + $0x3a4] ss:$8 sps:$4 sm:$0xff]  }
 0x295   : > { %v1901_v38 = vmax.f32 %v1529_v32, 0.0  ;;  %v1531_v27 = vpop.f32.mrb[139].mxu1  ;;  %3950 = vmatmul.mubr.bf16.gmra.mrb[4].mxu0 %v2381_v28  ;;  %v2149_v35 = vmul.f32 %v1893_v11, %v1893_v11 }
 0x296   : > { %v1902_v22 = vmax.f32 %v1531_v27, 0.0  ;;  %4105 = vmatpush1.bf16.msra.mxu0 %v5161_v26  ;;  %v2150_v46 = vmul.f32 %v1894_v34, %v1894_v34 }
 0x297   : > { %v2157_v29 = vmul.f32 %v1901_v38, %v1901_v38  ;;  %1827 = vmatmul.mubr.bf16.gmra.mrb[244].mxu1 %v5728_v41  ;;  %4106 = vmatprep.subr.bf16.mxu0 %v5166_v33 }
 0x298   : > { %v2158_v12 = vmul.f32 %v1902_v22, %v1902_v22  ;;  %1836 = vmatprep.mubr.bf16.mxu1 %v5730_v42  ;;  %v5185_v22 = vld [vmem:[#allocation8 + $0x3a0] ss:$8 sps:$4 sm:$0xff]  }
 0x299   : > { %v2389_v47 = vpack.c.bf16 %v2157_v29, %v2149_v35  ;;  %v5190_v29 = vld [vmem:[#allocation8 + $0x3b4] ss:$8 sps:$4 sm:$0xff]  }
 0x29a   : > { %v2390_v45 = vpack.c.bf16 %v2158_v12, %v2150_v46  ;;  %v1535_v36 = vpop.f32.mrb[140].mxu1  ;;  %4107 = vmatpush1.bf16.msra.mxu0 %v5164_v39 }
 0x29b   : > { %v1909_v37 = vmax.f32 %v1535_v36, 0.0  ;;  %v1537_v53 = vpop.f32.mrb[141].mxu1  ;;  %4108 = vmatprep.subr.bf16.mxu0 %v5169_v44  ;;  %v5188_v36 = vld [vmem:[#allocation8 + $0x3b0] ss:$8 sps:$4 sm:$0xff]  }
 0x29c   : > { %v1910_v50 = vmax.f32 %v1537_v53, 0.0  ;;  %v1539_v40 = vpop.f32.mrb[142].mxu1  ;;  %3959 = vmatprep.mubr.bf16.mxu0 %v2390_v45  ;;  %v5193_v53 = vld [vmem:[#allocation8 + $0x3c4] ss:$8 sps:$4 sm:$0xff]  }
 0x29d   : > { %v1917_v51 = vmax.f32 %v1539_v40, 0.0  ;;  %v1541_v41 = vpop.f32.mrb[143].mxu1  ;;  %3960 = vmatmul.mubr.bf16.gmra.mrb[8].mxu0 %v2389_v47  ;;  %v2165_v62 = vmul.f32 %v1909_v37, %v1909_v37 }
 0x29e   : > { %v1918_v43 = vmax.f32 %v1541_v41, 0.0  ;;  %4109 = vmatpush1.bf16.msra.mxu0 %v5167_v48  ;;  %v2166_v4 = vmul.f32 %v1910_v50, %v1910_v50 }
 0x29f   : > { %v2173_v42 = vmul.f32 %v1917_v51, %v1917_v51  ;;  %1837 = vmatmul.mubr.bf16.gmra.mrb[248].mxu1 %v5738_v49  ;;  %4110 = vmatprep.subr.bf16.mxu0 %v5172_v14 }
 0x2a0   : > { %v2174_v54 = vmul.f32 %v1918_v43, %v1918_v43  ;;  %1846 = vmatprep.mubr.bf16.mxu1 %v5740_v52  ;;  %v5191_v43 = vld [vmem:[#allocation8 + $0x3c0] ss:$8 sps:$4 sm:$0xff]  }
 0x2a1   : > { %v2397_v60 = vpack.c.bf16 %v2173_v42, %v2165_v62  ;;  %v5196_v42 = vld [vmem:[#allocation8 + $0x3d4] ss:$8 sps:$4 sm:$0xff]  }
 0x2a2   : > { %v2398_v5 = vpack.c.bf16 %v2174_v54, %v2166_v4  ;;  %v1545_v56 = vpop.f32.mrb[144].mxu1  ;;  %4111 = vmatpush1.bf16.msra.mxu0 %v5170_v61 }
 0x2a3   : > { %v1925_v57 = vmax.f32 %v1545_v56, 0.0  ;;  %v1547_v0 = vpop.f32.mrb[145].mxu1  ;;  %4112 = vmatprep.subr.bf16.mxu0 %v5175_v3  ;;  %v5194_v56 = vld [vmem:[#allocation8 + $0x3d0] ss:$8 sps:$4 sm:$0xff]  }
 0x2a4   : > { %v1926_v1 = vmax.f32 %v1547_v0, 0.0  ;;  %v1549_v18 = vpop.f32.mrb[146].mxu1  ;;  %3969 = vmatprep.mubr.bf16.mxu0 %v2398_v5  ;;  %v5199_v0 = vld [vmem:[#allocation8 + $0x3e4] ss:$8 sps:$4 sm:$0xff]  }
 0x2a5   : > { %v1933_v6 = vmax.f32 %v1549_v18, 0.0  ;;  %v1551_v49 = vpop.f32.mrb[147].mxu1  ;;  %3970 = vmatmul.mubr.bf16.gmra.mrb[12].mxu0 %v2397_v60  ;;  %v2181_v30 = vmul.f32 %v1925_v57, %v1925_v57 }
 0x2a6   : > { %v1934_v59 = vmax.f32 %v1551_v49, 0.0  ;;  %4113 = vmatpush1.bf16.msra.mxu0 %v5173_v58  ;;  %v2182_v2 = vmul.f32 %v1926_v1, %v1926_v1 }
 0x2a7   : > { %v2189_v52 = vmul.f32 %v1933_v6, %v1933_v6  ;;  %1847 = vmatmul.mubr.bf16.gmra.mrb[252].mxu1 %v5746_v55  ;;  %4114 = vmatprep.subr.bf16.mxu0 %v5178_v9 }
 0x2a8   : > { %v2190_v23 = vmul.f32 %v1934_v59, %v1934_v59  ;;  %v5197_v59 = vld [vmem:[#allocation8 + $0x3e0] ss:$8 sps:$4 sm:$0xff]  }
 0x2a9   : > { %v2405_v31 = vpack.c.bf16 %v2189_v52, %v2181_v30  ;;  %v5202_v52 = vld [vmem:[#allocation8 + $0x3f4] ss:$8 sps:$4 sm:$0xff]  }
 0x2aa   : > { %v2406_v20 = vpack.c.bf16 %v2190_v23, %v2182_v2  ;;  %v1555_v16 = vpop.f32.mrb[148].mxu1  ;;  %4115 = vmatpush1.bf16.msra.mxu0 %v5176_v7 }
 0x2ab   : > { %v1941_v24 = vmax.f32 %v1555_v16, 0.0  ;;  %v1557_v17 = vpop.f32.mrb[149].mxu1  ;;  %4116 = vmatprep.subr.bf16.mxu0 %v5181_v63  ;;  %v5200_v16 = vld [vmem:[#allocation8 + $0x3f0] ss:$8 sps:$4 sm:$0xff]  }
 0x2ac   : > { %v1942_v15 = vmax.f32 %v1557_v17, 0.0  ;;  %v1559_v19 = vpop.f32.mrb[150].mxu1  ;;  %3979 = vmatprep.mubr.bf16.mxu0 %v2406_v20 }
 0x2ad   : > { %v1949_v28 = vmax.f32 %v1559_v19, 0.0  ;;  %v1561_v21 = vpop.f32.mrb[151].mxu1  ;;  %3980 = vmatmul.mubr.bf16.gmra.mrb[16].mxu0 %v2405_v31  ;;  %v2197_v26 = vmul.f32 %v1941_v24, %v1941_v24 }
 0x2ae   : > { %v1950_v55 = vmax.f32 %v1561_v21, 0.0  ;;  %4117 = vmatpush1.bf16.msra.mxu0 %v5179_v8  ;;  %v2198_v33 = vmul.f32 %v1942_v15, %v1942_v15 }
 0x2af   : > { %v2205_v11 = vmul.f32 %v1949_v28, %v1949_v28  ;;  %4118 = vmatprep.subr.bf16.mxu0 %v5184_v13 }
 0x2b0   : > { %v2206_v34 = vmul.f32 %v1950_v55, %v1950_v55 }
 0x2b1   : > { %v2413_v32 = vpack.c.bf16 %v2205_v11, %v2197_v26 }
 0x2b2   : > { %v2414_v38 = vpack.c.bf16 %v2206_v34, %v2198_v33  ;;  %v1565_v27 = vpop.f32.mrb[152].mxu1  ;;  %4119 = vmatpush1.bf16.msra.mxu0 %v5182_v10 }
 0x2b3   : > { %v1957_v39 = vmax.f32 %v1565_v27, 0.0  ;;  %v1567_v35 = vpop.f32.mrb[153].mxu1  ;;  %4120 = vmatprep.subr.bf16.mxu0 %v5187_v25 }
 0x2b4   : > { %v1958_v44 = vmax.f32 %v1567_v35, 0.0  ;;  %v1569_v46 = vpop.f32.mrb[154].mxu1  ;;  %3989 = vmatprep.mubr.bf16.mxu0 %v2414_v38 }
 0x2b5   : > { %v1965_v12 = vmax.f32 %v1569_v46, 0.0  ;;  %v1571_v47 = vpop.f32.mrb[155].mxu1  ;;  %3990 = vmatmul.mubr.bf16.gmra.mrb[20].mxu0 %v2413_v32  ;;  %v2213_v48 = vmul.f32 %v1957_v39, %v1957_v39 }
 0x2b6   : > { %v1966_v45 = vmax.f32 %v1571_v47, 0.0  ;;  %4121 = vmatpush1.bf16.msra.mxu0 %v5185_v22  ;;  %v2214_v14 = vmul.f32 %v1958_v44, %v1958_v44 }
 0x2b7   : > { %v2221_v37 = vmul.f32 %v1965_v12, %v1965_v12  ;;  %4122 = vmatprep.subr.bf16.mxu0 %v5190_v29 }
 0x2b8   : > { %v2222_v50 = vmul.f32 %v1966_v45, %v1966_v45 }
 0x2b9   : > { %v2421_v40 = vpack.c.bf16 %v2221_v37, %v2213_v48 }
 0x2ba   : > { %v2422_v51 = vpack.c.bf16 %v2222_v50, %v2214_v14  ;;  %v1575_v41 = vpop.f32.mrb[156].mxu1  ;;  %4123 = vmatpush1.bf16.msra.mxu0 %v5188_v36 }
 0x2bb   : > { %v1973_v61 = vmax.f32 %v1575_v41, 0.0  ;;  %v1577_v62 = vpop.f32.mrb[157].mxu1  ;;  %4124 = vmatprep.subr.bf16.mxu0 %v5193_v53 }
 0x2bc   : > { %v1974_v3 = vmax.f32 %v1577_v62, 0.0  ;;  %v1579_v4 = vpop.f32.mrb[158].mxu1  ;;  %3999 = vmatprep.mubr.bf16.mxu0 %v2422_v51 }
 0x2bd   : > { %v1981_v54 = vmax.f32 %v1579_v4, 0.0  ;;  %v1581_v60 = vpop.f32.mrb[159].mxu1  ;;  %4000 = vmatmul.mubr.bf16.gmra.mrb[24].mxu0 %v2421_v40  ;;  %v2229_v58 = vmul.f32 %v1973_v61, %v1973_v61 }
 0x2be   : > { %v1982_v5 = vmax.f32 %v1581_v60, 0.0  ;;  %4125 = vmatpush1.bf16.msra.mxu0 %v5191_v43  ;;  %v2230_v9 = vmul.f32 %v1974_v3, %v1974_v3 }
 0x2bf   : > { %v2237_v57 = vmul.f32 %v1981_v54, %v1981_v54  ;;  %4126 = vmatprep.subr.bf16.mxu0 %v5196_v42 }
 0x2c0   : > { %v2238_v1 = vmul.f32 %v1982_v5, %v1982_v5 }
 0x2c1   : > { %v2429_v18 = vpack.c.bf16 %v2237_v57, %v2229_v58 }
 0x2c2   : > { %v2430_v6 = vpack.c.bf16 %v2238_v1, %v2230_v9  ;;  %v1585_v49 = vpop.f32.mrb[160].mxu1  ;;  %4127 = vmatpush1.bf16.msra.mxu0 %v5194_v56 }
 0x2c3   : > { %v1989_v7 = vmax.f32 %v1585_v49, 0.0  ;;  %v1587_v30 = vpop.f32.mrb[161].mxu1  ;;  %4128 = vmatprep.subr.bf16.mxu0 %v5199_v0 }
 0x2c4   : > { %v1990_v63 = vmax.f32 %v1587_v30, 0.0  ;;  %v1589_v2 = vpop.f32.mrb[162].mxu1  ;;  %4009 = vmatprep.mubr.bf16.mxu0 %v2430_v6 }
 0x2c5   : > { %v1997_v23 = vmax.f32 %v1589_v2, 0.0  ;;  %v1591_v31 = vpop.f32.mrb[163].mxu1  ;;  %4010 = vmatmul.mubr.bf16.gmra.mrb[28].mxu0 %v2429_v18  ;;  %v2245_v8 = vmul.f32 %v1989_v7, %v1989_v7 }
 0x2c6   : > { %v1998_v20 = vmax.f32 %v1591_v31, 0.0  ;;  %4129 = vmatpush1.bf16.msra.mxu0 %v5197_v59  ;;  %v2246_v17 = vmul.f32 %v1990_v63, %v1990_v63 }
 0x2c7   : > { %v2253_v24 = vmul.f32 %v1997_v23, %v1997_v23  ;;  %4130 = vmatprep.subr.bf16.mxu0 %v5202_v52 }
 0x2c8   : > { %v2254_v13 = vmul.f32 %v1998_v20, %v1998_v20 }
 0x2c9   : > { %v2437_v15 = vpack.c.bf16 %v2253_v24, %v2245_v8 }
 0x2ca   : > { %v2438_v19 = vpack.c.bf16 %v2254_v13, %v2246_v17  ;;  %v1595_v28 = vpop.f32.mrb[164].mxu1  ;;  %4131 = vmatpush1.bf16.msra.mxu0 %v5200_v16 }
 0x2cb   : > { %v2005_v21 = vmax.f32 %v1595_v28, 0.0  ;;  %v1597_v55 = vpop.f32.mrb[165].mxu1 }
 0x2cc   : > { %v2006_v10 = vmax.f32 %v1597_v55, 0.0  ;;  %v1599_v26 = vpop.f32.mrb[166].mxu1  ;;  %4019 = vmatprep.mubr.bf16.mxu0 %v2438_v19 }
 0x2cd   : > { %v2013_v11 = vmax.f32 %v1599_v26, 0.0  ;;  %v1601_v25 = vpop.f32.mrb[167].mxu1  ;;  %4020 = vmatmul.mubr.bf16.gmra.mrb[32].mxu0 %v2437_v15  ;;  %v2261_v34 = vmul.f32 %v2005_v21, %v2005_v21 }
 0x2ce   : > { %v2014_v33 = vmax.f32 %v1601_v25, 0.0  ;;  %v2262_v38 = vmul.f32 %v2006_v10, %v2006_v10 }
 0x2cf   : > { %v2269_v32 = vmul.f32 %v2013_v11, %v2013_v11 }
 0x2d0   : > { %v2270_v27 = vmul.f32 %v2014_v33, %v2014_v33 }
 0x2d1   : > { %v2445_v22 = vpack.c.bf16 %v2269_v32, %v2261_v34 }
 0x2d2   : > { %v2446_v39 = vpack.c.bf16 %v2270_v27, %v2262_v38  ;;  %v1605_v35 = vpop.f32.mrb[168].mxu1 }
 0x2d3   : > { %v2021_v29 = vmax.f32 %v1605_v35, 0.0  ;;  %v1607_v44 = vpop.f32.mrb[169].mxu1 }
 0x2d4   : > { %v2022_v46 = vmax.f32 %v1607_v44, 0.0  ;;  %v1609_v12 = vpop.f32.mrb[170].mxu1  ;;  %4029 = vmatprep.mubr.bf16.mxu0 %v2446_v39 }
 0x2d5   : > { %v2029_v47 = vmax.f32 %v1609_v12, 0.0  ;;  %v1611_v45 = vpop.f32.mrb[171].mxu1  ;;  %4030 = vmatmul.mubr.bf16.gmra.mrb[36].mxu0 %v2445_v22  ;;  %v2277_v48 = vmul.f32 %v2021_v29, %v2021_v29 }
 0x2d6   : > { %v2030_v36 = vmax.f32 %v1611_v45, 0.0  ;;  %v2278_v53 = vmul.f32 %v2022_v46, %v2022_v46 }
 0x2d7   : > { %v2285_v37 = vmul.f32 %v2029_v47, %v2029_v47 }
 0x2d8   : > { %v2286_v14 = vmul.f32 %v2030_v36, %v2030_v36 }
 0x2d9   : > { %v2453_v50 = vpack.c.bf16 %v2285_v37, %v2277_v48 }
 0x2da   : > { %v2454_v40 = vpack.c.bf16 %v2286_v14, %v2278_v53  ;;  %v1615_v51 = vpop.f32.mrb[172].mxu1 }
 0x2db   : > { %v2037_v41 = vmax.f32 %v1615_v51, 0.0  ;;  %v1617_v43 = vpop.f32.mrb[173].mxu1 }
 0x2dc   : > { %v2038_v61 = vmax.f32 %v1617_v43, 0.0  ;;  %v1619_v62 = vpop.f32.mrb[174].mxu1  ;;  %4039 = vmatprep.mubr.bf16.mxu0 %v2454_v40 }
 0x2dd   : > { %v2045_v42 = vmax.f32 %v1619_v62, 0.0  ;;  %v1621_v3 = vpop.f32.mrb[175].mxu1  ;;  %4040 = vmatmul.mubr.bf16.gmra.mrb[40].mxu0 %v2453_v50  ;;  %v2293_v54 = vmul.f32 %v2037_v41, %v2037_v41 }
 0x2de   : > { %v2046_v4 = vmax.f32 %v1621_v3, 0.0  ;;  %v2294_v5 = vmul.f32 %v2038_v61, %v2038_v61 }
 0x2df   : > { %v2301_v60 = vmul.f32 %v2045_v42, %v2045_v42 }
 0x2e0   : > { %v2302_v56 = vmul.f32 %v2046_v4, %v2046_v4 }
 0x2e1   : > { %v2461_v58 = vpack.c.bf16 %v2301_v60, %v2293_v54 }
 0x2e2   : > { %v2462_v57 = vpack.c.bf16 %v2302_v56, %v2294_v5  ;;  %v1625_v0 = vpop.f32.mrb[176].mxu1 }
 0x2e3   : > { %v2053_v9 = vmax.f32 %v1625_v0, 0.0  ;;  %v1627_v1 = vpop.f32.mrb[177].mxu1 }
 0x2e4   : > { %v2054_v18 = vmax.f32 %v1627_v1, 0.0  ;;  %v1629_v6 = vpop.f32.mrb[178].mxu1  ;;  %4049 = vmatprep.mubr.bf16.mxu0 %v2462_v57 }
 0x2e5   : > { %v2061_v49 = vmax.f32 %v1629_v6, 0.0  ;;  %v1631_v59 = vpop.f32.mrb[179].mxu1  ;;  %4050 = vmatmul.mubr.bf16.gmra.mrb[44].mxu0 %v2461_v58  ;;  %v2309_v30 = vmul.f32 %v2053_v9, %v2053_v9 }
 0x2e6   : > { %v2062_v7 = vmax.f32 %v1631_v59, 0.0  ;;  %v2310_v63 = vmul.f32 %v2054_v18, %v2054_v18 }
 0x2e7   : > { %v2317_v52 = vmul.f32 %v2061_v49, %v2061_v49 }
 0x2e8   : > { %v2318_v2 = vmul.f32 %v2062_v7, %v2062_v7 }
 0x2e9   : > { %v2469_v23 = vpack.c.bf16 %v2317_v52, %v2309_v30 }
 0x2ea   : > { %v2470_v31 = vpack.c.bf16 %v2318_v2, %v2310_v63  ;;  %v1635_v20 = vpop.f32.mrb[180].mxu1 }
 0x2eb   : > { %v2069_v16 = vmax.f32 %v1635_v20, 0.0  ;;  %v1637_v8 = vpop.f32.mrb[181].mxu1 }
 0x2ec   : > { %v2070_v24 = vmax.f32 %v1637_v8, 0.0  ;;  %v1639_v17 = vpop.f32.mrb[182].mxu1  ;;  %4059 = vmatprep.mubr.bf16.mxu0 %v2470_v31 }
 0x2ed   : > { %v2077_v13 = vmax.f32 %v1639_v17, 0.0  ;;  %v1641_v15 = vpop.f32.mrb[183].mxu1  ;;  %4060 = vmatmul.mubr.bf16.gmra.mrb[48].mxu0 %v2469_v23  ;;  %v2325_v28 = vmul.f32 %v2069_v16, %v2069_v16 }
 0x2ee   : > { %v2078_v19 = vmax.f32 %v1641_v15, 0.0  ;;  %v2326_v55 = vmul.f32 %v2070_v24, %v2070_v24 }
 0x2ef   : > { %v2333_v21 = vmul.f32 %v2077_v13, %v2077_v13 }
 0x2f0   : > { %v2334_v10 = vmul.f32 %v2078_v19, %v2078_v19 }
 0x2f1   : > { %v2477_v26 = vpack.c.bf16 %v2333_v21, %v2325_v28 }
 0x2f2   : > { %v2478_v11 = vpack.c.bf16 %v2334_v10, %v2326_v55  ;;  %v1645_v25 = vpop.f32.mrb[184].mxu1 }
 0x2f3   : > { %v2085_v33 = vmax.f32 %v1645_v25, 0.0  ;;  %v1647_v34 = vpop.f32.mrb[185].mxu1 }
 0x2f4   : > { %v2086_v32 = vmax.f32 %v1647_v34, 0.0  ;;  %v1649_v38 = vpop.f32.mrb[186].mxu1  ;;  %4069 = vmatprep.mubr.bf16.mxu0 %v2478_v11 }
 0x2f5   : > { %v2093_v27 = vmax.f32 %v1649_v38, 0.0  ;;  %v1651_v22 = vpop.f32.mrb[187].mxu1  ;;  %4070 = vmatmul.mubr.bf16.gmra.mrb[52].mxu0 %v2477_v26  ;;  %v2341_v35 = vmul.f32 %v2085_v33, %v2085_v33 }
 0x2f6   : > { %v2094_v39 = vmax.f32 %v1651_v22, 0.0  ;;  %v2342_v44 = vmul.f32 %v2086_v32, %v2086_v32 }
 0x2f7   : > { %v2349_v29 = vmul.f32 %v2093_v27, %v2093_v27 }
 0x2f8   : > { %v2350_v46 = vmul.f32 %v2094_v39, %v2094_v39 }
 0x2f9   : > { %v2485_v12 = vpack.c.bf16 %v2349_v29, %v2341_v35 }
 0x2fa   : > { %v2486_v47 = vpack.c.bf16 %v2350_v46, %v2342_v44  ;;  %v1655_v45 = vpop.f32.mrb[188].mxu1 }
 0x2fb   : > { %v2101_v36 = vmax.f32 %v1655_v45, 0.0  ;;  %v1657_v48 = vpop.f32.mrb[189].mxu1 }
 0x2fc   : > { %v2102_v37 = vmax.f32 %v1657_v48, 0.0  ;;  %v1659_v53 = vpop.f32.mrb[190].mxu1  ;;  %4079 = vmatprep.mubr.bf16.mxu0 %v2486_v47 }
 0x2fd   : > { %v2109_v14 = vmax.f32 %v1659_v53, 0.0  ;;  %v1661_v50 = vpop.f32.mrb[191].mxu1  ;;  %4080 = vmatmul.mubr.bf16.gmra.mrb[56].mxu0 %v2485_v12  ;;  %v2357_v51 = vmul.f32 %v2101_v36, %v2101_v36 }
 0x2fe   : > { %v2110_v40 = vmax.f32 %v1661_v50, 0.0  ;;  %v2358_v43 = vmul.f32 %v2102_v37, %v2102_v37 }
 0x2ff   : > { %v2365_v41 = vmul.f32 %v2109_v14, %v2109_v14 }
 0x300   : > { %v2366_v61 = vmul.f32 %v2110_v40, %v2110_v40 }
 0x301   : > { %v2493_v62 = vpack.c.bf16 %v2365_v41, %v2357_v51 }
 0x302   : > { %v2494_v42 = vpack.c.bf16 %v2366_v61, %v2358_v43  ;;  %v1698_v3 = vpop.f32.mrb[192].mxu1 }
 0x303   : > { %v1863_v4 = vmax.f32 %v1698_v3, 0.0  ;;  %v1700_v54 = vpop.f32.mrb[193].mxu1 }
 0x304   : > { %v1864_v60 = vmax.f32 %v1700_v54, 0.0  ;;  %v1702_v5 = vpop.f32.mrb[194].mxu1  ;;  %4089 = vmatprep.mubr.bf16.mxu0 %v2494_v42 }
 0x305   : > { %v1871_v56 = vmax.f32 %v1702_v5, 0.0  ;;  %v1704_v58 = vpop.f32.mrb[195].mxu1  ;;  %4090 = vmatmul.mubr.bf16.gmra.mrb[60].mxu0 %v2493_v62  ;;  %v2119_v0 = vmul.f32 %v1863_v4, %v1863_v4 }
 0x306   : > { %v1872_v57 = vmax.f32 %v1704_v58, 0.0  ;;  %v2120_v1 = vmul.f32 %v1864_v60, %v1864_v60 }
 0x307   : > { %v2127_v9 = vmul.f32 %v1871_v56, %v1871_v56 }
 0x308   : > { %v2128_v18 = vmul.f32 %v1872_v57, %v1872_v57 }
 0x309   : > { %v2375_v6 = vpack.c.bf16 %v2127_v9, %v2119_v0 }
 0x30a   : > { %v2376_v49 = vpack.c.bf16 %v2128_v18, %v2120_v1  ;;  %v1708_v59 = vpop.f32.mrb[196].mxu1 }
 0x30b   : > { %v1879_v7 = vmax.f32 %v1708_v59, 0.0  ;;  %v1710_v30 = vpop.f32.mrb[197].mxu1 }
 0x30c   : > { %v1880_v52 = vmax.f32 %v1710_v30, 0.0  ;;  %v1712_v63 = vpop.f32.mrb[198].mxu1  ;;  %4132 = vmatprep.mubr.bf16.mxu0 %v2376_v49 }
 0x30d   : > { %v1887_v2 = vmax.f32 %v1712_v63, 0.0  ;;  %v1714_v23 = vpop.f32.mrb[199].mxu1  ;;  %4133 = vmatmul.mubr.bf16.vlgmr.msra.gmra.mrb[0].mxu0 %v2375_v6  ;;  %v2135_v20 = vmul.f32 %v1879_v7, %v1879_v7 }
 0x30e   : > { %v1888_v31 = vmax.f32 %v1714_v23, 0.0  ;;  %v2136_v8 = vmul.f32 %v1880_v52, %v1880_v52 }
 0x30f   : > { %v2143_v16 = vmul.f32 %v1887_v2, %v1887_v2 }
 0x310   : > { %v2144_v24 = vmul.f32 %v1888_v31, %v1888_v31 }
 0x311   : > { %v2383_v17 = vpack.c.bf16 %v2143_v16, %v2135_v20 }
 0x312   : > { %v2384_v13 = vpack.c.bf16 %v2144_v24, %v2136_v8  ;;  %v1718_v15 = vpop.f32.mrb[200].mxu1 }
 0x313   : > { %v1895_v19 = vmax.f32 %v1718_v15, 0.0  ;;  %v1720_v28 = vpop.f32.mrb[201].mxu1 }
 0x314   : > { %v1896_v21 = vmax.f32 %v1720_v28, 0.0  ;;  %v1722_v55 = vpop.f32.mrb[202].mxu1  ;;  %4142 = vmatprep.mubr.bf16.mxu0 %v2384_v13 }
 0x315   : > { %v1903_v10 = vmax.f32 %v1722_v55, 0.0  ;;  %v1724_v26 = vpop.f32.mrb[203].mxu1  ;;  %4143 = vmatmul.mubr.bf16.gmra.mrb[4].mxu0 %v2383_v17  ;;  %v2151_v25 = vmul.f32 %v1895_v19, %v1895_v19 }
 0x316   : > { %v1904_v11 = vmax.f32 %v1724_v26, 0.0  ;;  %v2152_v34 = vmul.f32 %v1896_v21, %v1896_v21 }
 0x317   : > { %v2159_v33 = vmul.f32 %v1903_v10, %v1903_v10 }
 0x318   : > { %v2160_v32 = vmul.f32 %v1904_v11, %v1904_v11 }
 0x319   : > { %v2391_v38 = vpack.c.bf16 %v2159_v33, %v2151_v25 }
 0x31a   : > { %v2392_v27 = vpack.c.bf16 %v2160_v32, %v2152_v34  ;;  %v1728_v22 = vpop.f32.mrb[204].mxu1 }
 0x31b   : > { %v1911_v39 = vmax.f32 %v1728_v22, 0.0  ;;  %v1730_v35 = vpop.f32.mrb[205].mxu1 }
 0x31c   : > { %v1912_v29 = vmax.f32 %v1730_v35, 0.0  ;;  %v1732_v44 = vpop.f32.mrb[206].mxu1  ;;  %4152 = vmatprep.mubr.bf16.mxu0 %v2392_v27 }
 0x31d   : > { %v1919_v46 = vmax.f32 %v1732_v44, 0.0  ;;  %v1734_v12 = vpop.f32.mrb[207].mxu1  ;;  %4153 = vmatmul.mubr.bf16.gmra.mrb[8].mxu0 %v2391_v38  ;;  %v2167_v45 = vmul.f32 %v1911_v39, %v1911_v39 }
 0x31e   : > { %v1920_v47 = vmax.f32 %v1734_v12, 0.0  ;;  %v2168_v48 = vmul.f32 %v1912_v29, %v1912_v29 }
 0x31f   : > { %v2175_v36 = vmul.f32 %v1919_v46, %v1919_v46 }
 0x320   : > { %v2176_v37 = vmul.f32 %v1920_v47, %v1920_v47 }
 0x321   : > { %v2399_v53 = vpack.c.bf16 %v2175_v36, %v2167_v45 }
 0x322   : > { %v2400_v14 = vpack.c.bf16 %v2176_v37, %v2168_v48  ;;  %v1738_v50 = vpop.f32.mrb[208].mxu1 }
 0x323   : > { %v1927_v40 = vmax.f32 %v1738_v50, 0.0  ;;  %v1740_v51 = vpop.f32.mrb[209].mxu1 }
 0x324   : > { %v1928_v41 = vmax.f32 %v1740_v51, 0.0  ;;  %v1742_v43 = vpop.f32.mrb[210].mxu1  ;;  %4162 = vmatprep.mubr.bf16.mxu0 %v2400_v14 }
 0x325   : > { %v1935_v61 = vmax.f32 %v1742_v43, 0.0  ;;  %v1744_v62 = vpop.f32.mrb[211].mxu1  ;;  %4163 = vmatmul.mubr.bf16.gmra.mrb[12].mxu0 %v2399_v53  ;;  %v2183_v3 = vmul.f32 %v1927_v40, %v1927_v40 }
 0x326   : > { %v1936_v42 = vmax.f32 %v1744_v62, 0.0  ;;  %v2184_v54 = vmul.f32 %v1928_v41, %v1928_v41 }
 0x327   : > { %v2191_v4 = vmul.f32 %v1935_v61, %v1935_v61 }
 0x328   : > { %v2192_v60 = vmul.f32 %v1936_v42, %v1936_v42 }
 0x329   : > { %v2407_v5 = vpack.c.bf16 %v2191_v4, %v2183_v3 }
 0x32a   : > { %v2408_v56 = vpack.c.bf16 %v2192_v60, %v2184_v54  ;;  %v1748_v58 = vpop.f32.mrb[212].mxu1 }
 0x32b   : > { %v1943_v57 = vmax.f32 %v1748_v58, 0.0  ;;  %v1750_v0 = vpop.f32.mrb[213].mxu1 }
 0x32c   : > { %v1944_v9 = vmax.f32 %v1750_v0, 0.0  ;;  %v1752_v1 = vpop.f32.mrb[214].mxu1  ;;  %4172 = vmatprep.mubr.bf16.mxu0 %v2408_v56 }
 0x32d   : > { %v1951_v18 = vmax.f32 %v1752_v1, 0.0  ;;  %v1754_v6 = vpop.f32.mrb[215].mxu1  ;;  %4173 = vmatmul.mubr.bf16.gmra.mrb[16].mxu0 %v2407_v5  ;;  %v2199_v59 = vmul.f32 %v1943_v57, %v1943_v57 }
 0x32e   : > { %v1952_v49 = vmax.f32 %v1754_v6, 0.0  ;;  %v2200_v30 = vmul.f32 %v1944_v9, %v1944_v9 }
 0x32f   : > { %v2207_v7 = vmul.f32 %v1951_v18, %v1951_v18 }
 0x330   : > { %v2208_v52 = vmul.f32 %v1952_v49, %v1952_v49 }
 0x331   : > { %v2415_v63 = vpack.c.bf16 %v2207_v7, %v2199_v59 }
 0x332   : > { %v2416_v2 = vpack.c.bf16 %v2208_v52, %v2200_v30  ;;  %v1758_v23 = vpop.f32.mrb[216].mxu1 }
 0x333   : > { %v1959_v31 = vmax.f32 %v1758_v23, 0.0  ;;  %v1760_v20 = vpop.f32.mrb[217].mxu1 }
 0x334   : > { %v1960_v16 = vmax.f32 %v1760_v20, 0.0  ;;  %v1762_v8 = vpop.f32.mrb[218].mxu1  ;;  %4182 = vmatprep.mubr.bf16.mxu0 %v2416_v2 }
 0x335   : > { %v1967_v24 = vmax.f32 %v1762_v8, 0.0  ;;  %v1764_v17 = vpop.f32.mrb[219].mxu1  ;;  %4183 = vmatmul.mubr.bf16.gmra.mrb[20].mxu0 %v2415_v63  ;;  %v2215_v15 = vmul.f32 %v1959_v31, %v1959_v31 }
 0x336   : > { %v1968_v13 = vmax.f32 %v1764_v17, 0.0  ;;  %v2216_v28 = vmul.f32 %v1960_v16, %v1960_v16 }
 0x337   : > { %v2223_v19 = vmul.f32 %v1967_v24, %v1967_v24 }
 0x338   : > { %v2224_v21 = vmul.f32 %v1968_v13, %v1968_v13 }
 0x339   : > { %v2423_v55 = vpack.c.bf16 %v2223_v19, %v2215_v15 }
 0x33a   : > { %v2424_v10 = vpack.c.bf16 %v2224_v21, %v2216_v28  ;;  %v1768_v26 = vpop.f32.mrb[220].mxu1 }
 0x33b   : > { %v1975_v11 = vmax.f32 %v1768_v26, 0.0  ;;  %v1770_v25 = vpop.f32.mrb[221].mxu1 }
 0x33c   : > { %v1976_v33 = vmax.f32 %v1770_v25, 0.0  ;;  %v1772_v34 = vpop.f32.mrb[222].mxu1  ;;  %4192 = vmatprep.mubr.bf16.mxu0 %v2424_v10 }
 0x33d   : > { %v1983_v32 = vmax.f32 %v1772_v34, 0.0  ;;  %v1774_v38 = vpop.f32.mrb[223].mxu1  ;;  %4193 = vmatmul.mubr.bf16.gmra.mrb[24].mxu0 %v2423_v55  ;;  %v2231_v22 = vmul.f32 %v1975_v11, %v1975_v11 }
 0x33e   : > { %v1984_v27 = vmax.f32 %v1774_v38, 0.0  ;;  %v2232_v35 = vmul.f32 %v1976_v33, %v1976_v33 }
 0x33f   : > { %v2239_v39 = vmul.f32 %v1983_v32, %v1983_v32 }
 0x340   : > { %v2240_v29 = vmul.f32 %v1984_v27, %v1984_v27 }
 0x341   : > { %v2431_v44 = vpack.c.bf16 %v2239_v39, %v2231_v22 }
 0x342   : > { %v2432_v46 = vpack.c.bf16 %v2240_v29, %v2232_v35  ;;  %v1778_v12 = vpop.f32.mrb[224].mxu1 }
 0x343   : > { %v1991_v47 = vmax.f32 %v1778_v12, 0.0  ;;  %v1780_v45 = vpop.f32.mrb[225].mxu1 }
 0x344   : > { %v1992_v36 = vmax.f32 %v1780_v45, 0.0  ;;  %v1782_v48 = vpop.f32.mrb[226].mxu1  ;;  %4202 = vmatprep.mubr.bf16.mxu0 %v2432_v46 }
 0x345   : > { %v1999_v37 = vmax.f32 %v1782_v48, 0.0  ;;  %v1784_v53 = vpop.f32.mrb[227].mxu1  ;;  %4203 = vmatmul.mubr.bf16.gmra.mrb[28].mxu0 %v2431_v44  ;;  %v2247_v50 = vmul.f32 %v1991_v47, %v1991_v47 }
 0x346   : > { %v2000_v14 = vmax.f32 %v1784_v53, 0.0  ;;  %v2248_v51 = vmul.f32 %v1992_v36, %v1992_v36 }
 0x347   : > { %v2255_v40 = vmul.f32 %v1999_v37, %v1999_v37 }
 0x348   : > { %v2256_v41 = vmul.f32 %v2000_v14, %v2000_v14 }
 0x349   : > { %v2439_v43 = vpack.c.bf16 %v2255_v40, %v2247_v50 }
 0x34a   : > { %v2440_v61 = vpack.c.bf16 %v2256_v41, %v2248_v51  ;;  %v1788_v62 = vpop.f32.mrb[228].mxu1 }
 0x34b   : > { %v2007_v42 = vmax.f32 %v1788_v62, 0.0  ;;  %v1790_v3 = vpop.f32.mrb[229].mxu1 }
 0x34c   : > { %v2008_v4 = vmax.f32 %v1790_v3, 0.0  ;;  %v1792_v54 = vpop.f32.mrb[230].mxu1  ;;  %4212 = vmatprep.mubr.bf16.mxu0 %v2440_v61 }
 0x34d   : > { %v2015_v60 = vmax.f32 %v1792_v54, 0.0  ;;  %v1794_v5 = vpop.f32.mrb[231].mxu1  ;;  %4213 = vmatmul.mubr.bf16.gmra.mrb[32].mxu0 %v2439_v43  ;;  %v2263_v58 = vmul.f32 %v2007_v42, %v2007_v42 }
 0x34e   : > { %v2016_v56 = vmax.f32 %v1794_v5, 0.0  ;;  %v2264_v0 = vmul.f32 %v2008_v4, %v2008_v4 }
 0x34f   : > { %v2271_v57 = vmul.f32 %v2015_v60, %v2015_v60 }
 0x350   : > { %v2272_v9 = vmul.f32 %v2016_v56, %v2016_v56 }
 0x351   : > { %v2447_v1 = vpack.c.bf16 %v2271_v57, %v2263_v58 }
 0x352   : > { %v2448_v18 = vpack.c.bf16 %v2272_v9, %v2264_v0  ;;  %v1798_v6 = vpop.f32.mrb[232].mxu1 }
 0x353   : > { %v2023_v49 = vmax.f32 %v1798_v6, 0.0  ;;  %v1800_v59 = vpop.f32.mrb[233].mxu1 }
 0x354   : > { %v2024_v7 = vmax.f32 %v1800_v59, 0.0  ;;  %v1802_v30 = vpop.f32.mrb[234].mxu1  ;;  %4222 = vmatprep.mubr.bf16.mxu0 %v2448_v18 }
 0x355   : > { %v2031_v52 = vmax.f32 %v1802_v30, 0.0  ;;  %v1804_v63 = vpop.f32.mrb[235].mxu1  ;;  %4223 = vmatmul.mubr.bf16.gmra.mrb[36].mxu0 %v2447_v1  ;;  %v2279_v23 = vmul.f32 %v2023_v49, %v2023_v49 }
 0x356   : > { %v2032_v2 = vmax.f32 %v1804_v63, 0.0  ;;  %v2280_v20 = vmul.f32 %v2024_v7, %v2024_v7 }
 0x357   : > { %v2287_v31 = vmul.f32 %v2031_v52, %v2031_v52 }
 0x358   : > { %v2288_v16 = vmul.f32 %v2032_v2, %v2032_v2 }
 0x359   : > { %v2455_v8 = vpack.c.bf16 %v2287_v31, %v2279_v23 }
 0x35a   : > { %v2456_v24 = vpack.c.bf16 %v2288_v16, %v2280_v20  ;;  %v1808_v17 = vpop.f32.mrb[236].mxu1 }
 0x35b   : > { %v2039_v13 = vmax.f32 %v1808_v17, 0.0  ;;  %v1810_v15 = vpop.f32.mrb[237].mxu1 }
 0x35c   : > { %v2040_v19 = vmax.f32 %v1810_v15, 0.0  ;;  %v1812_v28 = vpop.f32.mrb[238].mxu1  ;;  %4232 = vmatprep.mubr.bf16.mxu0 %v2456_v24 }
 0x35d   : > { %v2047_v21 = vmax.f32 %v1812_v28, 0.0  ;;  %v1814_v55 = vpop.f32.mrb[239].mxu1  ;;  %4233 = vmatmul.mubr.bf16.gmra.mrb[40].mxu0 %v2455_v8  ;;  %v2295_v26 = vmul.f32 %v2039_v13, %v2039_v13 }
 0x35e   : > { %v2048_v10 = vmax.f32 %v1814_v55, 0.0  ;;  %v2296_v25 = vmul.f32 %v2040_v19, %v2040_v19 }
 0x35f   : > { %v2303_v11 = vmul.f32 %v2047_v21, %v2047_v21 }
 0x360   : > { %v2304_v33 = vmul.f32 %v2048_v10, %v2048_v10 }
 0x361   : > { %v2463_v34 = vpack.c.bf16 %v2303_v11, %v2295_v26 }
 0x362   : > { %v2464_v32 = vpack.c.bf16 %v2304_v33, %v2296_v25  ;;  %v1818_v38 = vpop.f32.mrb[240].mxu1 }
 0x363   : > { %v2055_v27 = vmax.f32 %v1818_v38, 0.0  ;;  %v1820_v22 = vpop.f32.mrb[241].mxu1 }
 0x364   : > { %v2056_v39 = vmax.f32 %v1820_v22, 0.0  ;;  %v1822_v35 = vpop.f32.mrb[242].mxu1  ;;  %4242 = vmatprep.mubr.bf16.mxu0 %v2464_v32 }
 0x365   : > { %v2063_v29 = vmax.f32 %v1822_v35, 0.0  ;;  %v1824_v44 = vpop.f32.mrb[243].mxu1  ;;  %4243 = vmatmul.mubr.bf16.gmra.mrb[44].mxu0 %v2463_v34  ;;  %v2311_v12 = vmul.f32 %v2055_v27, %v2055_v27 }
 0x366   : > { %v2064_v46 = vmax.f32 %v1824_v44, 0.0  ;;  %v2312_v45 = vmul.f32 %v2056_v39, %v2056_v39 }
 0x367   : > { %v2319_v47 = vmul.f32 %v2063_v29, %v2063_v29 }
 0x368   : > { %v2320_v36 = vmul.f32 %v2064_v46, %v2064_v46 }
 0x369   : > { %v2471_v48 = vpack.c.bf16 %v2319_v47, %v2311_v12 }
 0x36a   : > { %v2472_v37 = vpack.c.bf16 %v2320_v36, %v2312_v45  ;;  %v1828_v53 = vpop.f32.mrb[244].mxu1 }
 0x36b   : > { %v2071_v14 = vmax.f32 %v1828_v53, 0.0  ;;  %v1830_v50 = vpop.f32.mrb[245].mxu1 }
 0x36c   : > { %v2072_v40 = vmax.f32 %v1830_v50, 0.0  ;;  %v1832_v51 = vpop.f32.mrb[246].mxu1  ;;  %4252 = vmatprep.mubr.bf16.mxu0 %v2472_v37 }
 0x36d   : > { %v2079_v41 = vmax.f32 %v1832_v51, 0.0  ;;  %v1834_v43 = vpop.f32.mrb[247].mxu1  ;;  %4253 = vmatmul.mubr.bf16.gmra.mrb[48].mxu0 %v2471_v48  ;;  %v2327_v62 = vmul.f32 %v2071_v14, %v2071_v14 }
 0x36e   : > { %v2080_v61 = vmax.f32 %v1834_v43, 0.0  ;;  %v2328_v3 = vmul.f32 %v2072_v40, %v2072_v40 }
 0x36f   : > { %v2335_v42 = vmul.f32 %v2079_v41, %v2079_v41 }
 0x370   : > { %v2336_v4 = vmul.f32 %v2080_v61, %v2080_v61 }
 0x371   : > { %v2479_v54 = vpack.c.bf16 %v2335_v42, %v2327_v62 }
 0x372   : > { %v2480_v60 = vpack.c.bf16 %v2336_v4, %v2328_v3  ;;  %v1838_v5 = vpop.f32.mrb[248].mxu1 }
 0x373   : > { %v2087_v56 = vmax.f32 %v1838_v5, 0.0  ;;  %v1840_v58 = vpop.f32.mrb[249].mxu1 }
 0x374   : > { %v2088_v57 = vmax.f32 %v1840_v58, 0.0  ;;  %v1842_v0 = vpop.f32.mrb[250].mxu1  ;;  %4262 = vmatprep.mubr.bf16.mxu0 %v2480_v60 }
 0x375   : > { %v2095_v9 = vmax.f32 %v1842_v0, 0.0  ;;  %v1844_v1 = vpop.f32.mrb[251].mxu1  ;;  %4263 = vmatmul.mubr.bf16.gmra.mrb[52].mxu0 %v2479_v54  ;;  %v2343_v6 = vmul.f32 %v2087_v56, %v2087_v56 }
 0x376   : > { %v2096_v18 = vmax.f32 %v1844_v1, 0.0  ;;  %v2344_v59 = vmul.f32 %v2088_v57, %v2088_v57 }
 0x377   : > { %v2351_v49 = vmul.f32 %v2095_v9, %v2095_v9 }
 0x378   : > { %v2352_v7 = vmul.f32 %v2096_v18, %v2096_v18 }
 0x379   : > { %v2487_v30 = vpack.c.bf16 %v2351_v49, %v2343_v6 }
 0x37a   : > { %v2488_v52 = vpack.c.bf16 %v2352_v7, %v2344_v59  ;;  %v1848_v63 = vpop.f32.mrb[252].mxu1 }
 0x37b   : > { %v2103_v2 = vmax.f32 %v1848_v63, 0.0  ;;  %v1850_v23 = vpop.f32.mrb[253].mxu1 }
 0x37c   : > { %v2104_v31 = vmax.f32 %v1850_v23, 0.0  ;;  %v1852_v20 = vpop.f32.mrb[254].mxu1  ;;  %4272 = vmatprep.mubr.bf16.mxu0 %v2488_v52 }
 0x37d   : > { %v2111_v16 = vmax.f32 %v1852_v20, 0.0  ;;  %v1854_v8 = vpop.f32.mrb[255].mxu1  ;;  %4273 = vmatmul.mubr.bf16.gmra.mrb[56].mxu0 %v2487_v30  ;;  %v2359_v17 = vmul.f32 %v2103_v2, %v2103_v2 }
 0x37e   : > { %v2112_v24 = vmax.f32 %v1854_v8, 0.0  ;;  %v2360_v15 = vmul.f32 %v2104_v31, %v2104_v31 }
 0x37f   : > { %v2367_v13 = vmul.f32 %v2111_v16, %v2111_v16 }
 0x380   : > { %v2368_v19 = vmul.f32 %v2112_v24, %v2112_v24 }
 0x381   : > { %v2495_v28 = vpack.c.bf16 %v2367_v13, %v2359_v17 }
 0x382   : > { %v2496_v21 = vpack.c.bf16 %v2368_v19, %v2360_v15 }
 0x384   : > { %4282 = vmatprep.mubr.bf16.mxu0 %v2496_v21 }
 0x385   : > { %4283 = vmatmul.mubr.bf16.gmra.mrb[60].mxu0 %v2495_v28 }
 0x3e0   : > { %v4134_v55 = vpop.f32.mrb[0].mxu0 }
 0x3e1   : > { %4293 = vst [vmem:[%s5861_s18] sm:$0xff] %v4134_v55  ;;  %v4136_v10 = vpop.f32.mrb[1].mxu0 }
 0x3e2   : > { %4294 = vst [vmem:[%s5861_s18 + $0x8] sm:$0xff] %v4136_v10  ;;  %v4138_v26 = vpop.f32.mrb[2].mxu0 }
 0x3e3   : > { %4295 = vst [vmem:[%s5861_s18 + $0x10] sm:$0xff] %v4138_v26  ;;  %v4140_v11 = vpop.f32.mrb[3].mxu0 }
 0x3e4   : > { %4296 = vst [vmem:[%s5861_s18 + $0x18] sm:$0xff] %v4140_v11 }
 0x3e8   : > { %v4144_v25 = vpop.f32.mrb[4].mxu0 }
 0x3e9   : > { %4297 = vst [vmem:[%s5861_s18 + $0x20] sm:$0xff] %v4144_v25  ;;  %v4146_v33 = vpop.f32.mrb[5].mxu0 }
 0x3ea   : > { %4298 = vst [vmem:[%s5861_s18 + $0x28] sm:$0xff] %v4146_v33  ;;  %v4148_v34 = vpop.f32.mrb[6].mxu0 }
 0x3eb   : > { %4299 = vst [vmem:[%s5861_s18 + $0x30] sm:$0xff] %v4148_v34  ;;  %v4150_v32 = vpop.f32.mrb[7].mxu0 }
 0x3ec   : > { %4300 = vst [vmem:[%s5861_s18 + $0x38] sm:$0xff] %v4150_v32 }
 0x3f0   : > { %v4154_v38 = vpop.f32.mrb[8].mxu0 }
 0x3f1   : > { %4301 = vst [vmem:[%s5861_s18 + $0x40] sm:$0xff] %v4154_v38  ;;  %v4156_v27 = vpop.f32.mrb[9].mxu0 }
 0x3f2   : > { %4302 = vst [vmem:[%s5861_s18 + $0x48] sm:$0xff] %v4156_v27  ;;  %v4158_v22 = vpop.f32.mrb[10].mxu0 }
 0x3f3   : > { %4303 = vst [vmem:[%s5861_s18 + $0x50] sm:$0xff] %v4158_v22  ;;  %v4160_v39 = vpop.f32.mrb[11].mxu0 }
 0x3f4   : > { %4304 = vst [vmem:[%s5861_s18 + $0x58] sm:$0xff] %v4160_v39 }
 0x3f8   : > { %v4164_v35 = vpop.f32.mrb[12].mxu0 }
 0x3f9   : > { %4305 = vst [vmem:[%s5861_s18 + $0x60] sm:$0xff] %v4164_v35  ;;  %v4166_v29 = vpop.f32.mrb[13].mxu0 }
 0x3fa   : > { %4306 = vst [vmem:[%s5861_s18 + $0x68] sm:$0xff] %v4166_v29  ;;  %v4168_v44 = vpop.f32.mrb[14].mxu0 }
 0x3fb   : > { %4307 = vst [vmem:[%s5861_s18 + $0x70] sm:$0xff] %v4168_v44  ;;  %v4170_v46 = vpop.f32.mrb[15].mxu0 }
 0x3fc   : > { %4308 = vst [vmem:[%s5861_s18 + $0x78] sm:$0xff] %v4170_v46 }
 0x400   : > { %v4174_v12 = vpop.f32.mrb[16].mxu0 }
 0x401   : > { %4309 = vst [vmem:[%s5861_s18 + $0x80] sm:$0xff] %v4174_v12  ;;  %v4176_v47 = vpop.f32.mrb[17].mxu0 }
 0x402   : > { %4310 = vst [vmem:[%s5861_s18 + $0x88] sm:$0xff] %v4176_v47  ;;  %v4178_v45 = vpop.f32.mrb[18].mxu0 }
 0x403   : > { %4311 = vst [vmem:[%s5861_s18 + $0x90] sm:$0xff] %v4178_v45  ;;  %v4180_v36 = vpop.f32.mrb[19].mxu0 }
 0x404   : > { %4312 = vst [vmem:[%s5861_s18 + $0x98] sm:$0xff] %v4180_v36 }
 0x408   : > { %v4184_v48 = vpop.f32.mrb[20].mxu0 }
 0x409   : > { %4313 = vst [vmem:[%s5861_s18 + $0xa0] sm:$0xff] %v4184_v48  ;;  %v4186_v37 = vpop.f32.mrb[21].mxu0 }
 0x40a   : > { %4314 = vst [vmem:[%s5861_s18 + $0xa8] sm:$0xff] %v4186_v37  ;;  %v4188_v53 = vpop.f32.mrb[22].mxu0 }
 0x40b   : > { %4315 = vst [vmem:[%s5861_s18 + $0xb0] sm:$0xff] %v4188_v53  ;;  %v4190_v14 = vpop.f32.mrb[23].mxu0 }
 0x40c   : > { %4316 = vst [vmem:[%s5861_s18 + $0xb8] sm:$0xff] %v4190_v14 }
 0x410   : > { %v4194_v50 = vpop.f32.mrb[24].mxu0 }
 0x411   : > { %4317 = vst [vmem:[%s5861_s18 + $0xc0] sm:$0xff] %v4194_v50  ;;  %v4196_v40 = vpop.f32.mrb[25].mxu0 }
 0x412   : > { %4318 = vst [vmem:[%s5861_s18 + $0xc8] sm:$0xff] %v4196_v40  ;;  %v4198_v51 = vpop.f32.mrb[26].mxu0 }
 0x413   : > { %4319 = vst [vmem:[%s5861_s18 + $0xd0] sm:$0xff] %v4198_v51  ;;  %v4200_v41 = vpop.f32.mrb[27].mxu0 }
 0x414   : > { %4320 = vst [vmem:[%s5861_s18 + $0xd8] sm:$0xff] %v4200_v41 }
 0x418   : > { %v4204_v43 = vpop.f32.mrb[28].mxu0 }
 0x419   : > { %4321 = vst [vmem:[%s5861_s18 + $0xe0] sm:$0xff] %v4204_v43  ;;  %v4206_v61 = vpop.f32.mrb[29].mxu0 }
 0x41a   : > { %4322 = vst [vmem:[%s5861_s18 + $0xe8] sm:$0xff] %v4206_v61  ;;  %v4208_v62 = vpop.f32.mrb[30].mxu0 }
 0x41b   : > { %4323 = vst [vmem:[%s5861_s18 + $0xf0] sm:$0xff] %v4208_v62  ;;  %v4210_v42 = vpop.f32.mrb[31].mxu0 }
 0x41c   : > { %4324 = vst [vmem:[%s5861_s18 + $0xf8] sm:$0xff] %v4210_v42 }
 0x420   : > { %v4214_v3 = vpop.f32.mrb[32].mxu0 }
 0x421   : > { %4325 = vst [vmem:[%s5861_s18 + $0x100] sm:$0xff] %v4214_v3  ;;  %v4216_v4 = vpop.f32.mrb[33].mxu0 }
 0x422   : > { %4326 = vst [vmem:[%s5861_s18 + $0x108] sm:$0xff] %v4216_v4  ;;  %v4218_v54 = vpop.f32.mrb[34].mxu0 }
 0x423   : > { %4327 = vst [vmem:[%s5861_s18 + $0x110] sm:$0xff] %v4218_v54  ;;  %v4220_v60 = vpop.f32.mrb[35].mxu0 }
 0x424   : > { %4328 = vst [vmem:[%s5861_s18 + $0x118] sm:$0xff] %v4220_v60 }
 0x428   : > { %v4224_v5 = vpop.f32.mrb[36].mxu0 }
 0x429   : > { %4329 = vst [vmem:[%s5861_s18 + $0x120] sm:$0xff] %v4224_v5  ;;  %v4226_v56 = vpop.f32.mrb[37].mxu0 }
 0x42a   : > { %4330 = vst [vmem:[%s5861_s18 + $0x128] sm:$0xff] %v4226_v56  ;;  %v4228_v58 = vpop.f32.mrb[38].mxu0 }
 0x42b   : > { %4331 = vst [vmem:[%s5861_s18 + $0x130] sm:$0xff] %v4228_v58  ;;  %v4230_v57 = vpop.f32.mrb[39].mxu0 }
 0x42c   : > { %4332 = vst [vmem:[%s5861_s18 + $0x138] sm:$0xff] %v4230_v57 }
 0x430   : > { %v4234_v0 = vpop.f32.mrb[40].mxu0 }
 0x431   : > { %4333 = vst [vmem:[%s5861_s18 + $0x140] sm:$0xff] %v4234_v0  ;;  %v4236_v9 = vpop.f32.mrb[41].mxu0 }
 0x432   : > { %4334 = vst [vmem:[%s5861_s18 + $0x148] sm:$0xff] %v4236_v9  ;;  %v4238_v1 = vpop.f32.mrb[42].mxu0 }
 0x433   : > { %4335 = vst [vmem:[%s5861_s18 + $0x150] sm:$0xff] %v4238_v1  ;;  %v4240_v18 = vpop.f32.mrb[43].mxu0 }
 0x434   : > { %4336 = vst [vmem:[%s5861_s18 + $0x158] sm:$0xff] %v4240_v18 }
 0x438   : > { %v4244_v6 = vpop.f32.mrb[44].mxu0 }
 0x439   : > { %4337 = vst [vmem:[%s5861_s18 + $0x160] sm:$0xff] %v4244_v6  ;;  %v4246_v49 = vpop.f32.mrb[45].mxu0 }
 0x43a   : > { %4338 = vst [vmem:[%s5861_s18 + $0x168] sm:$0xff] %v4246_v49  ;;  %v4248_v59 = vpop.f32.mrb[46].mxu0 }
 0x43b   : > { %4339 = vst [vmem:[%s5861_s18 + $0x170] sm:$0xff] %v4248_v59  ;;  %v4250_v7 = vpop.f32.mrb[47].mxu0 }
 0x43c   : > { %4340 = vst [vmem:[%s5861_s18 + $0x178] sm:$0xff] %v4250_v7 }
 0x440   : > { %v4254_v30 = vpop.f32.mrb[48].mxu0 }
 0x441   : > { %4341 = vst [vmem:[%s5861_s18 + $0x180] sm:$0xff] %v4254_v30  ;;  %v4256_v52 = vpop.f32.mrb[49].mxu0 }
 0x442   : > { %4342 = vst [vmem:[%s5861_s18 + $0x188] sm:$0xff] %v4256_v52  ;;  %v4258_v63 = vpop.f32.mrb[50].mxu0 }
 0x443   : > { %4343 = vst [vmem:[%s5861_s18 + $0x190] sm:$0xff] %v4258_v63  ;;  %v4260_v2 = vpop.f32.mrb[51].mxu0 }
 0x444   : > { %4344 = vst [vmem:[%s5861_s18 + $0x198] sm:$0xff] %v4260_v2 }
 0x448   : > { %v4264_v23 = vpop.f32.mrb[52].mxu0 }
 0x449   : > { %4345 = vst [vmem:[%s5861_s18 + $0x1a0] sm:$0xff] %v4264_v23  ;;  %v4266_v31 = vpop.f32.mrb[53].mxu0 }
 0x44a   : > { %4346 = vst [vmem:[%s5861_s18 + $0x1a8] sm:$0xff] %v4266_v31  ;;  %v4268_v20 = vpop.f32.mrb[54].mxu0 }
 0x44b   : > { %4347 = vst [vmem:[%s5861_s18 + $0x1b0] sm:$0xff] %v4268_v20  ;;  %v4270_v16 = vpop.f32.mrb[55].mxu0 }
 0x44c   : > { %4348 = vst [vmem:[%s5861_s18 + $0x1b8] sm:$0xff] %v4270_v16 }
 0x450   : > { %v4274_v8 = vpop.f32.mrb[56].mxu0 }
 0x451   : > { %4349 = vst [vmem:[%s5861_s18 + $0x1c0] sm:$0xff] %v4274_v8  ;;  %v4276_v24 = vpop.f32.mrb[57].mxu0 }
 0x452   : > { %4350 = vst [vmem:[%s5861_s18 + $0x1c8] sm:$0xff] %v4276_v24  ;;  %v4278_v17 = vpop.f32.mrb[58].mxu0 }
 0x453   : > { %4351 = vst [vmem:[%s5861_s18 + $0x1d0] sm:$0xff] %v4278_v17  ;;  %v4280_v13 = vpop.f32.mrb[59].mxu0 }
 0x454   : > { %4352 = vst [vmem:[%s5861_s18 + $0x1d8] sm:$0xff] %v4280_v13 }
 0x458   : > { %v4284_v15 = vpop.f32.mrb[60].mxu0 }
 0x459   : > { %4353 = vst [vmem:[%s5861_s18 + $0x1e0] sm:$0xff] %v4284_v15  ;;  %v4286_v19 = vpop.f32.mrb[61].mxu0 }
 0x45a   : > { %4354 = vst [vmem:[%s5861_s18 + $0x1e8] sm:$0xff] %v4286_v19  ;;  %v4288_v28 = vpop.f32.mrb[62].mxu0 }
 0x45b   : > { %4355 = vst [vmem:[%s5861_s18 + $0x1f0] sm:$0xff] %v4288_v28  ;;  %v4290_v21 = vpop.f32.mrb[63].mxu0 }
 0x45c   : > { %4356 = vst [vmem:[%s5861_s18 + $0x1f8] sm:$0xff] %v4290_v21 }
 0x45d   : > { %5302 = shalt.err (!%p5299_p2)
}
 0x45e   : > { %s5303_s25 = scalar_lea.hbm %s5929_s22, 8192  ;;  %s5307_s26 = scalar_lea.hbm %s5981_s3, 16384 }
 0x45f   : > { %p5304_p13 = scmp.ne.s32.totalorder %s5929_s22, %s5303_s25  ;;  %p5308_p4 = scmp.lt.u32.totalorder %s5929_s22, %s5981_s3 }
 0x460   : > { %p5309_p7 = scmp.lt.u32.totalorder %s5307_s26, %s5303_s25  ;;  %p5311_p11 = scmp.lt.u32.totalorder %s5303_s25, %s5929_s22 }
 0x461   : > { %p5305_p6 = pnand %p5304_p13, %p5995_p0 }
 0x462   : > { %p5310_p8 = por %p5309_p7, %p5308_p4 }
 0x463   : > { %p5306_p10 = pneg %p5305_p6 }
 0x464   : > { %p5312_p1 = por %p5311_p11, %p5310_p8 }
 0x466   : > { %p5313_p3 = pnand %p5312_p1, %p5306_p10 }
 0x468   : > { %5316 = shalt.err (!%p5313_p3)
}
 0x469   : > { %s5371_s5 = smov 256   ;;  %s5372_s18 = smov 16  }
 0x46a   : > { %4946 = dma.vmem_to_hbm [thread:$0]  (%p5995_p0), %s5931_s24, 8192, %s5929_s22, %s4358_s16, %s5371_s5, %s5371_s5, %s5372_s18  }
 0x46b PF: > { %s4387_s20 = sand.u32 1, %s5347_s12   ;;  %p5996_p5 = scmp.ne.s32.totalorder %s5986_s19, 0 }
 0x46c   : > { %p5997_p9 = scmp.ge.s32.totalorder %s5359_s15, 2  ;;  %s4388_s27 = scalar_lea.sflag [#allocation5], %s4387_s20 }
 0x46e   : > { %p4960_p12 = pnand %p5997_p9, %p5996_p5 }
 0x470   : > { %5342 = dma.done.wait (!%p4960_p12), %s4388_s27, 8192  }
 0x471   : > { %5344 = vsyncadd (!%p4960_p12), %s4388_s27, 4294959104  ;;  %p17_p2 = scmp.ge.s32.totalorder %s5503_s6, 4   ;;  %s5998_s12 = smov %s5351_s13 }
 0x472   : > { %s5999_s13 = smov %s5355_s14  ;;  %s6000_s14 = smov %s5512_s9 }
 0x473   : > { %s6001_s15 = smov %s5503_s6  ;;  %19 = sbr.rel (!%p17_p2) target bundleno = 6 (0x6), region = 85 }
 0x47a   :  { %4393 = vsyncpa [#allocation4], 1 }
 0x47b   :  { %4395 = vsyncpa [#allocation4 + $0x1], 1 }
 0x47c   :  { %4396 = vsyncpa [#allocation7], 1 }
 0x47d   :  { %4397 = vsyncpa [#allocation5], 1 }
 0x47e   :  { %4399 = vsyncpa [#allocation5 + $0x1], 1 }

// kernel: mlp_forward.1
= control target key start
LH: loop header
LB: loop body
LE: loop exit
PB: predicated region body
PF: predicated region fallthrough
CT: control target
= control target key end

     0   :  { %8 = vsyncpa [#allocation4], 0  ;;  %s5978_s0 = inlined_call_operand.hbm [shape: f32[512,256], index: 0, kind: input, shape index: {}]   ;;  %s5979_s1 = inlined_call_operand.hbm [shape: bf16[256,1024], index: 1, kind: input, shape index: {}]   ;;  %s5980_s2 = inlined_call_operand.hbm [shape: bf16[1024,256], index: 2, kind: input, shape index: {}]   ;;  %s5981_s3 = inlined_call_operand.hbm [shape: f32[512,256], index: 3, kind: output, shape index: {}]  }
   0x1   :  { %10 = vsyncpa [#allocation4 + $0x1], 0 }
   0x2   :  { %11 = vsyncpa [#allocation7], 0 }
   0x3   :  { %12 = vsyncpa [#allocation5], 0 }
   0x4   :  { %14 = vsyncpa [#allocation5 + $0x1], 0  ;;  %s5393_s12 = smov 0   ;;  %s5395_s13 = smov 0  }
   0x5   :  { %s5397_s14 = smov 0   ;;  %s5399_s15 = smov 0  }
   0x6 LB: > { %s5414_s16 = sadd.s32 4294967295, %s5359_s15   ;;  %s4464_s17 = sadd.s32 4294967294, %s5359_s15   ;;  %s5359_s15 = sphi %s5399_s15, %s6001_s15   ;;  %s5355_s14 = sphi %s5397_s14, %s6000_s14   ;;  %s5351_s13 = sphi %s5395_s13, %s5999_s13   ;;  %s5347_s12 = sphi %s5393_s12, %s5998_s12  }
   0x7   : > { %p40_p0 = scmp.ne.s32.totalorder %s5351_s13, %s5347_s12  ;;  %p5982_p1 = scmp.eq.s32.totalorder %s5414_s16, 0 }
   0x8   : > { %p112_p3 = scmp.eq.s32.totalorder %s4464_s17, 1  ;;  %p4465_p5 = scmp.ge.s32.totalorder %s5359_s15, 1 }
   0x9   : > { %p5423_p4 = por %p5982_p1, %p40_p0  ;;  %p119_p7 = scmp.lt.s32.totalorder %s5359_s15, 3 }
   0xa   : > { %p5428_p6 = por %p112_p3, %p40_p0  ;;  %s5361_s21 = smov [#allocation6]  }
   0xb   : > { %s5985_s18 = scalar_select %p5423_p4, 1, 0 }
   0xc   : > { %s5986_s19 = scalar_select %p5428_p6, 1, 0 }
   0xd   : > { %p5433_p8 = pnand %p4465_p5, %p119_p7  ;;  %s131_s22 = sshll.u32 %s5361_s21, 4  ;;  %s5437_s22 = int_to_ptr.vmem [resolvable:$true] %s131_s22 }
   0xe   : > { %s5362_s24 = smov [#allocation8]   ;;  %s5203_s28 = scalar_lea.hbm %s5979_s1, 16384 }
   0xf   : > { %p4948_p9 = pneg %p5433_p8  ;;  %s144_s25 = sshll.u32 %s5362_s24, 4  ;;  %s5448_s25 = int_to_ptr.vmem [resolvable:$true] %s144_s25 }
  0x10   : > { %p5204_p12 = scmp.ne.s32.totalorder %s5979_s1, %s5203_s28  ;;  %p5210_p5 = scmp.lt.u32.totalorder %s5203_s28, %s5979_s1 }
  0x11   : > { %p5444_p11 = pnand %p4948_p9, %p5982_p1 }
  0x13   : > { %p5205_p13 = pneg %p5444_p11 }
  0x15   : > { %p5206_p0 = pnand %p5205_p13, %p5204_p12 }
  0x17   : > { %p5207_p3 = pneg %p5206_p0 }
  0x19   : > { %p5212_p7 = pnand %p5210_p5, %p5207_p3 }
  0x1b   : > { %5215 = shalt.err (!%p5212_p7)
}
  0x1c   : > { %s5216_s6 = scalar_lea.vmem %s5437_s22, 16384  ;;  %p5224_p2 = scmp.lt.s32.totalorder %s5437_s22, %s5437_s22 }
  0x1d   : > { %p5217_p9 = scmp.ne.s32.totalorder %s5437_s22, %s5216_s6  ;;  %p5225_p12 = scmp.lt.s32.totalorder %s5216_s6, %s5216_s6 }
  0x1f   : > { %p5219_p10 = pnand %p5217_p9, %p5205_p13  ;;  %p5226_p0 = por %p5225_p12, %p5224_p2 }
  0x21   : > { %p5220_p1 = pneg %p5219_p10 }
  0x23   : > { %p5227_p6 = pnand %p5226_p0, %p5220_p1 }
  0x25   : > { %5230 = shalt.err (!%p5227_p6)
}
  0x26   : > { %s5363_s7 = smov 512   ;;  %s5364_s8 = smov 32  }
  0x27   : > { %4951 = dma.hbm_to_vmem [thread:$0]  (!%p5444_p11), %s5979_s1, 16384, %s5437_s22, [#allocation7], %s5363_s7, %s5363_s7, %s5364_s8  }
  0x28   : > { %s5231_s21 = scalar_lea.hbm %s5980_s2, 16384 }
  0x29   : > { %p5232_p2 = scmp.ne.s32.totalorder %s5980_s2, %s5231_s21  ;;  %p5238_p10 = scmp.lt.u32.totalorder %s5231_s21, %s5980_s2 }
  0x2b   : > { %p5234_p1 = pnand %p5232_p2, %p5205_p13 }
  0x2d   : > { %p5235_p6 = pneg %p5234_p1 }
  0x2f   : > { %p5240_p3 = pnand %p5238_p10, %p5235_p6 }
  0x31   : > { %5243 = shalt.err (!%p5240_p3)
}
  0x32   : > { %s5244_s22 = scalar_lea.vmem %s5448_s25, 16384  ;;  %p5252_p12 = scmp.lt.s32.totalorder %s5448_s25, %s5448_s25 }
  0x33   : > { %p5245_p5 = scmp.ne.s32.totalorder %s5448_s25, %s5244_s22  ;;  %p5253_p0 = scmp.lt.s32.totalorder %s5244_s22, %s5244_s22 }
  0x35   : > { %p5247_p7 = pnand %p5245_p5, %p5205_p13  ;;  %p5254_p2 = por %p5253_p0, %p5252_p12 }
  0x37   : > { %p5248_p9 = pneg %p5247_p7 }
  0x39   : > { %p5255_p1 = pnand %p5254_p2, %p5248_p9 }
  0x3b   : > { %5258 = shalt.err (!%p5255_p1)
}
  0x3c   : > { %s5365_s29 = smov 128   ;;  %s5366_s30 = smov 8  }
  0x3d   : > { %4954 = dma.hbm_to_vmem [thread:$0]  (!%p5444_p11), %s5980_s2, 16384, %s5448_s25, [#allocation7], %s5365_s29, %s5365_s29, %s5366_s30  }
  0x3e   : > { %s5503_s6 = sadd.s32 1, %s5359_s15   ;;  %s27_s8 = sadd.s32 1, %s5355_s14 }
  0x3f   : > { %s24_s7 = ssub.s32 %s5359_s15, %s5503_s6  ;;  %p34_p6 = scmp.ne.s32.totalorder %s5355_s14, %s5351_s13 }
  0x40   : > { %p25_p13 = scmp.eq.s32.totalorder %s24_s7, 0  ;;  %p35_p10 = scmp.eq.s32.totalorder %s5359_s15, 0 }
  0x41   : > { %p5989_p5 = scmp.eq.s32.totalorder %s5414_s16, 1  ;;  %p4965_p9 = scmp.lt.s32.totalorder %s5359_s15, 2 }
  0x42   : > { %s5512_s9 = scalar_select %p25_p13, %s5355_s14, %s27_s8  }
  0x43   : > { %p36_p3 = por %p35_p10, %p34_p6  ;;  %p5516_p7 = por %p5989_p5, %p34_p6 }
  0x44   : > { %s158_s23 = sand.u32 1, %s5355_s14   ;;  %s4741_s25 = sshll.u32 %s5359_s15, 13 }
  0x45   : > { %s5990_s10 = scalar_select %p5516_p7, 1, 0 }
  0x46   : > { %s4469_s11 = sshll.u32 %s158_s23, 9  ;;  %s5526_s24 = scalar_lea.hbm %s5978_s0, %s4741_s25 }
  0x47   : > { %s162_s26 = scalar_lea.vmem [#allocation3], %s4469_s11  ;;  %p5530_p11 = pnand %p4965_p9, %p36_p3 }
  0x48   : > { %s170_s27 = sshll.u32 %s162_s26, 4  ;;  %s5534_s22 = scalar_lea.sflag [#allocation4], %s158_s23  ;;  %s5528_s27 = int_to_ptr.vmem [resolvable:$true] %s170_s27 }
  0x49   : > { %s5259_s29 = scalar_lea.hbm %s5526_s24, 8192  ;;  %p5261_p0 = pneg %p5530_p11 }
  0x4a   : > { %p5260_p12 = scmp.ne.s32.totalorder %s5526_s24, %s5259_s29  ;;  %s5264_s5 = scalar_lea.hbm %s5978_s0, 16384 }
  0x4b   : > { %p5265_p13 = scmp.lt.u32.totalorder %s5526_s24, %s5978_s0  ;;  %p5266_p6 = scmp.lt.u32.totalorder %s5264_s5, %s5259_s29 }
  0x4c   : > { %p5262_p2 = pnand %p5261_p0, %p5260_p12  ;;  %p5268_p3 = scmp.lt.u32.totalorder %s5259_s29, %s5526_s24 }
  0x4d   : > { %p5267_p10 = por %p5266_p6, %p5265_p13 }
  0x4e   : > { %p5263_p1 = pneg %p5262_p2 }
  0x4f   : > { %p5269_p5 = por %p5268_p3, %p5267_p10 }
  0x51   : > { %p5270_p9 = pnand %p5269_p5, %p5263_p1 }
  0x53   : > { %5273 = shalt.err (!%p5270_p9)
}
  0x54   : > { %s5274_s23 = scalar_lea.vmem %s5528_s27, 8192  ;;  %s5367_s11 = smov [#allocation3]  }
  0x55   : > { %p5275_p12 = scmp.ne.s32.totalorder %s5528_s27, %s5274_s23  ;;  %s5279_s25 = sshll.u32 %s5367_s11, 4  ;;  %s5280_s25 = int_to_ptr.vmem [resolvable:$false] %s5279_s25 }
  0x56   : > { %s5281_s17 = scalar_lea.vmem %s5280_s25, 16384  ;;  %p5282_p4 = scmp.lt.s32.totalorder %s5528_s27, %s5280_s25 }
  0x57   : > { %p5277_p2 = pnand %p5275_p12, %p5261_p0  ;;  %p5283_p13 = scmp.lt.s32.totalorder %s5281_s17, %s5274_s23 }
  0x59   : > { %p5278_p7 = pneg %p5277_p2  ;;  %p5284_p6 = por %p5283_p13, %p5282_p4 }
  0x5b   : > { %p5285_p10 = pnand %p5284_p6, %p5278_p7 }
  0x5d   : > { %5288 = shalt.err (!%p5285_p10)
}
  0x5e   : > { %s5368_s21 = smov 256   ;;  %s5369_s26 = smov 16  }
  0x5f   : > { %4958 = dma.hbm_to_vmem [thread:$0]  (!%p5530_p11), %s5526_s24, 8192, %s5528_s27, %s5534_s22, %s5368_s21, %s5368_s21, %s5369_s26  }
  0x60   : > { %182 = sbr.rel (%p5433_p8) target bundleno = 1131 (0x46b), region = 32  ;;  %s5565_s29 = sand.u32 (!%p5433_p8), 1, %s5351_s13  }
  0x61   : > { %s4474_s30 = sshll.u32 (!%p5433_p8), %s5565_s29, 9  ;;  %s185_s4 = scalar_lea.sflag (!%p5433_p8), [#allocation4], %s5565_s29 }
  0x62   : > { %s5571_s5 = scalar_lea.vmem (!%p5433_p8), [#allocation3], %s4474_s30  ;;  %p5992_p4 = scmp.ne.s32.totalorder (!%p5433_p8), %s5985_s18, 0 }
  0x67   : > { %5334 = dma.done.wait (%p5992_p4), %s185_s4, 8192  }
  0x68   : > { %5336 = vsyncadd (%p5992_p4), %s185_s4, 4294959104  ;;  %p5993_p7 = scmp.eq.s32.totalorder %s5414_s16, 0 }
  0x6a   : > { %5338 = dma.done.wait (%p5993_p7), [#allocation7], 32768   ;;  %p5994_p8 = pmov %p5993_p7 }
  0x6b   : > { %v317_v0 = vld [vmem:[#allocation6] sm:$0xff]  ;;  %v222_v17 = vld [vmem:[%s5571_s5 + $0x8] sm:$0xff]  ;;  %v224_v18 = vld [vmem:[%s5571_s5 + $0x18] sm:$0xff]  ;;  %s5861_s18 = scalar_lea.vmem [#allocation9], %s4474_s30  ;;  %s4743_s20 = sshll.u32 %s5414_s16, 13 }
  0x6c   : > { %5340 = vsyncadd (%p5994_p8), [#allocation7], 4294934528  ;;  %v321_v1 = vld [vmem:[#allocation6 + $0x20] sm:$0xff]  ;;  %v5583_v20 = vpack.c.bf16 %v224_v18, %v222_v17  ;;  %s4372_s24 = sshll.u32 %s5861_s18, 4  ;;  %s5929_s22 = scalar_lea.hbm %s5981_s3, %s4743_s20  ;;  %s5931_s24 = int_to_ptr.vmem [resolvable:$true] %s4372_s24 }
  0x6d   : > { %v325_v2 = vld [vmem:[#allocation6 + $0x40] sm:$0xff]  ;;  %v4479_v3 = vcombine.high %v317_v0, %v321_v1  ;;  %v4478_v4 = vcombine.low %v317_v0, %v321_v1  ;;  %v318_v1 = vld [vmem:[#allocation6 + $0x8] sm:$0xff]  ;;  %s4358_s16 = scalar_lea.sflag [#allocation5], %s5565_s29  ;;  %s5289_s7 = scalar_lea.vmem %s5931_s24, 8192 }
  0x6e   : > { %v329_v5 = vld [vmem:[#allocation6 + $0x60] sm:$0xff]  ;;  %1117 = vmatprep.mubr.bf16.mxu1 %v5583_v20  ;;  %p5290_p11 = scmp.ne.s32.totalorder %s5931_s24, %s5289_s7  ;;  %p5995_p0 = scmp.ne.s32.totalorder %s5990_s10, 0 }
  0x6f   : > { %v4487_v6 = vcombine.high %v325_v2, %v329_v5  ;;  %v333_v7 = vld [vmem:[#allocation6 + $0x80] sm:$0xff]  ;;  %1085 = vmatprep.subr.bf16.mxu1 %v4479_v3  ;;  %v4486_v9 = vcombine.low %v325_v2, %v329_v5  ;;  %v322_v2 = vld [vmem:[#allocation6 + $0x28] sm:$0xff]  ;;  %v223_v5 = vld [vmem:[%s5571_s5 + $0x10] sm:$0xff]  ;;  %s5370_s8 = smov [#allocation9]  }
  0x70   : > { %v337_v8 = vld [vmem:[#allocation6 + $0xa0] sm:$0xff]  ;;  %1086 = vmatpush1.bf16.msra.mxu1 %v4478_v4  ;;  %p5291_p1 = pnand %p5290_p11, %p5995_p0  ;;  %s5293_s23 = sshll.u32 %s5370_s8, 4  ;;  %s5294_s23 = int_to_ptr.vmem [resolvable:$false] %s5293_s23 }
  0x71   : > { %1087 = vmatprep.subr.bf16.mxu1 %v4487_v6  ;;  %v4495_v10 = vcombine.high %v333_v7, %v337_v8  ;;  %v341_v11 = vld [vmem:[#allocation6 + $0xc0] sm:$0xff]  ;;  %v4494_v13 = vcombine.low %v333_v7, %v337_v8  ;;  %v226_v6 = vld [vmem:[%s5571_s5 + $0x28] sm:$0xff]  ;;  %v228_v7 = vld [vmem:[%s5571_s5 + $0x38] sm:$0xff]  ;;  %s5295_s11 = scalar_lea.vmem %s5294_s23, 16384  ;;  %p5296_p5 = scmp.lt.s32.totalorder %s5931_s24, %s5294_s23 }
  0x72   : > { %v345_v12 = vld [vmem:[#allocation6 + $0xe0] sm:$0xff]  ;;  %p5292_p3 = pneg %p5291_p1  ;;  %p5297_p9 = scmp.lt.s32.totalorder %s5295_s11, %s5289_s7 }
  0x73   : > { %v4503_v14 = vcombine.high %v341_v11, %v345_v12  ;;  %v349_v15 = vld [vmem:[#allocation6 + $0x100] sm:$0xff]  ;;  %v4502_v19 = vcombine.low %v341_v11, %v345_v12  ;;  %v4481_v11 = vcombine.high %v318_v1, %v322_v2 }
  0x74   : > { %1088 = vmatpush1.bf16.msra.mxu1 %v4486_v9  ;;  %v353_v16 = vld [vmem:[#allocation6 + $0x120] sm:$0xff]  ;;  %v326_v9 = vld [vmem:[#allocation6 + $0x48] sm:$0xff]  ;;  %p5298_p12 = por %p5297_p9, %p5296_p5 }
  0x75   : > { %1089 = vmatprep.subr.bf16.mxu1 %v4495_v10  ;;  %v4511_v21 = vcombine.high %v349_v15, %v353_v16  ;;  %v357_v22 = vld [vmem:[#allocation6 + $0x140] sm:$0xff]  ;;  %v4510_v24 = vcombine.low %v349_v15, %v353_v16  ;;  %v330_v10 = vld [vmem:[#allocation6 + $0x68] sm:$0xff] }
  0x76   : > { %v361_v23 = vld [vmem:[#allocation6 + $0x160] sm:$0xff]  ;;  %v334_v15 = vld [vmem:[#allocation6 + $0x88] sm:$0xff]  ;;  %v4489_v17 = vcombine.high %v326_v9, %v330_v10  ;;  %p5299_p2 = pnand %p5298_p12, %p5292_p3 }
  0x77   : > { %v4519_v25 = vcombine.high %v357_v22, %v361_v23  ;;  %v365_v26 = vld [vmem:[#allocation6 + $0x180] sm:$0xff]  ;;  %v4518_v28 = vcombine.low %v357_v22, %v361_v23  ;;  %v338_v16 = vld [vmem:[#allocation6 + $0xa8] sm:$0xff]  ;;  %v232_v22 = vld [vmem:[%s5571_s5 + $0x58] sm:$0xff] }
  0x78   : > { %1090 = vmatpush1.bf16.msra.mxu1 %v4494_v13  ;;  %v369_v27 = vld [vmem:[#allocation6 + $0x1a0] sm:$0xff]  ;;  %v4480_v13 = vcombine.low %v318_v1, %v322_v2  ;;  %v5599_v23 = vld [vmem:[#allocation6 + $0x10] sm:$0xff] }
  0x79   : > { %1091 = vmatprep.subr.bf16.mxu1 %v4503_v14  ;;  %v4527_v29 = vcombine.high %v365_v26, %v369_v27  ;;  %v373_v30 = vld [vmem:[#allocation6 + $0x1c0] sm:$0xff]  ;;  %v4526_v32 = vcombine.low %v365_v26, %v369_v27  ;;  %v5592_v14 = vpack.c.bf16 %v228_v7, %v226_v6  ;;  %v342_v26 = vld [vmem:[#allocation6 + $0xc8] sm:$0xff]  ;;  %v239_v2 = vld [vmem:[%s5571_s5 + $0x90] sm:$0xff] }
  0x7a   : > { %v377_v31 = vld [vmem:[#allocation6 + $0x1e0] sm:$0xff]  ;;  %v346_v27 = vld [vmem:[#allocation6 + $0xe8] sm:$0xff]  ;;  %v244_v6 = vld [vmem:[%s5571_s5 + $0xb8] sm:$0xff] }
  0x7b   : > { %v4535_v33 = vcombine.high %v373_v30, %v377_v31  ;;  %v381_v34 = vld [vmem:[#allocation6 + $0x200] sm:$0xff]  ;;  %v4534_v36 = vcombine.low %v373_v30, %v377_v31 }
  0x7c   : > { %1092 = vmatpush1.bf16.msra.mxu1 %v4502_v19  ;;  %v385_v35 = vld [vmem:[#allocation6 + $0x220] sm:$0xff]  ;;  %v227_v19 = vld [vmem:[%s5571_s5 + $0x30] sm:$0xff] }
  0x7d   : > { %1093 = vmatprep.subr.bf16.mxu1 %v4511_v21  ;;  %v4543_v37 = vcombine.high %v381_v34, %v385_v35  ;;  %v389_v38 = vld [vmem:[#allocation6 + $0x240] sm:$0xff]  ;;  %v4542_v40 = vcombine.low %v381_v34, %v385_v35  ;;  %v230_v21 = vld [vmem:[%s5571_s5 + $0x48] sm:$0xff]  ;;  %v4505_v35 = vcombine.high %v342_v26, %v346_v27 }
  0x7e   : > { %v393_v39 = vld [vmem:[#allocation6 + $0x260] sm:$0xff]  ;;  %v5608_v31 = vpack.c.bf16 %v232_v22, %v230_v21  ;;  %v354_v34 = vld [vmem:[#allocation6 + $0x128] sm:$0xff]  ;;  %v243_v21 = vld [vmem:[%s5571_s5 + $0xb0] sm:$0xff] }
  0x7f   : > { %v4551_v41 = vcombine.high %v389_v38, %v393_v39  ;;  %v397_v42 = vld [vmem:[#allocation6 + $0x280] sm:$0xff]  ;;  %v4550_v44 = vcombine.low %v389_v38, %v393_v39  ;;  %v234_v38 = vld [vmem:[%s5571_s5 + $0x68] sm:$0xff]  ;;  %v236_v39 = vld [vmem:[%s5571_s5 + $0x78] sm:$0xff] }
  0x80   : > { %1094 = vmatpush1.bf16.msra.mxu1 %v4510_v24  ;;  %v401_v43 = vld [vmem:[#allocation6 + $0x2a0] sm:$0xff]  ;;  %v5601_v24 = vld [vmem:[#allocation6 + $0x30] sm:$0xff] }
  0x81   : > { %1095 = vmatprep.subr.bf16.mxu1 %v4519_v25  ;;  %v4559_v45 = vcombine.high %v397_v42, %v401_v43  ;;  %v405_v46 = vld [vmem:[#allocation6 + $0x2c0] sm:$0xff]  ;;  %v4558_v48 = vcombine.low %v397_v42, %v401_v43  ;;  %v4488_v25 = vcombine.low %v326_v9, %v330_v10  ;;  %v362_v42 = vld [vmem:[#allocation6 + $0x168] sm:$0xff] }
  0x82   : > { %v409_v47 = vld [vmem:[#allocation6 + $0x2e0] sm:$0xff]  ;;  %v394_v9 = vld [vmem:[#allocation6 + $0x268] sm:$0xff] }
  0x83   : > { %v413_v49 = vld [vmem:[#allocation6 + $0x300] sm:$0xff]  ;;  %v4567_v51 = vcombine.high %v405_v46, %v409_v47  ;;  %v4566_v52 = vcombine.low %v405_v46, %v409_v47  ;;  %v366_v47 = vld [vmem:[#allocation6 + $0x188] sm:$0xff] }
  0x84   : > { %1096 = vmatpush1.bf16.msra.mxu1 %v4518_v28  ;;  %v417_v50 = vld [vmem:[#allocation6 + $0x320] sm:$0xff]  ;;  %v4482_v28 = vcombine.low %v5599_v23, %v5601_v24 }
  0x85   : > { %1097 = vmatprep.subr.bf16.mxu1 %v4527_v29  ;;  %v421_v53 = vld [vmem:[#allocation6 + $0x340] sm:$0xff]  ;;  %v4575_v55 = vcombine.high %v413_v49, %v417_v50  ;;  %v4574_v56 = vcombine.low %v413_v49, %v417_v50  ;;  %v4497_v29 = vcombine.high %v334_v15, %v338_v16 }
  0x86   : > { %v425_v54 = vld [vmem:[#allocation6 + $0x360] sm:$0xff] }
  0x87   : > { %v429_v57 = vld [vmem:[#allocation6 + $0x380] sm:$0xff]  ;;  %v4583_v59 = vcombine.high %v421_v53, %v425_v54  ;;  %v4582_v60 = vcombine.low %v421_v53, %v425_v54  ;;  %v240_v53 = vld [vmem:[%s5571_s5 + $0x98] sm:$0xff] }
  0x88   : > { %1098 = vmatpush1.bf16.msra.mxu1 %v4526_v32  ;;  %v433_v58 = vld [vmem:[#allocation6 + $0x3a0] sm:$0xff]  ;;  %v4496_v32 = vcombine.low %v334_v15, %v338_v16  ;;  %v398_v16 = vld [vmem:[#allocation6 + $0x288] sm:$0xff] }
  0x89   : > { %1099 = vmatprep.subr.bf16.mxu1 %v4535_v33  ;;  %v437_v61 = vld [vmem:[#allocation6 + $0x3c0] sm:$0xff]  ;;  %v4591_v63 = vcombine.high %v429_v57, %v433_v58  ;;  %v4590_v0 = vcombine.low %v429_v57, %v433_v58  ;;  %v350_v33 = vld [vmem:[#allocation6 + $0x108] sm:$0xff] }
  0x8a   : > { %v441_v62 = vld [vmem:[#allocation6 + $0x3e0] sm:$0xff]  ;;  %v4513_v43 = vcombine.high %v350_v33, %v354_v34  ;;  %v4512_v46 = vcombine.low %v350_v33, %v354_v34  ;;  %v406_v33 = vld [vmem:[#allocation6 + $0x2c8] sm:$0xff] }
  0x8b   : > { %v4599_v3 = vcombine.high %v437_v61, %v441_v62  ;;  %v221_v4 = vld [vmem:[%s5571_s5] sm:$0xff]  ;;  %v4598_v8 = vcombine.low %v437_v61, %v441_v62  ;;  %v382_v62 = vld [vmem:[#allocation6 + $0x208] sm:$0xff] }
  0x8c   : > { %1100 = vmatpush1.bf16.msra.mxu1 %v4534_v36  ;;  %v5590_v12 = vpack.c.bf16 %v223_v5, %v221_v4  ;;  %v225_v18 = vld [vmem:[%s5571_s5 + $0x20] sm:$0xff]  ;;  %v242_v5 = vld [vmem:[%s5571_s5 + $0xa8] sm:$0xff] }
  0x8d   : > { %1101 = vmatprep.subr.bf16.mxu1 %v4543_v37  ;;  %v5606_v30 = vpack.c.bf16 %v227_v19, %v225_v18  ;;  %v229_v36 = vld [vmem:[%s5571_s5 + $0x40] sm:$0xff]  ;;  %v231_v37 = vld [vmem:[%s5571_s5 + $0x50] sm:$0xff]  ;;  %v410_v34 = vld [vmem:[#allocation6 + $0x2e8] sm:$0xff] }
  0x8e   : > { %v233_v50 = vld [vmem:[%s5571_s5 + $0x60] sm:$0xff]  ;;  %v5014_v19 = vld [vmem:[#allocation8 + $0x14] ss:$8 sps:$4 sm:$0xff]  }
  0x8f   : > { %v237_v1 = vld [vmem:[%s5571_s5 + $0x80] sm:$0xff] }
  0x90   : > { %1102 = vmatpush1.bf16.msra.mxu1 %v4542_v40  ;;  %v4504_v40 = vcombine.low %v342_v26, %v346_v27  ;;  %v5013_v4 = vld [vmem:[#allocation8] ss:$8 sps:$4 sm:$0xff]   ;;  %v5636_v10 = vpack.c.bf16 %v239_v2, %v237_v1  ;;  %v5017_v26 = vld [vmem:[#allocation8 + $0x24] ss:$8 sps:$4 sm:$0xff]   ;;  %v5026_v1 = vld [vmem:[#allocation8 + $0x54] ss:$8 sps:$4 sm:$0xff]  }
  0x91   : > { %1103 = vmatprep.subr.bf16.mxu1 %v4551_v41  ;;  %v358_v41 = vld [vmem:[#allocation6 + $0x148] sm:$0xff]  ;;  %v241_v18 = vld [vmem:[%s5571_s5 + $0xa0] sm:$0xff]  ;;  %v251_v2 = vld [vmem:[%s5571_s5 + $0xf0] sm:$0xff] }
  0x92   : > { %v4521_v49 = vcombine.high %v358_v41, %v362_v42  ;;  %v4520_v54 = vcombine.low %v358_v41, %v362_v42  ;;  %v246_v27 = vld [vmem:[%s5571_s5 + $0xc8] sm:$0xff]  ;;  %v245_v42 = vld [vmem:[%s5571_s5 + $0xc0] sm:$0xff] }
  0x93   : > { %v418_v41 = vld [vmem:[#allocation6 + $0x328] sm:$0xff] }
  0x94   : > { %1104 = vmatpush1.bf16.msra.mxu1 %v4550_v44  ;;  %v5616_v44 = vpack.c.bf16 %v231_v37, %v229_v36  ;;  %v5646_v36 = vpack.c.bf16 %v243_v21, %v241_v18  ;;  %v253_v21 = vld [vmem:[%s5571_s5 + $0x100] sm:$0xff] }
  0x95   : > { %1105 = vmatprep.subr.bf16.mxu1 %v4559_v45  ;;  %v5618_v45 = vpack.c.bf16 %v236_v39, %v234_v38  ;;  %v4569_v39 = vcombine.high %v406_v33, %v410_v34 }
  0x98   : > { %1106 = vmatpush1.bf16.msra.mxu1 %v4558_v48  ;;  %v370_v48 = vld [vmem:[#allocation6 + $0x1a8] sm:$0xff] }
  0x99   : > { %1107 = vmatprep.subr.bf16.mxu1 %v4567_v51  ;;  %v235_v51 = vld [vmem:[%s5571_s5 + $0x70] sm:$0xff]  ;;  %v4529_v57 = vcombine.high %v366_v47, %v370_v48 }
  0x9a   : > { %v5626_v58 = vpack.c.bf16 %v235_v51, %v233_v50  ;;  %v250_v50 = vld [vmem:[%s5571_s5 + $0xe8] sm:$0xff]  ;;  %v252_v51 = vld [vmem:[%s5571_s5 + $0xf8] sm:$0xff] }
  0x9c   : > { %1108 = vmatpush1.bf16.msra.mxu1 %v4566_v52  ;;  %v238_v52 = vld [vmem:[%s5571_s5 + $0x88] sm:$0xff] }
  0x9d   : > { %1109 = vmatprep.subr.bf16.mxu1 %v4575_v55  ;;  %v374_v55 = vld [vmem:[#allocation6 + $0x1c8] sm:$0xff] }
  0xa0   : > { %1110 = vmatpush1.bf16.msra.mxu1 %v4574_v56  ;;  %v378_v56 = vld [vmem:[#allocation6 + $0x1e8] sm:$0xff] }
  0xa1   : > { %1111 = vmatprep.subr.bf16.mxu1 %v4583_v59  ;;  %v5628_v59 = vpack.c.bf16 %v240_v53, %v238_v52  ;;  %v4537_v61 = vcombine.high %v374_v55, %v378_v56  ;;  %v422_v53 = vld [vmem:[#allocation6 + $0x348] sm:$0xff] }
  0xa4   : > { %1112 = vmatpush1.bf16.msra.mxu1 %v4582_v60  ;;  %v4528_v60 = vcombine.low %v366_v47, %v370_v48  ;;  %v4568_v47 = vcombine.low %v406_v33, %v410_v34  ;;  %v5022_v48 = vld [vmem:[#allocation8 + $0x30] ss:$8 sps:$4 sm:$0xff]   ;;  %v4483_v34 = vcombine.high %v5599_v23, %v5601_v24 }
  0xa5   : > { %1113 = vmatprep.subr.bf16.mxu1 %v4591_v63  ;;  %v386_v63 = vld [vmem:[#allocation6 + $0x228] sm:$0xff]  ;;  %v260_v33 = vld [vmem:[%s5571_s5 + $0x138] sm:$0xff]  ;;  %v351_v23 = vld [vmem:[#allocation6 + $0x110] sm:$0xff] }
  0xa6   : > { %v4545_v7 = vcombine.high %v382_v62, %v386_v63  ;;  %v355_v24 = vld [vmem:[#allocation6 + $0x130] sm:$0xff] }
  0xa8   : > { %1114 = vmatpush1.bf16.msra.mxu1 %v4590_v0  ;;  %v5011_v0 = vld [vmem:[#allocation8 + $0x4] ss:$8 sps:$4 sm:$0xff]  }
  0xa9   : > { %1115 = vmatprep.subr.bf16.mxu1 %v4599_v3  ;;  %v4536_v3 = vcombine.low %v374_v55, %v378_v56  ;;  %3521 = vmatprep.subr.bf16.mxu0 %v5011_v0  ;;  %v5025_v55 = vld [vmem:[#allocation8 + $0x40] ss:$8 sps:$4 sm:$0xff]  }
  0xaa   : > { %3522 = vmatpush1.bf16.msra.mxu0 %v5013_v4  ;;  %v249_v0 = vld [vmem:[%s5571_s5 + $0xe0] sm:$0xff]  ;;  %v5028_v4 = vld [vmem:[#allocation8 + $0x50] ss:$8 sps:$4 sm:$0xff]  }
  0xab   : > { %3523 = vmatprep.subr.bf16.mxu0 %v5014_v19 }
  0xac   : > { %1116 = vmatpush1.bf16.msra.mxu1 %v4598_v8  ;;  %v390_v8 = vld [vmem:[#allocation6 + $0x248] sm:$0xff] }
  0xad   : > { %1278 = vmatprep.subr.bf16.mxu1 %v4481_v11  ;;  %v5638_v11 = vpack.c.bf16 %v244_v6, %v242_v5  ;;  %v4553_v15 = vcombine.high %v390_v8, %v394_v9  ;;  %v4552_v22 = vcombine.low %v390_v8, %v394_v9  ;;  %v5029_v5 = vld [vmem:[#allocation8 + $0x64] ss:$8 sps:$4 sm:$0xff]  }
  0xae   : > { %v254_v6 = vld [vmem:[%s5571_s5 + $0x108] sm:$0xff] }
  0xaf   : > { %1118 = vmatmul.mubr.bf16.vlgmr.msra.gmra.mrb[0].mxu1 %v5590_v12  ;;  %v438_v9 = vld [vmem:[#allocation6 + $0x3c8] sm:$0xff] }
  0xb0   : > { %1279 = vmatpush1.bf16.msra.mxu1 %v4480_v13  ;;  %1127 = vmatprep.mubr.bf16.mxu1 %v5592_v14  ;;  %v4544_v13 = vcombine.low %v382_v62, %v386_v63  ;;  %v430_v62 = vld [vmem:[#allocation6 + $0x388] sm:$0xff] }
  0xb1   : > { %1280 = vmatprep.subr.bf16.mxu1 %v4489_v17  ;;  %v402_v17 = vld [vmem:[#allocation6 + $0x2a8] sm:$0xff] }
  0xb2   : > { %v4560_v38 = vcombine.low %v398_v16, %v402_v17  ;;  %v434_v63 = vld [vmem:[#allocation6 + $0x3a8] sm:$0xff] }
  0xb3   : > { %v4593_v8 = vcombine.high %v430_v62, %v434_v63  ;;  %v4592_v18 = vcombine.low %v430_v62, %v434_v63  ;;  %v268_v62 = vld [vmem:[%s5571_s5 + $0x178] sm:$0xff]  ;;  %v5049_v63 = vld [vmem:[#allocation8 + $0xc0] ss:$8 sps:$4 sm:$0xff]  }
  0xb4   : > { %1281 = vmatpush1.bf16.msra.mxu1 %v4488_v25  ;;  %v5016_v25 = vld [vmem:[#allocation8 + $0x10] ss:$8 sps:$4 sm:$0xff]  }
  0xb5   : > { %1282 = vmatprep.subr.bf16.mxu1 %v4497_v29  ;;  %v248_v29 = vld [vmem:[%s5571_s5 + $0xd8] sm:$0xff]  ;;  %3524 = vmatpush1.bf16.msra.mxu0 %v5016_v25  ;;  %v255_v25 = vld [vmem:[%s5571_s5 + $0x110] sm:$0xff] }
  0xb6   : > { %3525 = vmatprep.subr.bf16.mxu0 %v5017_v26  ;;  %v5648_v37 = vpack.c.bf16 %v248_v29, %v246_v27  ;;  %v5034_v27 = vld [vmem:[#allocation8 + $0x70] ss:$8 sps:$4 sm:$0xff]   ;;  %v5035_v29 = vld [vmem:[#allocation8 + $0x84] ss:$8 sps:$4 sm:$0xff]  }
  0xb7   : > { %1128 = vmatmul.mubr.bf16.gmra.mrb[4].mxu1 %v5606_v30 }
  0xb8   : > { %1137 = vmatprep.mubr.bf16.mxu1 %v5608_v31  ;;  %1283 = vmatpush1.bf16.msra.mxu1 %v4496_v32  ;;  %v4561_v32 = vcombine.high %v398_v16, %v402_v17  ;;  %v5666_v16 = vpack.c.bf16 %v251_v2, %v249_v0  ;;  %v5050_v2 = vld [vmem:[#allocation8 + $0xd4] ss:$8 sps:$4 sm:$0xff]  }
  0xb9   : > { %1284 = vmatprep.subr.bf16.mxu1 %v4505_v35  ;;  %v5019_v35 = vld [vmem:[#allocation8 + $0x20] ss:$8 sps:$4 sm:$0xff]  }
  0xba   : > { %3526 = vmatpush1.bf16.msra.mxu0 %v5019_v35  ;;  %v5037_v35 = vld [vmem:[#allocation8 + $0x80] ss:$8 sps:$4 sm:$0xff]  }
  0xbc   : > { %1285 = vmatpush1.bf16.msra.mxu1 %v4504_v40  ;;  %v414_v40 = vld [vmem:[#allocation6 + $0x308] sm:$0xff] }
  0xbd   : > { %1286 = vmatprep.subr.bf16.mxu1 %v4513_v43  ;;  %v5020_v43 = vld [vmem:[#allocation8 + $0x34] ss:$8 sps:$4 sm:$0xff]   ;;  %v4577_v52 = vcombine.high %v414_v40, %v418_v41 }
  0xbe   : > { %3527 = vmatprep.subr.bf16.mxu0 %v5020_v43  ;;  %v5040_v43 = vld [vmem:[#allocation8 + $0x90] ss:$8 sps:$4 sm:$0xff]  }
  0xbf   : > { %1138 = vmatmul.mubr.bf16.gmra.mrb[8].mxu1 %v5616_v44  ;;  %3528 = vmatpush1.bf16.msra.mxu0 %v5022_v48  ;;  %v264_v48 = vld [vmem:[%s5571_s5 + $0x158] sm:$0xff] }
  0xc0   : > { %1147 = vmatprep.mubr.bf16.mxu1 %v5618_v45  ;;  %1287 = vmatpush1.bf16.msra.mxu1 %v4512_v46  ;;  %v247_v46 = vld [vmem:[%s5571_s5 + $0xd0] sm:$0xff] }
  0xc1   : > { %1288 = vmatprep.subr.bf16.mxu1 %v4521_v49  ;;  %v5023_v49 = vld [vmem:[#allocation8 + $0x44] ss:$8 sps:$4 sm:$0xff]   ;;  %v5656_v56 = vpack.c.bf16 %v247_v46, %v245_v42  ;;  %v259_v42 = vld [vmem:[%s5571_s5 + $0x130] sm:$0xff] }
  0xc2   : > { %3529 = vmatprep.subr.bf16.mxu0 %v5023_v49  ;;  %v5041_v46 = vld [vmem:[#allocation8 + $0xa4] ss:$8 sps:$4 sm:$0xff]   ;;  %v5043_v49 = vld [vmem:[#allocation8 + $0xa0] ss:$8 sps:$4 sm:$0xff]  }
  0xc3   : > { %3530 = vmatpush1.bf16.msra.mxu0 %v5025_v55  ;;  %v5046_v55 = vld [vmem:[#allocation8 + $0xb0] ss:$8 sps:$4 sm:$0xff]  }
  0xc4   : > { %1289 = vmatpush1.bf16.msra.mxu1 %v4520_v54  ;;  %v426_v54 = vld [vmem:[#allocation6 + $0x368] sm:$0xff]  ;;  %3531 = vmatprep.subr.bf16.mxu0 %v5026_v1 }
  0xc5   : > { %1290 = vmatprep.subr.bf16.mxu1 %v4529_v57  ;;  %v5658_v57 = vpack.c.bf16 %v252_v51, %v250_v50 }
  0xc7   : > { %1148 = vmatmul.mubr.bf16.gmra.mrb[12].mxu1 %v5626_v58  ;;  %3532 = vmatpush1.bf16.msra.mxu0 %v5028_v4  ;;  %v267_v4 = vld [vmem:[%s5571_s5 + $0x170] sm:$0xff] }
  0xc8   : > { %1157 = vmatprep.mubr.bf16.mxu1 %v5628_v59  ;;  %1291 = vmatpush1.bf16.msra.mxu1 %v4528_v60  ;;  %v4576_v60 = vcombine.low %v414_v40, %v418_v41  ;;  %v257_v40 = vld [vmem:[%s5571_s5 + $0x120] sm:$0xff]  ;;  %v5038_v41 = vld [vmem:[#allocation8 + $0x94] ss:$8 sps:$4 sm:$0xff]  }
  0xc9   : > { %1292 = vmatprep.subr.bf16.mxu1 %v4537_v61  ;;  %v4585_v61 = vcombine.high %v422_v53, %v426_v54  ;;  %3533 = vmatprep.subr.bf16.mxu0 %v5029_v5  ;;  %v5688_v50 = vpack.c.bf16 %v259_v42, %v257_v40  ;;  %v5052_v5 = vld [vmem:[#allocation8 + $0xd0] ss:$8 sps:$4 sm:$0xff]   ;;  %v5061_v40 = vld [vmem:[#allocation8 + $0x104] ss:$8 sps:$4 sm:$0xff]  }
  0xcc   : > { %1293 = vmatpush1.bf16.msra.mxu1 %v4536_v3  ;;  %v4584_v3 = vcombine.low %v422_v53, %v426_v54  ;;  %v5044_v53 = vld [vmem:[#allocation8 + $0xb4] ss:$8 sps:$4 sm:$0xff]  }
  0xcd   : > { %1294 = vmatprep.subr.bf16.mxu1 %v4545_v7  ;;  %v256_v7 = vld [vmem:[%s5571_s5 + $0x118] sm:$0xff]  ;;  %v263_v54 = vld [vmem:[%s5571_s5 + $0x150] sm:$0xff] }
  0xce   : > { %v5668_v17 = vpack.c.bf16 %v256_v7, %v254_v6  ;;  %v270_v6 = vld [vmem:[%s5571_s5 + $0x188] sm:$0xff]  ;;  %v272_v7 = vld [vmem:[%s5571_s5 + $0x198] sm:$0xff] }
  0xcf   : > { %1158 = vmatmul.mubr.bf16.gmra.mrb[16].mxu1 %v5636_v10 }
  0xd0   : > { %1167 = vmatprep.mubr.bf16.mxu1 %v5638_v11  ;;  %1295 = vmatpush1.bf16.msra.mxu1 %v4544_v13  ;;  %v442_v13 = vld [vmem:[#allocation6 + $0x3e8] sm:$0xff] }
  0xd1   : > { %1296 = vmatprep.subr.bf16.mxu1 %v4553_v15  ;;  %v5031_v15 = vld [vmem:[#allocation8 + $0x60] ss:$8 sps:$4 sm:$0xff]   ;;  %v4601_v19 = vcombine.high %v438_v9, %v442_v13  ;;  %v4600_v26 = vcombine.low %v438_v9, %v442_v13  ;;  %v5053_v9 = vld [vmem:[#allocation8 + $0xe4] ss:$8 sps:$4 sm:$0xff]   ;;  %v5710_v13 = vpack.c.bf16 %v272_v7, %v270_v6  ;;  %v347_v6 = vld [vmem:[#allocation6 + $0xf0] sm:$0xff] }
  0xd2   : > { %3534 = vmatpush1.bf16.msra.mxu0 %v5031_v15  ;;  %v5055_v15 = vld [vmem:[#allocation8 + $0xe0] ss:$8 sps:$4 sm:$0xff]   ;;  %v5755_v7 = vld [vmem:[#allocation6 + $0x18] sm:$0xff] }
  0xd4   : > { %1297 = vmatpush1.bf16.msra.mxu1 %v4552_v22  ;;  %v5032_v22 = vld [vmem:[#allocation8 + $0x74] ss:$8 sps:$4 sm:$0xff]  }
  0xd5   : > { %1298 = vmatprep.subr.bf16.mxu1 %v4561_v32  ;;  %v258_v32 = vld [vmem:[%s5571_s5 + $0x128] sm:$0xff]  ;;  %3535 = vmatprep.subr.bf16.mxu0 %v5032_v22  ;;  %v5058_v22 = vld [vmem:[#allocation8 + $0xf0] ss:$8 sps:$4 sm:$0xff]  }
  0xd6   : > { %3536 = vmatpush1.bf16.msra.mxu0 %v5034_v27 }
  0xd7   : > { %1168 = vmatmul.mubr.bf16.gmra.mrb[20].mxu1 %v5646_v36  ;;  %3537 = vmatprep.subr.bf16.mxu0 %v5035_v29 }
  0xd8   : > { %1177 = vmatprep.mubr.bf16.mxu1 %v5648_v37  ;;  %1299 = vmatpush1.bf16.msra.mxu1 %v4560_v38  ;;  %v5678_v38 = vpack.c.bf16 %v255_v25, %v253_v21  ;;  %v271_v21 = vld [vmem:[%s5571_s5 + $0x190] sm:$0xff]  ;;  %v274_v25 = vld [vmem:[%s5571_s5 + $0x1a8] sm:$0xff] }
  0xd9   : > { %1300 = vmatprep.subr.bf16.mxu1 %v4569_v39  ;;  %v5680_v39 = vpack.c.bf16 %v260_v33, %v258_v32  ;;  %v273_v32 = vld [vmem:[%s5571_s5 + $0x1a0] sm:$0xff]  ;;  %v275_v33 = vld [vmem:[%s5571_s5 + $0x1b0] sm:$0xff] }
  0xda   : > { %3538 = vmatpush1.bf16.msra.mxu0 %v5037_v35  ;;  %v280_v35 = vld [vmem:[%s5571_s5 + $0x1d8] sm:$0xff] }
  0xdb   : > { %3539 = vmatprep.subr.bf16.mxu0 %v5038_v41  ;;  %v5728_v41 = vpack.c.bf16 %v275_v33, %v273_v32  ;;  %v367_v33 = vld [vmem:[#allocation6 + $0x190] sm:$0xff] }
  0xdc   : > { %1301 = vmatpush1.bf16.msra.mxu1 %v4568_v47  ;;  %v262_v47 = vld [vmem:[%s5571_s5 + $0x148] sm:$0xff] }
  0xdd   : > { %1302 = vmatprep.subr.bf16.mxu1 %v4577_v52  ;;  %v5690_v51 = vpack.c.bf16 %v264_v48, %v262_v47  ;;  %v261_v52 = vld [vmem:[%s5571_s5 + $0x140] sm:$0xff]  ;;  %v282_v47 = vld [vmem:[%s5571_s5 + $0x1e8] sm:$0xff]  ;;  %v284_v48 = vld [vmem:[%s5571_s5 + $0x1f8] sm:$0xff] }
  0xde   : > { %3540 = vmatpush1.bf16.msra.mxu0 %v5040_v43  ;;  %v5698_v0 = vpack.c.bf16 %v263_v54, %v261_v52  ;;  %v277_v43 = vld [vmem:[%s5571_s5 + $0x1c0] sm:$0xff]  ;;  %v5740_v52 = vpack.c.bf16 %v284_v48, %v282_v47  ;;  %v283_v54 = vld [vmem:[%s5571_s5 + $0x1f0] sm:$0xff] }
  0xdf   : > { %1178 = vmatmul.mubr.bf16.gmra.mrb[24].mxu1 %v5656_v56  ;;  %3541 = vmatprep.subr.bf16.mxu0 %v5041_v46  ;;  %v279_v46 = vld [vmem:[%s5571_s5 + $0x1d0] sm:$0xff] }
  0xe0   : > { %1187 = vmatprep.mubr.bf16.mxu1 %v5658_v57  ;;  %1303 = vmatpush1.bf16.msra.mxu1 %v4576_v60  ;;  %v5047_v60 = vld [vmem:[#allocation8 + $0xc4] ss:$8 sps:$4 sm:$0xff]  }
  0xe1   : > { %1304 = vmatprep.subr.bf16.mxu1 %v4585_v61  ;;  %v266_v61 = vld [vmem:[%s5571_s5 + $0x168] sm:$0xff] }
  0xe2   : > { %3542 = vmatpush1.bf16.msra.mxu0 %v5043_v49  ;;  %v5700_v1 = vpack.c.bf16 %v268_v62, %v266_v61  ;;  %v5738_v49 = vpack.c.bf16 %v279_v46, %v277_v43  ;;  %v331_v61 = vld [vmem:[#allocation6 + $0x70] sm:$0xff] }
  0xe3   : > { %3543 = vmatprep.subr.bf16.mxu0 %v5044_v53  ;;  %v281_v53 = vld [vmem:[%s5571_s5 + $0x1e0] sm:$0xff]  ;;  %v375_v43 = vld [vmem:[#allocation6 + $0x1d0] sm:$0xff] }
  0xe4   : > { %1305 = vmatpush1.bf16.msra.mxu1 %v4584_v3  ;;  %v265_v3 = vld [vmem:[%s5571_s5 + $0x160] sm:$0xff]  ;;  %v379_v46 = vld [vmem:[#allocation6 + $0x1f0] sm:$0xff] }
  0xe5   : > { %1306 = vmatprep.subr.bf16.mxu1 %v4593_v8  ;;  %v5708_v8 = vpack.c.bf16 %v267_v4, %v265_v3  ;;  %v4539_v48 = vcombine.high %v375_v43, %v379_v46 }
  0xe6   : > { %3544 = vmatpush1.bf16.msra.mxu0 %v5046_v55  ;;  %v5746_v55 = vpack.c.bf16 %v283_v54, %v281_v53  ;;  %v383_v53 = vld [vmem:[#allocation6 + $0x210] sm:$0xff] }
  0xe7   : > { %1188 = vmatmul.mubr.bf16.gmra.mrb[28].mxu1 %v5666_v16  ;;  %3545 = vmatprep.subr.bf16.mxu0 %v5047_v60  ;;  %v327_v60 = vld [vmem:[#allocation6 + $0x50] sm:$0xff] }
  0xe8   : > { %1197 = vmatprep.mubr.bf16.mxu1 %v5668_v17  ;;  %1307 = vmatpush1.bf16.msra.mxu1 %v4592_v18  ;;  %v5056_v18 = vld [vmem:[#allocation8 + $0xf4] ss:$8 sps:$4 sm:$0xff]   ;;  %v4491_v62 = vcombine.high %v327_v60, %v331_v61  ;;  %v4490_v3 = vcombine.low %v327_v60, %v331_v61  ;;  %v4538_v60 = vcombine.low %v375_v43, %v379_v46 }
  0xe9   : > { %1308 = vmatprep.subr.bf16.mxu1 %v4601_v19  ;;  %v269_v19 = vld [vmem:[%s5571_s5 + $0x180] sm:$0xff]  ;;  %v387_v54 = vld [vmem:[#allocation6 + $0x230] sm:$0xff] }
  0xea   : > { %3546 = vmatpush1.bf16.msra.mxu0 %v5049_v63  ;;  %v5718_v27 = vpack.c.bf16 %v271_v21, %v269_v19  ;;  %v335_v63 = vld [vmem:[#allocation6 + $0x90] sm:$0xff]  ;;  %v4515_v21 = vcombine.high %v351_v23, %v355_v24  ;;  %v4547_v61 = vcombine.high %v383_v53, %v387_v54 }
  0xeb   : > { %3547 = vmatprep.subr.bf16.mxu0 %v5050_v2  ;;  %v339_v2 = vld [vmem:[#allocation6 + $0xb0] sm:$0xff] }
  0xec   : > { %1309 = vmatpush1.bf16.msra.mxu1 %v4600_v26  ;;  %v276_v26 = vld [vmem:[%s5571_s5 + $0x1b8] sm:$0xff]  ;;  %v4499_v4 = vcombine.high %v335_v63, %v339_v2  ;;  %v435_v43 = vld [vmem:[#allocation6 + $0x3b0] sm:$0xff] }
  0xed   : > { %1471 = vmatprep.subr.bf16.mxu1 %v4483_v34  ;;  %v5720_v29 = vpack.c.bf16 %v276_v26, %v274_v25  ;;  %v278_v34 = vld [vmem:[%s5571_s5 + $0x1c8] sm:$0xff]  ;;  %v363_v25 = vld [vmem:[#allocation6 + $0x170] sm:$0xff]  ;;  %v4514_v26 = vcombine.low %v351_v23, %v355_v24 }
  0xee   : > { %3548 = vmatpush1.bf16.msra.mxu0 %v5052_v5  ;;  %v5730_v42 = vpack.c.bf16 %v280_v35, %v278_v34  ;;  %v343_v5 = vld [vmem:[#allocation6 + $0xd0] sm:$0xff] }
  0xef   : > { %1198 = vmatmul.mubr.bf16.gmra.mrb[32].mxu1 %v5678_v38  ;;  %3549 = vmatprep.subr.bf16.mxu0 %v5053_v9  ;;  %v5757_v9 = vld [vmem:[#allocation6 + $0x38] sm:$0xff]  ;;  %v4507_v19 = vcombine.high %v343_v5, %v347_v6  ;;  %v371_v34 = vld [vmem:[#allocation6 + $0x1b0] sm:$0xff] }
  0xf0   : > { %1207 = vmatprep.mubr.bf16.mxu1 %v5680_v39  ;;  %v4530_v47 = vcombine.low %v367_v33, %v371_v34  ;;  %v411_v23 = vld [vmem:[#allocation6 + $0x2f0] sm:$0xff] }
  0xf2   : > { %3550 = vmatpush1.bf16.msra.mxu0 %v5055_v15  ;;  %v4498_v15 = vcombine.low %v335_v63, %v339_v2  ;;  %v395_v63 = vld [vmem:[#allocation6 + $0x270] sm:$0xff]  ;;  %v4546_v2 = vcombine.low %v383_v53, %v387_v54 }
  0xf3   : > { %3551 = vmatprep.subr.bf16.mxu0 %v5056_v18  ;;  %v4484_v18 = vcombine.low %v5755_v7, %v5757_v9  ;;  %v443_v53 = vld [vmem:[#allocation6 + $0x3f0] sm:$0xff] }
  0xf6   : > { %3552 = vmatpush1.bf16.msra.mxu0 %v5058_v22  ;;  %v359_v22 = vld [vmem:[#allocation6 + $0x150] sm:$0xff] }
  0xf7   : > { %1208 = vmatmul.mubr.bf16.gmra.mrb[36].mxu1 %v5688_v50  ;;  %3714 = vmatprep.subr.bf16.mxu0 %v5061_v40  ;;  %v4523_v32 = vcombine.high %v359_v22, %v363_v25  ;;  %v4522_v35 = vcombine.low %v359_v22, %v363_v25  ;;  %v4531_v40 = vcombine.high %v367_v33, %v371_v34  ;;  %v419_v22 = vld [vmem:[#allocation6 + $0x330] sm:$0xff] }
  0xf8   : > { %1217 = vmatprep.mubr.bf16.mxu1 %v5690_v51  ;;  %v427_v33 = vld [vmem:[#allocation6 + $0x370] sm:$0xff] }
  0xff   : > { %1218 = vmatmul.mubr.bf16.gmra.mrb[40].mxu1 %v5698_v0 }
 0x100   : > { %1227 = vmatprep.mubr.bf16.mxu1 %v5700_v1 }
 0x107   : > { %1228 = vmatmul.mubr.bf16.gmra.mrb[44].mxu1 %v5708_v8 }
 0x108   : > { %1237 = vmatprep.mubr.bf16.mxu1 %v5710_v13 }
 0x10f   : > { %1238 = vmatmul.mubr.bf16.gmra.mrb[48].mxu1 %v5718_v27 }
 0x110   : > { %1247 = vmatprep.mubr.bf16.mxu1 %v5720_v29 }
 0x117   : > { %1248 = vmatmul.mubr.bf16.gmra.mrb[52].mxu1 %v5728_v41 }
 0x118   : > { %1257 = vmatprep.mubr.bf16.mxu1 %v5730_v42 }
 0x11f   : > { %1258 = vmatmul.mubr.bf16.gmra.mrb[56].mxu1 %v5738_v49 }
 0x120   : > { %1267 = vmatprep.mubr.bf16.mxu1 %v5740_v52 }
 0x127   : > { %1268 = vmatmul.mubr.bf16.gmra.mrb[60].mxu1 %v5746_v55 }
 0x128   : > { %1310 = vmatprep.mubr.bf16.mxu1 %v5583_v20 }
 0x12f   : > { %1311 = vmatmul.mubr.bf16.vlgmr.msra.gmra.mrb[64].mxu1 %v5590_v12 }
 0x130   : > { %1472 = vmatpush1.bf16.msra.mxu1 %v4482_v28  ;;  %1320 = vmatprep.mubr.bf16.mxu1 %v5592_v14  ;;  %v4506_v28 = vcombine.low %v343_v5, %v347_v6  ;;  %v403_v5 = vld [vmem:[#allocation6 + $0x2b0] sm:$0xff] }
 0x131   : > { %1473 = vmatprep.subr.bf16.mxu1 %v4491_v62  ;;  %v391_v62 = vld [vmem:[#allocation6 + $0x250] sm:$0xff] }
 0x132   : > { %v4554_v6 = vcombine.low %v391_v62, %v395_v63 }
 0x134   : > { %1474 = vmatpush1.bf16.msra.mxu1 %v4490_v3  ;;  %v4555_v3 = vcombine.high %v391_v62, %v395_v63  ;;  %v4485_v62 = vcombine.high %v5755_v7, %v5757_v9 }
 0x135   : > { %1475 = vmatprep.subr.bf16.mxu1 %v4499_v4  ;;  %v399_v4 = vld [vmem:[#allocation6 + $0x290] sm:$0xff] }
 0x136   : > { %v4562_v24 = vcombine.low %v399_v4, %v403_v5 }
 0x137   : > { %1321 = vmatmul.mubr.bf16.gmra.mrb[68].mxu1 %v5606_v30 }
 0x138   : > { %1330 = vmatprep.mubr.bf16.mxu1 %v5608_v31  ;;  %1476 = vmatpush1.bf16.msra.mxu1 %v4498_v15  ;;  %v4563_v15 = vcombine.high %v399_v4, %v403_v5 }
 0x139   : > { %1477 = vmatprep.subr.bf16.mxu1 %v4507_v19  ;;  %v407_v19 = vld [vmem:[#allocation6 + $0x2d0] sm:$0xff] }
 0x13a   : > { %v4570_v25 = vcombine.low %v407_v19, %v411_v23 }
 0x13c   : > { %1478 = vmatpush1.bf16.msra.mxu1 %v4506_v28  ;;  %v4571_v28 = vcombine.high %v407_v19, %v411_v23 }
 0x13d   : > { %1479 = vmatprep.subr.bf16.mxu1 %v4515_v21  ;;  %v415_v21 = vld [vmem:[#allocation6 + $0x310] sm:$0xff] }
 0x13e   : > { %v4578_v34 = vcombine.low %v415_v21, %v419_v22 }
 0x13f   : > { %1331 = vmatmul.mubr.bf16.gmra.mrb[72].mxu1 %v5616_v44 }
 0x140   : > { %1340 = vmatprep.mubr.bf16.mxu1 %v5618_v45  ;;  %1480 = vmatpush1.bf16.msra.mxu1 %v4514_v26  ;;  %v4579_v26 = vcombine.high %v415_v21, %v419_v22 }
 0x141   : > { %1481 = vmatprep.subr.bf16.mxu1 %v4523_v32  ;;  %v423_v32 = vld [vmem:[#allocation6 + $0x350] sm:$0xff] }
 0x142   : > { %v4586_v46 = vcombine.low %v423_v32, %v427_v33 }
 0x144   : > { %1482 = vmatpush1.bf16.msra.mxu1 %v4522_v35  ;;  %v4587_v35 = vcombine.high %v423_v32, %v427_v33  ;;  %v5059_v32 = vld [vmem:[#allocation8 + $0x100] ss:$8 sps:$4 sm:$0xff]  }
 0x145   : > { %1483 = vmatprep.subr.bf16.mxu1 %v4531_v40  ;;  %v431_v40 = vld [vmem:[#allocation6 + $0x390] sm:$0xff] }
 0x146   : > { %v4594_v54 = vcombine.low %v431_v40, %v435_v43 }
 0x147   : > { %1341 = vmatmul.mubr.bf16.gmra.mrb[76].mxu1 %v5626_v58 }
 0x148   : > { %1350 = vmatprep.mubr.bf16.mxu1 %v5628_v59  ;;  %1484 = vmatpush1.bf16.msra.mxu1 %v4530_v47  ;;  %v4595_v47 = vcombine.high %v431_v40, %v435_v43 }
 0x149   : > { %1485 = vmatprep.subr.bf16.mxu1 %v4539_v48  ;;  %v439_v48 = vld [vmem:[#allocation6 + $0x3d0] sm:$0xff] }
 0x14c   : > { %1486 = vmatpush1.bf16.msra.mxu1 %v4538_v60  ;;  %v4603_v60 = vcombine.high %v439_v48, %v443_v53 }
 0x14d   : > { %1487 = vmatprep.subr.bf16.mxu1 %v4547_v61  ;;  %v4602_v61 = vcombine.low %v439_v48, %v443_v53  ;;  %v5062_v53 = vld [vmem:[#allocation8 + $0x110] ss:$8 sps:$4 sm:$0xff]  }
 0x14f   : > { %1351 = vmatmul.mubr.bf16.gmra.mrb[80].mxu1 %v5636_v10 }
 0x150   : > { %1360 = vmatprep.mubr.bf16.mxu1 %v5638_v11  ;;  %1488 = vmatpush1.bf16.msra.mxu1 %v4546_v2 }
 0x151   : > { %1489 = vmatprep.subr.bf16.mxu1 %v4555_v3 }
 0x154   : > { %1490 = vmatpush1.bf16.msra.mxu1 %v4554_v6 }
 0x155   : > { %1491 = vmatprep.subr.bf16.mxu1 %v4563_v15 }
 0x157   : > { %1361 = vmatmul.mubr.bf16.gmra.mrb[84].mxu1 %v5646_v36 }
 0x158   : > { %1370 = vmatprep.mubr.bf16.mxu1 %v5648_v37  ;;  %1492 = vmatpush1.bf16.msra.mxu1 %v4562_v24 }
 0x159   : > { %1493 = vmatprep.subr.bf16.mxu1 %v4571_v28 }
 0x15c   : > { %1494 = vmatpush1.bf16.msra.mxu1 %v4570_v25 }
 0x15d   : > { %1495 = vmatprep.subr.bf16.mxu1 %v4579_v26 }
 0x15f   : > { %1371 = vmatmul.mubr.bf16.gmra.mrb[88].mxu1 %v5656_v56 }
 0x160   : > { %1380 = vmatprep.mubr.bf16.mxu1 %v5658_v57  ;;  %1496 = vmatpush1.bf16.msra.mxu1 %v4578_v34 }
 0x161   : > { %1497 = vmatprep.subr.bf16.mxu1 %v4587_v35  ;;  %v5064_v35 = vld [vmem:[#allocation8 + $0x114] ss:$8 sps:$4 sm:$0xff]  }
 0x164   : > { %1498 = vmatpush1.bf16.msra.mxu1 %v4586_v46 }
 0x165   : > { %1499 = vmatprep.subr.bf16.mxu1 %v4595_v47 }
 0x167   : > { %1381 = vmatmul.mubr.bf16.gmra.mrb[92].mxu1 %v5666_v16 }
 0x168   : > { %1390 = vmatprep.mubr.bf16.mxu1 %v5668_v17  ;;  %1500 = vmatpush1.bf16.msra.mxu1 %v4594_v54 }
 0x169   : > { %1501 = vmatprep.subr.bf16.mxu1 %v4603_v60 }
 0x16c   : > { %1502 = vmatpush1.bf16.msra.mxu1 %v4602_v61  ;;  %v5067_v61 = vld [vmem:[#allocation8 + $0x124] ss:$8 sps:$4 sm:$0xff]  }
 0x16d   : > { %1664 = vmatprep.subr.bf16.mxu1 %v4485_v62 }
 0x16f   : > { %1391 = vmatmul.mubr.bf16.gmra.mrb[96].mxu1 %v5678_v38 }
 0x170   : > { %1400 = vmatprep.mubr.bf16.mxu1 %v5680_v39 }
 0x177   : > { %1401 = vmatmul.mubr.bf16.gmra.mrb[100].mxu1 %v5688_v50 }
 0x178   : > { %1410 = vmatprep.mubr.bf16.mxu1 %v5690_v51 }
 0x17f   : > { %1411 = vmatmul.mubr.bf16.gmra.mrb[104].mxu1 %v5698_v0 }
 0x180   : > { %1420 = vmatprep.mubr.bf16.mxu1 %v5700_v1 }
 0x182   : > { %v1119_v63 = vpop.f32.mrb[0].mxu1 }
 0x183   : > { %v1857_v2 = vmax.f32 %v1119_v63, 0.0  ;;  %v1121_v3 = vpop.f32.mrb[1].mxu1 }
 0x184   : > { %v1858_v4 = vmax.f32 %v1121_v3, 0.0  ;;  %v1123_v5 = vpop.f32.mrb[2].mxu1 }
 0x185   : > { %v1865_v6 = vmax.f32 %v1123_v5, 0.0  ;;  %v1125_v15 = vpop.f32.mrb[3].mxu1  ;;  %v2113_v23 = vmul.f32 %v1857_v2, %v1857_v2  ;;  %v5065_v5 = vld [vmem:[#allocation8 + $0x120] ss:$8 sps:$4 sm:$0xff]  }
 0x186   : > { %v1866_v19 = vmax.f32 %v1125_v15, 0.0  ;;  %v2114_v28 = vmul.f32 %v1858_v4, %v1858_v4 }
 0x187   : > { %v2121_v24 = vmul.f32 %v1865_v6, %v1865_v6  ;;  %1421 = vmatmul.mubr.bf16.gmra.mrb[108].mxu1 %v5708_v8 }
 0x188   : > { %v2122_v21 = vmul.f32 %v1866_v19, %v1866_v19  ;;  %1430 = vmatprep.mubr.bf16.mxu1 %v5710_v13  ;;  %v5070_v19 = vld [vmem:[#allocation8 + $0x134] ss:$8 sps:$4 sm:$0xff]  }
 0x189   : > { %v2369_v22 = vpack.c.bf16 %v2121_v24, %v2113_v23 }
 0x18a   : > { %v1129_v25 = vpop.f32.mrb[4].mxu1  ;;  %v2370_v26 = vpack.c.bf16 %v2122_v21, %v2114_v28 }
 0x18b   : > { %v1873_v33 = vmax.f32 %v1129_v25, 0.0  ;;  %v1131_v34 = vpop.f32.mrb[5].mxu1  ;;  %v5068_v25 = vld [vmem:[#allocation8 + $0x130] ss:$8 sps:$4 sm:$0xff]  }
 0x18c   : > { %v1874_v40 = vmax.f32 %v1131_v34, 0.0  ;;  %v1133_v43 = vpop.f32.mrb[6].mxu1  ;;  %3553 = vmatprep.mubr.bf16.mxu0 %v2370_v26 }
 0x18d   : > { %v1881_v46 = vmax.f32 %v1133_v43, 0.0  ;;  %v1135_v47 = vpop.f32.mrb[7].mxu1  ;;  %3554 = vmatmul.mubr.bf16.vlgmr.msra.gmra.mrb[0].mxu0 %v2369_v22  ;;  %v2129_v54 = vmul.f32 %v1873_v33, %v1873_v33  ;;  %v5073_v33 = vld [vmem:[#allocation8 + $0x144] ss:$8 sps:$4 sm:$0xff]  }
 0x18e   : > { %v1882_v48 = vmax.f32 %v1135_v47, 0.0  ;;  %3715 = vmatpush1.bf16.msra.mxu0 %v5059_v32  ;;  %v2130_v62 = vmul.f32 %v1874_v40, %v1874_v40  ;;  %v5071_v47 = vld [vmem:[#allocation8 + $0x140] ss:$8 sps:$4 sm:$0xff]  }
 0x18f   : > { %v2137_v60 = vmul.f32 %v1881_v46, %v1881_v46  ;;  %1431 = vmatmul.mubr.bf16.gmra.mrb[112].mxu1 %v5718_v27  ;;  %3716 = vmatprep.subr.bf16.mxu0 %v5064_v35 }
 0x190   : > { %v2138_v63 = vmul.f32 %v1882_v48, %v1882_v48  ;;  %1440 = vmatprep.mubr.bf16.mxu1 %v5720_v29 }
 0x191   : > { %v2377_v2 = vpack.c.bf16 %v2137_v60, %v2129_v54  ;;  %v5076_v54 = vld [vmem:[#allocation8 + $0x154] ss:$8 sps:$4 sm:$0xff]  }
 0x192   : > { %v2378_v3 = vpack.c.bf16 %v2138_v63, %v2130_v62  ;;  %v1139_v4 = vpop.f32.mrb[8].mxu1  ;;  %3717 = vmatpush1.bf16.msra.mxu0 %v5062_v53 }
 0x193   : > { %v1889_v6 = vmax.f32 %v1139_v4, 0.0  ;;  %v1141_v15 = vpop.f32.mrb[9].mxu1  ;;  %3718 = vmatprep.subr.bf16.mxu0 %v5067_v61 }
 0x194   : > { %v1890_v23 = vmax.f32 %v1141_v15, 0.0  ;;  %v1143_v24 = vpop.f32.mrb[10].mxu1  ;;  %3563 = vmatprep.mubr.bf16.mxu0 %v2378_v3  ;;  %v5074_v3 = vld [vmem:[#allocation8 + $0x150] ss:$8 sps:$4 sm:$0xff]  }
 0x195   : > { %v1897_v28 = vmax.f32 %v1143_v24, 0.0  ;;  %v1145_v21 = vpop.f32.mrb[11].mxu1  ;;  %3564 = vmatmul.mubr.bf16.gmra.mrb[4].mxu0 %v2377_v2  ;;  %v2145_v26 = vmul.f32 %v1889_v6, %v1889_v6  ;;  %v5079_v6 = vld [vmem:[#allocation8 + $0x164] ss:$8 sps:$4 sm:$0xff]  }
 0x196   : > { %v1898_v22 = vmax.f32 %v1145_v21, 0.0  ;;  %3719 = vmatpush1.bf16.msra.mxu0 %v5065_v5  ;;  %v2146_v34 = vmul.f32 %v1890_v23, %v1890_v23  ;;  %v5077_v21 = vld [vmem:[#allocation8 + $0x160] ss:$8 sps:$4 sm:$0xff]  }
 0x197   : > { %v2153_v32 = vmul.f32 %v1897_v28, %v1897_v28  ;;  %1441 = vmatmul.mubr.bf16.gmra.mrb[116].mxu1 %v5728_v41  ;;  %3720 = vmatprep.subr.bf16.mxu0 %v5070_v19 }
 0x198   : > { %v2154_v35 = vmul.f32 %v1898_v22, %v1898_v22  ;;  %1450 = vmatprep.mubr.bf16.mxu1 %v5730_v42 }
 0x199   : > { %v2385_v40 = vpack.c.bf16 %v2153_v32, %v2145_v26  ;;  %v5082_v26 = vld [vmem:[#allocation8 + $0x174] ss:$8 sps:$4 sm:$0xff]  }
 0x19a   : > { %v2386_v43 = vpack.c.bf16 %v2154_v35, %v2146_v34  ;;  %v1149_v46 = vpop.f32.mrb[12].mxu1  ;;  %3721 = vmatpush1.bf16.msra.mxu0 %v5068_v25 }
 0x19b   : > { %v1905_v48 = vmax.f32 %v1149_v46, 0.0  ;;  %v1151_v53 = vpop.f32.mrb[13].mxu1  ;;  %3722 = vmatprep.subr.bf16.mxu0 %v5073_v33 }
 0x19c   : > { %v1906_v60 = vmax.f32 %v1151_v53, 0.0  ;;  %v1153_v61 = vpop.f32.mrb[14].mxu1  ;;  %3573 = vmatprep.mubr.bf16.mxu0 %v2386_v43  ;;  %v5080_v43 = vld [vmem:[#allocation8 + $0x170] ss:$8 sps:$4 sm:$0xff]  }
 0x19d   : > { %v1913_v62 = vmax.f32 %v1153_v61, 0.0  ;;  %v1155_v63 = vpop.f32.mrb[15].mxu1  ;;  %3574 = vmatmul.mubr.bf16.gmra.mrb[8].mxu0 %v2385_v40  ;;  %v2161_v4 = vmul.f32 %v1905_v48, %v1905_v48  ;;  %v5085_v48 = vld [vmem:[#allocation8 + $0x184] ss:$8 sps:$4 sm:$0xff]  }
 0x19e   : > { %v1914_v2 = vmax.f32 %v1155_v63, 0.0  ;;  %3723 = vmatpush1.bf16.msra.mxu0 %v5071_v47  ;;  %v2162_v15 = vmul.f32 %v1906_v60, %v1906_v60  ;;  %v328_v63 = vld [vmem:[#allocation6 + $0x58] sm:$0xff] }
 0x19f   : > { %v2169_v5 = vmul.f32 %v1913_v62, %v1913_v62  ;;  %1451 = vmatmul.mubr.bf16.gmra.mrb[120].mxu1 %v5738_v49  ;;  %3724 = vmatprep.subr.bf16.mxu0 %v5076_v54 }
 0x1a0   : > { %v2170_v19 = vmul.f32 %v1914_v2, %v1914_v2  ;;  %1460 = vmatprep.mubr.bf16.mxu1 %v5740_v52  ;;  %v332_v2 = vld [vmem:[#allocation6 + $0x78] sm:$0xff] }
 0x1a1   : > { %v2393_v23 = vpack.c.bf16 %v2169_v5, %v2161_v4 }
 0x1a2   : > { %v2394_v24 = vpack.c.bf16 %v2170_v19, %v2162_v15  ;;  %v1159_v28 = vpop.f32.mrb[16].mxu1  ;;  %3725 = vmatpush1.bf16.msra.mxu0 %v5074_v3  ;;  %v5083_v3 = vld [vmem:[#allocation8 + $0x180] ss:$8 sps:$4 sm:$0xff]  }
 0x1a3   : > { %v1921_v22 = vmax.f32 %v1159_v28, 0.0  ;;  %v1161_v25 = vpop.f32.mrb[17].mxu1  ;;  %3726 = vmatprep.subr.bf16.mxu0 %v5079_v6  ;;  %v5088_v6 = vld [vmem:[#allocation8 + $0x194] ss:$8 sps:$4 sm:$0xff]   ;;  %v4493_v28 = vcombine.high %v328_v63, %v332_v2 }
 0x1a4   : > { %v1922_v32 = vmax.f32 %v1161_v25, 0.0  ;;  %v1163_v33 = vpop.f32.mrb[18].mxu1  ;;  %3583 = vmatprep.mubr.bf16.mxu0 %v2394_v24  ;;  %v340_v25 = vld [vmem:[#allocation6 + $0xb8] sm:$0xff] }
 0x1a5   : > { %v1929_v34 = vmax.f32 %v1163_v33, 0.0  ;;  %v1165_v35 = vpop.f32.mrb[19].mxu1  ;;  %3584 = vmatmul.mubr.bf16.gmra.mrb[12].mxu0 %v2393_v23  ;;  %v2177_v46 = vmul.f32 %v1921_v22, %v1921_v22  ;;  %v336_v22 = vld [vmem:[#allocation6 + $0x98] sm:$0xff] }
 0x1a6   : > { %v1930_v40 = vmax.f32 %v1165_v35, 0.0  ;;  %3727 = vmatpush1.bf16.msra.mxu0 %v5077_v21  ;;  %v2178_v53 = vmul.f32 %v1922_v32, %v1922_v32  ;;  %v4500_v7 = vcombine.low %v336_v22, %v340_v25 }
 0x1a7   : > { %v2185_v47 = vmul.f32 %v1929_v34, %v1929_v34  ;;  %1461 = vmatmul.mubr.bf16.gmra.mrb[124].mxu1 %v5746_v55  ;;  %3728 = vmatprep.subr.bf16.mxu0 %v5082_v26  ;;  %v5086_v26 = vld [vmem:[#allocation8 + $0x190] ss:$8 sps:$4 sm:$0xff]   ;;  %v5091_v34 = vld [vmem:[#allocation8 + $0x1a4] ss:$8 sps:$4 sm:$0xff]  }
 0x1a8   : > { %v2186_v54 = vmul.f32 %v1930_v40, %v1930_v40  ;;  %1503 = vmatprep.mubr.bf16.mxu1 %v5583_v20 }
 0x1a9   : > { %v2401_v60 = vpack.c.bf16 %v2185_v47, %v2177_v46  ;;  %v4501_v47 = vcombine.high %v336_v22, %v340_v25 }
 0x1aa   : > { %v2402_v61 = vpack.c.bf16 %v2186_v54, %v2178_v53  ;;  %v1169_v62 = vpop.f32.mrb[20].mxu1  ;;  %3729 = vmatpush1.bf16.msra.mxu0 %v5080_v43  ;;  %v4492_v43 = vcombine.low %v328_v63, %v332_v2  ;;  %v344_v54 = vld [vmem:[#allocation6 + $0xd8] sm:$0xff] }
 0x1ab   : > { %v1937_v4 = vmax.f32 %v1169_v62, 0.0  ;;  %v1171_v5 = vpop.f32.mrb[21].mxu1  ;;  %3730 = vmatprep.subr.bf16.mxu0 %v5085_v48 }
 0x1ac   : > { %v1938_v15 = vmax.f32 %v1171_v5, 0.0  ;;  %v1173_v19 = vpop.f32.mrb[22].mxu1  ;;  %3593 = vmatprep.mubr.bf16.mxu0 %v2402_v61  ;;  %v5089_v61 = vld [vmem:[#allocation8 + $0x1a0] ss:$8 sps:$4 sm:$0xff]  }
 0x1ad   : > { %v1945_v23 = vmax.f32 %v1173_v19, 0.0  ;;  %v1175_v24 = vpop.f32.mrb[23].mxu1  ;;  %3594 = vmatmul.mubr.bf16.gmra.mrb[16].mxu0 %v2401_v60  ;;  %v2193_v32 = vmul.f32 %v1937_v4, %v1937_v4  ;;  %v348_v60 = vld [vmem:[#allocation6 + $0xf8] sm:$0xff] }
 0x1ae   : > { %v1946_v21 = vmax.f32 %v1175_v24, 0.0  ;;  %3731 = vmatpush1.bf16.msra.mxu0 %v5083_v3  ;;  %v2194_v35 = vmul.f32 %v1938_v15, %v1938_v15  ;;  %v5094_v4 = vld [vmem:[#allocation8 + $0x1b4] ss:$8 sps:$4 sm:$0xff]   ;;  %v4509_v63 = vcombine.high %v344_v54, %v348_v60  ;;  %v4508_v22 = vcombine.low %v344_v54, %v348_v60 }
 0x1af   : > { %v2201_v33 = vmul.f32 %v1945_v23, %v1945_v23  ;;  %1504 = vmatmul.mubr.bf16.vlgmr.msra.gmra.mrb[128].mxu1 %v5590_v12  ;;  %3732 = vmatprep.subr.bf16.mxu0 %v5088_v6  ;;  %v352_v15 = vld [vmem:[#allocation6 + $0x118] sm:$0xff] }
 0x1b0   : > { %v2202_v40 = vmul.f32 %v1946_v21, %v1946_v21  ;;  %1665 = vmatpush1.bf16.msra.mxu1 %v4484_v18  ;;  %1513 = vmatprep.mubr.bf16.mxu1 %v5592_v14  ;;  %v356_v19 = vld [vmem:[#allocation6 + $0x138] sm:$0xff]  ;;  %v5097_v21 = vld [vmem:[#allocation8 + $0x1c4] ss:$8 sps:$4 sm:$0xff]  }
 0x1b1   : > { %v2409_v46 = vpack.c.bf16 %v2201_v33, %v2193_v32  ;;  %1666 = vmatprep.subr.bf16.mxu1 %v4493_v28  ;;  %v5092_v23 = vld [vmem:[#allocation8 + $0x1b0] ss:$8 sps:$4 sm:$0xff]   ;;  %v4517_v33 = vcombine.high %v352_v15, %v356_v19 }
 0x1b2   : > { %v2410_v48 = vpack.c.bf16 %v2202_v40, %v2194_v35  ;;  %v1179_v53 = vpop.f32.mrb[24].mxu1  ;;  %3733 = vmatpush1.bf16.msra.mxu0 %v5086_v26  ;;  %v360_v40 = vld [vmem:[#allocation6 + $0x158] sm:$0xff] }
 0x1b3   : > { %v1953_v62 = vmax.f32 %v1179_v53, 0.0  ;;  %v1181_v3 = vpop.f32.mrb[25].mxu1  ;;  %3734 = vmatprep.subr.bf16.mxu0 %v5091_v34  ;;  %v5100_v53 = vld [vmem:[#allocation8 + $0x1d4] ss:$8 sps:$4 sm:$0xff]  }
 0x1b4   : > { %v1954_v5 = vmax.f32 %v1181_v3, 0.0  ;;  %v1183_v6 = vpop.f32.mrb[26].mxu1  ;;  %3603 = vmatprep.mubr.bf16.mxu0 %v2410_v48  ;;  %1667 = vmatpush1.bf16.msra.mxu1 %v4492_v43  ;;  %v364_v43 = vld [vmem:[#allocation6 + $0x178] sm:$0xff]  ;;  %v4516_v3 = vcombine.low %v352_v15, %v356_v19 }
 0x1b5   : > { %v1961_v9 = vmax.f32 %v1183_v6, 0.0  ;;  %v1185_v18 = vpop.f32.mrb[27].mxu1  ;;  %3604 = vmatmul.mubr.bf16.gmra.mrb[20].mxu0 %v2409_v46  ;;  %1668 = vmatprep.subr.bf16.mxu1 %v4501_v47  ;;  %v2209_v24 = vmul.f32 %v1953_v62, %v1953_v62  ;;  %v5095_v46 = vld [vmem:[#allocation8 + $0x1c0] ss:$8 sps:$4 sm:$0xff]   ;;  %v4525_v60 = vcombine.high %v360_v40, %v364_v43  ;;  %v368_v6 = vld [vmem:[#allocation6 + $0x198] sm:$0xff]  ;;  %v4524_v15 = vcombine.low %v360_v40, %v364_v43 }
 0x1b6   : > { %v1962_v2 = vmax.f32 %v1185_v18, 0.0  ;;  %3735 = vmatpush1.bf16.msra.mxu0 %v5089_v61  ;;  %v2210_v26 = vmul.f32 %v1954_v5, %v1954_v5 }
 0x1b7   : > { %v2217_v28 = vmul.f32 %v1961_v9, %v1961_v9  ;;  %1514 = vmatmul.mubr.bf16.gmra.mrb[132].mxu1 %v5606_v30  ;;  %3736 = vmatprep.subr.bf16.mxu0 %v5094_v4  ;;  %v5098_v9 = vld [vmem:[#allocation8 + $0x1d0] ss:$8 sps:$4 sm:$0xff]  }
 0x1b8   : > { %v2218_v32 = vmul.f32 %v1962_v2, %v1962_v2  ;;  %1523 = vmatprep.mubr.bf16.mxu1 %v5608_v31  ;;  %1669 = vmatpush1.bf16.msra.mxu1 %v4500_v7  ;;  %v372_v7 = vld [vmem:[#allocation6 + $0x1b8] sm:$0xff]  ;;  %v5103_v2 = vld [vmem:[#allocation8 + $0x1e4] ss:$8 sps:$4 sm:$0xff]  }
 0x1b9   : > { %v2417_v25 = vpack.c.bf16 %v2217_v28, %v2209_v24  ;;  %1670 = vmatprep.subr.bf16.mxu1 %v4509_v63  ;;  %v4533_v28 = vcombine.high %v368_v6, %v372_v7 }
 0x1ba   : > { %v2418_v34 = vpack.c.bf16 %v2218_v32, %v2210_v26  ;;  %v1189_v35 = vpop.f32.mrb[28].mxu1  ;;  %3737 = vmatpush1.bf16.msra.mxu0 %v5092_v23  ;;  %v376_v32 = vld [vmem:[#allocation6 + $0x1d8] sm:$0xff] }
 0x1bb   : > { %v1969_v47 = vmax.f32 %v1189_v35, 0.0  ;;  %v1191_v48 = vpop.f32.mrb[29].mxu1  ;;  %3738 = vmatprep.subr.bf16.mxu0 %v5097_v21  ;;  %v5106_v35 = vld [vmem:[#allocation8 + $0x1f4] ss:$8 sps:$4 sm:$0xff]  }
 0x1bc   : > { %v1970_v61 = vmax.f32 %v1191_v48, 0.0  ;;  %v1193_v62 = vpop.f32.mrb[30].mxu1  ;;  %3613 = vmatprep.mubr.bf16.mxu0 %v2418_v34  ;;  %1671 = vmatpush1.bf16.msra.mxu1 %v4508_v22  ;;  %v380_v22 = vld [vmem:[#allocation6 + $0x1f8] sm:$0xff]  ;;  %v4532_v48 = vcombine.low %v368_v6, %v372_v7 }
 0x1bd   : > { %v1977_v4 = vmax.f32 %v1193_v62, 0.0  ;;  %v1195_v54 = vpop.f32.mrb[31].mxu1  ;;  %3614 = vmatmul.mubr.bf16.gmra.mrb[24].mxu0 %v2417_v25  ;;  %1672 = vmatprep.subr.bf16.mxu1 %v4517_v33  ;;  %v2225_v18 = vmul.f32 %v1969_v47, %v1969_v47  ;;  %v5101_v25 = vld [vmem:[#allocation8 + $0x1e0] ss:$8 sps:$4 sm:$0xff]   ;;  %v4541_v43 = vcombine.high %v376_v32, %v380_v22  ;;  %v384_v62 = vld [vmem:[#allocation6 + $0x218] sm:$0xff]  ;;  %v4540_v6 = vcombine.low %v376_v32, %v380_v22 }
 0x1be   : > { %v1978_v5 = vmax.f32 %v1195_v54, 0.0  ;;  %3739 = vmatpush1.bf16.msra.mxu0 %v5095_v46  ;;  %v2226_v23 = vmul.f32 %v1970_v61, %v1970_v61 }
 0x1bf   : > { %v2233_v63 = vmul.f32 %v1977_v4, %v1977_v4  ;;  %1524 = vmatmul.mubr.bf16.gmra.mrb[136].mxu1 %v5616_v44  ;;  %3740 = vmatprep.subr.bf16.mxu0 %v5100_v53  ;;  %v5104_v4 = vld [vmem:[#allocation8 + $0x1f0] ss:$8 sps:$4 sm:$0xff]  }
 0x1c0   : > { %v2234_v24 = vmul.f32 %v1978_v5, %v1978_v5  ;;  %1533 = vmatprep.mubr.bf16.mxu1 %v5618_v45  ;;  %1673 = vmatpush1.bf16.msra.mxu1 %v4516_v3  ;;  %v388_v3 = vld [vmem:[#allocation6 + $0x238] sm:$0xff]  ;;  %v5109_v5 = vld [vmem:[#allocation8 + $0x204] ss:$8 sps:$4 sm:$0xff]  }
 0x1c1   : > { %v2425_v19 = vpack.c.bf16 %v2233_v63, %v2225_v18  ;;  %1674 = vmatprep.subr.bf16.mxu1 %v4525_v60  ;;  %v4549_v63 = vcombine.high %v384_v62, %v388_v3 }
 0x1c2   : > { %v2426_v21 = vpack.c.bf16 %v2234_v24, %v2226_v23  ;;  %v1199_v26 = vpop.f32.mrb[32].mxu1  ;;  %3741 = vmatpush1.bf16.msra.mxu0 %v5098_v9  ;;  %v392_v24 = vld [vmem:[#allocation6 + $0x258] sm:$0xff] }
 0x1c3   : > { %v1985_v33 = vmax.f32 %v1199_v26, 0.0  ;;  %v1201_v34 = vpop.f32.mrb[33].mxu1  ;;  %3742 = vmatprep.subr.bf16.mxu0 %v5103_v2 }
 0x1c4   : > { %v1986_v46 = vmax.f32 %v1201_v34, 0.0  ;;  %v1203_v47 = vpop.f32.mrb[34].mxu1  ;;  %3623 = vmatprep.mubr.bf16.mxu0 %v2426_v21  ;;  %1675 = vmatpush1.bf16.msra.mxu1 %v4524_v15  ;;  %v396_v15 = vld [vmem:[#allocation6 + $0x278] sm:$0xff] }
 0x1c5   : > { %v1993_v53 = vmax.f32 %v1203_v47, 0.0  ;;  %v1205_v40 = vpop.f32.mrb[35].mxu1  ;;  %3624 = vmatmul.mubr.bf16.gmra.mrb[28].mxu0 %v2425_v19  ;;  %1676 = vmatprep.subr.bf16.mxu1 %v4533_v28  ;;  %v2241_v54 = vmul.f32 %v1985_v33, %v1985_v33  ;;  %v4557_v32 = vcombine.high %v392_v24, %v396_v15 }
 0x1c6   : > { %v1994_v61 = vmax.f32 %v1205_v40, 0.0  ;;  %3743 = vmatpush1.bf16.msra.mxu0 %v5101_v25  ;;  %v2242_v9 = vmul.f32 %v1986_v46, %v1986_v46  ;;  %v4548_v25 = vcombine.low %v384_v62, %v388_v3  ;;  %v404_v46 = vld [vmem:[#allocation6 + $0x2b8] sm:$0xff] }
 0x1c7   : > { %v2249_v60 = vmul.f32 %v1993_v53, %v1993_v53  ;;  %1534 = vmatmul.mubr.bf16.gmra.mrb[140].mxu1 %v5626_v58  ;;  %3744 = vmatprep.subr.bf16.mxu0 %v5106_v35  ;;  %v400_v35 = vld [vmem:[#allocation6 + $0x298] sm:$0xff] }
 0x1c8   : > { %v2250_v18 = vmul.f32 %v1994_v61, %v1994_v61  ;;  %1543 = vmatprep.mubr.bf16.mxu1 %v5628_v59  ;;  %1677 = vmatpush1.bf16.msra.mxu1 %v4532_v48  ;;  %v4565_v62 = vcombine.high %v400_v35, %v404_v46 }
 0x1c9   : > { %v2433_v7 = vpack.c.bf16 %v2249_v60, %v2241_v54  ;;  %1678 = vmatprep.subr.bf16.mxu1 %v4541_v43  ;;  %v4556_v43 = vcombine.low %v392_v24, %v396_v15  ;;  %v408_v54 = vld [vmem:[#allocation6 + $0x2d8] sm:$0xff] }
 0x1ca   : > { %v2434_v2 = vpack.c.bf16 %v2250_v18, %v2242_v9  ;;  %v1209_v23 = vpop.f32.mrb[36].mxu1  ;;  %3745 = vmatpush1.bf16.msra.mxu0 %v5104_v4  ;;  %v412_v60 = vld [vmem:[#allocation6 + $0x2f8] sm:$0xff] }
 0x1cb   : > { %v2001_v19 = vmax.f32 %v1209_v23, 0.0  ;;  %v1211_v28 = vpop.f32.mrb[37].mxu1  ;;  %3907 = vmatprep.subr.bf16.mxu0 %v5109_v5  ;;  %v4573_v23 = vcombine.high %v408_v54, %v412_v60  ;;  %v416_v15 = vld [vmem:[#allocation6 + $0x318] sm:$0xff] }
 0x1cc   : > { %v2002_v21 = vmax.f32 %v1211_v28, 0.0  ;;  %v1213_v26 = vpop.f32.mrb[38].mxu1  ;;  %3633 = vmatprep.mubr.bf16.mxu0 %v2434_v2  ;;  %1679 = vmatpush1.bf16.msra.mxu1 %v4540_v6 }
 0x1cd   : > { %v2009_v33 = vmax.f32 %v1213_v26, 0.0  ;;  %v1215_v34 = vpop.f32.mrb[39].mxu1  ;;  %3634 = vmatmul.mubr.bf16.gmra.mrb[32].mxu0 %v2433_v7  ;;  %1680 = vmatprep.subr.bf16.mxu1 %v4549_v63  ;;  %v2257_v47 = vmul.f32 %v2001_v19, %v2001_v19  ;;  %v4564_v7 = vcombine.low %v400_v35, %v404_v46  ;;  %v420_v19 = vld [vmem:[#allocation6 + $0x338] sm:$0xff] }
 0x1ce   : > { %v2010_v22 = vmax.f32 %v1215_v34, 0.0  ;;  %v2258_v53 = vmul.f32 %v2002_v21, %v2002_v21  ;;  %v424_v46 = vld [vmem:[#allocation6 + $0x358] sm:$0xff] }
 0x1cf   : > { %v2265_v48 = vmul.f32 %v2009_v33, %v2009_v33  ;;  %1544 = vmatmul.mubr.bf16.gmra.mrb[144].mxu1 %v5636_v10  ;;  %v4572_v33 = vcombine.low %v408_v54, %v412_v60  ;;  %v432_v60 = vld [vmem:[#allocation6 + $0x398] sm:$0xff] }
 0x1d0   : > { %v2266_v40 = vmul.f32 %v2010_v22, %v2010_v22  ;;  %1553 = vmatprep.mubr.bf16.mxu1 %v5638_v11  ;;  %1681 = vmatpush1.bf16.msra.mxu1 %v4548_v25 }
 0x1d1   : > { %v2441_v61 = vpack.c.bf16 %v2265_v48, %v2257_v47  ;;  %1682 = vmatprep.subr.bf16.mxu1 %v4557_v32  ;;  %v4581_v32 = vcombine.high %v416_v15, %v420_v19  ;;  %v428_v47 = vld [vmem:[#allocation6 + $0x378] sm:$0xff] }
 0x1d2   : > { %v2442_v3 = vpack.c.bf16 %v2266_v40, %v2258_v53  ;;  %v1219_v4 = vpop.f32.mrb[40].mxu1 }
 0x1d3   : > { %v2017_v5 = vmax.f32 %v1219_v4, 0.0  ;;  %v1221_v9 = vpop.f32.mrb[41].mxu1  ;;  %v4589_v4 = vcombine.high %v424_v46, %v428_v47 }
 0x1d4   : > { %v2018_v18 = vmax.f32 %v1221_v9, 0.0  ;;  %v1223_v6 = vpop.f32.mrb[42].mxu1  ;;  %3643 = vmatprep.mubr.bf16.mxu0 %v2442_v3  ;;  %1683 = vmatpush1.bf16.msra.mxu1 %v4556_v43 }
 0x1d5   : > { %v2025_v63 = vmax.f32 %v1223_v6, 0.0  ;;  %v1225_v2 = vpop.f32.mrb[43].mxu1  ;;  %3644 = vmatmul.mubr.bf16.gmra.mrb[36].mxu0 %v2441_v61  ;;  %1684 = vmatprep.subr.bf16.mxu1 %v4565_v62  ;;  %v2273_v28 = vmul.f32 %v2017_v5, %v2017_v5  ;;  %v4580_v61 = vcombine.low %v416_v15, %v420_v19  ;;  %v436_v5 = vld [vmem:[#allocation6 + $0x3b8] sm:$0xff] }
 0x1d6   : > { %v2026_v24 = vmax.f32 %v1225_v2, 0.0  ;;  %v2274_v26 = vmul.f32 %v2018_v18, %v2018_v18  ;;  %v440_v19 = vld [vmem:[#allocation6 + $0x3d8] sm:$0xff] }
 0x1d7   : > { %v2281_v21 = vmul.f32 %v2025_v63, %v2025_v63  ;;  %1554 = vmatmul.mubr.bf16.gmra.mrb[148].mxu1 %v5646_v36  ;;  %v4588_v63 = vcombine.low %v424_v46, %v428_v47 }
 0x1d8   : > { %v2282_v25 = vmul.f32 %v2026_v24, %v2026_v24  ;;  %1563 = vmatprep.mubr.bf16.mxu1 %v5648_v37  ;;  %1685 = vmatpush1.bf16.msra.mxu1 %v4564_v7 }
 0x1d9   : > { %v2449_v34 = vpack.c.bf16 %v2281_v21, %v2273_v28  ;;  %1686 = vmatprep.subr.bf16.mxu1 %v4573_v23  ;;  %v4597_v23 = vcombine.high %v432_v60, %v436_v5  ;;  %v444_v28 = vld [vmem:[#allocation6 + $0x3f8] sm:$0xff] }
 0x1da   : > { %v2450_v22 = vpack.c.bf16 %v2282_v25, %v2274_v26  ;;  %v1229_v35 = vpop.f32.mrb[44].mxu1 }
 0x1db   : > { %v2033_v48 = vmax.f32 %v1229_v35, 0.0  ;;  %v1231_v53 = vpop.f32.mrb[45].mxu1  ;;  %v4605_v35 = vcombine.high %v440_v19, %v444_v28 }
 0x1dc   : > { %v2034_v40 = vmax.f32 %v1231_v53, 0.0  ;;  %v1233_v43 = vpop.f32.mrb[46].mxu1  ;;  %3653 = vmatprep.mubr.bf16.mxu0 %v2450_v22  ;;  %1687 = vmatpush1.bf16.msra.mxu1 %v4572_v33 }
 0x1dd   : > { %v2041_v62 = vmax.f32 %v1233_v43, 0.0  ;;  %v1235_v3 = vpop.f32.mrb[47].mxu1  ;;  %3654 = vmatmul.mubr.bf16.gmra.mrb[40].mxu0 %v2449_v34  ;;  %1688 = vmatprep.subr.bf16.mxu1 %v4581_v32  ;;  %v2289_v9 = vmul.f32 %v2033_v48, %v2033_v48  ;;  %v4596_v34 = vcombine.low %v432_v60, %v436_v5  ;;  %v4604_v43 = vcombine.low %v440_v19, %v444_v28 }
 0x1de   : > { %v2042_v54 = vmax.f32 %v1235_v3, 0.0  ;;  %v2290_v6 = vmul.f32 %v2034_v40, %v2034_v40 }
 0x1df   : > { %v2297_v18 = vmul.f32 %v2041_v62, %v2041_v62  ;;  %1564 = vmatmul.mubr.bf16.gmra.mrb[152].mxu1 %v5656_v56 }
 0x1e0   : > { %v2298_v7 = vmul.f32 %v2042_v54, %v2042_v54  ;;  %1573 = vmatprep.mubr.bf16.mxu1 %v5658_v57  ;;  %1689 = vmatpush1.bf16.msra.mxu1 %v4580_v61 }
 0x1e1   : > { %v2457_v2 = vpack.c.bf16 %v2297_v18, %v2289_v9  ;;  %1690 = vmatprep.subr.bf16.mxu1 %v4589_v4 }
 0x1e2   : > { %v2458_v24 = vpack.c.bf16 %v2298_v7, %v2290_v6  ;;  %v1239_v15 = vpop.f32.mrb[48].mxu1 }
 0x1e3   : > { %v2049_v21 = vmax.f32 %v1239_v15, 0.0  ;;  %v1241_v26 = vpop.f32.mrb[49].mxu1 }
 0x1e4   : > { %v2050_v25 = vmax.f32 %v1241_v26, 0.0  ;;  %v1243_v33 = vpop.f32.mrb[50].mxu1  ;;  %3663 = vmatprep.mubr.bf16.mxu0 %v2458_v24  ;;  %1691 = vmatpush1.bf16.msra.mxu1 %v4588_v63 }
 0x1e5   : > { %v2057_v32 = vmax.f32 %v1243_v33, 0.0  ;;  %v1245_v22 = vpop.f32.mrb[51].mxu1  ;;  %3664 = vmatmul.mubr.bf16.gmra.mrb[44].mxu0 %v2457_v2  ;;  %1692 = vmatprep.subr.bf16.mxu1 %v4597_v23  ;;  %v2305_v47 = vmul.f32 %v2049_v21, %v2049_v21 }
 0x1e6   : > { %v2058_v46 = vmax.f32 %v1245_v22, 0.0  ;;  %v2306_v53 = vmul.f32 %v2050_v25, %v2050_v25 }
 0x1e7   : > { %v2313_v48 = vmul.f32 %v2057_v32, %v2057_v32  ;;  %1574 = vmatmul.mubr.bf16.gmra.mrb[156].mxu1 %v5666_v16 }
 0x1e8   : > { %v2314_v40 = vmul.f32 %v2058_v46, %v2058_v46  ;;  %1583 = vmatprep.mubr.bf16.mxu1 %v5668_v17  ;;  %1693 = vmatpush1.bf16.msra.mxu1 %v4596_v34 }
 0x1e9   : > { %v2465_v61 = vpack.c.bf16 %v2313_v48, %v2305_v47  ;;  %1694 = vmatprep.subr.bf16.mxu1 %v4605_v35 }
 0x1ea   : > { %v2466_v62 = vpack.c.bf16 %v2314_v40, %v2306_v53  ;;  %v1249_v3 = vpop.f32.mrb[52].mxu1 }
 0x1eb   : > { %v2065_v4 = vmax.f32 %v1249_v3, 0.0  ;;  %v1251_v54 = vpop.f32.mrb[53].mxu1 }
 0x1ec   : > { %v2066_v60 = vmax.f32 %v1251_v54, 0.0  ;;  %v1253_v5 = vpop.f32.mrb[54].mxu1  ;;  %3673 = vmatprep.mubr.bf16.mxu0 %v2466_v62  ;;  %1695 = vmatpush1.bf16.msra.mxu1 %v4604_v43 }
 0x1ed   : > { %v2073_v9 = vmax.f32 %v1253_v5, 0.0  ;;  %v1255_v18 = vpop.f32.mrb[55].mxu1  ;;  %3674 = vmatmul.mubr.bf16.gmra.mrb[48].mxu0 %v2465_v61  ;;  %v2321_v7 = vmul.f32 %v2065_v4, %v2065_v4 }
 0x1ee   : > { %v2074_v6 = vmax.f32 %v1255_v18, 0.0  ;;  %v2322_v2 = vmul.f32 %v2066_v60, %v2066_v60 }
 0x1ef   : > { %v2329_v63 = vmul.f32 %v2073_v9, %v2073_v9  ;;  %1584 = vmatmul.mubr.bf16.gmra.mrb[160].mxu1 %v5678_v38 }
 0x1f0   : > { %v2330_v23 = vmul.f32 %v2074_v6, %v2074_v6  ;;  %1593 = vmatprep.mubr.bf16.mxu1 %v5680_v39 }
 0x1f1   : > { %v2473_v24 = vpack.c.bf16 %v2329_v63, %v2321_v7 }
 0x1f2   : > { %v2474_v15 = vpack.c.bf16 %v2330_v23, %v2322_v2  ;;  %v1259_v19 = vpop.f32.mrb[56].mxu1 }
 0x1f3   : > { %v2081_v28 = vmax.f32 %v1259_v19, 0.0  ;;  %v1261_v21 = vpop.f32.mrb[57].mxu1 }
 0x1f4   : > { %v2082_v26 = vmax.f32 %v1261_v21, 0.0  ;;  %v1263_v25 = vpop.f32.mrb[58].mxu1  ;;  %3683 = vmatprep.mubr.bf16.mxu0 %v2474_v15 }
 0x1f5   : > { %v2089_v33 = vmax.f32 %v1263_v25, 0.0  ;;  %v1265_v34 = vpop.f32.mrb[59].mxu1  ;;  %3684 = vmatmul.mubr.bf16.gmra.mrb[52].mxu0 %v2473_v24  ;;  %v2337_v22 = vmul.f32 %v2081_v28, %v2081_v28 }
 0x1f6   : > { %v2090_v32 = vmax.f32 %v1265_v34, 0.0  ;;  %v2338_v46 = vmul.f32 %v2082_v26, %v2082_v26 }
 0x1f7   : > { %v2345_v35 = vmul.f32 %v2089_v33, %v2089_v33  ;;  %1594 = vmatmul.mubr.bf16.gmra.mrb[164].mxu1 %v5688_v50 }
 0x1f8   : > { %v2346_v47 = vmul.f32 %v2090_v32, %v2090_v32  ;;  %1603 = vmatprep.mubr.bf16.mxu1 %v5690_v51 }
 0x1f9   : > { %v2481_v48 = vpack.c.bf16 %v2345_v35, %v2337_v22 }
 0x1fa   : > { %v2482_v53 = vpack.c.bf16 %v2346_v47, %v2338_v46  ;;  %v1269_v40 = vpop.f32.mrb[60].mxu1  ;;  %v5107_v47 = vld [vmem:[#allocation8 + $0x200] ss:$8 sps:$4 sm:$0xff]  }
 0x1fb   : > { %v2097_v43 = vmax.f32 %v1269_v40, 0.0  ;;  %v1271_v61 = vpop.f32.mrb[61].mxu1  ;;  %v5112_v40 = vld [vmem:[#allocation8 + $0x214] ss:$8 sps:$4 sm:$0xff]  }
 0x1fc   : > { %v2098_v62 = vmax.f32 %v1271_v61, 0.0  ;;  %v1273_v3 = vpop.f32.mrb[62].mxu1  ;;  %3693 = vmatprep.mubr.bf16.mxu0 %v2482_v53 }
 0x1fd   : > { %v2105_v4 = vmax.f32 %v1273_v3, 0.0  ;;  %v1275_v54 = vpop.f32.mrb[63].mxu1  ;;  %3694 = vmatmul.mubr.bf16.gmra.mrb[56].mxu0 %v2481_v48  ;;  %v2353_v5 = vmul.f32 %v2097_v43, %v2097_v43 }
 0x1fe   : > { %v2106_v60 = vmax.f32 %v1275_v54, 0.0  ;;  %v2354_v18 = vmul.f32 %v2098_v62, %v2098_v62  ;;  %v5110_v54 = vld [vmem:[#allocation8 + $0x210] ss:$8 sps:$4 sm:$0xff]  }
 0x1ff   : > { %v2361_v9 = vmul.f32 %v2105_v4, %v2105_v4  ;;  %1604 = vmatmul.mubr.bf16.gmra.mrb[168].mxu1 %v5698_v0 }
 0x200   : > { %v2362_v6 = vmul.f32 %v2106_v60, %v2106_v60  ;;  %1613 = vmatprep.mubr.bf16.mxu1 %v5700_v1 }
 0x201   : > { %v2489_v7 = vpack.c.bf16 %v2361_v9, %v2353_v5  ;;  %v5115_v9 = vld [vmem:[#allocation8 + $0x224] ss:$8 sps:$4 sm:$0xff]  }
 0x202   : > { %v2490_v63 = vpack.c.bf16 %v2362_v6, %v2354_v18  ;;  %v1312_v2 = vpop.f32.mrb[64].mxu1 }
 0x203   : > { %v1859_v23 = vmax.f32 %v1312_v2, 0.0  ;;  %v1314_v24 = vpop.f32.mrb[65].mxu1 }
 0x204   : > { %v1860_v15 = vmax.f32 %v1314_v24, 0.0  ;;  %v1316_v19 = vpop.f32.mrb[66].mxu1  ;;  %3703 = vmatprep.mubr.bf16.mxu0 %v2490_v63 }
 0x205   : > { %v1867_v28 = vmax.f32 %v1316_v19, 0.0  ;;  %v1318_v21 = vpop.f32.mrb[67].mxu1  ;;  %3704 = vmatmul.mubr.bf16.gmra.mrb[60].mxu0 %v2489_v7  ;;  %v2115_v25 = vmul.f32 %v1859_v23, %v1859_v23  ;;  %v5113_v23 = vld [vmem:[#allocation8 + $0x220] ss:$8 sps:$4 sm:$0xff]   ;;  %v5118_v19 = vld [vmem:[#allocation8 + $0x234] ss:$8 sps:$4 sm:$0xff]  }
 0x206   : > { %v1868_v26 = vmax.f32 %v1318_v21, 0.0  ;;  %v2116_v34 = vmul.f32 %v1860_v15, %v1860_v15 }
 0x207   : > { %v2123_v33 = vmul.f32 %v1867_v28, %v1867_v28  ;;  %1614 = vmatmul.mubr.bf16.gmra.mrb[172].mxu1 %v5708_v8 }
 0x208   : > { %v2124_v32 = vmul.f32 %v1868_v26, %v1868_v26  ;;  %1623 = vmatprep.mubr.bf16.mxu1 %v5710_v13 }
 0x209   : > { %v2371_v22 = vpack.c.bf16 %v2123_v33, %v2115_v25 }
 0x20a   : > { %v2372_v35 = vpack.c.bf16 %v2124_v32, %v2116_v34  ;;  %v1322_v46 = vpop.f32.mrb[68].mxu1  ;;  %v5116_v34 = vld [vmem:[#allocation8 + $0x230] ss:$8 sps:$4 sm:$0xff]  }
 0x20b   : > { %v1875_v48 = vmax.f32 %v1322_v46, 0.0  ;;  %v1324_v53 = vpop.f32.mrb[69].mxu1 }
 0x20c   : > { %v1876_v43 = vmax.f32 %v1324_v53, 0.0  ;;  %v1326_v61 = vpop.f32.mrb[70].mxu1  ;;  %3746 = vmatprep.mubr.bf16.mxu0 %v2372_v35  ;;  %v5121_v35 = vld [vmem:[#allocation8 + $0x244] ss:$8 sps:$4 sm:$0xff]  }
 0x20d   : > { %v1883_v62 = vmax.f32 %v1326_v61, 0.0  ;;  %v1328_v3 = vpop.f32.mrb[71].mxu1  ;;  %3747 = vmatmul.mubr.bf16.vlgmr.msra.gmra.mrb[0].mxu0 %v2371_v22  ;;  %v2131_v60 = vmul.f32 %v1875_v48, %v1875_v48 }
 0x20e   : > { %v1884_v4 = vmax.f32 %v1328_v3, 0.0  ;;  %3908 = vmatpush1.bf16.msra.mxu0 %v5107_v47  ;;  %v2132_v18 = vmul.f32 %v1876_v43, %v1876_v43  ;;  %v5119_v43 = vld [vmem:[#allocation8 + $0x240] ss:$8 sps:$4 sm:$0xff]   ;;  %v5124_v3 = vld [vmem:[#allocation8 + $0x254] ss:$8 sps:$4 sm:$0xff]  }
 0x20f   : > { %v2139_v5 = vmul.f32 %v1883_v62, %v1883_v62  ;;  %1624 = vmatmul.mubr.bf16.gmra.mrb[176].mxu1 %v5718_v27  ;;  %3909 = vmatprep.subr.bf16.mxu0 %v5112_v40 }
 0x210   : > { %v2140_v6 = vmul.f32 %v1884_v4, %v1884_v4  ;;  %1633 = vmatprep.mubr.bf16.mxu1 %v5720_v29 }
 0x211   : > { %v2379_v7 = vpack.c.bf16 %v2139_v5, %v2131_v60 }
 0x212   : > { %v2380_v63 = vpack.c.bf16 %v2140_v6, %v2132_v18  ;;  %v1332_v2 = vpop.f32.mrb[72].mxu1  ;;  %3910 = vmatpush1.bf16.msra.mxu0 %v5110_v54  ;;  %v5122_v18 = vld [vmem:[#allocation8 + $0x250] ss:$8 sps:$4 sm:$0xff]  }
 0x213   : > { %v1891_v24 = vmax.f32 %v1332_v2, 0.0  ;;  %v1334_v15 = vpop.f32.mrb[73].mxu1  ;;  %3911 = vmatprep.subr.bf16.mxu0 %v5115_v9 }
 0x214   : > { %v1892_v28 = vmax.f32 %v1334_v15, 0.0  ;;  %v1336_v21 = vpop.f32.mrb[74].mxu1  ;;  %3756 = vmatprep.mubr.bf16.mxu0 %v2380_v63  ;;  %v5127_v63 = vld [vmem:[#allocation8 + $0x264] ss:$8 sps:$4 sm:$0xff]  }
 0x215   : > { %v1899_v26 = vmax.f32 %v1336_v21, 0.0  ;;  %v1338_v25 = vpop.f32.mrb[75].mxu1  ;;  %3757 = vmatmul.mubr.bf16.gmra.mrb[4].mxu0 %v2379_v7  ;;  %v2147_v32 = vmul.f32 %v1891_v24, %v1891_v24 }
 0x216   : > { %v1900_v33 = vmax.f32 %v1338_v25, 0.0  ;;  %3912 = vmatpush1.bf16.msra.mxu0 %v5113_v23  ;;  %v2148_v46 = vmul.f32 %v1892_v28, %v1892_v28  ;;  %v5125_v28 = vld [vmem:[#allocation8 + $0x260] ss:$8 sps:$4 sm:$0xff]   ;;  %v5130_v25 = vld [vmem:[#allocation8 + $0x274] ss:$8 sps:$4 sm:$0xff]  }
 0x217   : > { %v2155_v22 = vmul.f32 %v1899_v26, %v1899_v26  ;;  %1634 = vmatmul.mubr.bf16.gmra.mrb[180].mxu1 %v5728_v41  ;;  %3913 = vmatprep.subr.bf16.mxu0 %v5118_v19 }
 0x218   : > { %v2156_v47 = vmul.f32 %v1900_v33, %v1900_v33  ;;  %1643 = vmatprep.mubr.bf16.mxu1 %v5730_v42 }
 0x219   : > { %v2387_v48 = vpack.c.bf16 %v2155_v22, %v2147_v32 }
 0x21a   : > { %v2388_v53 = vpack.c.bf16 %v2156_v47, %v2148_v46  ;;  %v1342_v40 = vpop.f32.mrb[76].mxu1  ;;  %3914 = vmatpush1.bf16.msra.mxu0 %v5116_v34  ;;  %v5128_v46 = vld [vmem:[#allocation8 + $0x270] ss:$8 sps:$4 sm:$0xff]  }
 0x21b   : > { %v1907_v61 = vmax.f32 %v1342_v40, 0.0  ;;  %v1344_v62 = vpop.f32.mrb[77].mxu1  ;;  %3915 = vmatprep.subr.bf16.mxu0 %v5121_v35 }
 0x21c   : > { %v1908_v4 = vmax.f32 %v1344_v62, 0.0  ;;  %v1346_v54 = vpop.f32.mrb[78].mxu1  ;;  %3766 = vmatprep.mubr.bf16.mxu0 %v2388_v53  ;;  %v5133_v53 = vld [vmem:[#allocation8 + $0x284] ss:$8 sps:$4 sm:$0xff]  }
 0x21d   : > { %v1915_v60 = vmax.f32 %v1346_v54, 0.0  ;;  %v1348_v5 = vpop.f32.mrb[79].mxu1  ;;  %3767 = vmatmul.mubr.bf16.gmra.mrb[8].mxu0 %v2387_v48  ;;  %v2163_v6 = vmul.f32 %v1907_v61, %v1907_v61 }
 0x21e   : > { %v1916_v9 = vmax.f32 %v1348_v5, 0.0  ;;  %3916 = vmatpush1.bf16.msra.mxu0 %v5119_v43  ;;  %v2164_v2 = vmul.f32 %v1908_v4, %v1908_v4  ;;  %v5131_v4 = vld [vmem:[#allocation8 + $0x280] ss:$8 sps:$4 sm:$0xff]   ;;  %v5136_v5 = vld [vmem:[#allocation8 + $0x294] ss:$8 sps:$4 sm:$0xff]  }
 0x21f   : > { %v2171_v7 = vmul.f32 %v1915_v60, %v1915_v60  ;;  %1644 = vmatmul.mubr.bf16.gmra.mrb[184].mxu1 %v5738_v49  ;;  %3917 = vmatprep.subr.bf16.mxu0 %v5124_v3 }
 0x220   : > { %v2172_v23 = vmul.f32 %v1916_v9, %v1916_v9  ;;  %1653 = vmatprep.mubr.bf16.mxu1 %v5740_v52 }
 0x221   : > { %v2395_v24 = vpack.c.bf16 %v2171_v7, %v2163_v6 }
 0x222   : > { %v2396_v15 = vpack.c.bf16 %v2172_v23, %v2164_v2  ;;  %v1352_v19 = vpop.f32.mrb[80].mxu1  ;;  %3918 = vmatpush1.bf16.msra.mxu0 %v5122_v18  ;;  %v5134_v2 = vld [vmem:[#allocation8 + $0x290] ss:$8 sps:$4 sm:$0xff]  }
 0x223   : > { %v1923_v21 = vmax.f32 %v1352_v19, 0.0  ;;  %v1354_v26 = vpop.f32.mrb[81].mxu1  ;;  %3919 = vmatprep.subr.bf16.mxu0 %v5127_v63 }
 0x224   : > { %v1924_v33 = vmax.f32 %v1354_v26, 0.0  ;;  %v1356_v34 = vpop.f32.mrb[82].mxu1  ;;  %3776 = vmatprep.mubr.bf16.mxu0 %v2396_v15 }
 0x225   : > { %v1931_v32 = vmax.f32 %v1356_v34, 0.0  ;;  %v1358_v22 = vpop.f32.mrb[83].mxu1  ;;  %3777 = vmatmul.mubr.bf16.gmra.mrb[12].mxu0 %v2395_v24  ;;  %v2179_v47 = vmul.f32 %v1923_v21, %v1923_v21  ;;  %v5139_v24 = vld [vmem:[#allocation8 + $0x2a4] ss:$8 sps:$4 sm:$0xff]  }
 0x226   : > { %v1932_v35 = vmax.f32 %v1358_v22, 0.0  ;;  %3920 = vmatpush1.bf16.msra.mxu0 %v5125_v28  ;;  %v2180_v40 = vmul.f32 %v1924_v33, %v1924_v33 }
 0x227   : > { %v2187_v48 = vmul.f32 %v1931_v32, %v1931_v32  ;;  %1654 = vmatmul.mubr.bf16.gmra.mrb[188].mxu1 %v5746_v55  ;;  %3921 = vmatprep.subr.bf16.mxu0 %v5130_v25  ;;  %v5137_v25 = vld [vmem:[#allocation8 + $0x2a0] ss:$8 sps:$4 sm:$0xff]   ;;  %v5142_v32 = vld [vmem:[#allocation8 + $0x2b4] ss:$8 sps:$4 sm:$0xff]  }
 0x228   : > { %v2188_v43 = vmul.f32 %v1932_v35, %v1932_v35  ;;  %1696 = vmatprep.mubr.bf16.mxu1 %v5583_v20 }
 0x229   : > { %v2403_v61 = vpack.c.bf16 %v2187_v48, %v2179_v47  ;;  %v5140_v48 = vld [vmem:[#allocation8 + $0x2b0] ss:$8 sps:$4 sm:$0xff]  }
 0x22a   : > { %v2404_v62 = vpack.c.bf16 %v2188_v43, %v2180_v40  ;;  %v1362_v3 = vpop.f32.mrb[84].mxu1  ;;  %3922 = vmatpush1.bf16.msra.mxu0 %v5128_v46  ;;  %v5145_v40 = vld [vmem:[#allocation8 + $0x2c4] ss:$8 sps:$4 sm:$0xff]  }
 0x22b   : > { %v1939_v54 = vmax.f32 %v1362_v3, 0.0  ;;  %v1364_v60 = vpop.f32.mrb[85].mxu1  ;;  %3923 = vmatprep.subr.bf16.mxu0 %v5133_v53 }
 0x22c   : > { %v1940_v9 = vmax.f32 %v1364_v60, 0.0  ;;  %v1366_v18 = vpop.f32.mrb[86].mxu1  ;;  %3786 = vmatprep.mubr.bf16.mxu0 %v2404_v62 }
 0x22d   : > { %v1947_v6 = vmax.f32 %v1366_v18, 0.0  ;;  %v1368_v7 = vpop.f32.mrb[87].mxu1  ;;  %3787 = vmatmul.mubr.bf16.gmra.mrb[16].mxu0 %v2403_v61  ;;  %v2195_v23 = vmul.f32 %v1939_v54, %v1939_v54  ;;  %v5143_v54 = vld [vmem:[#allocation8 + $0x2c0] ss:$8 sps:$4 sm:$0xff]  }
 0x22e   : > { %v1948_v63 = vmax.f32 %v1368_v7, 0.0  ;;  %3924 = vmatpush1.bf16.msra.mxu0 %v5131_v4  ;;  %v2196_v15 = vmul.f32 %v1940_v9, %v1940_v9  ;;  %v5148_v9 = vld [vmem:[#allocation8 + $0x2d4] ss:$8 sps:$4 sm:$0xff]  }
 0x22f   : > { %v2203_v20 = vmul.f32 %v1947_v6, %v1947_v6  ;;  %1697 = vmatmul.mubr.bf16.vlgmr.msra.gmra.mrb[192].mxu1 %v5590_v12  ;;  %3925 = vmatprep.subr.bf16.mxu0 %v5136_v5 }
 0x230   : > { %v2204_v19 = vmul.f32 %v1948_v63, %v1948_v63  ;;  %1706 = vmatprep.mubr.bf16.mxu1 %v5592_v14 }
 0x231   : > { %v2411_v28 = vpack.c.bf16 %v2203_v20, %v2195_v23  ;;  %v5151_v20 = vld [vmem:[#allocation8 + $0x2e4] ss:$8 sps:$4 sm:$0xff]  }
 0x232   : > { %v2412_v21 = vpack.c.bf16 %v2204_v19, %v2196_v15  ;;  %v1372_v26 = vpop.f32.mrb[88].mxu1  ;;  %3926 = vmatpush1.bf16.msra.mxu0 %v5134_v2  ;;  %v5146_v2 = vld [vmem:[#allocation8 + $0x2d0] ss:$8 sps:$4 sm:$0xff]  }
 0x233   : > { %v1955_v33 = vmax.f32 %v1372_v26, 0.0  ;;  %v1374_v34 = vpop.f32.mrb[89].mxu1  ;;  %3927 = vmatprep.subr.bf16.mxu0 %v5139_v24  ;;  %v5149_v26 = vld [vmem:[#allocation8 + $0x2e0] ss:$8 sps:$4 sm:$0xff]  }
 0x234   : > { %v1956_v22 = vmax.f32 %v1374_v34, 0.0  ;;  %v1376_v35 = vpop.f32.mrb[90].mxu1  ;;  %3796 = vmatprep.mubr.bf16.mxu0 %v2412_v21  ;;  %v5154_v34 = vld [vmem:[#allocation8 + $0x2f4] ss:$8 sps:$4 sm:$0xff]  }
 0x235   : > { %v1963_v46 = vmax.f32 %v1376_v35, 0.0  ;;  %v1378_v12 = vpop.f32.mrb[91].mxu1  ;;  %3797 = vmatmul.mubr.bf16.gmra.mrb[20].mxu0 %v2411_v28  ;;  %v2211_v53 = vmul.f32 %v1955_v33, %v1955_v33 }
 0x236   : > { %v1964_v47 = vmax.f32 %v1378_v12, 0.0  ;;  %3928 = vmatpush1.bf16.msra.mxu0 %v5137_v25  ;;  %v2212_v43 = vmul.f32 %v1956_v22, %v1956_v22  ;;  %v5152_v12 = vld [vmem:[#allocation8 + $0x2f0] ss:$8 sps:$4 sm:$0xff]  }
 0x237   : > { %v2219_v14 = vmul.f32 %v1963_v46, %v1963_v46  ;;  %1707 = vmatmul.mubr.bf16.gmra.mrb[196].mxu1 %v5606_v30  ;;  %3929 = vmatprep.subr.bf16.mxu0 %v5142_v32 }
 0x238   : > { %v2220_v61 = vmul.f32 %v1964_v47, %v1964_v47  ;;  %1716 = vmatprep.mubr.bf16.mxu1 %v5608_v31 }
 0x239   : > { %v2419_v62 = vpack.c.bf16 %v2219_v14, %v2211_v53 }
 0x23a   : > { %v2420_v3 = vpack.c.bf16 %v2220_v61, %v2212_v43  ;;  %v1382_v4 = vpop.f32.mrb[92].mxu1  ;;  %3930 = vmatpush1.bf16.msra.mxu0 %v5140_v48  ;;  %v5157_v48 = vld [vmem:[#allocation8 + $0x304] ss:$8 sps:$4 sm:$0xff]  }
 0x23b   : > { %v1971_v60 = vmax.f32 %v1382_v4, 0.0  ;;  %v1384_v5 = vpop.f32.mrb[93].mxu1  ;;  %3931 = vmatprep.subr.bf16.mxu0 %v5145_v40 }
 0x23c   : > { %v1972_v18 = vmax.f32 %v1384_v5, 0.0  ;;  %v1386_v6 = vpop.f32.mrb[94].mxu1  ;;  %3806 = vmatprep.mubr.bf16.mxu0 %v2420_v3 }
 0x23d   : > { %v1979_v7 = vmax.f32 %v1386_v6, 0.0  ;;  %v1388_v30 = vpop.f32.mrb[95].mxu1  ;;  %3807 = vmatmul.mubr.bf16.gmra.mrb[24].mxu0 %v2419_v62  ;;  %v2227_v23 = vmul.f32 %v1971_v60, %v1971_v60 }
 0x23e   : > { %v1980_v63 = vmax.f32 %v1388_v30, 0.0  ;;  %3932 = vmatpush1.bf16.msra.mxu0 %v5143_v54  ;;  %v2228_v24 = vmul.f32 %v1972_v18, %v1972_v18 }
 0x23f   : > { %v2235_v31 = vmul.f32 %v1979_v7, %v1979_v7  ;;  %1717 = vmatmul.mubr.bf16.gmra.mrb[200].mxu1 %v5616_v44  ;;  %3933 = vmatprep.subr.bf16.mxu0 %v5148_v9 }
 0x240   : > { %v2236_v15 = vmul.f32 %v1980_v63, %v1980_v63  ;;  %1726 = vmatprep.mubr.bf16.mxu1 %v5618_v45 }
 0x241   : > { %v2427_v19 = vpack.c.bf16 %v2235_v31, %v2227_v23 }
 0x242   : > { %v2428_v28 = vpack.c.bf16 %v2236_v15, %v2228_v24  ;;  %v1392_v21 = vpop.f32.mrb[96].mxu1  ;;  %3934 = vmatpush1.bf16.msra.mxu0 %v5146_v2 }
 0x243   : > { %v1987_v25 = vmax.f32 %v1392_v21, 0.0  ;;  %v1394_v33 = vpop.f32.mrb[97].mxu1  ;;  %3935 = vmatprep.subr.bf16.mxu0 %v5151_v20 }
 0x244   : > { %v1988_v32 = vmax.f32 %v1394_v33, 0.0  ;;  %v1396_v22 = vpop.f32.mrb[98].mxu1  ;;  %3816 = vmatprep.mubr.bf16.mxu0 %v2428_v28 }
 0x245   : > { %v1995_v35 = vmax.f32 %v1396_v22, 0.0  ;;  %v1398_v44 = vpop.f32.mrb[99].mxu1  ;;  %3817 = vmatmul.mubr.bf16.gmra.mrb[28].mxu0 %v2427_v19  ;;  %v2243_v47 = vmul.f32 %v1987_v25, %v1987_v25 }
 0x246   : > { %v1996_v46 = vmax.f32 %v1398_v44, 0.0  ;;  %3936 = vmatpush1.bf16.msra.mxu0 %v5149_v26  ;;  %v2244_v53 = vmul.f32 %v1988_v32, %v1988_v32 }
 0x247   : > { %v2251_v45 = vmul.f32 %v1995_v35, %v1995_v35  ;;  %1727 = vmatmul.mubr.bf16.gmra.mrb[204].mxu1 %v5626_v58  ;;  %3937 = vmatprep.subr.bf16.mxu0 %v5154_v34 }
 0x248   : > { %v2252_v14 = vmul.f32 %v1996_v46, %v1996_v46  ;;  %1736 = vmatprep.mubr.bf16.mxu1 %v5628_v59 }
 0x249   : > { %v2435_v40 = vpack.c.bf16 %v2251_v45, %v2243_v47 }
 0x24a   : > { %v2436_v43 = vpack.c.bf16 %v2252_v14, %v2244_v53  ;;  %v1402_v61 = vpop.f32.mrb[100].mxu1  ;;  %3938 = vmatpush1.bf16.msra.mxu0 %v5152_v12 }
 0x24b   : > { %v2003_v62 = vmax.f32 %v1402_v61, 0.0  ;;  %v1404_v3 = vpop.f32.mrb[101].mxu1  ;;  %4100 = vmatprep.subr.bf16.mxu0 %v5157_v48 }
 0x24c   : > { %v2004_v4 = vmax.f32 %v1404_v3, 0.0  ;;  %v1406_v54 = vpop.f32.mrb[102].mxu1  ;;  %3826 = vmatprep.mubr.bf16.mxu0 %v2436_v43 }
 0x24d   : > { %v2011_v60 = vmax.f32 %v1406_v54, 0.0  ;;  %v1408_v5 = vpop.f32.mrb[103].mxu1  ;;  %3827 = vmatmul.mubr.bf16.gmra.mrb[32].mxu0 %v2435_v40  ;;  %v2259_v9 = vmul.f32 %v2003_v62, %v2003_v62 }
 0x24e   : > { %v2012_v58 = vmax.f32 %v1408_v5, 0.0  ;;  %v2260_v6 = vmul.f32 %v2004_v4, %v2004_v4 }
 0x24f   : > { %v2267_v18 = vmul.f32 %v2011_v60, %v2011_v60  ;;  %1737 = vmatmul.mubr.bf16.gmra.mrb[208].mxu1 %v5636_v10 }
 0x250   : > { %v2268_v59 = vmul.f32 %v2012_v58, %v2012_v58  ;;  %1746 = vmatprep.mubr.bf16.mxu1 %v5638_v11 }
 0x251   : > { %v2443_v7 = vpack.c.bf16 %v2267_v18, %v2259_v9 }
 0x252   : > { %v2444_v30 = vpack.c.bf16 %v2268_v59, %v2260_v6  ;;  %v1412_v63 = vpop.f32.mrb[104].mxu1 }
 0x253   : > { %v2019_v2 = vmax.f32 %v1412_v63, 0.0  ;;  %v1414_v23 = vpop.f32.mrb[105].mxu1 }
 0x254   : > { %v2020_v31 = vmax.f32 %v1414_v23, 0.0  ;;  %v1416_v20 = vpop.f32.mrb[106].mxu1  ;;  %3836 = vmatprep.mubr.bf16.mxu0 %v2444_v30 }
 0x255   : > { %v2027_v24 = vmax.f32 %v1416_v20, 0.0  ;;  %v1418_v15 = vpop.f32.mrb[107].mxu1  ;;  %3837 = vmatmul.mubr.bf16.gmra.mrb[36].mxu0 %v2443_v7  ;;  %v2275_v28 = vmul.f32 %v2019_v2, %v2019_v2 }
 0x256   : > { %v2028_v19 = vmax.f32 %v1418_v15, 0.0  ;;  %v2276_v10 = vmul.f32 %v2020_v31, %v2020_v31 }
 0x257   : > { %v2283_v21 = vmul.f32 %v2027_v24, %v2027_v24  ;;  %1747 = vmatmul.mubr.bf16.gmra.mrb[212].mxu1 %v5646_v36 }
 0x258   : > { %v2284_v26 = vmul.f32 %v2028_v19, %v2028_v19  ;;  %1756 = vmatprep.mubr.bf16.mxu1 %v5648_v37 }
 0x259   : > { %v2451_v11 = vpack.c.bf16 %v2283_v21, %v2275_v28 }
 0x25a   : > { %v2452_v25 = vpack.c.bf16 %v2284_v26, %v2276_v10  ;;  %v1422_v33 = vpop.f32.mrb[108].mxu1 }
 0x25b   : > { %v2035_v34 = vmax.f32 %v1422_v33, 0.0  ;;  %v1424_v32 = vpop.f32.mrb[109].mxu1 }
 0x25c   : > { %v2036_v22 = vmax.f32 %v1424_v32, 0.0  ;;  %v1426_v35 = vpop.f32.mrb[110].mxu1  ;;  %3846 = vmatprep.mubr.bf16.mxu0 %v2452_v25 }
 0x25d   : > { %v2043_v44 = vmax.f32 %v1426_v35, 0.0  ;;  %v1428_v46 = vpop.f32.mrb[111].mxu1  ;;  %3847 = vmatmul.mubr.bf16.gmra.mrb[40].mxu0 %v2451_v11  ;;  %v2291_v47 = vmul.f32 %v2035_v34, %v2035_v34 }
 0x25e   : > { %v2044_v12 = vmax.f32 %v1428_v46, 0.0  ;;  %v2292_v36 = vmul.f32 %v2036_v22, %v2036_v22 }
 0x25f   : > { %v2299_v45 = vmul.f32 %v2043_v44, %v2043_v44  ;;  %1757 = vmatmul.mubr.bf16.gmra.mrb[216].mxu1 %v5656_v56 }
 0x260   : > { %v2300_v48 = vmul.f32 %v2044_v12, %v2044_v12  ;;  %1766 = vmatprep.mubr.bf16.mxu1 %v5658_v57 }
 0x261   : > { %v2459_v37 = vpack.c.bf16 %v2299_v45, %v2291_v47 }
 0x262   : > { %v2460_v53 = vpack.c.bf16 %v2300_v48, %v2292_v36  ;;  %v1432_v14 = vpop.f32.mrb[112].mxu1 }
 0x263   : > { %v2051_v40 = vmax.f32 %v1432_v14, 0.0  ;;  %v1434_v43 = vpop.f32.mrb[113].mxu1 }
 0x264   : > { %v2052_v61 = vmax.f32 %v1434_v43, 0.0  ;;  %v1436_v62 = vpop.f32.mrb[114].mxu1  ;;  %3856 = vmatprep.mubr.bf16.mxu0 %v2460_v53 }
 0x265   : > { %v2059_v3 = vmax.f32 %v1436_v62, 0.0  ;;  %v1438_v4 = vpop.f32.mrb[115].mxu1  ;;  %3857 = vmatmul.mubr.bf16.gmra.mrb[44].mxu0 %v2459_v37  ;;  %v2307_v60 = vmul.f32 %v2051_v40, %v2051_v40 }
 0x266   : > { %v2060_v54 = vmax.f32 %v1438_v4, 0.0  ;;  %v2308_v56 = vmul.f32 %v2052_v61, %v2052_v61 }
 0x267   : > { %v2315_v5 = vmul.f32 %v2059_v3, %v2059_v3  ;;  %1767 = vmatmul.mubr.bf16.gmra.mrb[220].mxu1 %v5666_v16 }
 0x268   : > { %v2316_v58 = vmul.f32 %v2060_v54, %v2060_v54  ;;  %1776 = vmatprep.mubr.bf16.mxu1 %v5668_v17 }
 0x269   : > { %v2467_v57 = vpack.c.bf16 %v2315_v5, %v2307_v60 }
 0x26a   : > { %v2468_v9 = vpack.c.bf16 %v2316_v58, %v2308_v56  ;;  %v1442_v18 = vpop.f32.mrb[116].mxu1 }
 0x26b   : > { %v2067_v6 = vmax.f32 %v1442_v18, 0.0  ;;  %v1444_v59 = vpop.f32.mrb[117].mxu1 }
 0x26c   : > { %v2068_v7 = vmax.f32 %v1444_v59, 0.0  ;;  %v1446_v30 = vpop.f32.mrb[118].mxu1  ;;  %3866 = vmatprep.mubr.bf16.mxu0 %v2468_v9  ;;  %v5155_v59 = vld [vmem:[#allocation8 + $0x300] ss:$8 sps:$4 sm:$0xff]  }
 0x26d   : > { %v2075_v63 = vmax.f32 %v1446_v30, 0.0  ;;  %v1448_v2 = vpop.f32.mrb[119].mxu1  ;;  %3867 = vmatmul.mubr.bf16.gmra.mrb[48].mxu0 %v2467_v57  ;;  %v2323_v31 = vmul.f32 %v2067_v6, %v2067_v6 }
 0x26e   : > { %v2076_v23 = vmax.f32 %v1448_v2, 0.0  ;;  %v2324_v16 = vmul.f32 %v2068_v7, %v2068_v7 }
 0x26f   : > { %v2331_v20 = vmul.f32 %v2075_v63, %v2075_v63  ;;  %1777 = vmatmul.mubr.bf16.gmra.mrb[224].mxu1 %v5678_v38  ;;  %v5160_v63 = vld [vmem:[#allocation8 + $0x314] ss:$8 sps:$4 sm:$0xff]  }
 0x270   : > { %v2332_v24 = vmul.f32 %v2076_v23, %v2076_v23  ;;  %1786 = vmatprep.mubr.bf16.mxu1 %v5680_v39 }
 0x271   : > { %v2475_v17 = vpack.c.bf16 %v2331_v20, %v2323_v31 }
 0x272   : > { %v2476_v15 = vpack.c.bf16 %v2332_v24, %v2324_v16  ;;  %v1452_v19 = vpop.f32.mrb[120].mxu1 }
 0x273   : > { %v2083_v28 = vmax.f32 %v1452_v19, 0.0  ;;  %v1454_v21 = vpop.f32.mrb[121].mxu1 }
 0x274   : > { %v2084_v10 = vmax.f32 %v1454_v21, 0.0  ;;  %v1456_v26 = vpop.f32.mrb[122].mxu1  ;;  %3876 = vmatprep.mubr.bf16.mxu0 %v2476_v15 }
 0x275   : > { %v2091_v11 = vmax.f32 %v1456_v26, 0.0  ;;  %v1458_v25 = vpop.f32.mrb[123].mxu1  ;;  %3877 = vmatmul.mubr.bf16.gmra.mrb[52].mxu0 %v2475_v17  ;;  %v2339_v34 = vmul.f32 %v2083_v28, %v2083_v28  ;;  %v5161_v26 = vld [vmem:[#allocation8 + $0x320] ss:$8 sps:$4 sm:$0xff]  }
 0x276   : > { %v2092_v33 = vmax.f32 %v1458_v25, 0.0  ;;  %v2340_v38 = vmul.f32 %v2084_v10, %v2084_v10 }
 0x277   : > { %v2347_v32 = vmul.f32 %v2091_v11, %v2091_v11  ;;  %1787 = vmatmul.mubr.bf16.gmra.mrb[228].mxu1 %v5688_v50 }
 0x278   : > { %v2348_v22 = vmul.f32 %v2092_v33, %v2092_v33  ;;  %1796 = vmatprep.mubr.bf16.mxu1 %v5690_v51  ;;  %v5166_v33 = vld [vmem:[#allocation8 + $0x334] ss:$8 sps:$4 sm:$0xff]  }
 0x279   : > { %v2483_v39 = vpack.c.bf16 %v2347_v32, %v2339_v34 }
 0x27a   : > { %v2484_v35 = vpack.c.bf16 %v2348_v22, %v2340_v38  ;;  %v1462_v44 = vpop.f32.mrb[124].mxu1 }
 0x27b   : > { %v2099_v46 = vmax.f32 %v1462_v44, 0.0  ;;  %v1464_v12 = vpop.f32.mrb[125].mxu1  ;;  %v5169_v44 = vld [vmem:[#allocation8 + $0x344] ss:$8 sps:$4 sm:$0xff]  }
 0x27c   : > { %v2100_v47 = vmax.f32 %v1464_v12, 0.0  ;;  %v1466_v45 = vpop.f32.mrb[126].mxu1  ;;  %3886 = vmatprep.mubr.bf16.mxu0 %v2484_v35 }
 0x27d   : > { %v2107_v36 = vmax.f32 %v1466_v45, 0.0  ;;  %v1468_v48 = vpop.f32.mrb[127].mxu1  ;;  %3887 = vmatmul.mubr.bf16.gmra.mrb[56].mxu0 %v2483_v39  ;;  %v2355_v53 = vmul.f32 %v2099_v46, %v2099_v46  ;;  %v5164_v39 = vld [vmem:[#allocation8 + $0x330] ss:$8 sps:$4 sm:$0xff]  }
 0x27e   : > { %v2108_v37 = vmax.f32 %v1468_v48, 0.0  ;;  %v2356_v50 = vmul.f32 %v2100_v47, %v2100_v47  ;;  %v5167_v48 = vld [vmem:[#allocation8 + $0x340] ss:$8 sps:$4 sm:$0xff]  }
 0x27f   : > { %v2363_v14 = vmul.f32 %v2107_v36, %v2107_v36  ;;  %1797 = vmatmul.mubr.bf16.gmra.mrb[232].mxu1 %v5698_v0 }
 0x280   : > { %v2364_v40 = vmul.f32 %v2108_v37, %v2108_v37  ;;  %1806 = vmatprep.mubr.bf16.mxu1 %v5700_v1 }
 0x281   : > { %v2491_v51 = vpack.c.bf16 %v2363_v14, %v2355_v53  ;;  %v5172_v14 = vld [vmem:[#allocation8 + $0x354] ss:$8 sps:$4 sm:$0xff]  }
 0x282   : > { %v2492_v43 = vpack.c.bf16 %v2364_v40, %v2356_v50  ;;  %v1505_v61 = vpop.f32.mrb[128].mxu1 }
 0x283   : > { %v1861_v62 = vmax.f32 %v1505_v61, 0.0  ;;  %v1507_v3 = vpop.f32.mrb[129].mxu1  ;;  %v5170_v61 = vld [vmem:[#allocation8 + $0x350] ss:$8 sps:$4 sm:$0xff]  }
 0x284   : > { %v1862_v4 = vmax.f32 %v1507_v3, 0.0  ;;  %v1509_v54 = vpop.f32.mrb[130].mxu1  ;;  %3896 = vmatprep.mubr.bf16.mxu0 %v2492_v43  ;;  %v5175_v3 = vld [vmem:[#allocation8 + $0x364] ss:$8 sps:$4 sm:$0xff]  }
 0x285   : > { %v1869_v60 = vmax.f32 %v1509_v54, 0.0  ;;  %v1511_v5 = vpop.f32.mrb[131].mxu1  ;;  %3897 = vmatmul.mubr.bf16.gmra.mrb[60].mxu0 %v2491_v51  ;;  %v2117_v58 = vmul.f32 %v1861_v62, %v1861_v62 }
 0x286   : > { %v1870_v56 = vmax.f32 %v1511_v5, 0.0  ;;  %v2118_v0 = vmul.f32 %v1862_v4, %v1862_v4 }
 0x287   : > { %v2125_v57 = vmul.f32 %v1869_v60, %v1869_v60  ;;  %1807 = vmatmul.mubr.bf16.gmra.mrb[236].mxu1 %v5708_v8  ;;  %v5158_v8 = vld [vmem:[#allocation8 + $0x310] ss:$8 sps:$4 sm:$0xff]  }
 0x288   : > { %v2126_v9 = vmul.f32 %v1870_v56, %v1870_v56  ;;  %1816 = vmatprep.mubr.bf16.mxu1 %v5710_v13  ;;  %v5163_v13 = vld [vmem:[#allocation8 + $0x324] ss:$8 sps:$4 sm:$0xff]  }
 0x289   : > { %v2373_v1 = vpack.c.bf16 %v2125_v57, %v2117_v58  ;;  %v5173_v58 = vld [vmem:[#allocation8 + $0x360] ss:$8 sps:$4 sm:$0xff]  }
 0x28a   : > { %v2374_v18 = vpack.c.bf16 %v2126_v9, %v2118_v0  ;;  %v1515_v6 = vpop.f32.mrb[132].mxu1  ;;  %v5178_v9 = vld [vmem:[#allocation8 + $0x374] ss:$8 sps:$4 sm:$0xff]  }
 0x28b   : > { %v1877_v7 = vmax.f32 %v1515_v6, 0.0  ;;  %v1517_v30 = vpop.f32.mrb[133].mxu1 }
 0x28c   : > { %v1878_v2 = vmax.f32 %v1517_v30, 0.0  ;;  %v1519_v23 = vpop.f32.mrb[134].mxu1  ;;  %3939 = vmatprep.mubr.bf16.mxu0 %v2374_v18 }
 0x28d   : > { %v1885_v31 = vmax.f32 %v1519_v23, 0.0  ;;  %v1521_v20 = vpop.f32.mrb[135].mxu1  ;;  %3940 = vmatmul.mubr.bf16.vlgmr.msra.gmra.mrb[0].mxu0 %v2373_v1  ;;  %v2133_v24 = vmul.f32 %v1877_v7, %v1877_v7  ;;  %v5176_v7 = vld [vmem:[#allocation8 + $0x370] ss:$8 sps:$4 sm:$0xff]  }
 0x28e   : > { %v1886_v16 = vmax.f32 %v1521_v20, 0.0  ;;  %4101 = vmatpush1.bf16.msra.mxu0 %v5155_v59  ;;  %v2134_v15 = vmul.f32 %v1878_v2, %v1878_v2 }
 0x28f   : > { %v2141_v17 = vmul.f32 %v1885_v31, %v1885_v31  ;;  %1817 = vmatmul.mubr.bf16.gmra.mrb[240].mxu1 %v5718_v27  ;;  %4102 = vmatprep.subr.bf16.mxu0 %v5160_v63  ;;  %v5181_v63 = vld [vmem:[#allocation8 + $0x384] ss:$8 sps:$4 sm:$0xff]  }
 0x290   : > { %v2142_v19 = vmul.f32 %v1886_v16, %v1886_v16  ;;  %1826 = vmatprep.mubr.bf16.mxu1 %v5720_v29 }
 0x291   : > { %v2381_v28 = vpack.c.bf16 %v2141_v17, %v2133_v24 }
 0x292   : > { %v2382_v21 = vpack.c.bf16 %v2142_v19, %v2134_v15  ;;  %v1525_v10 = vpop.f32.mrb[136].mxu1  ;;  %4103 = vmatpush1.bf16.msra.mxu0 %v5158_v8  ;;  %v5179_v8 = vld [vmem:[#allocation8 + $0x380] ss:$8 sps:$4 sm:$0xff]  }
 0x293   : > { %v1893_v11 = vmax.f32 %v1525_v10, 0.0  ;;  %v1527_v25 = vpop.f32.mrb[137].mxu1  ;;  %4104 = vmatprep.subr.bf16.mxu0 %v5163_v13  ;;  %v5184_v13 = vld [vmem:[#allocation8 + $0x394] ss:$8 sps:$4 sm:$0xff]   ;;  %v5182_v10 = vld [vmem:[#allocation8 + $0x390] ss:$8 sps:$4 sm:$0xff]  }
 0x294   : > { %v1894_v34 = vmax.f32 %v1527_v25, 0.0  ;;  %v1529_v32 = vpop.f32.mrb[138].mxu1  ;;  %3949 = vmatprep.mubr.bf16.mxu0 %v2382_v21  ;;  %v5187_v25 = vld [vmem:[#allocation8 + $0x3a4] ss:$8 sps:$4 sm:$0xff]  }
 0x295   : > { %v1901_v38 = vmax.f32 %v1529_v32, 0.0  ;;  %v1531_v27 = vpop.f32.mrb[139].mxu1  ;;  %3950 = vmatmul.mubr.bf16.gmra.mrb[4].mxu0 %v2381_v28  ;;  %v2149_v35 = vmul.f32 %v1893_v11, %v1893_v11 }
 0x296   : > { %v1902_v22 = vmax.f32 %v1531_v27, 0.0  ;;  %4105 = vmatpush1.bf16.msra.mxu0 %v5161_v26  ;;  %v2150_v46 = vmul.f32 %v1894_v34, %v1894_v34 }
 0x297   : > { %v2157_v29 = vmul.f32 %v1901_v38, %v1901_v38  ;;  %1827 = vmatmul.mubr.bf16.gmra.mrb[244].mxu1 %v5728_v41  ;;  %4106 = vmatprep.subr.bf16.mxu0 %v5166_v33 }
 0x298   : > { %v2158_v12 = vmul.f32 %v1902_v22, %v1902_v22  ;;  %1836 = vmatprep.mubr.bf16.mxu1 %v5730_v42  ;;  %v5185_v22 = vld [vmem:[#allocation8 + $0x3a0] ss:$8 sps:$4 sm:$0xff]  }
 0x299   : > { %v2389_v47 = vpack.c.bf16 %v2157_v29, %v2149_v35  ;;  %v5190_v29 = vld [vmem:[#allocation8 + $0x3b4] ss:$8 sps:$4 sm:$0xff]  }
 0x29a   : > { %v2390_v45 = vpack.c.bf16 %v2158_v12, %v2150_v46  ;;  %v1535_v36 = vpop.f32.mrb[140].mxu1  ;;  %4107 = vmatpush1.bf16.msra.mxu0 %v5164_v39 }
 0x29b   : > { %v1909_v37 = vmax.f32 %v1535_v36, 0.0  ;;  %v1537_v53 = vpop.f32.mrb[141].mxu1  ;;  %4108 = vmatprep.subr.bf16.mxu0 %v5169_v44  ;;  %v5188_v36 = vld [vmem:[#allocation8 + $0x3b0] ss:$8 sps:$4 sm:$0xff]  }
 0x29c   : > { %v1910_v50 = vmax.f32 %v1537_v53, 0.0  ;;  %v1539_v40 = vpop.f32.mrb[142].mxu1  ;;  %3959 = vmatprep.mubr.bf16.mxu0 %v2390_v45  ;;  %v5193_v53 = vld [vmem:[#allocation8 + $0x3c4] ss:$8 sps:$4 sm:$0xff]  }
 0x29d   : > { %v1917_v51 = vmax.f32 %v1539_v40, 0.0  ;;  %v1541_v41 = vpop.f32.mrb[143].mxu1  ;;  %3960 = vmatmul.mubr.bf16.gmra.mrb[8].mxu0 %v2389_v47  ;;  %v2165_v62 = vmul.f32 %v1909_v37, %v1909_v37 }
 0x29e   : > { %v1918_v43 = vmax.f32 %v1541_v41, 0.0  ;;  %4109 = vmatpush1.bf16.msra.mxu0 %v5167_v48  ;;  %v2166_v4 = vmul.f32 %v1910_v50, %v1910_v50 }
 0x29f   : > { %v2173_v42 = vmul.f32 %v1917_v51, %v1917_v51  ;;  %1837 = vmatmul.mubr.bf16.gmra.mrb[248].mxu1 %v5738_v49  ;;  %4110 = vmatprep.subr.bf16.mxu0 %v5172_v14 }
 0x2a0   : > { %v2174_v54 = vmul.f32 %v1918_v43, %v1918_v43  ;;  %1846 = vmatprep.mubr.bf16.mxu1 %v5740_v52  ;;  %v5191_v43 = vld [vmem:[#allocation8 + $0x3c0] ss:$8 sps:$4 sm:$0xff]  }
 0x2a1   : > { %v2397_v60 = vpack.c.bf16 %v2173_v42, %v2165_v62  ;;  %v5196_v42 = vld [vmem:[#allocation8 + $0x3d4] ss:$8 sps:$4 sm:$0xff]  }
 0x2a2   : > { %v2398_v5 = vpack.c.bf16 %v2174_v54, %v2166_v4  ;;  %v1545_v56 = vpop.f32.mrb[144].mxu1  ;;  %4111 = vmatpush1.bf16.msra.mxu0 %v5170_v61 }
 0x2a3   : > { %v1925_v57 = vmax.f32 %v1545_v56, 0.0  ;;  %v1547_v0 = vpop.f32.mrb[145].mxu1  ;;  %4112 = vmatprep.subr.bf16.mxu0 %v5175_v3  ;;  %v5194_v56 = vld [vmem:[#allocation8 + $0x3d0] ss:$8 sps:$4 sm:$0xff]  }
 0x2a4   : > { %v1926_v1 = vmax.f32 %v1547_v0, 0.0  ;;  %v1549_v18 = vpop.f32.mrb[146].mxu1  ;;  %3969 = vmatprep.mubr.bf16.mxu0 %v2398_v5  ;;  %v5199_v0 = vld [vmem:[#allocation8 + $0x3e4] ss:$8 sps:$4 sm:$0xff]  }
 0x2a5   : > { %v1933_v6 = vmax.f32 %v1549_v18, 0.0  ;;  %v1551_v49 = vpop.f32.mrb[147].mxu1  ;;  %3970 = vmatmul.mubr.bf16.gmra.mrb[12].mxu0 %v2397_v60  ;;  %v2181_v30 = vmul.f32 %v1925_v57, %v1925_v57 }
 0x2a6   : > { %v1934_v59 = vmax.f32 %v1551_v49, 0.0  ;;  %4113 = vmatpush1.bf16.msra.mxu0 %v5173_v58  ;;  %v2182_v2 = vmul.f32 %v1926_v1, %v1926_v1 }
 0x2a7   : > { %v2189_v52 = vmul.f32 %v1933_v6, %v1933_v6  ;;  %1847 = vmatmul.mubr.bf16.gmra.mrb[252].mxu1 %v5746_v55  ;;  %4114 = vmatprep.subr.bf16.mxu0 %v5178_v9 }
 0x2a8   : > { %v2190_v23 = vmul.f32 %v1934_v59, %v1934_v59  ;;  %v5197_v59 = vld [vmem:[#allocation8 + $0x3e0] ss:$8 sps:$4 sm:$0xff]  }
 0x2a9   : > { %v2405_v31 = vpack.c.bf16 %v2189_v52, %v2181_v30  ;;  %v5202_v52 = vld [vmem:[#allocation8 + $0x3f4] ss:$8 sps:$4 sm:$0xff]  }
 0x2aa   : > { %v2406_v20 = vpack.c.bf16 %v2190_v23, %v2182_v2  ;;  %v1555_v16 = vpop.f32.mrb[148].mxu1  ;;  %4115 = vmatpush1.bf16.msra.mxu0 %v5176_v7 }
 0x2ab   : > { %v1941_v24 = vmax.f32 %v1555_v16, 0.0  ;;  %v1557_v17 = vpop.f32.mrb[149].mxu1  ;;  %4116 = vmatprep.subr.bf16.mxu0 %v5181_v63  ;;  %v5200_v16 = vld [vmem:[#allocation8 + $0x3f0] ss:$8 sps:$4 sm:$0xff]  }
 0x2ac   : > { %v1942_v15 = vmax.f32 %v1557_v17, 0.0  ;;  %v1559_v19 = vpop.f32.mrb[150].mxu1  ;;  %3979 = vmatprep.mubr.bf16.mxu0 %v2406_v20 }
 0x2ad   : > { %v1949_v28 = vmax.f32 %v1559_v19, 0.0  ;;  %v1561_v21 = vpop.f32.mrb[151].mxu1  ;;  %3980 = vmatmul.mubr.bf16.gmra.mrb[16].mxu0 %v2405_v31  ;;  %v2197_v26 = vmul.f32 %v1941_v24, %v1941_v24 }
 0x2ae   : > { %v1950_v55 = vmax.f32 %v1561_v21, 0.0  ;;  %4117 = vmatpush1.bf16.msra.mxu0 %v5179_v8  ;;  %v2198_v33 = vmul.f32 %v1942_v15, %v1942_v15 }
 0x2af   : > { %v2205_v11 = vmul.f32 %v1949_v28, %v1949_v28  ;;  %4118 = vmatprep.subr.bf16.mxu0 %v5184_v13 }
 0x2b0   : > { %v2206_v34 = vmul.f32 %v1950_v55, %v1950_v55 }
 0x2b1   : > { %v2413_v32 = vpack.c.bf16 %v2205_v11, %v2197_v26 }
 0x2b2   : > { %v2414_v38 = vpack.c.bf16 %v2206_v34, %v2198_v33  ;;  %v1565_v27 = vpop.f32.mrb[152].mxu1  ;;  %4119 = vmatpush1.bf16.msra.mxu0 %v5182_v10 }
 0x2b3   : > { %v1957_v39 = vmax.f32 %v1565_v27, 0.0  ;;  %v1567_v35 = vpop.f32.mrb[153].mxu1  ;;  %4120 = vmatprep.subr.bf16.mxu0 %v5187_v25 }
 0x2b4   : > { %v1958_v44 = vmax.f32 %v1567_v35, 0.0  ;;  %v1569_v46 = vpop.f32.mrb[154].mxu1  ;;  %3989 = vmatprep.mubr.bf16.mxu0 %v2414_v38 }
 0x2b5   : > { %v1965_v12 = vmax.f32 %v1569_v46, 0.0  ;;  %v1571_v47 = vpop.f32.mrb[155].mxu1  ;;  %3990 = vmatmul.mubr.bf16.gmra.mrb[20].mxu0 %v2413_v32  ;;  %v2213_v48 = vmul.f32 %v1957_v39, %v1957_v39 }
 0x2b6   : > { %v1966_v45 = vmax.f32 %v1571_v47, 0.0  ;;  %4121 = vmatpush1.bf16.msra.mxu0 %v5185_v22  ;;  %v2214_v14 = vmul.f32 %v1958_v44, %v1958_v44 }
 0x2b7   : > { %v2221_v37 = vmul.f32 %v1965_v12, %v1965_v12  ;;  %4122 = vmatprep.subr.bf16.mxu0 %v5190_v29 }
 0x2b8   : > { %v2222_v50 = vmul.f32 %v1966_v45, %v1966_v45 }
 0x2b9   : > { %v2421_v40 = vpack.c.bf16 %v2221_v37, %v2213_v48 }
 0x2ba   : > { %v2422_v51 = vpack.c.bf16 %v2222_v50, %v2214_v14  ;;  %v1575_v41 = vpop.f32.mrb[156].mxu1  ;;  %4123 = vmatpush1.bf16.msra.mxu0 %v5188_v36 }
 0x2bb   : > { %v1973_v61 = vmax.f32 %v1575_v41, 0.0  ;;  %v1577_v62 = vpop.f32.mrb[157].mxu1  ;;  %4124 = vmatprep.subr.bf16.mxu0 %v5193_v53 }
 0x2bc   : > { %v1974_v3 = vmax.f32 %v1577_v62, 0.0  ;;  %v1579_v4 = vpop.f32.mrb[158].mxu1  ;;  %3999 = vmatprep.mubr.bf16.mxu0 %v2422_v51 }
 0x2bd   : > { %v1981_v54 = vmax.f32 %v1579_v4, 0.0  ;;  %v1581_v60 = vpop.f32.mrb[159].mxu1  ;;  %4000 = vmatmul.mubr.bf16.gmra.mrb[24].mxu0 %v2421_v40  ;;  %v2229_v58 = vmul.f32 %v1973_v61, %v1973_v61 }
 0x2be   : > { %v1982_v5 = vmax.f32 %v1581_v60, 0.0  ;;  %4125 = vmatpush1.bf16.msra.mxu0 %v5191_v43  ;;  %v2230_v9 = vmul.f32 %v1974_v3, %v1974_v3 }
 0x2bf   : > { %v2237_v57 = vmul.f32 %v1981_v54, %v1981_v54  ;;  %4126 = vmatprep.subr.bf16.mxu0 %v5196_v42 }
 0x2c0   : > { %v2238_v1 = vmul.f32 %v1982_v5, %v1982_v5 }
 0x2c1   : > { %v2429_v18 = vpack.c.bf16 %v2237_v57, %v2229_v58 }
 0x2c2   : > { %v2430_v6 = vpack.c.bf16 %v2238_v1, %v2230_v9  ;;  %v1585_v49 = vpop.f32.mrb[160].mxu1  ;;  %4127 = vmatpush1.bf16.msra.mxu0 %v5194_v56 }
 0x2c3   : > { %v1989_v7 = vmax.f32 %v1585_v49, 0.0  ;;  %v1587_v30 = vpop.f32.mrb[161].mxu1  ;;  %4128 = vmatprep.subr.bf16.mxu0 %v5199_v0 }
 0x2c4   : > { %v1990_v63 = vmax.f32 %v1587_v30, 0.0  ;;  %v1589_v2 = vpop.f32.mrb[162].mxu1  ;;  %4009 = vmatprep.mubr.bf16.mxu0 %v2430_v6 }
 0x2c5   : > { %v1997_v23 = vmax.f32 %v1589_v2, 0.0  ;;  %v1591_v31 = vpop.f32.mrb[163].mxu1  ;;  %4010 = vmatmul.mubr.bf16.gmra.mrb[28].mxu0 %v2429_v18  ;;  %v2245_v8 = vmul.f32 %v1989_v7, %v1989_v7 }
 0x2c6   : > { %v1998_v20 = vmax.f32 %v1591_v31, 0.0  ;;  %4129 = vmatpush1.bf16.msra.mxu0 %v5197_v59  ;;  %v2246_v17 = vmul.f32 %v1990_v63, %v1990_v63 }
 0x2c7   : > { %v2253_v24 = vmul.f32 %v1997_v23, %v1997_v23  ;;  %4130 = vmatprep.subr.bf16.mxu0 %v5202_v52 }
 0x2c8   : > { %v2254_v13 = vmul.f32 %v1998_v20, %v1998_v20 }
 0x2c9   : > { %v2437_v15 = vpack.c.bf16 %v2253_v24, %v2245_v8 }
 0x2ca   : > { %v2438_v19 = vpack.c.bf16 %v2254_v13, %v2246_v17  ;;  %v1595_v28 = vpop.f32.mrb[164].mxu1  ;;  %4131 = vmatpush1.bf16.msra.mxu0 %v5200_v16 }
 0x2cb   : > { %v2005_v21 = vmax.f32 %v1595_v28, 0.0  ;;  %v1597_v55 = vpop.f32.mrb[165].mxu1 }
 0x2cc   : > { %v2006_v10 = vmax.f32 %v1597_v55, 0.0  ;;  %v1599_v26 = vpop.f32.mrb[166].mxu1  ;;  %4019 = vmatprep.mubr.bf16.mxu0 %v2438_v19 }
 0x2cd   : > { %v2013_v11 = vmax.f32 %v1599_v26, 0.0  ;;  %v1601_v25 = vpop.f32.mrb[167].mxu1  ;;  %4020 = vmatmul.mubr.bf16.gmra.mrb[32].mxu0 %v2437_v15  ;;  %v2261_v34 = vmul.f32 %v2005_v21, %v2005_v21 }
 0x2ce   : > { %v2014_v33 = vmax.f32 %v1601_v25, 0.0  ;;  %v2262_v38 = vmul.f32 %v2006_v10, %v2006_v10 }
 0x2cf   : > { %v2269_v32 = vmul.f32 %v2013_v11, %v2013_v11 }
 0x2d0   : > { %v2270_v27 = vmul.f32 %v2014_v33, %v2014_v33 }
 0x2d1   : > { %v2445_v22 = vpack.c.bf16 %v2269_v32, %v2261_v34 }
 0x2d2   : > { %v2446_v39 = vpack.c.bf16 %v2270_v27, %v2262_v38  ;;  %v1605_v35 = vpop.f32.mrb[168].mxu1 }
 0x2d3   : > { %v2021_v29 = vmax.f32 %v1605_v35, 0.0  ;;  %v1607_v44 = vpop.f32.mrb[169].mxu1 }
 0x2d4   : > { %v2022_v46 = vmax.f32 %v1607_v44, 0.0  ;;  %v1609_v12 = vpop.f32.mrb[170].mxu1  ;;  %4029 = vmatprep.mubr.bf16.mxu0 %v2446_v39 }
 0x2d5   : > { %v2029_v47 = vmax.f32 %v1609_v12, 0.0  ;;  %v1611_v45 = vpop.f32.mrb[171].mxu1  ;;  %4030 = vmatmul.mubr.bf16.gmra.mrb[36].mxu0 %v2445_v22  ;;  %v2277_v48 = vmul.f32 %v2021_v29, %v2021_v29 }
 0x2d6   : > { %v2030_v36 = vmax.f32 %v1611_v45, 0.0  ;;  %v2278_v53 = vmul.f32 %v2022_v46, %v2022_v46 }
 0x2d7   : > { %v2285_v37 = vmul.f32 %v2029_v47, %v2029_v47 }
 0x2d8   : > { %v2286_v14 = vmul.f32 %v2030_v36, %v2030_v36 }
 0x2d9   : > { %v2453_v50 = vpack.c.bf16 %v2285_v37, %v2277_v48 }
 0x2da   : > { %v2454_v40 = vpack.c.bf16 %v2286_v14, %v2278_v53  ;;  %v1615_v51 = vpop.f32.mrb[172].mxu1 }
 0x2db   : > { %v2037_v41 = vmax.f32 %v1615_v51, 0.0  ;;  %v1617_v43 = vpop.f32.mrb[173].mxu1 }
 0x2dc   : > { %v2038_v61 = vmax.f32 %v1617_v43, 0.0  ;;  %v1619_v62 = vpop.f32.mrb[174].mxu1  ;;  %4039 = vmatprep.mubr.bf16.mxu0 %v2454_v40 }
 0x2dd   : > { %v2045_v42 = vmax.f32 %v1619_v62, 0.0  ;;  %v1621_v3 = vpop.f32.mrb[175].mxu1  ;;  %4040 = vmatmul.mubr.bf16.gmra.mrb[40].mxu0 %v2453_v50  ;;  %v2293_v54 = vmul.f32 %v2037_v41, %v2037_v41 }
 0x2de   : > { %v2046_v4 = vmax.f32 %v1621_v3, 0.0  ;;  %v2294_v5 = vmul.f32 %v2038_v61, %v2038_v61 }
 0x2df   : > { %v2301_v60 = vmul.f32 %v2045_v42, %v2045_v42 }
 0x2e0   : > { %v2302_v56 = vmul.f32 %v2046_v4, %v2046_v4 }
 0x2e1   : > { %v2461_v58 = vpack.c.bf16 %v2301_v60, %v2293_v54 }
 0x2e2   : > { %v2462_v57 = vpack.c.bf16 %v2302_v56, %v2294_v5  ;;  %v1625_v0 = vpop.f32.mrb[176].mxu1 }
 0x2e3   : > { %v2053_v9 = vmax.f32 %v1625_v0, 0.0  ;;  %v1627_v1 = vpop.f32.mrb[177].mxu1 }
 0x2e4   : > { %v2054_v18 = vmax.f32 %v1627_v1, 0.0  ;;  %v1629_v6 = vpop.f32.mrb[178].mxu1  ;;  %4049 = vmatprep.mubr.bf16.mxu0 %v2462_v57 }
 0x2e5   : > { %v2061_v49 = vmax.f32 %v1629_v6, 0.0  ;;  %v1631_v59 = vpop.f32.mrb[179].mxu1  ;;  %4050 = vmatmul.mubr.bf16.gmra.mrb[44].mxu0 %v2461_v58  ;;  %v2309_v30 = vmul.f32 %v2053_v9, %v2053_v9 }
 0x2e6   : > { %v2062_v7 = vmax.f32 %v1631_v59, 0.0  ;;  %v2310_v63 = vmul.f32 %v2054_v18, %v2054_v18 }
 0x2e7   : > { %v2317_v52 = vmul.f32 %v2061_v49, %v2061_v49 }
 0x2e8   : > { %v2318_v2 = vmul.f32 %v2062_v7, %v2062_v7 }
 0x2e9   : > { %v2469_v23 = vpack.c.bf16 %v2317_v52, %v2309_v30 }
 0x2ea   : > { %v2470_v31 = vpack.c.bf16 %v2318_v2, %v2310_v63  ;;  %v1635_v20 = vpop.f32.mrb[180].mxu1 }
 0x2eb   : > { %v2069_v16 = vmax.f32 %v1635_v20, 0.0  ;;  %v1637_v8 = vpop.f32.mrb[181].mxu1 }
 0x2ec   : > { %v2070_v24 = vmax.f32 %v1637_v8, 0.0  ;;  %v1639_v17 = vpop.f32.mrb[182].mxu1  ;;  %4059 = vmatprep.mubr.bf16.mxu0 %v2470_v31 }
 0x2ed   : > { %v2077_v13 = vmax.f32 %v1639_v17, 0.0  ;;  %v1641_v15 = vpop.f32.mrb[183].mxu1  ;;  %4060 = vmatmul.mubr.bf16.gmra.mrb[48].mxu0 %v2469_v23  ;;  %v2325_v28 = vmul.f32 %v2069_v16, %v2069_v16 }
 0x2ee   : > { %v2078_v19 = vmax.f32 %v1641_v15, 0.0  ;;  %v2326_v55 = vmul.f32 %v2070_v24, %v2070_v24 }
 0x2ef   : > { %v2333_v21 = vmul.f32 %v2077_v13, %v2077_v13 }
 0x2f0   : > { %v2334_v10 = vmul.f32 %v2078_v19, %v2078_v19 }
 0x2f1   : > { %v2477_v26 = vpack.c.bf16 %v2333_v21, %v2325_v28 }
 0x2f2   : > { %v2478_v11 = vpack.c.bf16 %v2334_v10, %v2326_v55  ;;  %v1645_v25 = vpop.f32.mrb[184].mxu1 }
 0x2f3   : > { %v2085_v33 = vmax.f32 %v1645_v25, 0.0  ;;  %v1647_v34 = vpop.f32.mrb[185].mxu1 }
 0x2f4   : > { %v2086_v32 = vmax.f32 %v1647_v34, 0.0  ;;  %v1649_v38 = vpop.f32.mrb[186].mxu1  ;;  %4069 = vmatprep.mubr.bf16.mxu0 %v2478_v11 }
 0x2f5   : > { %v2093_v27 = vmax.f32 %v1649_v38, 0.0  ;;  %v1651_v22 = vpop.f32.mrb[187].mxu1  ;;  %4070 = vmatmul.mubr.bf16.gmra.mrb[52].mxu0 %v2477_v26  ;;  %v2341_v35 = vmul.f32 %v2085_v33, %v2085_v33 }
 0x2f6   : > { %v2094_v39 = vmax.f32 %v1651_v22, 0.0  ;;  %v2342_v44 = vmul.f32 %v2086_v32, %v2086_v32 }
 0x2f7   : > { %v2349_v29 = vmul.f32 %v2093_v27, %v2093_v27 }
 0x2f8   : > { %v2350_v46 = vmul.f32 %v2094_v39, %v2094_v39 }
 0x2f9   : > { %v2485_v12 = vpack.c.bf16 %v2349_v29, %v2341_v35 }
 0x2fa   : > { %v2486_v47 = vpack.c.bf16 %v2350_v46, %v2342_v44  ;;  %v1655_v45 = vpop.f32.mrb[188].mxu1 }
 0x2fb   : > { %v2101_v36 = vmax.f32 %v1655_v45, 0.0  ;;  %v1657_v48 = vpop.f32.mrb[189].mxu1 }
 0x2fc   : > { %v2102_v37 = vmax.f32 %v1657_v48, 0.0  ;;  %v1659_v53 = vpop.f32.mrb[190].mxu1  ;;  %4079 = vmatprep.mubr.bf16.mxu0 %v2486_v47 }
 0x2fd   : > { %v2109_v14 = vmax.f32 %v1659_v53, 0.0  ;;  %v1661_v50 = vpop.f32.mrb[191].mxu1  ;;  %4080 = vmatmul.mubr.bf16.gmra.mrb[56].mxu0 %v2485_v12  ;;  %v2357_v51 = vmul.f32 %v2101_v36, %v2101_v36 }
 0x2fe   : > { %v2110_v40 = vmax.f32 %v1661_v50, 0.0  ;;  %v2358_v43 = vmul.f32 %v2102_v37, %v2102_v37 }
 0x2ff   : > { %v2365_v41 = vmul.f32 %v2109_v14, %v2109_v14 }
 0x300   : > { %v2366_v61 = vmul.f32 %v2110_v40, %v2110_v40 }
 0x301   : > { %v2493_v62 = vpack.c.bf16 %v2365_v41, %v2357_v51 }
 0x302   : > { %v2494_v42 = vpack.c.bf16 %v2366_v61, %v2358_v43  ;;  %v1698_v3 = vpop.f32.mrb[192].mxu1 }
 0x303   : > { %v1863_v4 = vmax.f32 %v1698_v3, 0.0  ;;  %v1700_v54 = vpop.f32.mrb[193].mxu1 }
 0x304   : > { %v1864_v60 = vmax.f32 %v1700_v54, 0.0  ;;  %v1702_v5 = vpop.f32.mrb[194].mxu1  ;;  %4089 = vmatprep.mubr.bf16.mxu0 %v2494_v42 }
 0x305   : > { %v1871_v56 = vmax.f32 %v1702_v5, 0.0  ;;  %v1704_v58 = vpop.f32.mrb[195].mxu1  ;;  %4090 = vmatmul.mubr.bf16.gmra.mrb[60].mxu0 %v2493_v62  ;;  %v2119_v0 = vmul.f32 %v1863_v4, %v1863_v4 }
 0x306   : > { %v1872_v57 = vmax.f32 %v1704_v58, 0.0  ;;  %v2120_v1 = vmul.f32 %v1864_v60, %v1864_v60 }
 0x307   : > { %v2127_v9 = vmul.f32 %v1871_v56, %v1871_v56 }
 0x308   : > { %v2128_v18 = vmul.f32 %v1872_v57, %v1872_v57 }
 0x309   : > { %v2375_v6 = vpack.c.bf16 %v2127_v9, %v2119_v0 }
 0x30a   : > { %v2376_v49 = vpack.c.bf16 %v2128_v18, %v2120_v1  ;;  %v1708_v59 = vpop.f32.mrb[196].mxu1 }
 0x30b   : > { %v1879_v7 = vmax.f32 %v1708_v59, 0.0  ;;  %v1710_v30 = vpop.f32.mrb[197].mxu1 }
 0x30c   : > { %v1880_v52 = vmax.f32 %v1710_v30, 0.0  ;;  %v1712_v63 = vpop.f32.mrb[198].mxu1  ;;  %4132 = vmatprep.mubr.bf16.mxu0 %v2376_v49 }
 0x30d   : > { %v1887_v2 = vmax.f32 %v1712_v63, 0.0  ;;  %v1714_v23 = vpop.f32.mrb[199].mxu1  ;;  %4133 = vmatmul.mubr.bf16.vlgmr.msra.gmra.mrb[0].mxu0 %v2375_v6  ;;  %v2135_v20 = vmul.f32 %v1879_v7, %v1879_v7 }
 0x30e   : > { %v1888_v31 = vmax.f32 %v1714_v23, 0.0  ;;  %v2136_v8 = vmul.f32 %v1880_v52, %v1880_v52 }
 0x30f   : > { %v2143_v16 = vmul.f32 %v1887_v2, %v1887_v2 }
 0x310   : > { %v2144_v24 = vmul.f32 %v1888_v31, %v1888_v31 }
 0x311   : > { %v2383_v17 = vpack.c.bf16 %v2143_v16, %v2135_v20 }
 0x312   : > { %v2384_v13 = vpack.c.bf16 %v2144_v24, %v2136_v8  ;;  %v1718_v15 = vpop.f32.mrb[200].mxu1 }
 0x313   : > { %v1895_v19 = vmax.f32 %v1718_v15, 0.0  ;;  %v1720_v28 = vpop.f32.mrb[201].mxu1 }
 0x314   : > { %v1896_v21 = vmax.f32 %v1720_v28, 0.0  ;;  %v1722_v55 = vpop.f32.mrb[202].mxu1  ;;  %4142 = vmatprep.mubr.bf16.mxu0 %v2384_v13 }
 0x315   : > { %v1903_v10 = vmax.f32 %v1722_v55, 0.0  ;;  %v1724_v26 = vpop.f32.mrb[203].mxu1  ;;  %4143 = vmatmul.mubr.bf16.gmra.mrb[4].mxu0 %v2383_v17  ;;  %v2151_v25 = vmul.f32 %v1895_v19, %v1895_v19 }
 0x316   : > { %v1904_v11 = vmax.f32 %v1724_v26, 0.0  ;;  %v2152_v34 = vmul.f32 %v1896_v21, %v1896_v21 }
 0x317   : > { %v2159_v33 = vmul.f32 %v1903_v10, %v1903_v10 }
 0x318   : > { %v2160_v32 = vmul.f32 %v1904_v11, %v1904_v11 }
 0x319   : > { %v2391_v38 = vpack.c.bf16 %v2159_v33, %v2151_v25 }
 0x31a   : > { %v2392_v27 = vpack.c.bf16 %v2160_v32, %v2152_v34  ;;  %v1728_v22 = vpop.f32.mrb[204].mxu1 }
 0x31b   : > { %v1911_v39 = vmax.f32 %v1728_v22, 0.0  ;;  %v1730_v35 = vpop.f32.mrb[205].mxu1 }
 0x31c   : > { %v1912_v29 = vmax.f32 %v1730_v35, 0.0  ;;  %v1732_v44 = vpop.f32.mrb[206].mxu1  ;;  %4152 = vmatprep.mubr.bf16.mxu0 %v2392_v27 }
 0x31d   : > { %v1919_v46 = vmax.f32 %v1732_v44, 0.0  ;;  %v1734_v12 = vpop.f32.mrb[207].mxu1  ;;  %4153 = vmatmul.mubr.bf16.gmra.mrb[8].mxu0 %v2391_v38  ;;  %v2167_v45 = vmul.f32 %v1911_v39, %v1911_v39 }
 0x31e   : > { %v1920_v47 = vmax.f32 %v1734_v12, 0.0  ;;  %v2168_v48 = vmul.f32 %v1912_v29, %v1912_v29 }
 0x31f   : > { %v2175_v36 = vmul.f32 %v1919_v46, %v1919_v46 }
 0x320   : > { %v2176_v37 = vmul.f32 %v1920_v47, %v1920_v47 }
 0x321   : > { %v2399_v53 = vpack.c.bf16 %v2175_v36, %v2167_v45 }
 0x322   : > { %v2400_v14 = vpack.c.bf16 %v2176_v37, %v2168_v48  ;;  %v1738_v50 = vpop.f32.mrb[208].mxu1 }
 0x323   : > { %v1927_v40 = vmax.f32 %v1738_v50, 0.0  ;;  %v1740_v51 = vpop.f32.mrb[209].mxu1 }
 0x324   : > { %v1928_v41 = vmax.f32 %v1740_v51, 0.0  ;;  %v1742_v43 = vpop.f32.mrb[210].mxu1  ;;  %4162 = vmatprep.mubr.bf16.mxu0 %v2400_v14 }
 0x325   : > { %v1935_v61 = vmax.f32 %v1742_v43, 0.0  ;;  %v1744_v62 = vpop.f32.mrb[211].mxu1  ;;  %4163 = vmatmul.mubr.bf16.gmra.mrb[12].mxu0 %v2399_v53  ;;  %v2183_v3 = vmul.f32 %v1927_v40, %v1927_v40 }
 0x326   : > { %v1936_v42 = vmax.f32 %v1744_v62, 0.0  ;;  %v2184_v54 = vmul.f32 %v1928_v41, %v1928_v41 }
 0x327   : > { %v2191_v4 = vmul.f32 %v1935_v61, %v1935_v61 }
 0x328   : > { %v2192_v60 = vmul.f32 %v1936_v42, %v1936_v42 }
 0x329   : > { %v2407_v5 = vpack.c.bf16 %v2191_v4, %v2183_v3 }
 0x32a   : > { %v2408_v56 = vpack.c.bf16 %v2192_v60, %v2184_v54  ;;  %v1748_v58 = vpop.f32.mrb[212].mxu1 }
 0x32b   : > { %v1943_v57 = vmax.f32 %v1748_v58, 0.0  ;;  %v1750_v0 = vpop.f32.mrb[213].mxu1 }
 0x32c   : > { %v1944_v9 = vmax.f32 %v1750_v0, 0.0  ;;  %v1752_v1 = vpop.f32.mrb[214].mxu1  ;;  %4172 = vmatprep.mubr.bf16.mxu0 %v2408_v56 }
 0x32d   : > { %v1951_v18 = vmax.f32 %v1752_v1, 0.0  ;;  %v1754_v6 = vpop.f32.mrb[215].mxu1  ;;  %4173 = vmatmul.mubr.bf16.gmra.mrb[16].mxu0 %v2407_v5  ;;  %v2199_v59 = vmul.f32 %v1943_v57, %v1943_v57 }
 0x32e   : > { %v1952_v49 = vmax.f32 %v1754_v6, 0.0  ;;  %v2200_v30 = vmul.f32 %v1944_v9, %v1944_v9 }
 0x32f   : > { %v2207_v7 = vmul.f32 %v1951_v18, %v1951_v18 }
 0x330   : > { %v2208_v52 = vmul.f32 %v1952_v49, %v1952_v49 }
 0x331   : > { %v2415_v63 = vpack.c.bf16 %v2207_v7, %v2199_v59 }
 0x332   : > { %v2416_v2 = vpack.c.bf16 %v2208_v52, %v2200_v30  ;;  %v1758_v23 = vpop.f32.mrb[216].mxu1 }
 0x333   : > { %v1959_v31 = vmax.f32 %v1758_v23, 0.0  ;;  %v1760_v20 = vpop.f32.mrb[217].mxu1 }
 0x334   : > { %v1960_v16 = vmax.f32 %v1760_v20, 0.0  ;;  %v1762_v8 = vpop.f32.mrb[218].mxu1  ;;  %4182 = vmatprep.mubr.bf16.mxu0 %v2416_v2 }
 0x335   : > { %v1967_v24 = vmax.f32 %v1762_v8, 0.0  ;;  %v1764_v17 = vpop.f32.mrb[219].mxu1  ;;  %4183 = vmatmul.mubr.bf16.gmra.mrb[20].mxu0 %v2415_v63  ;;  %v2215_v15 = vmul.f32 %v1959_v31, %v1959_v31 }
 0x336   : > { %v1968_v13 = vmax.f32 %v1764_v17, 0.0  ;;  %v2216_v28 = vmul.f32 %v1960_v16, %v1960_v16 }
 0x337   : > { %v2223_v19 = vmul.f32 %v1967_v24, %v1967_v24 }
 0x338   : > { %v2224_v21 = vmul.f32 %v1968_v13, %v1968_v13 }
 0x339   : > { %v2423_v55 = vpack.c.bf16 %v2223_v19, %v2215_v15 }
 0x33a   : > { %v2424_v10 = vpack.c.bf16 %v2224_v21, %v2216_v28  ;;  %v1768_v26 = vpop.f32.mrb[220].mxu1 }
 0x33b   : > { %v1975_v11 = vmax.f32 %v1768_v26, 0.0  ;;  %v1770_v25 = vpop.f32.mrb[221].mxu1 }
 0x33c   : > { %v1976_v33 = vmax.f32 %v1770_v25, 0.0  ;;  %v1772_v34 = vpop.f32.mrb[222].mxu1  ;;  %4192 = vmatprep.mubr.bf16.mxu0 %v2424_v10 }
 0x33d   : > { %v1983_v32 = vmax.f32 %v1772_v34, 0.0  ;;  %v1774_v38 = vpop.f32.mrb[223].mxu1  ;;  %4193 = vmatmul.mubr.bf16.gmra.mrb[24].mxu0 %v2423_v55  ;;  %v2231_v22 = vmul.f32 %v1975_v11, %v1975_v11 }
 0x33e   : > { %v1984_v27 = vmax.f32 %v1774_v38, 0.0  ;;  %v2232_v35 = vmul.f32 %v1976_v33, %v1976_v33 }
 0x33f   : > { %v2239_v39 = vmul.f32 %v1983_v32, %v1983_v32 }
 0x340   : > { %v2240_v29 = vmul.f32 %v1984_v27, %v1984_v27 }
 0x341   : > { %v2431_v44 = vpack.c.bf16 %v2239_v39, %v2231_v22 }
 0x342   : > { %v2432_v46 = vpack.c.bf16 %v2240_v29, %v2232_v35  ;;  %v1778_v12 = vpop.f32.mrb[224].mxu1 }
 0x343   : > { %v1991_v47 = vmax.f32 %v1778_v12, 0.0  ;;  %v1780_v45 = vpop.f32.mrb[225].mxu1 }
 0x344   : > { %v1992_v36 = vmax.f32 %v1780_v45, 0.0  ;;  %v1782_v48 = vpop.f32.mrb[226].mxu1  ;;  %4202 = vmatprep.mubr.bf16.mxu0 %v2432_v46 }
 0x345   : > { %v1999_v37 = vmax.f32 %v1782_v48, 0.0  ;;  %v1784_v53 = vpop.f32.mrb[227].mxu1  ;;  %4203 = vmatmul.mubr.bf16.gmra.mrb[28].mxu0 %v2431_v44  ;;  %v2247_v50 = vmul.f32 %v1991_v47, %v1991_v47 }
 0x346   : > { %v2000_v14 = vmax.f32 %v1784_v53, 0.0  ;;  %v2248_v51 = vmul.f32 %v1992_v36, %v1992_v36 }
 0x347   : > { %v2255_v40 = vmul.f32 %v1999_v37, %v1999_v37 }
 0x348   : > { %v2256_v41 = vmul.f32 %v2000_v14, %v2000_v14 }
 0x349   : > { %v2439_v43 = vpack.c.bf16 %v2255_v40, %v2247_v50 }
 0x34a   : > { %v2440_v61 = vpack.c.bf16 %v2256_v41, %v2248_v51  ;;  %v1788_v62 = vpop.f32.mrb[228].mxu1 }
 0x34b   : > { %v2007_v42 = vmax.f32 %v1788_v62, 0.0  ;;  %v1790_v3 = vpop.f32.mrb[229].mxu1 }
 0x34c   : > { %v2008_v4 = vmax.f32 %v1790_v3, 0.0  ;;  %v1792_v54 = vpop.f32.mrb[230].mxu1  ;;  %4212 = vmatprep.mubr.bf16.mxu0 %v2440_v61 }
 0x34d   : > { %v2015_v60 = vmax.f32 %v1792_v54, 0.0  ;;  %v1794_v5 = vpop.f32.mrb[231].mxu1  ;;  %4213 = vmatmul.mubr.bf16.gmra.mrb[32].mxu0 %v2439_v43  ;;  %v2263_v58 = vmul.f32 %v2007_v42, %v2007_v42 }
 0x34e   : > { %v2016_v56 = vmax.f32 %v1794_v5, 0.0  ;;  %v2264_v0 = vmul.f32 %v2008_v4, %v2008_v4 }
 0x34f   : > { %v2271_v57 = vmul.f32 %v2015_v60, %v2015_v60 }
 0x350   : > { %v2272_v9 = vmul.f32 %v2016_v56, %v2016_v56 }
 0x351   : > { %v2447_v1 = vpack.c.bf16 %v2271_v57, %v2263_v58 }
 0x352   : > { %v2448_v18 = vpack.c.bf16 %v2272_v9, %v2264_v0  ;;  %v1798_v6 = vpop.f32.mrb[232].mxu1 }
 0x353   : > { %v2023_v49 = vmax.f32 %v1798_v6, 0.0  ;;  %v1800_v59 = vpop.f32.mrb[233].mxu1 }
 0x354   : > { %v2024_v7 = vmax.f32 %v1800_v59, 0.0  ;;  %v1802_v30 = vpop.f32.mrb[234].mxu1  ;;  %4222 = vmatprep.mubr.bf16.mxu0 %v2448_v18 }
 0x355   : > { %v2031_v52 = vmax.f32 %v1802_v30, 0.0  ;;  %v1804_v63 = vpop.f32.mrb[235].mxu1  ;;  %4223 = vmatmul.mubr.bf16.gmra.mrb[36].mxu0 %v2447_v1  ;;  %v2279_v23 = vmul.f32 %v2023_v49, %v2023_v49 }
 0x356   : > { %v2032_v2 = vmax.f32 %v1804_v63, 0.0  ;;  %v2280_v20 = vmul.f32 %v2024_v7, %v2024_v7 }
 0x357   : > { %v2287_v31 = vmul.f32 %v2031_v52, %v2031_v52 }
 0x358   : > { %v2288_v16 = vmul.f32 %v2032_v2, %v2032_v2 }
 0x359   : > { %v2455_v8 = vpack.c.bf16 %v2287_v31, %v2279_v23 }
 0x35a   : > { %v2456_v24 = vpack.c.bf16 %v2288_v16, %v2280_v20  ;;  %v1808_v17 = vpop.f32.mrb[236].mxu1 }
 0x35b   : > { %v2039_v13 = vmax.f32 %v1808_v17, 0.0  ;;  %v1810_v15 = vpop.f32.mrb[237].mxu1 }
 0x35c   : > { %v2040_v19 = vmax.f32 %v1810_v15, 0.0  ;;  %v1812_v28 = vpop.f32.mrb[238].mxu1  ;;  %4232 = vmatprep.mubr.bf16.mxu0 %v2456_v24 }
 0x35d   : > { %v2047_v21 = vmax.f32 %v1812_v28, 0.0  ;;  %v1814_v55 = vpop.f32.mrb[239].mxu1  ;;  %4233 = vmatmul.mubr.bf16.gmra.mrb[40].mxu0 %v2455_v8  ;;  %v2295_v26 = vmul.f32 %v2039_v13, %v2039_v13 }
 0x35e   : > { %v2048_v10 = vmax.f32 %v1814_v55, 0.0  ;;  %v2296_v25 = vmul.f32 %v2040_v19, %v2040_v19 }
 0x35f   : > { %v2303_v11 = vmul.f32 %v2047_v21, %v2047_v21 }
 0x360   : > { %v2304_v33 = vmul.f32 %v2048_v10, %v2048_v10 }
 0x361   : > { %v2463_v34 = vpack.c.bf16 %v2303_v11, %v2295_v26 }
 0x362   : > { %v2464_v32 = vpack.c.bf16 %v2304_v33, %v2296_v25  ;;  %v1818_v38 = vpop.f32.mrb[240].mxu1 }
 0x363   : > { %v2055_v27 = vmax.f32 %v1818_v38, 0.0  ;;  %v1820_v22 = vpop.f32.mrb[241].mxu1 }
 0x364   : > { %v2056_v39 = vmax.f32 %v1820_v22, 0.0  ;;  %v1822_v35 = vpop.f32.mrb[242].mxu1  ;;  %4242 = vmatprep.mubr.bf16.mxu0 %v2464_v32 }
 0x365   : > { %v2063_v29 = vmax.f32 %v1822_v35, 0.0  ;;  %v1824_v44 = vpop.f32.mrb[243].mxu1  ;;  %4243 = vmatmul.mubr.bf16.gmra.mrb[44].mxu0 %v2463_v34  ;;  %v2311_v12 = vmul.f32 %v2055_v27, %v2055_v27 }
 0x366   : > { %v2064_v46 = vmax.f32 %v1824_v44, 0.0  ;;  %v2312_v45 = vmul.f32 %v2056_v39, %v2056_v39 }
 0x367   : > { %v2319_v47 = vmul.f32 %v2063_v29, %v2063_v29 }
 0x368   : > { %v2320_v36 = vmul.f32 %v2064_v46, %v2064_v46 }
 0x369   : > { %v2471_v48 = vpack.c.bf16 %v2319_v47, %v2311_v12 }
 0x36a   : > { %v2472_v37 = vpack.c.bf16 %v2320_v36, %v2312_v45  ;;  %v1828_v53 = vpop.f32.mrb[244].mxu1 }
 0x36b   : > { %v2071_v14 = vmax.f32 %v1828_v53, 0.0  ;;  %v1830_v50 = vpop.f32.mrb[245].mxu1 }
 0x36c   : > { %v2072_v40 = vmax.f32 %v1830_v50, 0.0  ;;  %v1832_v51 = vpop.f32.mrb[246].mxu1  ;;  %4252 = vmatprep.mubr.bf16.mxu0 %v2472_v37 }
 0x36d   : > { %v2079_v41 = vmax.f32 %v1832_v51, 0.0  ;;  %v1834_v43 = vpop.f32.mrb[247].mxu1  ;;  %4253 = vmatmul.mubr.bf16.gmra.mrb[48].mxu0 %v2471_v48  ;;  %v2327_v62 = vmul.f32 %v2071_v14, %v2071_v14 }
 0x36e   : > { %v2080_v61 = vmax.f32 %v1834_v43, 0.0  ;;  %v2328_v3 = vmul.f32 %v2072_v40, %v2072_v40 }
 0x36f   : > { %v2335_v42 = vmul.f32 %v2079_v41, %v2079_v41 }
 0x370   : > { %v2336_v4 = vmul.f32 %v2080_v61, %v2080_v61 }
 0x371   : > { %v2479_v54 = vpack.c.bf16 %v2335_v42, %v2327_v62 }
 0x372   : > { %v2480_v60 = vpack.c.bf16 %v2336_v4, %v2328_v3  ;;  %v1838_v5 = vpop.f32.mrb[248].mxu1 }
 0x373   : > { %v2087_v56 = vmax.f32 %v1838_v5, 0.0  ;;  %v1840_v58 = vpop.f32.mrb[249].mxu1 }
 0x374   : > { %v2088_v57 = vmax.f32 %v1840_v58, 0.0  ;;  %v1842_v0 = vpop.f32.mrb[250].mxu1  ;;  %4262 = vmatprep.mubr.bf16.mxu0 %v2480_v60 }
 0x375   : > { %v2095_v9 = vmax.f32 %v1842_v0, 0.0  ;;  %v1844_v1 = vpop.f32.mrb[251].mxu1  ;;  %4263 = vmatmul.mubr.bf16.gmra.mrb[52].mxu0 %v2479_v54  ;;  %v2343_v6 = vmul.f32 %v2087_v56, %v2087_v56 }
 0x376   : > { %v2096_v18 = vmax.f32 %v1844_v1, 0.0  ;;  %v2344_v59 = vmul.f32 %v2088_v57, %v2088_v57 }
 0x377   : > { %v2351_v49 = vmul.f32 %v2095_v9, %v2095_v9 }
 0x378   : > { %v2352_v7 = vmul.f32 %v2096_v18, %v2096_v18 }
 0x379   : > { %v2487_v30 = vpack.c.bf16 %v2351_v49, %v2343_v6 }
 0x37a   : > { %v2488_v52 = vpack.c.bf16 %v2352_v7, %v2344_v59  ;;  %v1848_v63 = vpop.f32.mrb[252].mxu1 }
 0x37b   : > { %v2103_v2 = vmax.f32 %v1848_v63, 0.0  ;;  %v1850_v23 = vpop.f32.mrb[253].mxu1 }
 0x37c   : > { %v2104_v31 = vmax.f32 %v1850_v23, 0.0  ;;  %v1852_v20 = vpop.f32.mrb[254].mxu1  ;;  %4272 = vmatprep.mubr.bf16.mxu0 %v2488_v52 }
 0x37d   : > { %v2111_v16 = vmax.f32 %v1852_v20, 0.0  ;;  %v1854_v8 = vpop.f32.mrb[255].mxu1  ;;  %4273 = vmatmul.mubr.bf16.gmra.mrb[56].mxu0 %v2487_v30  ;;  %v2359_v17 = vmul.f32 %v2103_v2, %v2103_v2 }
 0x37e   : > { %v2112_v24 = vmax.f32 %v1854_v8, 0.0  ;;  %v2360_v15 = vmul.f32 %v2104_v31, %v2104_v31 }
 0x37f   : > { %v2367_v13 = vmul.f32 %v2111_v16, %v2111_v16 }
 0x380   : > { %v2368_v19 = vmul.f32 %v2112_v24, %v2112_v24 }
 0x381   : > { %v2495_v28 = vpack.c.bf16 %v2367_v13, %v2359_v17 }
 0x382   : > { %v2496_v21 = vpack.c.bf16 %v2368_v19, %v2360_v15 }
 0x384   : > { %4282 = vmatprep.mubr.bf16.mxu0 %v2496_v21 }
 0x385   : > { %4283 = vmatmul.mubr.bf16.gmra.mrb[60].mxu0 %v2495_v28 }
 0x3e0   : > { %v4134_v55 = vpop.f32.mrb[0].mxu0 }
 0x3e1   : > { %4293 = vst [vmem:[%s5861_s18] sm:$0xff] %v4134_v55  ;;  %v4136_v10 = vpop.f32.mrb[1].mxu0 }
 0x3e2   : > { %4294 = vst [vmem:[%s5861_s18 + $0x8] sm:$0xff] %v4136_v10  ;;  %v4138_v26 = vpop.f32.mrb[2].mxu0 }
 0x3e3   : > { %4295 = vst [vmem:[%s5861_s18 + $0x10] sm:$0xff] %v4138_v26  ;;  %v4140_v11 = vpop.f32.mrb[3].mxu0 }
 0x3e4   : > { %4296 = vst [vmem:[%s5861_s18 + $0x18] sm:$0xff] %v4140_v11 }
 0x3e8   : > { %v4144_v25 = vpop.f32.mrb[4].mxu0 }
 0x3e9   : > { %4297 = vst [vmem:[%s5861_s18 + $0x20] sm:$0xff] %v4144_v25  ;;  %v4146_v33 = vpop.f32.mrb[5].mxu0 }
 0x3ea   : > { %4298 = vst [vmem:[%s5861_s18 + $0x28] sm:$0xff] %v4146_v33  ;;  %v4148_v34 = vpop.f32.mrb[6].mxu0 }
 0x3eb   : > { %4299 = vst [vmem:[%s5861_s18 + $0x30] sm:$0xff] %v4148_v34  ;;  %v4150_v32 = vpop.f32.mrb[7].mxu0 }
 0x3ec   : > { %4300 = vst [vmem:[%s5861_s18 + $0x38] sm:$0xff] %v4150_v32 }
 0x3f0   : > { %v4154_v38 = vpop.f32.mrb[8].mxu0 }
 0x3f1   : > { %4301 = vst [vmem:[%s5861_s18 + $0x40] sm:$0xff] %v4154_v38  ;;  %v4156_v27 = vpop.f32.mrb[9].mxu0 }
 0x3f2   : > { %4302 = vst [vmem:[%s5861_s18 + $0x48] sm:$0xff] %v4156_v27  ;;  %v4158_v22 = vpop.f32.mrb[10].mxu0 }
 0x3f3   : > { %4303 = vst [vmem:[%s5861_s18 + $0x50] sm:$0xff] %v4158_v22  ;;  %v4160_v39 = vpop.f32.mrb[11].mxu0 }
 0x3f4   : > { %4304 = vst [vmem:[%s5861_s18 + $0x58] sm:$0xff] %v4160_v39 }
 0x3f8   : > { %v4164_v35 = vpop.f32.mrb[12].mxu0 }
 0x3f9   : > { %4305 = vst [vmem:[%s5861_s18 + $0x60] sm:$0xff] %v4164_v35  ;;  %v4166_v29 = vpop.f32.mrb[13].mxu0 }
 0x3fa   : > { %4306 = vst [vmem:[%s5861_s18 + $0x68] sm:$0xff] %v4166_v29  ;;  %v4168_v44 = vpop.f32.mrb[14].mxu0 }
 0x3fb   : > { %4307 = vst [vmem:[%s5861_s18 + $0x70] sm:$0xff] %v4168_v44  ;;  %v4170_v46 = vpop.f32.mrb[15].mxu0 }
 0x3fc   : > { %4308 = vst [vmem:[%s5861_s18 + $0x78] sm:$0xff] %v4170_v46 }
 0x400   : > { %v4174_v12 = vpop.f32.mrb[16].mxu0 }
 0x401   : > { %4309 = vst [vmem:[%s5861_s18 + $0x80] sm:$0xff] %v4174_v12  ;;  %v4176_v47 = vpop.f32.mrb[17].mxu0 }
 0x402   : > { %4310 = vst [vmem:[%s5861_s18 + $0x88] sm:$0xff] %v4176_v47  ;;  %v4178_v45 = vpop.f32.mrb[18].mxu0 }
 0x403   : > { %4311 = vst [vmem:[%s5861_s18 + $0x90] sm:$0xff] %v4178_v45  ;;  %v4180_v36 = vpop.f32.mrb[19].mxu0 }
 0x404   : > { %4312 = vst [vmem:[%s5861_s18 + $0x98] sm:$0xff] %v4180_v36 }
 0x408   : > { %v4184_v48 = vpop.f32.mrb[20].mxu0 }
 0x409   : > { %4313 = vst [vmem:[%s5861_s18 + $0xa0] sm:$0xff] %v4184_v48  ;;  %v4186_v37 = vpop.f32.mrb[21].mxu0 }
 0x40a   : > { %4314 = vst [vmem:[%s5861_s18 + $0xa8] sm:$0xff] %v4186_v37  ;;  %v4188_v53 = vpop.f32.mrb[22].mxu0 }
 0x40b   : > { %4315 = vst [vmem:[%s5861_s18 + $0xb0] sm:$0xff] %v4188_v53  ;;  %v4190_v14 = vpop.f32.mrb[23].mxu0 }
 0x40c   : > { %4316 = vst [vmem:[%s5861_s18 + $0xb8] sm:$0xff] %v4190_v14 }
 0x410   : > { %v4194_v50 = vpop.f32.mrb[24].mxu0 }
 0x411   : > { %4317 = vst [vmem:[%s5861_s18 + $0xc0] sm:$0xff] %v4194_v50  ;;  %v4196_v40 = vpop.f32.mrb[25].mxu0 }
 0x412   : > { %4318 = vst [vmem:[%s5861_s18 + $0xc8] sm:$0xff] %v4196_v40  ;;  %v4198_v51 = vpop.f32.mrb[26].mxu0 }
 0x413   : > { %4319 = vst [vmem:[%s5861_s18 + $0xd0] sm:$0xff] %v4198_v51  ;;  %v4200_v41 = vpop.f32.mrb[27].mxu0 }
 0x414   : > { %4320 = vst [vmem:[%s5861_s18 + $0xd8] sm:$0xff] %v4200_v41 }
 0x418   : > { %v4204_v43 = vpop.f32.mrb[28].mxu0 }
 0x419   : > { %4321 = vst [vmem:[%s5861_s18 + $0xe0] sm:$0xff] %v4204_v43  ;;  %v4206_v61 = vpop.f32.mrb[29].mxu0 }
 0x41a   : > { %4322 = vst [vmem:[%s5861_s18 + $0xe8] sm:$0xff] %v4206_v61  ;;  %v4208_v62 = vpop.f32.mrb[30].mxu0 }
 0x41b   : > { %4323 = vst [vmem:[%s5861_s18 + $0xf0] sm:$0xff] %v4208_v62  ;;  %v4210_v42 = vpop.f32.mrb[31].mxu0 }
 0x41c   : > { %4324 = vst [vmem:[%s5861_s18 + $0xf8] sm:$0xff] %v4210_v42 }
 0x420   : > { %v4214_v3 = vpop.f32.mrb[32].mxu0 }
 0x421   : > { %4325 = vst [vmem:[%s5861_s18 + $0x100] sm:$0xff] %v4214_v3  ;;  %v4216_v4 = vpop.f32.mrb[33].mxu0 }
 0x422   : > { %4326 = vst [vmem:[%s5861_s18 + $0x108] sm:$0xff] %v4216_v4  ;;  %v4218_v54 = vpop.f32.mrb[34].mxu0 }
 0x423   : > { %4327 = vst [vmem:[%s5861_s18 + $0x110] sm:$0xff] %v4218_v54  ;;  %v4220_v60 = vpop.f32.mrb[35].mxu0 }
 0x424   : > { %4328 = vst [vmem:[%s5861_s18 + $0x118] sm:$0xff] %v4220_v60 }
 0x428   : > { %v4224_v5 = vpop.f32.mrb[36].mxu0 }
 0x429   : > { %4329 = vst [vmem:[%s5861_s18 + $0x120] sm:$0xff] %v4224_v5  ;;  %v4226_v56 = vpop.f32.mrb[37].mxu0 }
 0x42a   : > { %4330 = vst [vmem:[%s5861_s18 + $0x128] sm:$0xff] %v4226_v56  ;;  %v4228_v58 = vpop.f32.mrb[38].mxu0 }
 0x42b   : > { %4331 = vst [vmem:[%s5861_s18 + $0x130] sm:$0xff] %v4228_v58  ;;  %v4230_v57 = vpop.f32.mrb[39].mxu0 }
 0x42c   : > { %4332 = vst [vmem:[%s5861_s18 + $0x138] sm:$0xff] %v4230_v57 }
 0x430   : > { %v4234_v0 = vpop.f32.mrb[40].mxu0 }
 0x431   : > { %4333 = vst [vmem:[%s5861_s18 + $0x140] sm:$0xff] %v4234_v0  ;;  %v4236_v9 = vpop.f32.mrb[41].mxu0 }
 0x432   : > { %4334 = vst [vmem:[%s5861_s18 + $0x148] sm:$0xff] %v4236_v9  ;;  %v4238_v1 = vpop.f32.mrb[42].mxu0 }
 0x433   : > { %4335 = vst [vmem:[%s5861_s18 + $0x150] sm:$0xff] %v4238_v1  ;;  %v4240_v18 = vpop.f32.mrb[43].mxu0 }
 0x434   : > { %4336 = vst [vmem:[%s5861_s18 + $0x158] sm:$0xff] %v4240_v18 }
 0x438   : > { %v4244_v6 = vpop.f32.mrb[44].mxu0 }
 0x439   : > { %4337 = vst [vmem:[%s5861_s18 + $0x160] sm:$0xff] %v4244_v6  ;;  %v4246_v49 = vpop.f32.mrb[45].mxu0 }
 0x43a   : > { %4338 = vst [vmem:[%s5861_s18 + $0x168] sm:$0xff] %v4246_v49  ;;  %v4248_v59 = vpop.f32.mrb[46].mxu0 }
 0x43b   : > { %4339 = vst [vmem:[%s5861_s18 + $0x170] sm:$0xff] %v4248_v59  ;;  %v4250_v7 = vpop.f32.mrb[47].mxu0 }
 0x43c   : > { %4340 = vst [vmem:[%s5861_s18 + $0x178] sm:$0xff] %v4250_v7 }
 0x440   : > { %v4254_v30 = vpop.f32.mrb[48].mxu0 }
 0x441   : > { %4341 = vst [vmem:[%s5861_s18 + $0x180] sm:$0xff] %v4254_v30  ;;  %v4256_v52 = vpop.f32.mrb[49].mxu0 }
 0x442   : > { %4342 = vst [vmem:[%s5861_s18 + $0x188] sm:$0xff] %v4256_v52  ;;  %v4258_v63 = vpop.f32.mrb[50].mxu0 }
 0x443   : > { %4343 = vst [vmem:[%s5861_s18 + $0x190] sm:$0xff] %v4258_v63  ;;  %v4260_v2 = vpop.f32.mrb[51].mxu0 }
 0x444   : > { %4344 = vst [vmem:[%s5861_s18 + $0x198] sm:$0xff] %v4260_v2 }
 0x448   : > { %v4264_v23 = vpop.f32.mrb[52].mxu0 }
 0x449   : > { %4345 = vst [vmem:[%s5861_s18 + $0x1a0] sm:$0xff] %v4264_v23  ;;  %v4266_v31 = vpop.f32.mrb[53].mxu0 }
 0x44a   : > { %4346 = vst [vmem:[%s5861_s18 + $0x1a8] sm:$0xff] %v4266_v31  ;;  %v4268_v20 = vpop.f32.mrb[54].mxu0 }
 0x44b   : > { %4347 = vst [vmem:[%s5861_s18 + $0x1b0] sm:$0xff] %v4268_v20  ;;  %v4270_v16 = vpop.f32.mrb[55].mxu0 }
 0x44c   : > { %4348 = vst [vmem:[%s5861_s18 + $0x1b8] sm:$0xff] %v4270_v16 }
 0x450   : > { %v4274_v8 = vpop.f32.mrb[56].mxu0 }
 0x451   : > { %4349 = vst [vmem:[%s5861_s18 + $0x1c0] sm:$0xff] %v4274_v8  ;;  %v4276_v24 = vpop.f32.mrb[57].mxu0 }
 0x452   : > { %4350 = vst [vmem:[%s5861_s18 + $0x1c8] sm:$0xff] %v4276_v24  ;;  %v4278_v17 = vpop.f32.mrb[58].mxu0 }
 0x453   : > { %4351 = vst [vmem:[%s5861_s18 + $0x1d0] sm:$0xff] %v4278_v17  ;;  %v4280_v13 = vpop.f32.mrb[59].mxu0 }
 0x454   : > { %4352 = vst [vmem:[%s5861_s18 + $0x1d8] sm:$0xff] %v4280_v13 }
 0x458   : > { %v4284_v15 = vpop.f32.mrb[60].mxu0 }
 0x459   : > { %4353 = vst [vmem:[%s5861_s18 + $0x1e0] sm:$0xff] %v4284_v15  ;;  %v4286_v19 = vpop.f32.mrb[61].mxu0 }
 0x45a   : > { %4354 = vst [vmem:[%s5861_s18 + $0x1e8] sm:$0xff] %v4286_v19  ;;  %v4288_v28 = vpop.f32.mrb[62].mxu0 }
 0x45b   : > { %4355 = vst [vmem:[%s5861_s18 + $0x1f0] sm:$0xff] %v4288_v28  ;;  %v4290_v21 = vpop.f32.mrb[63].mxu0 }
 0x45c   : > { %4356 = vst [vmem:[%s5861_s18 + $0x1f8] sm:$0xff] %v4290_v21 }
 0x45d   : > { %5302 = shalt.err (!%p5299_p2)
}
 0x45e   : > { %s5303_s25 = scalar_lea.hbm %s5929_s22, 8192  ;;  %s5307_s26 = scalar_lea.hbm %s5981_s3, 16384 }
 0x45f   : > { %p5304_p13 = scmp.ne.s32.totalorder %s5929_s22, %s5303_s25  ;;  %p5308_p4 = scmp.lt.u32.totalorder %s5929_s22, %s5981_s3 }
 0x460   : > { %p5309_p7 = scmp.lt.u32.totalorder %s5307_s26, %s5303_s25  ;;  %p5311_p11 = scmp.lt.u32.totalorder %s5303_s25, %s5929_s22 }
 0x461   : > { %p5305_p6 = pnand %p5304_p13, %p5995_p0 }
 0x462   : > { %p5310_p8 = por %p5309_p7, %p5308_p4 }
 0x463   : > { %p5306_p10 = pneg %p5305_p6 }
 0x464   : > { %p5312_p1 = por %p5311_p11, %p5310_p8 }
 0x466   : > { %p5313_p3 = pnand %p5312_p1, %p5306_p10 }
 0x468   : > { %5316 = shalt.err (!%p5313_p3)
}
 0x469   : > { %s5371_s5 = smov 256   ;;  %s5372_s18 = smov 16  }
 0x46a   : > { %4946 = dma.vmem_to_hbm [thread:$0]  (%p5995_p0), %s5931_s24, 8192, %s5929_s22, %s4358_s16, %s5371_s5, %s5371_s5, %s5372_s18  }
 0x46b PF: > { %s4387_s20 = sand.u32 1, %s5347_s12   ;;  %p5996_p5 = scmp.ne.s32.totalorder %s5986_s19, 0 }
 0x46c   : > { %p5997_p9 = scmp.ge.s32.totalorder %s5359_s15, 2  ;;  %s4388_s27 = scalar_lea.sflag [#allocation5], %s4387_s20 }
 0x46e   : > { %p4960_p12 = pnand %p5997_p9, %p5996_p5 }
 0x470   : > { %5342 = dma.done.wait (!%p4960_p12), %s4388_s27, 8192  }
 0x471   : > { %5344 = vsyncadd (!%p4960_p12), %s4388_s27, 4294959104  ;;  %p17_p2 = scmp.ge.s32.totalorder %s5503_s6, 4   ;;  %s5998_s12 = smov %s5351_s13 }
 0x472   : > { %s5999_s13 = smov %s5355_s14  ;;  %s6000_s14 = smov %s5512_s9 }
 0x473   : > { %s6001_s15 = smov %s5503_s6  ;;  %19 = sbr.rel (!%p17_p2) target bundleno = 6 (0x6), region = 85 }
 0x47a   :  { %4393 = vsyncpa [#allocation4], 1 }
 0x47b   :  { %4395 = vsyncpa [#allocation4 + $0x1], 1 }
 0x47c   :  { %4396 = vsyncpa [#allocation7], 1 }
 0x47d   :  { %4397 = vsyncpa [#allocation5], 1 }
 0x47e   :  { %4399 = vsyncpa [#allocation5 + $0x1], 1 }

</bundles_post_ra>
